<compile_context>
chip_gen: v6e
topology: v6e:2x2x1
jax: 0.10.0
libtpu: 0.0.40
codegen_flags: <defaults>
</compile_context>

<pallas_src>
import functools

import jax
import jax.numpy as jnp
from jax.experimental import pallas as pl
from jax.experimental.pallas import tpu as pltpu


_LANES = 128  # lane width; channel dims are padded to a multiple of this


def _pad_ch(c):
    return ((c + _LANES - 1) // _LANES) * _LANES


@functools.lru_cache(maxsize=None)
def _vmem_capacity():
    try:
        return int(pltpu.get_tpu_info().vmem_capacity_bytes)
    except Exception:  # conservative fallback (assume v7x-like 64 MiB)
        return 64 * 1024 * 1024


def _vmem_limit():
    # ~half of physical VMEM: 64 MiB on v5e/v6e (128 MiB), 32 MiB on v7x.
    return int(min(_vmem_capacity() // 2, 96 * 1024 * 1024))


def _row_target():
    return 1024 if _vmem_capacity() >= (96 << 20) else 512


def _cparams(dim_sem):
    return pltpu.CompilerParams(dimension_semantics=dim_sem,
                                vmem_limit_bytes=_vmem_limit())


def _pick_divisor_tile(dim, target, quantum):
    if dim <= target:
        return dim
    for t in range(target, quantum - 1, -1):
        if dim % t == 0 and t % quantum == 0:
            return t
    return dim


# ----------------------------------------------------------------------------
# Space-to-depth view of the padded activation (plain-JAX layout glue).
# Folds the 4x4 / stride-2 / pad-1 conv into a 2x2-tap / stride-1 conv.
# ----------------------------------------------------------------------------
def space_to_depth(x):
    """x: (N, H, W, C), even H/W -> (N, H//2+1, W//2+1, 4*C) bf16 (pad=1)."""
    n, h, w, c = x.shape
    hs, ws = h // 2 + 1, w // 2 + 1
    xp = jnp.pad(x, ((0, 0), (1, 1), (1, 1), (0, 0)))
    xs = xp.reshape(n, hs, 2, ws, 2, c).transpose(0, 1, 3, 2, 4, 5)
    return xs.reshape(n, hs, ws, 4 * c).astype(jnp.bfloat16)


# ----------------------------------------------------------------------------
# Conv(k=4, s=2, p=1) as 4-tap implicit-im2col GEMM + bias (+ LeakyReLU)
# (+ fused per-image BatchNorm partial statistics).  One image per grid step.
# ----------------------------------------------------------------------------
def _conv_tap_kernel(x_ref, w_ref, b_ref, *out_refs, Ho, Wo, slope):
    # x_ref: (1, Ho+1, Wo+1, Cs) bf16   space-to-depth input (conv pad folded in)
    # w_ref: (4, Cs, Cout)        bf16  per-tap packed weights (fully resident)
    # b_ref: (1, Cout)            f32
    # out_refs[0]: (1, Ho, Wo, Cout)    conv output (+ bias, optional LeakyReLU)
    # out_refs[1:]: (1, 1, Cout) f32 x2 fused BN sum / sumsq (optional)
    o_ref = out_refs[0]
    emit_stats = len(out_refs) == 3
    cout = o_ref.shape[-1]
    bias = b_ref[...]
    if emit_stats:
        s_tot = jnp.zeros((1, cout), jnp.float32)
        ss_tot = jnp.zeros((1, cout), jnp.float32)
    for oh in range(Ho):  # static unroll; every ref index below is static
        acc = jnp.zeros((Wo, cout), jnp.float32)
        for dh in range(2):
            for dw in range(2):
                tap = x_ref[0, oh + dh, dw:dw + Wo, :]        # (Wo, Cs)
                acc = acc + jnp.dot(tap, w_ref[2 * dh + dw],
                                    preferred_element_type=jnp.float32)
        out = acc + bias
        if slope is not None:
            out = jnp.where(out >= 0.0, out, slope * out)
        if emit_stats:
            s_tot = s_tot + jnp.sum(out, axis=0, keepdims=True)
            ss_tot = ss_tot + jnp.sum(out * out, axis=0, keepdims=True)
        o_ref[0, oh] = out.astype(o_ref.dtype)
    if emit_stats:
        out_refs[1][0] = s_tot
        out_refs[2][0] = ss_tot


def conv4x4s2(x_nhwc, w_packed, bias_row, *, slope=None, emit_stats=False,
              out_dtype=jnp.bfloat16):
    """Conv2d(4, 2, 1) on NHWC x (+bias, optional LeakyReLU, optional fused BN
    partial stats).  Returns NHWC output (channel-padded) [, sums, sumsqs]."""
    n, h, w, _ = x_nhwc.shape
    xs = space_to_depth(x_nhwc)                 # (N, Hs, Ws, Cs) bf16
    _, hs, ws, cs = xs.shape
    ho, wo = h // 2, w // 2
    cout = w_packed.shape[-1]
    assert w_packed.shape[1] == cs

    out_shape = [jax.ShapeDtypeStruct((n, ho, wo, cout), out_dtype)]
    out_specs = [pl.BlockSpec((1, ho, wo, cout), lambda i: (i, 0, 0, 0))]
    if emit_stats:
        out_shape += [jax.ShapeDtypeStruct((n, 1, cout), jnp.float32)] * 2
        out_specs += [pl.BlockSpec((1, 1, cout), lambda i: (i, 0, 0))] * 2

    outs = pl.pallas_call(
        functools.partial(_conv_tap_kernel, Ho=ho, Wo=wo, slope=slope),
        out_shape=tuple(out_shape),
        grid_spec=pltpu.PrefetchScalarGridSpec(
            num_scalar_prefetch=0,
            grid=(n,),
            in_specs=[
                pl.BlockSpec((1, hs, ws, cs), lambda i: (i, 0, 0, 0)),
                pl.BlockSpec((4, cs, cout), lambda i: (0, 0, 0)),
                pl.BlockSpec((1, cout), lambda i: (0, 0)),
            ],
            out_specs=out_specs,
        ),
        compiler_params=_cparams(("parallel",)),
    )(xs, w_packed, bias_row)
    return outs if emit_stats else outs[0]


# ----------------------------------------------------------------------------
# BatchNorm (training-mode batch stats, fused pass-1) + LeakyReLU normalize.
# ----------------------------------------------------------------------------
def _bn_act_kernel(x_ref, scale_ref, shift_ref, o_ref, *, slope):
    y = x_ref[...].astype(jnp.float32) * scale_ref[...] + shift_ref[...]
    o_ref[...] = jnp.where(y >= 0.0, y, slope * y).astype(o_ref.dtype)


def batchnorm_lrelu(act, sums, sumsqs, gamma_row, beta_row, *, eps=1e-5,
                    slope=0.2):
    n, ho, wo, c = act.shape
    count = float(n * ho * wo)
    s = jnp.sum(sums, axis=0)                   # (1, C) tiny cross-image reduce
    ss = jnp.sum(sumsqs, axis=0)                # (1, C)
    mean = s / count
    var = jnp.maximum(ss / count - mean * mean, 0.0)   # biased (train-mode)
    scale = gamma_row * jax.lax.rsqrt(var + eps)
    shift = beta_row - mean * scale

    m = n * ho * wo
    x2d = act.reshape(m, c)
    target = _row_target()
    if m <= target:
        tm, mp = m, m
    else:
        tm = max(8, (target // 8) * 8)
        mp = ((m + tm - 1) // tm) * tm
        if mp != m:
            x2d = jnp.pad(x2d, ((0, mp - m), (0, 0)))

    y2d = pl.pallas_call(
        functools.partial(_bn_act_kernel, slope=slope),
        out_shape=jax.ShapeDtypeStruct((mp, c), jnp.bfloat16),
        grid_spec=pltpu.PrefetchScalarGridSpec(
            num_scalar_prefetch=0,
            grid=(mp // tm,),
            in_specs=[
                pl.BlockSpec((tm, c), lambda i: (i, 0)),
                pl.BlockSpec((1, c), lambda i: (0, 0)),
                pl.BlockSpec((1, c), lambda i: (0, 0)),
            ],
            out_specs=pl.BlockSpec((tm, c), lambda i: (i, 0)),
        ),
        compiler_params=_cparams(("parallel",)),
    )(x2d, scale, shift)
    if mp != m:
        y2d = y2d[:m]
    return y2d.reshape(n, ho, wo, c)


# ----------------------------------------------------------------------------
# Fused fc1 + LeakyReLU + fc2 (row-parallel, K reduction last).
# ----------------------------------------------------------------------------
def _fused_fc_kernel(f_ref, w1_ref, b1_ref, w2_ref, b2_ref, o_ref, acc_ref, *,
                     slope):
    k = pl.program_id(1)

    @pl.when(k == 0)
    def _():
        acc_ref[...] = jnp.zeros_like(acc_ref)

    acc_ref[...] += jnp.dot(f_ref[...], w1_ref[...],
                            preferred_element_type=jnp.float32)

    @pl.when(k == pl.num_programs(1) - 1)
    def _():
        h = acc_ref[...] + b1_ref[...]
        h = jnp.where(h >= 0.0, h, slope * h)
        out = jnp.dot(h.astype(jnp.bfloat16), w2_ref[...],
                      preferred_element_type=jnp.float32)
        o_ref[...] = (out + b2_ref[...]).astype(o_ref.dtype)


def fused_fc(f, w1, b1_row, w2, b2_row, *, slope=0.2):
    """LeakyReLU(f @ w1 + b1) @ w2 + b2 in a single pallas_call."""
    b, k = f.shape
    hp = w1.shape[1]
    f = f.astype(jnp.bfloat16)
    tb = _pick_divisor_tile(b, 256, 8)
    tk = _pick_divisor_tile(k, _row_target(), 128)
    grid = (b // tb, k // tk)

    return pl.pallas_call(
        functools.partial(_fused_fc_kernel, slope=slope),
        out_shape=jax.ShapeDtypeStruct((b, hp), jnp.float32),
        grid_spec=pltpu.PrefetchScalarGridSpec(
            num_scalar_prefetch=0,
            grid=grid,
            in_specs=[
                pl.BlockSpec((tb, tk), lambda i, j: (i, j)),
                pl.BlockSpec((tk, hp), lambda i, j: (j, 0)),
                pl.BlockSpec((1, hp), lambda i, j: (0, 0)),
                pl.BlockSpec((hp, hp), lambda i, j: (0, 0)),
                pl.BlockSpec((1, hp), lambda i, j: (0, 0)),
            ],
            out_specs=pl.BlockSpec((tb, hp), lambda i, j: (i, 0)),
            scratch_shapes=[pltpu.VMEM((tb, hp), jnp.float32)],
        ),
        compiler_params=_cparams(("parallel", "arbitrary")),
    )(f, w1, b1_row, w2, b2_row)


# ----------------------------------------------------------------------------
# Parameter init (synthetic N(0, 0.02)).  Weights pre-packed ONCE:
#   conv -> (4 taps, 4*Cin_pad, Cout_pad) matching the space-to-depth layout,
#   fc   -> (in_pad, out_pad).  Biases / BN params as (1, Cpad) f32 rows.
# ----------------------------------------------------------------------------
def _pack_conv(w, cin_pad, cout_pad):
    cout, cin, kh, kw = w.shape
    assert kh == 4 and kw == 4
    wt = jnp.transpose(w, (2, 3, 1, 0))                       # (KH, KW, Ci, Co)
    wt = jnp.pad(wt, ((0, 0), (0, 0), (0, cin_pad - cin), (0, cout_pad - cout)))
    wt = wt.reshape(2, 2, 2, 2, cin_pad, cout_pad)            # (dh, p, dw, q, ci, co)
    wt = wt.transpose(0, 2, 1, 3, 4, 5)                       # (dh, dw, p, q, ci, co)
    return wt.reshape(4, 4 * cin_pad, cout_pad).astype(jnp.bfloat16)


def _pack_fc(w, in_pad, out_pad):
    out_f, in_f = w.shape
    wt = jnp.transpose(w, (1, 0))
    wt = jnp.pad(wt, ((0, in_pad - in_f), (0, out_pad - out_f)))
    return wt.astype(jnp.bfloat16)


def _pad_row(v, cp):
    return jnp.pad(v, (0, cp - v.shape[0])).reshape(1, cp).astype(jnp.float32)


def init_params(key, in_nc, nf, img_size):
    ks = jax.random.split(key, 6)

    def norm(k, shape):
        return jax.random.normal(k, shape, jnp.float32) * 0.02

    c1, c2, c3, c4 = nf, nf * 2, nf * 4, nf * 8
    c1p, c2p, c3p, c4p = map(_pad_ch, (c1, c2, c3, c4))
    feat = c3 * (img_size // 8) ** 2
    hp = _pad_ch(c4)

    return {
        "conv1_w": _pack_conv(norm(ks[0], (c1, in_nc, 4, 4)), in_nc, c1p),
        "conv1_b": _pad_row(jnp.zeros((c1,), jnp.float32), c1p),
        "conv2_w": _pack_conv(norm(ks[1], (c2, c1, 4, 4)), c1p, c2p),
        "conv2_b": _pad_row(jnp.zeros((c2,), jnp.float32), c2p),
        "bn2_g": _pad_row(jnp.ones((c2,), jnp.float32), c2p),
        "bn2_b": _pad_row(jnp.zeros((c2,), jnp.float32), c2p),
        "conv3_w": _pack_conv(norm(ks[2], (c3, c2, 4, 4)), c2p, c3p),
        "conv3_b": _pad_row(jnp.zeros((c3,), jnp.float32), c3p),
        "bn3_g": _pad_row(jnp.ones((c3,), jnp.float32), c3p),
        "bn3_b": _pad_row(jnp.zeros((c3,), jnp.float32), c3p),
        "conv4_w": _pack_conv(norm(ks[3], (c4, c3, 4, 4)), c3p, c4p),
        "conv4_b": _pad_row(jnp.zeros((c4,), jnp.float32), c4p),
        "fc1_w": _pack_fc(norm(ks[4], (c4, feat)), feat, hp),
        "fc1_b": _pad_row(jnp.zeros((c4,), jnp.float32), hp),
        "fc2_w": _pack_fc(norm(ks[5], (c4, c4)), hp, hp),
        "fc2_b": _pad_row(jnp.zeros((c4,), jnp.float32), hp),
    }


# ----------------------------------------------------------------------------
# encoder.forward
# ----------------------------------------------------------------------------
def encoder_forward(params, x_nchw, nf, img_size):
    del img_size  # spatial sizes derived from the activations themselves
    c3, c4 = nf * 4, nf * 8

    # NCHW -> NHWC once at the API boundary.
    x = jnp.transpose(x_nchw, (0, 2, 3, 1))

    # conv1 + LeakyReLU (fused epilogue).
    h = conv4x4s2(x, params["conv1_w"], params["conv1_b"], slope=0.2)

    # conv2 (+ fused BN partial stats) -> BatchNorm + LeakyReLU.
    h, s2, ss2 = conv4x4s2(h, params["conv2_w"], params["conv2_b"],
                           emit_stats=True)
    h = batchnorm_lrelu(h, s2, ss2, params["bn2_g"], params["bn2_b"])

    # conv3 (+ fused BN partial stats) -> BatchNorm + LeakyReLU.
    h, s3, ss3 = conv4x4s2(h, params["conv3_w"], params["conv3_b"],
                           emit_stats=True)
    x_feat = batchnorm_lrelu(h, s3, ss3, params["bn3_g"], params["bn3_b"])

    # independent feature: one more strided conv; un-pad channels + NCHW only
    # at the API boundary.
    i4 = conv4x4s2(x_feat, params["conv4_w"], params["conv4_b"],
                   out_dtype=jnp.float32)
    i = jnp.transpose(i4[..., :c4], (0, 3, 1, 2))

    # specific feature: PyTorch flattens x_feat in NCHW order.
    n, h3, w3, _ = x_feat.shape
    feat = c3 * h3 * w3
    f = jnp.transpose(x_feat[..., :c3], (0, 3, 1, 2)).reshape(n, feat)
    s = fused_fc(f, params["fc1_w"], params["fc1_b"],
                 params["fc2_w"], params["fc2_b"], slope=0.2)
    s = s[:, :c4]
    return i, s[:, :, None, None]   # unsqueeze(2), unsqueeze(3)


if __name__ == "__main__":
    # Small shapes consistent with the module: in_nc=4, nf=8, img_size=16, B=2.
    in_nc, nf, img_size, batch = 4, 8, 16, 2

    key = jax.random.PRNGKey(0)
    k_params, k_x = jax.random.split(key)
    params = init_params(k_params, in_nc, nf, img_size)
    x = jax.random.normal(k_x, (batch, in_nc, img_size, img_size), jnp.float32)

    fwd = jax.jit(functools.partial(encoder_forward, nf=nf, img_size=img_size))
    i_out, s_out = fwd(params, x)
    jax.block_until_ready((i_out, s_out))

    assert i_out.shape == (batch, nf * 8, img_size // 16, img_size // 16)
    assert s_out.shape == (batch, nf * 8, 1, 1)
    print("KERNEL_OK")
</pallas_src>

<mosaic_0001>
module attributes {stable_mosaic.version = 11 : i64} {
  func.func @_conv_tap_kernel(%arg0: i32, %arg1: memref<1x9x9x16xbf16, #tpu.memory_space<vmem>>, %arg2: memref<4x16x128xbf16, #tpu.memory_space<vmem>>, %arg3: memref<1x128xf32, #tpu.memory_space<vmem>>, %arg4: memref<1x8x8x128xbf16, #tpu.memory_space<vmem>>) attributes {dimension_semantics = [#tpu.dimension_semantics<parallel>], iteration_bounds = array<i64: 2>, scalar_prefetch = 0 : i64, scratch_operands = 0 : i64, tpu.core_type = #tpu.core_type<tc>, window_params = [{transform_indices = @transform_0, window_bounds = array<i64: 1, 9, 9, 16>}, {pipeline_mode = #tpu.pipeline_mode<synchronous>, transform_indices = @transform_1, window_bounds = array<i64: 4, 16, 128>}, {pipeline_mode = #tpu.pipeline_mode<synchronous>, transform_indices = @transform_2, window_bounds = array<i64: 1, 128>}, {transform_indices = @transform_3, window_bounds = array<i64: 1, 8, 8, 128>}]} {
    %c0 = arith.constant 0 : index
    %c0_0 = arith.constant 0 : index
    %0 = vector.load %arg3[%c0, %c0_0] : memref<1x128xf32, #tpu.memory_space<vmem>>, vector<1x128xf32>
    %cst = arith.constant 0.000000e+00 : f32
    %1 = vector.broadcast %cst : f32 to vector<8x128xf32>
    %c0_1 = arith.constant 0 : index
    %c0_2 = arith.constant 0 : index
    %c0_3 = arith.constant 0 : index
    %c0_4 = arith.constant 0 : index
    %2 = vector.load %arg1[%c0_1, %c0_2, %c0_3, %c0_4] : memref<1x9x9x16xbf16, #tpu.memory_space<vmem>>, vector<1x1x8x16xbf16>
    %3 = vector.shape_cast %2 : vector<1x1x8x16xbf16> to vector<8x16xbf16>
    %c0_5 = arith.constant 0 : index
    %c0_6 = arith.constant 0 : index
    %c0_7 = arith.constant 0 : index
    %4 = vector.load %arg2[%c0_5, %c0_6, %c0_7] : memref<4x16x128xbf16, #tpu.memory_space<vmem>>, vector<1x16x128xbf16>
    %5 = vector.shape_cast %4 : vector<1x16x128xbf16> to vector<16x128xbf16>
    %cst_8 = arith.constant dense<0.000000e+00> : vector<8x128xf32>
    %6 = tpu.matmul %3, %5, %cst_8 {dimension_numbers = #tpu.dot_dimension_numbers<[1], [0], [0], [1], [0, 0, 1, 1], [], []>} : vector<8x16xbf16>, vector<16x128xbf16>, vector<8x128xf32> -> vector<8x128xf32>
    %7 = arith.addf %1, %6 : vector<8x128xf32>
    %c0_9 = arith.constant 0 : index
    %c0_10 = arith.constant 0 : index
    %c1 = arith.constant 1 : index
    %c0_11 = arith.constant 0 : index
    %8 = vector.load %arg1[%c0_9, %c0_10, %c1, %c0_11] : memref<1x9x9x16xbf16, #tpu.memory_space<vmem>>, vector<1x1x8x16xbf16>
    %9 = vector.shape_cast %8 : vector<1x1x8x16xbf16> to vector<8x16xbf16>
    %c1_12 = arith.constant 1 : index
    %c0_13 = arith.constant 0 : index
    %c0_14 = arith.constant 0 : index
    %10 = vector.load %arg2[%c1_12, %c0_13, %c0_14] : memref<4x16x128xbf16, #tpu.memory_space<vmem>>, vector<1x16x128xbf16>
    %11 = vector.shape_cast %10 : vector<1x16x128xbf16> to vector<16x128xbf16>
    %cst_15 = arith.constant dense<0.000000e+00> : vector<8x128xf32>
    %12 = tpu.matmul %9, %11, %cst_15 {dimension_numbers = #tpu.dot_dimension_numbers<[1], [0], [0], [1], [0, 0, 1, 1], [], []>} : vector<8x16xbf16>, vector<16x128xbf16>, vector<8x128xf32> -> vector<8x128xf32>
    %13 = arith.addf %7, %12 : vector<8x128xf32>
    %c0_16 = arith.constant 0 : index
    %c1_17 = arith.constant 1 : index
    %c0_18 = arith.constant 0 : index
    %c0_19 = arith.constant 0 : index
    %14 = vector.load %arg1[%c0_16, %c1_17, %c0_18, %c0_19] : memref<1x9x9x16xbf16, #tpu.memory_space<vmem>>, vector<1x1x8x16xbf16>
    %15 = vector.shape_cast %14 : vector<1x1x8x16xbf16> to vector<8x16xbf16>
    %c2 = arith.constant 2 : index
    %c0_20 = arith.constant 0 : index
    %c0_21 = arith.constant 0 : index
    %16 = vector.load %arg2[%c2, %c0_20, %c0_21] : memref<4x16x128xbf16, #tpu.memory_space<vmem>>, vector<1x16x128xbf16>
    %17 = vector.shape_cast %16 : vector<1x16x128xbf16> to vector<16x128xbf16>
    %cst_22 = arith.constant dense<0.000000e+00> : vector<8x128xf32>
    %18 = tpu.matmul %15, %17, %cst_22 {dimension_numbers = #tpu.dot_dimension_numbers<[1], [0], [0], [1], [0, 0, 1, 1], [], []>} : vector<8x16xbf16>, vector<16x128xbf16>, vector<8x128xf32> -> vector<8x128xf32>
    %19 = arith.addf %13, %18 : vector<8x128xf32>
    %c0_23 = arith.constant 0 : index
    %c1_24 = arith.constant 1 : index
    %c1_25 = arith.constant 1 : index
    %c0_26 = arith.constant 0 : index
    %20 = vector.load %arg1[%c0_23, %c1_24, %c1_25, %c0_26] : memref<1x9x9x16xbf16, #tpu.memory_space<vmem>>, vector<1x1x8x16xbf16>
    %21 = vector.shape_cast %20 : vector<1x1x8x16xbf16> to vector<8x16xbf16>
    %c3 = arith.constant 3 : index
    %c0_27 = arith.constant 0 : index
    %c0_28 = arith.constant 0 : index
    %22 = vector.load %arg2[%c3, %c0_27, %c0_28] : memref<4x16x128xbf16, #tpu.memory_space<vmem>>, vector<1x16x128xbf16>
    %23 = vector.shape_cast %22 : vector<1x16x128xbf16> to vector<16x128xbf16>
    %cst_29 = arith.constant dense<0.000000e+00> : vector<8x128xf32>
    %24 = tpu.matmul %21, %23, %cst_29 {dimension_numbers = #tpu.dot_dimension_numbers<[1], [0], [0], [1], [0, 0, 1, 1], [], []>} : vector<8x16xbf16>, vector<16x128xbf16>, vector<8x128xf32> -> vector<8x128xf32>
    %25 = arith.addf %19, %24 : vector<8x128xf32>
    %26 = vector.broadcast %0 : vector<1x128xf32> to vector<8x128xf32>
    %27 = arith.addf %25, %26 : vector<8x128xf32>
    %cst_30 = arith.constant 0.000000e+00 : f32
    %28 = vector.broadcast %cst_30 : f32 to vector<8x128xf32>
    %29 = arith.cmpf oge, %27, %28 : vector<8x128xf32>
    %cst_31 = arith.constant 2.000000e-01 : f32
    %30 = vector.broadcast %cst_31 : f32 to vector<8x128xf32>
    %31 = arith.mulf %30, %27 : vector<8x128xf32>
    %32 = arith.select %29, %27, %31 : vector<8x128xi1>, vector<8x128xf32>
    %33 = arith.truncf %32 : vector<8x128xf32> to vector<8x128xbf16>
    %c0_32 = arith.constant 0 : index
    %c0_33 = arith.constant 0 : index
    %c0_34 = arith.constant 0 : index
    %c0_35 = arith.constant 0 : index
    %34 = vector.load %arg4[%c0_32, %c0_33, %c0_34, %c0_35] : memref<1x8x8x128xbf16, #tpu.memory_space<vmem>>, vector<1x1x8x128xbf16>
    %35 = vector.shape_cast %34 : vector<1x1x8x128xbf16> to vector<8x128xbf16>
    %36 = vector.shape_cast %33 : vector<8x128xbf16> to vector<1x1x8x128xbf16>
    tpu.vector_store %arg4[%c0_32, %c0_33, %c0_34, %c0_35], %36 {strides = array<i32>} : memref<1x8x8x128xbf16, #tpu.memory_space<vmem>>, vector<1x1x8x128xbf16>,
    %cst_36 = arith.constant 0.000000e+00 : f32
    %37 = vector.broadcast %cst_36 : f32 to vector<8x128xf32>
    %c0_37 = arith.constant 0 : index
    %c1_38 = arith.constant 1 : index
    %c0_39 = arith.constant 0 : index
    %c0_40 = arith.constant 0 : index
    %38 = vector.load %arg1[%c0_37, %c1_38, %c0_39, %c0_40] : memref<1x9x9x16xbf16, #tpu.memory_space<vmem>>, vector<1x1x8x16xbf16>
    %39 = vector.shape_cast %38 : vector<1x1x8x16xbf16> to vector<8x16xbf16>
    %c0_41 = arith.constant 0 : index
    %c0_42 = arith.constant 0 : index
    %c0_43 = arith.constant 0 : index
    %40 = vector.load %arg2[%c0_41, %c0_42, %c0_43] : memref<4x16x128xbf16, #tpu.memory_space<vmem>>, vector<1x16x128xbf16>
    %41 = vector.shape_cast %40 : vector<1x16x128xbf16> to vector<16x128xbf16>
    %cst_44 = arith.constant dense<0.000000e+00> : vector<8x128xf32>
    %42 = tpu.matmul %39, %41, %cst_44 {dimension_numbers = #tpu.dot_dimension_numbers<[1], [0], [0], [1], [0, 0, 1, 1], [], []>} : vector<8x16xbf16>, vector<16x128xbf16>, vector<8x128xf32> -> vector<8x128xf32>
    %43 = arith.addf %37, %42 : vector<8x128xf32>
    %c0_45 = arith.constant 0 : index
    %c1_46 = arith.constant 1 : index
    %c1_47 = arith.constant 1 : index
    %c0_48 = arith.constant 0 : index
    %44 = vector.load %arg1[%c0_45, %c1_46, %c1_47, %c0_48] : memref<1x9x9x16xbf16, #tpu.memory_space<vmem>>, vector<1x1x8x16xbf16>
    %45 = vector.shape_cast %44 : vector<1x1x8x16xbf16> to vector<8x16xbf16>
    %c1_49 = arith.constant 1 : index
    %c0_50 = arith.constant 0 : index
    %c0_51 = arith.constant 0 : index
    %46 = vector.load %arg2[%c1_49, %c0_50, %c0_51] : memref<4x16x128xbf16, #tpu.memory_space<vmem>>, vector<1x16x128xbf16>
    %47 = vector.shape_cast %46 : vector<1x16x128xbf16> to vector<16x128xbf16>
    %cst_52 = arith.constant dense<0.000000e+00> : vector<8x128xf32>
    %48 = tpu.matmul %45, %47, %cst_52 {dimension_numbers = #tpu.dot_dimension_numbers<[1], [0], [0], [1], [0, 0, 1, 1], [], []>} : vector<8x16xbf16>, vector<16x128xbf16>, vector<8x128xf32> -> vector<8x128xf32>
    %49 = arith.addf %43, %48 : vector<8x128xf32>
    %c0_53 = arith.constant 0 : index
    %c2_54 = arith.constant 2 : index
    %c0_55 = arith.constant 0 : index
    %c0_56 = arith.constant 0 : index
    %50 = vector.load %arg1[%c0_53, %c2_54, %c0_55, %c0_56] : memref<1x9x9x16xbf16, #tpu.memory_space<vmem>>, vector<1x1x8x16xbf16>
    %51 = vector.shape_cast %50 : vector<1x1x8x16xbf16> to vector<8x16xbf16>
    %c2_57 = arith.constant 2 : index
    %c0_58 = arith.constant 0 : index
    %c0_59 = arith.constant 0 : index
    %52 = vector.load %arg2[%c2_57, %c0_58, %c0_59] : memref<4x16x128xbf16, #tpu.memory_space<vmem>>, vector<1x16x128xbf16>
    %53 = vector.shape_cast %52 : vector<1x16x128xbf16> to vector<16x128xbf16>
    %cst_60 = arith.constant dense<0.000000e+00> : vector<8x128xf32>
    %54 = tpu.matmul %51, %53, %cst_60 {dimension_numbers = #tpu.dot_dimension_numbers<[1], [0], [0], [1], [0, 0, 1, 1], [], []>} : vector<8x16xbf16>, vector<16x128xbf16>, vector<8x128xf32> -> vector<8x128xf32>
    %55 = arith.addf %49, %54 : vector<8x128xf32>
    %c0_61 = arith.constant 0 : index
    %c2_62 = arith.constant 2 : index
    %c1_63 = arith.constant 1 : index
    %c0_64 = arith.constant 0 : index
    %56 = vector.load %arg1[%c0_61, %c2_62, %c1_63, %c0_64] : memref<1x9x9x16xbf16, #tpu.memory_space<vmem>>, vector<1x1x8x16xbf16>
    %57 = vector.shape_cast %56 : vector<1x1x8x16xbf16> to vector<8x16xbf16>
    %c3_65 = arith.constant 3 : index
    %c0_66 = arith.constant 0 : index
    %c0_67 = arith.constant 0 : index
    %58 = vector.load %arg2[%c3_65, %c0_66, %c0_67] : memref<4x16x128xbf16, #tpu.memory_space<vmem>>, vector<1x16x128xbf16>
    %59 = vector.shape_cast %58 : vector<1x16x128xbf16> to vector<16x128xbf16>
    %cst_68 = arith.constant dense<0.000000e+00> : vector<8x128xf32>
    %60 = tpu.matmul %57, %59, %cst_68 {dimension_numbers = #tpu.dot_dimension_numbers<[1], [0], [0], [1], [0, 0, 1, 1], [], []>} : vector<8x16xbf16>, vector<16x128xbf16>, vector<8x128xf32> -> vector<8x128xf32>
    %61 = arith.addf %55, %60 : vector<8x128xf32>
    %62 = vector.broadcast %0 : vector<1x128xf32> to vector<8x128xf32>
    %63 = arith.addf %61, %62 : vector<8x128xf32>
    %cst_69 = arith.constant 0.000000e+00 : f32
    %64 = vector.broadcast %cst_69 : f32 to vector<8x128xf32>
    %65 = arith.cmpf oge, %63, %64 : vector<8x128xf32>
    %cst_70 = arith.constant 2.000000e-01 : f32
    %66 = vector.broadcast %cst_70 : f32 to vector<8x128xf32>
    %67 = arith.mulf %66, %63 : vector<8x128xf32>
    %68 = arith.select %65, %63, %67 : vector<8x128xi1>, vector<8x128xf32>
    %69 = arith.truncf %68 : vector<8x128xf32> to vector<8x128xbf16>
    %c0_71 = arith.constant 0 : index
    %c1_72 = arith.constant 1 : index
    %c0_73 = arith.constant 0 : index
    %c0_74 = arith.constant 0 : index
    %70 = vector.load %arg4[%c0_71, %c1_72, %c0_73, %c0_74] : memref<1x8x8x128xbf16, #tpu.memory_space<vmem>>, vector<1x1x8x128xbf16>
    %71 = vector.shape_cast %70 : vector<1x1x8x128xbf16> to vector<8x128xbf16>
    %72 = vector.shape_cast %69 : vector<8x128xbf16> to vector<1x1x8x128xbf16>
    tpu.vector_store %arg4[%c0_71, %c1_72, %c0_73, %c0_74], %72 {strides = array<i32>} : memref<1x8x8x128xbf16, #tpu.memory_space<vmem>>, vector<1x1x8x128xbf16>,
    %cst_75 = arith.constant 0.000000e+00 : f32
    %73 = vector.broadcast %cst_75 : f32 to vector<8x128xf32>
    %c0_76 = arith.constant 0 : index
    %c2_77 = arith.constant 2 : index
    %c0_78 = arith.constant 0 : index
    %c0_79 = arith.constant 0 : index
    %74 = vector.load %arg1[%c0_76, %c2_77, %c0_78, %c0_79] : memref<1x9x9x16xbf16, #tpu.memory_space<vmem>>, vector<1x1x8x16xbf16>
    %75 = vector.shape_cast %74 : vector<1x1x8x16xbf16> to vector<8x16xbf16>
    %c0_80 = arith.constant 0 : index
    %c0_81 = arith.constant 0 : index
    %c0_82 = arith.constant 0 : index
    %76 = vector.load %arg2[%c0_80, %c0_81, %c0_82] : memref<4x16x128xbf16, #tpu.memory_space<vmem>>, vector<1x16x128xbf16>
    %77 = vector.shape_cast %76 : vector<1x16x128xbf16> to vector<16x128xbf16>
    %cst_83 = arith.constant dense<0.000000e+00> : vector<8x128xf32>
    %78 = tpu.matmul %75, %77, %cst_83 {dimension_numbers = #tpu.dot_dimension_numbers<[1], [0], [0], [1], [0, 0, 1, 1], [], []>} : vector<8x16xbf16>, vector<16x128xbf16>, vector<8x128xf32> -> vector<8x128xf32>
    %79 = arith.addf %73, %78 : vector<8x128xf32>
    %c0_84 = arith.constant 0 : index
    %c2_85 = arith.constant 2 : index
    %c1_86 = arith.constant 1 : index
    %c0_87 = arith.constant 0 : index
    %80 = vector.load %arg1[%c0_84, %c2_85, %c1_86, %c0_87] : memref<1x9x9x16xbf16, #tpu.memory_space<vmem>>, vector<1x1x8x16xbf16>
    %81 = vector.shape_cast %80 : vector<1x1x8x16xbf16> to vector<8x16xbf16>
    %c1_88 = arith.constant 1 : index
    %c0_89 = arith.constant 0 : index
    %c0_90 = arith.constant 0 : index
    %82 = vector.load %arg2[%c1_88, %c0_89, %c0_90] : memref<4x16x128xbf16, #tpu.memory_space<vmem>>, vector<1x16x128xbf16>
    %83 = vector.shape_cast %82 : vector<1x16x128xbf16> to vector<16x128xbf16>
    %cst_91 = arith.constant dense<0.000000e+00> : vector<8x128xf32>
    %84 = tpu.matmul %81, %83, %cst_91 {dimension_numbers = #tpu.dot_dimension_numbers<[1], [0], [0], [1], [0, 0, 1, 1], [], []>} : vector<8x16xbf16>, vector<16x128xbf16>, vector<8x128xf32> -> vector<8x128xf32>
    %85 = arith.addf %79, %84 : vector<8x128xf32>
    %c0_92 = arith.constant 0 : index
    %c3_93 = arith.constant 3 : index
    %c0_94 = arith.constant 0 : index
    %c0_95 = arith.constant 0 : index
    %86 = vector.load %arg1[%c0_92, %c3_93, %c0_94, %c0_95] : memref<1x9x9x16xbf16, #tpu.memory_space<vmem>>, vector<1x1x8x16xbf16>
    %87 = vector.shape_cast %86 : vector<1x1x8x16xbf16> to vector<8x16xbf16>
    %c2_96 = arith.constant 2 : index
    %c0_97 = arith.constant 0 : index
    %c0_98 = arith.constant 0 : index
    %88 = vector.load %arg2[%c2_96, %c0_97, %c0_98] : memref<4x16x128xbf16, #tpu.memory_space<vmem>>, vector<1x16x128xbf16>
    %89 = vector.shape_cast %88 : vector<1x16x128xbf16> to vector<16x128xbf16>
    %cst_99 = arith.constant dense<0.000000e+00> : vector<8x128xf32>
    %90 = tpu.matmul %87, %89, %cst_99 {dimension_numbers = #tpu.dot_dimension_numbers<[1], [0], [0], [1], [0, 0, 1, 1], [], []>} : vector<8x16xbf16>, vector<16x128xbf16>, vector<8x128xf32> -> vector<8x128xf32>
    %91 = arith.addf %85, %90 : vector<8x128xf32>
    %c0_100 = arith.constant 0 : index
    %c3_101 = arith.constant 3 : index
    %c1_102 = arith.constant 1 : index
    %c0_103 = arith.constant 0 : index
    %92 = vector.load %arg1[%c0_100, %c3_101, %c1_102, %c0_103] : memref<1x9x9x16xbf16, #tpu.memory_space<vmem>>, vector<1x1x8x16xbf16>
    %93 = vector.shape_cast %92 : vector<1x1x8x16xbf16> to vector<8x16xbf16>
    %c3_104 = arith.constant 3 : index
    %c0_105 = arith.constant 0 : index
    %c0_106 = arith.constant 0 : index
    %94 = vector.load %arg2[%c3_104, %c0_105, %c0_106] : memref<4x16x128xbf16, #tpu.memory_space<vmem>>, vector<1x16x128xbf16>
    %95 = vector.shape_cast %94 : vector<1x16x128xbf16> to vector<16x128xbf16>
    %cst_107 = arith.constant dense<0.000000e+00> : vector<8x128xf32>
    %96 = tpu.matmul %93, %95, %cst_107 {dimension_numbers = #tpu.dot_dimension_numbers<[1], [0], [0], [1], [0, 0, 1, 1], [], []>} : vector<8x16xbf16>, vector<16x128xbf16>, vector<8x128xf32> -> vector<8x128xf32>
    %97 = arith.addf %91, %96 : vector<8x128xf32>
    %98 = vector.broadcast %0 : vector<1x128xf32> to vector<8x128xf32>
    %99 = arith.addf %97, %98 : vector<8x128xf32>
    %cst_108 = arith.constant 0.000000e+00 : f32
    %100 = vector.broadcast %cst_108 : f32 to vector<8x128xf32>
    %101 = arith.cmpf oge, %99, %100 : vector<8x128xf32>
    %cst_109 = arith.constant 2.000000e-01 : f32
    %102 = vector.broadcast %cst_109 : f32 to vector<8x128xf32>
    %103 = arith.mulf %102, %99 : vector<8x128xf32>
    %104 = arith.select %101, %99, %103 : vector<8x128xi1>, vector<8x128xf32>
    %105 = arith.truncf %104 : vector<8x128xf32> to vector<8x128xbf16>
    %c0_110 = arith.constant 0 : index
    %c2_111 = arith.constant 2 : index
    %c0_112 = arith.constant 0 : index
    %c0_113 = arith.constant 0 : index
    %106 = vector.load %arg4[%c0_110, %c2_111, %c0_112, %c0_113] : memref<1x8x8x128xbf16, #tpu.memory_space<vmem>>, vector<1x1x8x128xbf16>
    %107 = vector.shape_cast %106 : vector<1x1x8x128xbf16> to vector<8x128xbf16>
    %108 = vector.shape_cast %105 : vector<8x128xbf16> to vector<1x1x8x128xbf16>
    tpu.vector_store %arg4[%c0_110, %c2_111, %c0_112, %c0_113], %108 {strides = array<i32>} : memref<1x8x8x128xbf16, #tpu.memory_space<vmem>>, vector<1x1x8x128xbf16>,
    %cst_114 = arith.constant 0.000000e+00 : f32
    %109 = vector.broadcast %cst_114 : f32 to vector<8x128xf32>
    %c0_115 = arith.constant 0 : index
    %c3_116 = arith.constant 3 : index
    %c0_117 = arith.constant 0 : index
    %c0_118 = arith.constant 0 : index
    %110 = vector.load %arg1[%c0_115, %c3_116, %c0_117, %c0_118] : memref<1x9x9x16xbf16, #tpu.memory_space<vmem>>, vector<1x1x8x16xbf16>
    %111 = vector.shape_cast %110 : vector<1x1x8x16xbf16> to vector<8x16xbf16>
    %c0_119 = arith.constant 0 : index
    %c0_120 = arith.constant 0 : index
    %c0_121 = arith.constant 0 : index
    %112 = vector.load %arg2[%c0_119, %c0_120, %c0_121] : memref<4x16x128xbf16, #tpu.memory_space<vmem>>, vector<1x16x128xbf16>
    %113 = vector.shape_cast %112 : vector<1x16x128xbf16> to vector<16x128xbf16>
    %cst_122 = arith.constant dense<0.000000e+00> : vector<8x128xf32>
    %114 = tpu.matmul %111, %113, %cst_122 {dimension_numbers = #tpu.dot_dimension_numbers<[1], [0], [0], [1], [0, 0, 1, 1], [], []>} : vector<8x16xbf16>, vector<16x128xbf16>, vector<8x128xf32> -> vector<8x128xf32>
    %115 = arith.addf %109, %114 : vector<8x128xf32>
    %c0_123 = arith.constant 0 : index
    %c3_124 = arith.constant 3 : index
    %c1_125 = arith.constant 1 : index
    %c0_126 = arith.constant 0 : index
    %116 = vector.load %arg1[%c0_123, %c3_124, %c1_125, %c0_126] : memref<1x9x9x16xbf16, #tpu.memory_space<vmem>>, vector<1x1x8x16xbf16>
    %117 = vector.shape_cast %116 : vector<1x1x8x16xbf16> to vector<8x16xbf16>
    %c1_127 = arith.constant 1 : index
    %c0_128 = arith.constant 0 : index
    %c0_129 = arith.constant 0 : index
    %118 = vector.load %arg2[%c1_127, %c0_128, %c0_129] : memref<4x16x128xbf16, #tpu.memory_space<vmem>>, vector<1x16x128xbf16>
    %119 = vector.shape_cast %118 : vector<1x16x128xbf16> to vector<16x128xbf16>
    %cst_130 = arith.constant dense<0.000000e+00> : vector<8x128xf32>
    %120 = tpu.matmul %117, %119, %cst_130 {dimension_numbers = #tpu.dot_dimension_numbers<[1], [0], [0], [1], [0, 0, 1, 1], [], []>} : vector<8x16xbf16>, vector<16x128xbf16>, vector<8x128xf32> -> vector<8x128xf32>
    %121 = arith.addf %115, %120 : vector<8x128xf32>
    %c0_131 = arith.constant 0 : index
    %c4 = arith.constant 4 : index
    %c0_132 = arith.constant 0 : index
    %c0_133 = arith.constant 0 : index
    %122 = vector.load %arg1[%c0_131, %c4, %c0_132, %c0_133] : memref<1x9x9x16xbf16, #tpu.memory_space<vmem>>, vector<1x1x8x16xbf16>
    %123 = vector.shape_cast %122 : vector<1x1x8x16xbf16> to vector<8x16xbf16>
    %c2_134 = arith.constant 2 : index
    %c0_135 = arith.constant 0 : index
    %c0_136 = arith.constant 0 : index
    %124 = vector.load %arg2[%c2_134, %c0_135, %c0_136] : memref<4x16x128xbf16, #tpu.memory_space<vmem>>, vector<1x16x128xbf16>
    %125 = vector.shape_cast %124 : vector<1x16x128xbf16> to vector<16x128xbf16>
    %cst_137 = arith.constant dense<0.000000e+00> : vector<8x128xf32>
    %126 = tpu.matmul %123, %125, %cst_137 {dimension_numbers = #tpu.dot_dimension_numbers<[1], [0], [0], [1], [0, 0, 1, 1], [], []>} : vector<8x16xbf16>, vector<16x128xbf16>, vector<8x128xf32> -> vector<8x128xf32>
    %127 = arith.addf %121, %126 : vector<8x128xf32>
    %c0_138 = arith.constant 0 : index
    %c4_139 = arith.constant 4 : index
    %c1_140 = arith.constant 1 : index
    %c0_141 = arith.constant 0 : index
    %128 = vector.load %arg1[%c0_138, %c4_139, %c1_140, %c0_141] : memref<1x9x9x16xbf16, #tpu.memory_space<vmem>>, vector<1x1x8x16xbf16>
    %129 = vector.shape_cast %128 : vector<1x1x8x16xbf16> to vector<8x16xbf16>
    %c3_142 = arith.constant 3 : index
    %c0_143 = arith.constant 0 : index
    %c0_144 = arith.constant 0 : index
    %130 = vector.load %arg2[%c3_142, %c0_143, %c0_144] : memref<4x16x128xbf16, #tpu.memory_space<vmem>>, vector<1x16x128xbf16>
    %131 = vector.shape_cast %130 : vector<1x16x128xbf16> to vector<16x128xbf16>
    %cst_145 = arith.constant dense<0.000000e+00> : vector<8x128xf32>
    %132 = tpu.matmul %129, %131, %cst_145 {dimension_numbers = #tpu.dot_dimension_numbers<[1], [0], [0], [1], [0, 0, 1, 1], [], []>} : vector<8x16xbf16>, vector<16x128xbf16>, vector<8x128xf32> -> vector<8x128xf32>
    %133 = arith.addf %127, %132 : vector<8x128xf32>
    %134 = vector.broadcast %0 : vector<1x128xf32> to vector<8x128xf32>
    %135 = arith.addf %133, %134 : vector<8x128xf32>
    %cst_146 = arith.constant 0.000000e+00 : f32
    %136 = vector.broadcast %cst_146 : f32 to vector<8x128xf32>
    %137 = arith.cmpf oge, %135, %136 : vector<8x128xf32>
    %cst_147 = arith.constant 2.000000e-01 : f32
    %138 = vector.broadcast %cst_147 : f32 to vector<8x128xf32>
    %139 = arith.mulf %138, %135 : vector<8x128xf32>
    %140 = arith.select %137, %135, %139 : vector<8x128xi1>, vector<8x128xf32>
    %141 = arith.truncf %140 : vector<8x128xf32> to vector<8x128xbf16>
    %c0_148 = arith.constant 0 : index
    %c3_149 = arith.constant 3 : index
    %c0_150 = arith.constant 0 : index
    %c0_151 = arith.constant 0 : index
    %142 = vector.load %arg4[%c0_148, %c3_149, %c0_150, %c0_151] : memref<1x8x8x128xbf16, #tpu.memory_space<vmem>>, vector<1x1x8x128xbf16>
    %143 = vector.shape_cast %142 : vector<1x1x8x128xbf16> to vector<8x128xbf16>
    %144 = vector.shape_cast %141 : vector<8x128xbf16> to vector<1x1x8x128xbf16>
    tpu.vector_store %arg4[%c0_148, %c3_149, %c0_150, %c0_151], %144 {strides = array<i32>} : memref<1x8x8x128xbf16, #tpu.memory_space<vmem>>, vector<1x1x8x128xbf16>,
    %cst_152 = arith.constant 0.000000e+00 : f32
    %145 = vector.broadcast %cst_152 : f32 to vector<8x128xf32>
    %c0_153 = arith.constant 0 : index
    %c4_154 = arith.constant 4 : index
    %c0_155 = arith.constant 0 : index
    %c0_156 = arith.constant 0 : index
    %146 = vector.load %arg1[%c0_153, %c4_154, %c0_155, %c0_156] : memref<1x9x9x16xbf16, #tpu.memory_space<vmem>>, vector<1x1x8x16xbf16>
    %147 = vector.shape_cast %146 : vector<1x1x8x16xbf16> to vector<8x16xbf16>
    %c0_157 = arith.constant 0 : index
    %c0_158 = arith.constant 0 : index
    %c0_159 = arith.constant 0 : index
    %148 = vector.load %arg2[%c0_157, %c0_158, %c0_159] : memref<4x16x128xbf16, #tpu.memory_space<vmem>>, vector<1x16x128xbf16>
    %149 = vector.shape_cast %148 : vector<1x16x128xbf16> to vector<16x128xbf16>
    %cst_160 = arith.constant dense<0.000000e+00> : vector<8x128xf32>
    %150 = tpu.matmul %147, %149, %cst_160 {dimension_numbers = #tpu.dot_dimension_numbers<[1], [0], [0], [1], [0, 0, 1, 1], [], []>} : vector<8x16xbf16>, vector<16x128xbf16>, vector<8x128xf32> -> vector<8x128xf32>
    %151 = arith.addf %145, %150 : vector<8x128xf32>
    %c0_161 = arith.constant 0 : index
    %c4_162 = arith.constant 4 : index
    %c1_163 = arith.constant 1 : index
    %c0_164 = arith.constant 0 : index
    %152 = vector.load %arg1[%c0_161, %c4_162, %c1_163, %c0_164] : memref<1x9x9x16xbf16, #tpu.memory_space<vmem>>, vector<1x1x8x16xbf16>
    %153 = vector.shape_cast %152 : vector<1x1x8x16xbf16> to vector<8x16xbf16>
    %c1_165 = arith.constant 1 : index
    %c0_166 = arith.constant 0 : index
    %c0_167 = arith.constant 0 : index
    %154 = vector.load %arg2[%c1_165, %c0_166, %c0_167] : memref<4x16x128xbf16, #tpu.memory_space<vmem>>, vector<1x16x128xbf16>
    %155 = vector.shape_cast %154 : vector<1x16x128xbf16> to vector<16x128xbf16>
    %cst_168 = arith.constant dense<0.000000e+00> : vector<8x128xf32>
    %156 = tpu.matmul %153, %155, %cst_168 {dimension_numbers = #tpu.dot_dimension_numbers<[1], [0], [0], [1], [0, 0, 1, 1], [], []>} : vector<8x16xbf16>, vector<16x128xbf16>, vector<8x128xf32> -> vector<8x128xf32>
    %157 = arith.addf %151, %156 : vector<8x128xf32>
    %c0_169 = arith.constant 0 : index
    %c5 = arith.constant 5 : index
    %c0_170 = arith.constant 0 : index
    %c0_171 = arith.constant 0 : index
    %158 = vector.load %arg1[%c0_169, %c5, %c0_170, %c0_171] : memref<1x9x9x16xbf16, #tpu.memory_space<vmem>>, vector<1x1x8x16xbf16>
    %159 = vector.shape_cast %158 : vector<1x1x8x16xbf16> to vector<8x16xbf16>
    %c2_172 = arith.constant 2 : index
    %c0_173 = arith.constant 0 : index
    %c0_174 = arith.constant 0 : index
    %160 = vector.load %arg2[%c2_172, %c0_173, %c0_174] : memref<4x16x128xbf16, #tpu.memory_space<vmem>>, vector<1x16x128xbf16>
    %161 = vector.shape_cast %160 : vector<1x16x128xbf16> to vector<16x128xbf16>
    %cst_175 = arith.constant dense<0.000000e+00> : vector<8x128xf32>
    %162 = tpu.matmul %159, %161, %cst_175 {dimension_numbers = #tpu.dot_dimension_numbers<[1], [0], [0], [1], [0, 0, 1, 1], [], []>} : vector<8x16xbf16>, vector<16x128xbf16>, vector<8x128xf32> -> vector<8x128xf32>
    %163 = arith.addf %157, %162 : vector<8x128xf32>
    %c0_176 = arith.constant 0 : index
    %c5_177 = arith.constant 5 : index
    %c1_178 = arith.constant 1 : index
    %c0_179 = arith.constant 0 : index
    %164 = vector.load %arg1[%c0_176, %c5_177, %c1_178, %c0_179] : memref<1x9x9x16xbf16, #tpu.memory_space<vmem>>, vector<1x1x8x16xbf16>
    %165 = vector.shape_cast %164 : vector<1x1x8x16xbf16> to vector<8x16xbf16>
    %c3_180 = arith.constant 3 : index
    %c0_181 = arith.constant 0 : index
    %c0_182 = arith.constant 0 : index
    %166 = vector.load %arg2[%c3_180, %c0_181, %c0_182] : memref<4x16x128xbf16, #tpu.memory_space<vmem>>, vector<1x16x128xbf16>
    %167 = vector.shape_cast %166 : vector<1x16x128xbf16> to vector<16x128xbf16>
    %cst_183 = arith.constant dense<0.000000e+00> : vector<8x128xf32>
    %168 = tpu.matmul %165, %167, %cst_183 {dimension_numbers = #tpu.dot_dimension_numbers<[1], [0], [0], [1], [0, 0, 1, 1], [], []>} : vector<8x16xbf16>, vector<16x128xbf16>, vector<8x128xf32> -> vector<8x128xf32>
    %169 = arith.addf %163, %168 : vector<8x128xf32>
    %170 = vector.broadcast %0 : vector<1x128xf32> to vector<8x128xf32>
    %171 = arith.addf %169, %170 : vector<8x128xf32>
    %cst_184 = arith.constant 0.000000e+00 : f32
    %172 = vector.broadcast %cst_184 : f32 to vector<8x128xf32>
    %173 = arith.cmpf oge, %171, %172 : vector<8x128xf32>
    %cst_185 = arith.constant 2.000000e-01 : f32
    %174 = vector.broadcast %cst_185 : f32 to vector<8x128xf32>
    %175 = arith.mulf %174, %171 : vector<8x128xf32>
    %176 = arith.select %173, %171, %175 : vector<8x128xi1>, vector<8x128xf32>
    %177 = arith.truncf %176 : vector<8x128xf32> to vector<8x128xbf16>
    %c0_186 = arith.constant 0 : index
    %c4_187 = arith.constant 4 : index
    %c0_188 = arith.constant 0 : index
    %c0_189 = arith.constant 0 : index
    %178 = vector.load %arg4[%c0_186, %c4_187, %c0_188, %c0_189] : memref<1x8x8x128xbf16, #tpu.memory_space<vmem>>, vector<1x1x8x128xbf16>
    %179 = vector.shape_cast %178 : vector<1x1x8x128xbf16> to vector<8x128xbf16>
    %180 = vector.shape_cast %177 : vector<8x128xbf16> to vector<1x1x8x128xbf16>
    tpu.vector_store %arg4[%c0_186, %c4_187, %c0_188, %c0_189], %180 {strides = array<i32>} : memref<1x8x8x128xbf16, #tpu.memory_space<vmem>>, vector<1x1x8x128xbf16>,
    %cst_190 = arith.constant 0.000000e+00 : f32
    %181 = vector.broadcast %cst_190 : f32 to vector<8x128xf32>
    %c0_191 = arith.constant 0 : index
    %c5_192 = arith.constant 5 : index
    %c0_193 = arith.constant 0 : index
    %c0_194 = arith.constant 0 : index
    %182 = vector.load %arg1[%c0_191, %c5_192, %c0_193, %c0_194] : memref<1x9x9x16xbf16, #tpu.memory_space<vmem>>, vector<1x1x8x16xbf16>
    %183 = vector.shape_cast %182 : vector<1x1x8x16xbf16> to vector<8x16xbf16>
    %c0_195 = arith.constant 0 : index
    %c0_196 = arith.constant 0 : index
    %c0_197 = arith.constant 0 : index
    %184 = vector.load %arg2[%c0_195, %c0_196, %c0_197] : memref<4x16x128xbf16, #tpu.memory_space<vmem>>, vector<1x16x128xbf16>
    %185 = vector.shape_cast %184 : vector<1x16x128xbf16> to vector<16x128xbf16>
    %cst_198 = arith.constant dense<0.000000e+00> : vector<8x128xf32>
    %186 = tpu.matmul %183, %185, %cst_198 {dimension_numbers = #tpu.dot_dimension_numbers<[1], [0], [0], [1], [0, 0, 1, 1], [], []>} : vector<8x16xbf16>, vector<16x128xbf16>, vector<8x128xf32> -> vector<8x128xf32>
    %187 = arith.addf %181, %186 : vector<8x128xf32>
    %c0_199 = arith.constant 0 : index
    %c5_200 = arith.constant 5 : index
    %c1_201 = arith.constant 1 : index
    %c0_202 = arith.constant 0 : index
    %188 = vector.load %arg1[%c0_199, %c5_200, %c1_201, %c0_202] : memref<1x9x9x16xbf16, #tpu.memory_space<vmem>>, vector<1x1x8x16xbf16>
    %189 = vector.shape_cast %188 : vector<1x1x8x16xbf16> to vector<8x16xbf16>
    %c1_203 = arith.constant 1 : index
    %c0_204 = arith.constant 0 : index
    %c0_205 = arith.constant 0 : index
    %190 = vector.load %arg2[%c1_203, %c0_204, %c0_205] : memref<4x16x128xbf16, #tpu.memory_space<vmem>>, vector<1x16x128xbf16>
    %191 = vector.shape_cast %190 : vector<1x16x128xbf16> to vector<16x128xbf16>
    %cst_206 = arith.constant dense<0.000000e+00> : vector<8x128xf32>
    %192 = tpu.matmul %189, %191, %cst_206 {dimension_numbers = #tpu.dot_dimension_numbers<[1], [0], [0], [1], [0, 0, 1, 1], [], []>} : vector<8x16xbf16>, vector<16x128xbf16>, vector<8x128xf32> -> vector<8x128xf32>
    %193 = arith.addf %187, %192 : vector<8x128xf32>
    %c0_207 = arith.constant 0 : index
    %c6 = arith.constant 6 : index
    %c0_208 = arith.constant 0 : index
    %c0_209 = arith.constant 0 : index
    %194 = vector.load %arg1[%c0_207, %c6, %c0_208, %c0_209] : memref<1x9x9x16xbf16, #tpu.memory_space<vmem>>, vector<1x1x8x16xbf16>
    %195 = vector.shape_cast %194 : vector<1x1x8x16xbf16> to vector<8x16xbf16>
    %c2_210 = arith.constant 2 : index
    %c0_211 = arith.constant 0 : index
    %c0_212 = arith.constant 0 : index
    %196 = vector.load %arg2[%c2_210, %c0_211, %c0_212] : memref<4x16x128xbf16, #tpu.memory_space<vmem>>, vector<1x16x128xbf16>
    %197 = vector.shape_cast %196 : vector<1x16x128xbf16> to vector<16x128xbf16>
    %cst_213 = arith.constant dense<0.000000e+00> : vector<8x128xf32>
    %198 = tpu.matmul %195, %197, %cst_213 {dimension_numbers = #tpu.dot_dimension_numbers<[1], [0], [0], [1], [0, 0, 1, 1], [], []>} : vector<8x16xbf16>, vector<16x128xbf16>, vector<8x128xf32> -> vector<8x128xf32>
    %199 = arith.addf %193, %198 : vector<8x128xf32>
    %c0_214 = arith.constant 0 : index
    %c6_215 = arith.constant 6 : index
    %c1_216 = arith.constant 1 : index
    %c0_217 = arith.constant 0 : index
    %200 = vector.load %arg1[%c0_214, %c6_215, %c1_216, %c0_217] : memref<1x9x9x16xbf16, #tpu.memory_space<vmem>>, vector<1x1x8x16xbf16>
    %201 = vector.shape_cast %200 : vector<1x1x8x16xbf16> to vector<8x16xbf16>
    %c3_218 = arith.constant 3 : index
    %c0_219 = arith.constant 0 : index
    %c0_220 = arith.constant 0 : index
    %202 = vector.load %arg2[%c3_218, %c0_219, %c0_220] : memref<4x16x128xbf16, #tpu.memory_space<vmem>>, vector<1x16x128xbf16>
    %203 = vector.shape_cast %202 : vector<1x16x128xbf16> to vector<16x128xbf16>
    %cst_221 = arith.constant dense<0.000000e+00> : vector<8x128xf32>
    %204 = tpu.matmul %201, %203, %cst_221 {dimension_numbers = #tpu.dot_dimension_numbers<[1], [0], [0], [1], [0, 0, 1, 1], [], []>} : vector<8x16xbf16>, vector<16x128xbf16>, vector<8x128xf32> -> vector<8x128xf32>
    %205 = arith.addf %199, %204 : vector<8x128xf32>
    %206 = vector.broadcast %0 : vector<1x128xf32> to vector<8x128xf32>
    %207 = arith.addf %205, %206 : vector<8x128xf32>
    %cst_222 = arith.constant 0.000000e+00 : f32
    %208 = vector.broadcast %cst_222 : f32 to vector<8x128xf32>
    %209 = arith.cmpf oge, %207, %208 : vector<8x128xf32>
    %cst_223 = arith.constant 2.000000e-01 : f32
    %210 = vector.broadcast %cst_223 : f32 to vector<8x128xf32>
    %211 = arith.mulf %210, %207 : vector<8x128xf32>
    %212 = arith.select %209, %207, %211 : vector<8x128xi1>, vector<8x128xf32>
    %213 = arith.truncf %212 : vector<8x128xf32> to vector<8x128xbf16>
    %c0_224 = arith.constant 0 : index
    %c5_225 = arith.constant 5 : index
    %c0_226 = arith.constant 0 : index
    %c0_227 = arith.constant 0 : index
    %214 = vector.load %arg4[%c0_224, %c5_225, %c0_226, %c0_227] : memref<1x8x8x128xbf16, #tpu.memory_space<vmem>>, vector<1x1x8x128xbf16>
    %215 = vector.shape_cast %214 : vector<1x1x8x128xbf16> to vector<8x128xbf16>
    %216 = vector.shape_cast %213 : vector<8x128xbf16> to vector<1x1x8x128xbf16>
    tpu.vector_store %arg4[%c0_224, %c5_225, %c0_226, %c0_227], %216 {strides = array<i32>} : memref<1x8x8x128xbf16, #tpu.memory_space<vmem>>, vector<1x1x8x128xbf16>,
    %cst_228 = arith.constant 0.000000e+00 : f32
    %217 = vector.broadcast %cst_228 : f32 to vector<8x128xf32>
    %c0_229 = arith.constant 0 : index
    %c6_230 = arith.constant 6 : index
    %c0_231 = arith.constant 0 : index
    %c0_232 = arith.constant 0 : index
    %218 = vector.load %arg1[%c0_229, %c6_230, %c0_231, %c0_232] : memref<1x9x9x16xbf16, #tpu.memory_space<vmem>>, vector<1x1x8x16xbf16>
    %219 = vector.shape_cast %218 : vector<1x1x8x16xbf16> to vector<8x16xbf16>
    %c0_233 = arith.constant 0 : index
    %c0_234 = arith.constant 0 : index
    %c0_235 = arith.constant 0 : index
    %220 = vector.load %arg2[%c0_233, %c0_234, %c0_235] : memref<4x16x128xbf16, #tpu.memory_space<vmem>>, vector<1x16x128xbf16>
    %221 = vector.shape_cast %220 : vector<1x16x128xbf16> to vector<16x128xbf16>
    %cst_236 = arith.constant dense<0.000000e+00> : vector<8x128xf32>
    %222 = tpu.matmul %219, %221, %cst_236 {dimension_numbers = #tpu.dot_dimension_numbers<[1], [0], [0], [1], [0, 0, 1, 1], [], []>} : vector<8x16xbf16>, vector<16x128xbf16>, vector<8x128xf32> -> vector<8x128xf32>
    %223 = arith.addf %217, %222 : vector<8x128xf32>
    %c0_237 = arith.constant 0 : index
    %c6_238 = arith.constant 6 : index
    %c1_239 = arith.constant 1 : index
    %c0_240 = arith.constant 0 : index
    %224 = vector.load %arg1[%c0_237, %c6_238, %c1_239, %c0_240] : memref<1x9x9x16xbf16, #tpu.memory_space<vmem>>, vector<1x1x8x16xbf16>
    %225 = vector.shape_cast %224 : vector<1x1x8x16xbf16> to vector<8x16xbf16>
    %c1_241 = arith.constant 1 : index
    %c0_242 = arith.constant 0 : index
    %c0_243 = arith.constant 0 : index
    %226 = vector.load %arg2[%c1_241, %c0_242, %c0_243] : memref<4x16x128xbf16, #tpu.memory_space<vmem>>, vector<1x16x128xbf16>
    %227 = vector.shape_cast %226 : vector<1x16x128xbf16> to vector<16x128xbf16>
    %cst_244 = arith.constant dense<0.000000e+00> : vector<8x128xf32>
    %228 = tpu.matmul %225, %227, %cst_244 {dimension_numbers = #tpu.dot_dimension_numbers<[1], [0], [0], [1], [0, 0, 1, 1], [], []>} : vector<8x16xbf16>, vector<16x128xbf16>, vector<8x128xf32> -> vector<8x128xf32>
    %229 = arith.addf %223, %228 : vector<8x128xf32>
    %c0_245 = arith.constant 0 : index
    %c7 = arith.constant 7 : index
    %c0_246 = arith.constant 0 : index
    %c0_247 = arith.constant 0 : index
    %230 = vector.load %arg1[%c0_245, %c7, %c0_246, %c0_247] : memref<1x9x9x16xbf16, #tpu.memory_space<vmem>>, vector<1x1x8x16xbf16>
    %231 = vector.shape_cast %230 : vector<1x1x8x16xbf16> to vector<8x16xbf16>
    %c2_248 = arith.constant 2 : index
    %c0_249 = arith.constant 0 : index
    %c0_250 = arith.constant 0 : index
    %232 = vector.load %arg2[%c2_248, %c0_249, %c0_250] : memref<4x16x128xbf16, #tpu.memory_space<vmem>>, vector<1x16x128xbf16>
    %233 = vector.shape_cast %232 : vector<1x16x128xbf16> to vector<16x128xbf16>
    %cst_251 = arith.constant dense<0.000000e+00> : vector<8x128xf32>
    %234 = tpu.matmul %231, %233, %cst_251 {dimension_numbers = #tpu.dot_dimension_numbers<[1], [0], [0], [1], [0, 0, 1, 1], [], []>} : vector<8x16xbf16>, vector<16x128xbf16>, vector<8x128xf32> -> vector<8x128xf32>
    %235 = arith.addf %229, %234 : vector<8x128xf32>
    %c0_252 = arith.constant 0 : index
    %c7_253 = arith.constant 7 : index
    %c1_254 = arith.constant 1 : index
    %c0_255 = arith.constant 0 : index
    %236 = vector.load %arg1[%c0_252, %c7_253, %c1_254, %c0_255] : memref<1x9x9x16xbf16, #tpu.memory_space<vmem>>, vector<1x1x8x16xbf16>
    %237 = vector.shape_cast %236 : vector<1x1x8x16xbf16> to vector<8x16xbf16>
    %c3_256 = arith.constant 3 : index
    %c0_257 = arith.constant 0 : index
    %c0_258 = arith.constant 0 : index
    %238 = vector.load %arg2[%c3_256, %c0_257, %c0_258] : memref<4x16x128xbf16, #tpu.memory_space<vmem>>, vector<1x16x128xbf16>
    %239 = vector.shape_cast %238 : vector<1x16x128xbf16> to vector<16x128xbf16>
    %cst_259 = arith.constant dense<0.000000e+00> : vector<8x128xf32>
    %240 = tpu.matmul %237, %239, %cst_259 {dimension_numbers = #tpu.dot_dimension_numbers<[1], [0], [0], [1], [0, 0, 1, 1], [], []>} : vector<8x16xbf16>, vector<16x128xbf16>, vector<8x128xf32> -> vector<8x128xf32>
    %241 = arith.addf %235, %240 : vector<8x128xf32>
    %242 = vector.broadcast %0 : vector<1x128xf32> to vector<8x128xf32>
    %243 = arith.addf %241, %242 : vector<8x128xf32>
    %cst_260 = arith.constant 0.000000e+00 : f32
    %244 = vector.broadcast %cst_260 : f32 to vector<8x128xf32>
    %245 = arith.cmpf oge, %243, %244 : vector<8x128xf32>
    %cst_261 = arith.constant 2.000000e-01 : f32
    %246 = vector.broadcast %cst_261 : f32 to vector<8x128xf32>
    %247 = arith.mulf %246, %243 : vector<8x128xf32>
    %248 = arith.select %245, %243, %247 : vector<8x128xi1>, vector<8x128xf32>
    %249 = arith.truncf %248 : vector<8x128xf32> to vector<8x128xbf16>
    %c0_262 = arith.constant 0 : index
    %c6_263 = arith.constant 6 : index
    %c0_264 = arith.constant 0 : index
    %c0_265 = arith.constant 0 : index
    %250 = vector.load %arg4[%c0_262, %c6_263, %c0_264, %c0_265] : memref<1x8x8x128xbf16, #tpu.memory_space<vmem>>, vector<1x1x8x128xbf16>
    %251 = vector.shape_cast %250 : vector<1x1x8x128xbf16> to vector<8x128xbf16>
    %252 = vector.shape_cast %249 : vector<8x128xbf16> to vector<1x1x8x128xbf16>
    tpu.vector_store %arg4[%c0_262, %c6_263, %c0_264, %c0_265], %252 {strides = array<i32>} : memref<1x8x8x128xbf16, #tpu.memory_space<vmem>>, vector<1x1x8x128xbf16>,
    %cst_266 = arith.constant 0.000000e+00 : f32
    %253 = vector.broadcast %cst_266 : f32 to vector<8x128xf32>
    %c0_267 = arith.constant 0 : index
    %c7_268 = arith.constant 7 : index
    %c0_269 = arith.constant 0 : index
    %c0_270 = arith.constant 0 : index
    %254 = vector.load %arg1[%c0_267, %c7_268, %c0_269, %c0_270] : memref<1x9x9x16xbf16, #tpu.memory_space<vmem>>, vector<1x1x8x16xbf16>
    %255 = vector.shape_cast %254 : vector<1x1x8x16xbf16> to vector<8x16xbf16>
    %c0_271 = arith.constant 0 : index
    %c0_272 = arith.constant 0 : index
    %c0_273 = arith.constant 0 : index
    %256 = vector.load %arg2[%c0_271, %c0_272, %c0_273] : memref<4x16x128xbf16, #tpu.memory_space<vmem>>, vector<1x16x128xbf16>
    %257 = vector.shape_cast %256 : vector<1x16x128xbf16> to vector<16x128xbf16>
    %cst_274 = arith.constant dense<0.000000e+00> : vector<8x128xf32>
    %258 = tpu.matmul %255, %257, %cst_274 {dimension_numbers = #tpu.dot_dimension_numbers<[1], [0], [0], [1], [0, 0, 1, 1], [], []>} : vector<8x16xbf16>, vector<16x128xbf16>, vector<8x128xf32> -> vector<8x128xf32>
    %259 = arith.addf %253, %258 : vector<8x128xf32>
    %c0_275 = arith.constant 0 : index
    %c7_276 = arith.constant 7 : index
    %c1_277 = arith.constant 1 : index
    %c0_278 = arith.constant 0 : index
    %260 = vector.load %arg1[%c0_275, %c7_276, %c1_277, %c0_278] : memref<1x9x9x16xbf16, #tpu.memory_space<vmem>>, vector<1x1x8x16xbf16>
    %261 = vector.shape_cast %260 : vector<1x1x8x16xbf16> to vector<8x16xbf16>
    %c1_279 = arith.constant 1 : index
    %c0_280 = arith.constant 0 : index
    %c0_281 = arith.constant 0 : index
    %262 = vector.load %arg2[%c1_279, %c0_280, %c0_281] : memref<4x16x128xbf16, #tpu.memory_space<vmem>>, vector<1x16x128xbf16>
    %263 = vector.shape_cast %262 : vector<1x16x128xbf16> to vector<16x128xbf16>
    %cst_282 = arith.constant dense<0.000000e+00> : vector<8x128xf32>
    %264 = tpu.matmul %261, %263, %cst_282 {dimension_numbers = #tpu.dot_dimension_numbers<[1], [0], [0], [1], [0, 0, 1, 1], [], []>} : vector<8x16xbf16>, vector<16x128xbf16>, vector<8x128xf32> -> vector<8x128xf32>
    %265 = arith.addf %259, %264 : vector<8x128xf32>
    %c0_283 = arith.constant 0 : index
    %c8 = arith.constant 8 : index
    %c0_284 = arith.constant 0 : index
    %c0_285 = arith.constant 0 : index
    %266 = vector.load %arg1[%c0_283, %c8, %c0_284, %c0_285] : memref<1x9x9x16xbf16, #tpu.memory_space<vmem>>, vector<1x1x8x16xbf16>
    %267 = vector.shape_cast %266 : vector<1x1x8x16xbf16> to vector<8x16xbf16>
    %c2_286 = arith.constant 2 : index
    %c0_287 = arith.constant 0 : index
    %c0_288 = arith.constant 0 : index
    %268 = vector.load %arg2[%c2_286, %c0_287, %c0_288] : memref<4x16x128xbf16, #tpu.memory_space<vmem>>, vector<1x16x128xbf16>
    %269 = vector.shape_cast %268 : vector<1x16x128xbf16> to vector<16x128xbf16>
    %cst_289 = arith.constant dense<0.000000e+00> : vector<8x128xf32>
    %270 = tpu.matmul %267, %269, %cst_289 {dimension_numbers = #tpu.dot_dimension_numbers<[1], [0], [0], [1], [0, 0, 1, 1], [], []>} : vector<8x16xbf16>, vector<16x128xbf16>, vector<8x128xf32> -> vector<8x128xf32>
    %271 = arith.addf %265, %270 : vector<8x128xf32>
    %c0_290 = arith.constant 0 : index
    %c8_291 = arith.constant 8 : index
    %c1_292 = arith.constant 1 : index
    %c0_293 = arith.constant 0 : index
    %272 = vector.load %arg1[%c0_290, %c8_291, %c1_292, %c0_293] : memref<1x9x9x16xbf16, #tpu.memory_space<vmem>>, vector<1x1x8x16xbf16>
    %273 = vector.shape_cast %272 : vector<1x1x8x16xbf16> to vector<8x16xbf16>
    %c3_294 = arith.constant 3 : index
    %c0_295 = arith.constant 0 : index
    %c0_296 = arith.constant 0 : index
    %274 = vector.load %arg2[%c3_294, %c0_295, %c0_296] : memref<4x16x128xbf16, #tpu.memory_space<vmem>>, vector<1x16x128xbf16>
    %275 = vector.shape_cast %274 : vector<1x16x128xbf16> to vector<16x128xbf16>
    %cst_297 = arith.constant dense<0.000000e+00> : vector<8x128xf32>
    %276 = tpu.matmul %273, %275, %cst_297 {dimension_numbers = #tpu.dot_dimension_numbers<[1], [0], [0], [1], [0, 0, 1, 1], [], []>} : vector<8x16xbf16>, vector<16x128xbf16>, vector<8x128xf32> -> vector<8x128xf32>
    %277 = arith.addf %271, %276 : vector<8x128xf32>
    %278 = vector.broadcast %0 : vector<1x128xf32> to vector<8x128xf32>
    %279 = arith.addf %277, %278 : vector<8x128xf32>
    %cst_298 = arith.constant 0.000000e+00 : f32
    %280 = vector.broadcast %cst_298 : f32 to vector<8x128xf32>
    %281 = arith.cmpf oge, %279, %280 : vector<8x128xf32>
    %cst_299 = arith.constant 2.000000e-01 : f32
    %282 = vector.broadcast %cst_299 : f32 to vector<8x128xf32>
    %283 = arith.mulf %282, %279 : vector<8x128xf32>
    %284 = arith.select %281, %279, %283 : vector<8x128xi1>, vector<8x128xf32>
    %285 = arith.truncf %284 : vector<8x128xf32> to vector<8x128xbf16>
    %c0_300 = arith.constant 0 : index
    %c7_301 = arith.constant 7 : index
    %c0_302 = arith.constant 0 : index
    %c0_303 = arith.constant 0 : index
    %286 = vector.load %arg4[%c0_300, %c7_301, %c0_302, %c0_303] : memref<1x8x8x128xbf16, #tpu.memory_space<vmem>>, vector<1x1x8x128xbf16>
    %287 = vector.shape_cast %286 : vector<1x1x8x128xbf16> to vector<8x128xbf16>
    %288 = vector.shape_cast %285 : vector<8x128xbf16> to vector<1x1x8x128xbf16>
    tpu.vector_store %arg4[%c0_300, %c7_301, %c0_302, %c0_303], %288 {strides = array<i32>} : memref<1x8x8x128xbf16, #tpu.memory_space<vmem>>, vector<1x1x8x128xbf16>,
    return
  }
  func.func @transform_0(%arg0: i32) -> (i32, i32, i32, i32) {
    %c0_i32 = arith.constant 0 : i32
    %c0_i32_0 = arith.constant 0 : i32
    %c0_i32_1 = arith.constant 0 : i32
    %c0_i32_2 = arith.constant 0 : i32
    return %arg0, %c0_i32, %c0_i32_0, %c0_i32_1 : i32, i32, i32, i32
  }
  func.func @transform_1(%arg0: i32) -> (i32, i32, i32) {
    %c0_i32 = arith.constant 0 : i32
    %c0_i32_0 = arith.constant 0 : i32
    %c0_i32_1 = arith.constant 0 : i32
    %c0_i32_2 = arith.constant 0 : i32
    return %c0_i32, %c0_i32_0, %c0_i32_1 : i32, i32, i32
  }
  func.func @transform_2(%arg0: i32) -> (i32, i32) {
    %c0_i32 = arith.constant 0 : i32
    %c0_i32_0 = arith.constant 0 : i32
    %c0_i32_1 = arith.constant 0 : i32
    return %c0_i32, %c0_i32_0 : i32, i32
  }
  func.func @transform_3(%arg0: i32) -> (i32, i32, i32, i32) {
    %c0_i32 = arith.constant 0 : i32
    %c0_i32_0 = arith.constant 0 : i32
    %c0_i32_1 = arith.constant 0 : i32
    %c0_i32_2 = arith.constant 0 : i32
    return %arg0, %c0_i32, %c0_i32_0, %c0_i32_1 : i32, i32, i32, i32
  }
}

module attributes {stable_mosaic.version = 11 : i64} {
  func.func @_bn_act_kernel(%arg0: i32, %arg1: memref<32x128xbf16, #tpu.memory_space<vmem>>, %arg2: memref<1x128xf32, #tpu.memory_space<vmem>>, %arg3: memref<1x128xf32, #tpu.memory_space<vmem>>, %arg4: memref<32x128xbf16, #tpu.memory_space<vmem>>) attributes {dimension_semantics = [#tpu.dimension_semantics<parallel>], iteration_bounds = array<i64: 1>, scalar_prefetch = 0 : i64, scratch_operands = 0 : i64, tpu.core_type = #tpu.core_type<tc>, window_params = [{transform_indices = @transform_0, window_bounds = array<i64: 32, 128>}, {pipeline_mode = #tpu.pipeline_mode<synchronous>, transform_indices = @transform_1, window_bounds = array<i64: 1, 128>}, {pipeline_mode = #tpu.pipeline_mode<synchronous>, transform_indices = @transform_2, window_bounds = array<i64: 1, 128>}, {transform_indices = @transform_3, window_bounds = array<i64: 32, 128>}]} {
    %c0 = arith.constant 0 : index
    %c0_0 = arith.constant 0 : index
    %0 = vector.load %arg1[%c0, %c0_0] : memref<32x128xbf16, #tpu.memory_space<vmem>>, vector<32x128xbf16>
    %1 = arith.extf %0 : vector<32x128xbf16> to vector<32x128xf32>
    %c0_1 = arith.constant 0 : index
    %c0_2 = arith.constant 0 : index
    %2 = vector.load %arg2[%c0_1, %c0_2] : memref<1x128xf32, #tpu.memory_space<vmem>>, vector<1x128xf32>
    %3 = vector.broadcast %2 : vector<1x128xf32> to vector<32x128xf32>
    %4 = arith.mulf %1, %3 : vector<32x128xf32>
    %c0_3 = arith.constant 0 : index
    %c0_4 = arith.constant 0 : index
    %5 = vector.load %arg3[%c0_3, %c0_4] : memref<1x128xf32, #tpu.memory_space<vmem>>, vector<1x128xf32>
    %6 = vector.broadcast %5 : vector<1x128xf32> to vector<32x128xf32>
    %7 = arith.addf %4, %6 : vector<32x128xf32>
    %cst = arith.constant 0.000000e+00 : f32
    %8 = vector.broadcast %cst : f32 to vector<32x128xf32>
    %9 = arith.cmpf oge, %7, %8 : vector<32x128xf32>
    %cst_5 = arith.constant 2.000000e-01 : f32
    %10 = vector.broadcast %cst_5 : f32 to vector<32x128xf32>
    %11 = arith.mulf %10, %7 : vector<32x128xf32>
    %12 = arith.select %9, %7, %11 : vector<32x128xi1>, vector<32x128xf32>
    %13 = arith.truncf %12 : vector<32x128xf32> to vector<32x128xbf16>
    %c0_6 = arith.constant 0 : index
    %c0_7 = arith.constant 0 : index
    %14 = vector.load %arg4[%c0_6, %c0_7] : memref<32x128xbf16, #tpu.memory_space<vmem>>, vector<32x128xbf16>
    tpu.vector_store %arg4[%c0_6, %c0_7], %13 {strides = array<i32>} : memref<32x128xbf16, #tpu.memory_space<vmem>>, vector<32x128xbf16>,
    return
  }
  func.func @transform_0(%arg0: i32) -> (i32, i32) {
    %c0_i32 = arith.constant 0 : i32
    %c0_i32_0 = arith.constant 0 : i32
    return %arg0, %c0_i32 : i32, i32
  }
  func.func @transform_1(%arg0: i32) -> (i32, i32) {
    %c0_i32 = arith.constant 0 : i32
    %c0_i32_0 = arith.constant 0 : i32
    %c0_i32_1 = arith.constant 0 : i32
    return %c0_i32, %c0_i32_0 : i32, i32
  }
  func.func @transform_2(%arg0: i32) -> (i32, i32) {
    %c0_i32 = arith.constant 0 : i32
    %c0_i32_0 = arith.constant 0 : i32
    %c0_i32_1 = arith.constant 0 : i32
    return %c0_i32, %c0_i32_0 : i32, i32
  }
  func.func @transform_3(%arg0: i32) -> (i32, i32) {
    %c0_i32 = arith.constant 0 : i32
    %c0_i32_0 = arith.constant 0 : i32
    return %arg0, %c0_i32 : i32, i32
  }
}

module attributes {stable_mosaic.version = 11 : i64} {
  func.func @_conv_tap_kernel(%arg0: i32, %arg1: memref<1x5x5x512xbf16, #tpu.memory_space<vmem>>, %arg2: memref<4x512x128xbf16, #tpu.memory_space<vmem>>, %arg3: memref<1x128xf32, #tpu.memory_space<vmem>>, %arg4: memref<1x4x4x128xbf16, #tpu.memory_space<vmem>>, %arg5: memref<1x1x128xf32, #tpu.memory_space<vmem>>, %arg6: memref<1x1x128xf32, #tpu.memory_space<vmem>>) attributes {dimension_semantics = [#tpu.dimension_semantics<parallel>], iteration_bounds = array<i64: 2>, scalar_prefetch = 0 : i64, scratch_operands = 0 : i64, tpu.core_type = #tpu.core_type<tc>, window_params = [{transform_indices = @transform_0, window_bounds = array<i64: 1, 5, 5, 512>}, {pipeline_mode = #tpu.pipeline_mode<synchronous>, transform_indices = @transform_1, window_bounds = array<i64: 4, 512, 128>}, {pipeline_mode = #tpu.pipeline_mode<synchronous>, transform_indices = @transform_2, window_bounds = array<i64: 1, 128>}, {transform_indices = @transform_3, window_bounds = array<i64: 1, 4, 4, 128>}, {transform_indices = @transform_4, window_bounds = array<i64: 1, 1, 128>}, {transform_indices = @transform_5, window_bounds = array<i64: 1, 1, 128>}]} {
    %c0 = arith.constant 0 : index
    %c0_0 = arith.constant 0 : index
    %0 = vector.load %arg3[%c0, %c0_0] : memref<1x128xf32, #tpu.memory_space<vmem>>, vector<1x128xf32>
    %cst = arith.constant 0.000000e+00 : f32
    %1 = vector.broadcast %cst : f32 to vector<1x128xf32>
    %cst_1 = arith.constant 0.000000e+00 : f32
    %2 = vector.broadcast %cst_1 : f32 to vector<1x128xf32>
    %cst_2 = arith.constant 0.000000e+00 : f32
    %3 = vector.broadcast %cst_2 : f32 to vector<4x128xf32>
    %c0_3 = arith.constant 0 : index
    %c0_4 = arith.constant 0 : index
    %c0_5 = arith.constant 0 : index
    %c0_6 = arith.constant 0 : index
    %4 = vector.load %arg1[%c0_3, %c0_4, %c0_5, %c0_6] : memref<1x5x5x512xbf16, #tpu.memory_space<vmem>>, vector<1x1x4x512xbf16>
    %5 = vector.shape_cast %4 : vector<1x1x4x512xbf16> to vector<4x512xbf16>
    %c0_7 = arith.constant 0 : index
    %c0_8 = arith.constant 0 : index
    %c0_9 = arith.constant 0 : index
    %6 = vector.load %arg2[%c0_7, %c0_8, %c0_9] : memref<4x512x128xbf16, #tpu.memory_space<vmem>>, vector<1x512x128xbf16>
    %7 = vector.shape_cast %6 : vector<1x512x128xbf16> to vector<512x128xbf16>
    %cst_10 = arith.constant dense<0.000000e+00> : vector<4x128xf32>
    %8 = tpu.matmul %5, %7, %cst_10 {dimension_numbers = #tpu.dot_dimension_numbers<[1], [0], [0], [1], [0, 0, 1, 1], [], []>} : vector<4x512xbf16>, vector<512x128xbf16>, vector<4x128xf32> -> vector<4x128xf32>
    %9 = arith.addf %3, %8 : vector<4x128xf32>
    %c0_11 = arith.constant 0 : index
    %c0_12 = arith.constant 0 : index
    %c1 = arith.constant 1 : index
    %c0_13 = arith.constant 0 : index
    %10 = vector.load %arg1[%c0_11, %c0_12, %c1, %c0_13] : memref<1x5x5x512xbf16, #tpu.memory_space<vmem>>, vector<1x1x4x512xbf16>
    %11 = vector.shape_cast %10 : vector<1x1x4x512xbf16> to vector<4x512xbf16>
    %c1_14 = arith.constant 1 : index
    %c0_15 = arith.constant 0 : index
    %c0_16 = arith.constant 0 : index
    %12 = vector.load %arg2[%c1_14, %c0_15, %c0_16] : memref<4x512x128xbf16, #tpu.memory_space<vmem>>, vector<1x512x128xbf16>
    %13 = vector.shape_cast %12 : vector<1x512x128xbf16> to vector<512x128xbf16>
    %cst_17 = arith.constant dense<0.000000e+00> : vector<4x128xf32>
    %14 = tpu.matmul %11, %13, %cst_17 {dimension_numbers = #tpu.dot_dimension_numbers<[1], [0], [0], [1], [0, 0, 1, 1], [], []>} : vector<4x512xbf16>, vector<512x128xbf16>, vector<4x128xf32> -> vector<4x128xf32>
    %15 = arith.addf %9, %14 : vector<4x128xf32>
    %c0_18 = arith.constant 0 : index
    %c1_19 = arith.constant 1 : index
    %c0_20 = arith.constant 0 : index
    %c0_21 = arith.constant 0 : index
    %16 = vector.load %arg1[%c0_18, %c1_19, %c0_20, %c0_21] : memref<1x5x5x512xbf16, #tpu.memory_space<vmem>>, vector<1x1x4x512xbf16>
    %17 = vector.shape_cast %16 : vector<1x1x4x512xbf16> to vector<4x512xbf16>
    %c2 = arith.constant 2 : index
    %c0_22 = arith.constant 0 : index
    %c0_23 = arith.constant 0 : index
    %18 = vector.load %arg2[%c2, %c0_22, %c0_23] : memref<4x512x128xbf16, #tpu.memory_space<vmem>>, vector<1x512x128xbf16>
    %19 = vector.shape_cast %18 : vector<1x512x128xbf16> to vector<512x128xbf16>
    %cst_24 = arith.constant dense<0.000000e+00> : vector<4x128xf32>
    %20 = tpu.matmul %17, %19, %cst_24 {dimension_numbers = #tpu.dot_dimension_numbers<[1], [0], [0], [1], [0, 0, 1, 1], [], []>} : vector<4x512xbf16>, vector<512x128xbf16>, vector<4x128xf32> -> vector<4x128xf32>
    %21 = arith.addf %15, %20 : vector<4x128xf32>
    %c0_25 = arith.constant 0 : index
    %c1_26 = arith.constant 1 : index
    %c1_27 = arith.constant 1 : index
    %c0_28 = arith.constant 0 : index
    %22 = vector.load %arg1[%c0_25, %c1_26, %c1_27, %c0_28] : memref<1x5x5x512xbf16, #tpu.memory_space<vmem>>, vector<1x1x4x512xbf16>
    %23 = vector.shape_cast %22 : vector<1x1x4x512xbf16> to vector<4x512xbf16>
    %c3 = arith.constant 3 : index
    %c0_29 = arith.constant 0 : index
    %c0_30 = arith.constant 0 : index
    %24 = vector.load %arg2[%c3, %c0_29, %c0_30] : memref<4x512x128xbf16, #tpu.memory_space<vmem>>, vector<1x512x128xbf16>
    %25 = vector.shape_cast %24 : vector<1x512x128xbf16> to vector<512x128xbf16>
    %cst_31 = arith.constant dense<0.000000e+00> : vector<4x128xf32>
    %26 = tpu.matmul %23, %25, %cst_31 {dimension_numbers = #tpu.dot_dimension_numbers<[1], [0], [0], [1], [0, 0, 1, 1], [], []>} : vector<4x512xbf16>, vector<512x128xbf16>, vector<4x128xf32> -> vector<4x128xf32>
    %27 = arith.addf %21, %26 : vector<4x128xf32>
    %28 = vector.broadcast %0 : vector<1x128xf32> to vector<4x128xf32>
    %29 = arith.addf %27, %28 : vector<4x128xf32>
    %cst_32 = arith.constant dense<0.000000e+00> : vector<128xf32>
    %30 = vector.multi_reduction <add>, %29, %cst_32 [0] : vector<4x128xf32> to vector<128xf32>
    %31 = vector.shape_cast %30 : vector<128xf32> to vector<1x128xf32>
    %32 = arith.addf %1, %31 : vector<1x128xf32>
    %33 = arith.mulf %29, %29 : vector<4x128xf32>
    %cst_33 = arith.constant dense<0.000000e+00> : vector<128xf32>
    %34 = vector.multi_reduction <add>, %33, %cst_33 [0] : vector<4x128xf32> to vector<128xf32>
    %35 = vector.shape_cast %34 : vector<128xf32> to vector<1x128xf32>
    %36 = arith.addf %2, %35 : vector<1x128xf32>
    %37 = arith.truncf %29 : vector<4x128xf32> to vector<4x128xbf16>
    %c0_34 = arith.constant 0 : index
    %c0_35 = arith.constant 0 : index
    %c0_36 = arith.constant 0 : index
    %c0_37 = arith.constant 0 : index
    %38 = vector.load %arg4[%c0_34, %c0_35, %c0_36, %c0_37] : memref<1x4x4x128xbf16, #tpu.memory_space<vmem>>, vector<1x1x4x128xbf16>
    %39 = vector.shape_cast %38 : vector<1x1x4x128xbf16> to vector<4x128xbf16>
    %40 = vector.shape_cast %37 : vector<4x128xbf16> to vector<1x1x4x128xbf16>
    tpu.vector_store %arg4[%c0_34, %c0_35, %c0_36, %c0_37], %40 {strides = array<i32>} : memref<1x4x4x128xbf16, #tpu.memory_space<vmem>>, vector<1x1x4x128xbf16>,
    %cst_38 = arith.constant 0.000000e+00 : f32
    %41 = vector.broadcast %cst_38 : f32 to vector<4x128xf32>
    %c0_39 = arith.constant 0 : index
    %c1_40 = arith.constant 1 : index
    %c0_41 = arith.constant 0 : index
    %c0_42 = arith.constant 0 : index
    %42 = vector.load %arg1[%c0_39, %c1_40, %c0_41, %c0_42] : memref<1x5x5x512xbf16, #tpu.memory_space<vmem>>, vector<1x1x4x512xbf16>
    %43 = vector.shape_cast %42 : vector<1x1x4x512xbf16> to vector<4x512xbf16>
    %c0_43 = arith.constant 0 : index
    %c0_44 = arith.constant 0 : index
    %c0_45 = arith.constant 0 : index
    %44 = vector.load %arg2[%c0_43, %c0_44, %c0_45] : memref<4x512x128xbf16, #tpu.memory_space<vmem>>, vector<1x512x128xbf16>
    %45 = vector.shape_cast %44 : vector<1x512x128xbf16> to vector<512x128xbf16>
    %cst_46 = arith.constant dense<0.000000e+00> : vector<4x128xf32>
    %46 = tpu.matmul %43, %45, %cst_46 {dimension_numbers = #tpu.dot_dimension_numbers<[1], [0], [0], [1], [0, 0, 1, 1], [], []>} : vector<4x512xbf16>, vector<512x128xbf16>, vector<4x128xf32> -> vector<4x128xf32>
    %47 = arith.addf %41, %46 : vector<4x128xf32>
    %c0_47 = arith.constant 0 : index
    %c1_48 = arith.constant 1 : index
    %c1_49 = arith.constant 1 : index
    %c0_50 = arith.constant 0 : index
    %48 = vector.load %arg1[%c0_47, %c1_48, %c1_49, %c0_50] : memref<1x5x5x512xbf16, #tpu.memory_space<vmem>>, vector<1x1x4x512xbf16>
    %49 = vector.shape_cast %48 : vector<1x1x4x512xbf16> to vector<4x512xbf16>
    %c1_51 = arith.constant 1 : index
    %c0_52 = arith.constant 0 : index
    %c0_53 = arith.constant 0 : index
    %50 = vector.load %arg2[%c1_51, %c0_52, %c0_53] : memref<4x512x128xbf16, #tpu.memory_space<vmem>>, vector<1x512x128xbf16>
    %51 = vector.shape_cast %50 : vector<1x512x128xbf16> to vector<512x128xbf16>
    %cst_54 = arith.constant dense<0.000000e+00> : vector<4x128xf32>
    %52 = tpu.matmul %49, %51, %cst_54 {dimension_numbers = #tpu.dot_dimension_numbers<[1], [0], [0], [1], [0, 0, 1, 1], [], []>} : vector<4x512xbf16>, vector<512x128xbf16>, vector<4x128xf32> -> vector<4x128xf32>
    %53 = arith.addf %47, %52 : vector<4x128xf32>
    %c0_55 = arith.constant 0 : index
    %c2_56 = arith.constant 2 : index
    %c0_57 = arith.constant 0 : index
    %c0_58 = arith.constant 0 : index
    %54 = vector.load %arg1[%c0_55, %c2_56, %c0_57, %c0_58] : memref<1x5x5x512xbf16, #tpu.memory_space<vmem>>, vector<1x1x4x512xbf16>
    %55 = vector.shape_cast %54 : vector<1x1x4x512xbf16> to vector<4x512xbf16>
    %c2_59 = arith.constant 2 : index
    %c0_60 = arith.constant 0 : index
    %c0_61 = arith.constant 0 : index
    %56 = vector.load %arg2[%c2_59, %c0_60, %c0_61] : memref<4x512x128xbf16, #tpu.memory_space<vmem>>, vector<1x512x128xbf16>
    %57 = vector.shape_cast %56 : vector<1x512x128xbf16> to vector<512x128xbf16>
    %cst_62 = arith.constant dense<0.000000e+00> : vector<4x128xf32>
    %58 = tpu.matmul %55, %57, %cst_62 {dimension_numbers = #tpu.dot_dimension_numbers<[1], [0], [0], [1], [0, 0, 1, 1], [], []>} : vector<4x512xbf16>, vector<512x128xbf16>, vector<4x128xf32> -> vector<4x128xf32>
    %59 = arith.addf %53, %58 : vector<4x128xf32>
    %c0_63 = arith.constant 0 : index
    %c2_64 = arith.constant 2 : index
    %c1_65 = arith.constant 1 : index
    %c0_66 = arith.constant 0 : index
    %60 = vector.load %arg1[%c0_63, %c2_64, %c1_65, %c0_66] : memref<1x5x5x512xbf16, #tpu.memory_space<vmem>>, vector<1x1x4x512xbf16>
    %61 = vector.shape_cast %60 : vector<1x1x4x512xbf16> to vector<4x512xbf16>
    %c3_67 = arith.constant 3 : index
    %c0_68 = arith.constant 0 : index
    %c0_69 = arith.constant 0 : index
    %62 = vector.load %arg2[%c3_67, %c0_68, %c0_69] : memref<4x512x128xbf16, #tpu.memory_space<vmem>>, vector<1x512x128xbf16>
    %63 = vector.shape_cast %62 : vector<1x512x128xbf16> to vector<512x128xbf16>
    %cst_70 = arith.constant dense<0.000000e+00> : vector<4x128xf32>
    %64 = tpu.matmul %61, %63, %cst_70 {dimension_numbers = #tpu.dot_dimension_numbers<[1], [0], [0], [1], [0, 0, 1, 1], [], []>} : vector<4x512xbf16>, vector<512x128xbf16>, vector<4x128xf32> -> vector<4x128xf32>
    %65 = arith.addf %59, %64 : vector<4x128xf32>
    %66 = vector.broadcast %0 : vector<1x128xf32> to vector<4x128xf32>
    %67 = arith.addf %65, %66 : vector<4x128xf32>
    %cst_71 = arith.constant dense<0.000000e+00> : vector<128xf32>
    %68 = vector.multi_reduction <add>, %67, %cst_71 [0] : vector<4x128xf32> to vector<128xf32>
    %69 = vector.shape_cast %68 : vector<128xf32> to vector<1x128xf32>
    %70 = arith.addf %32, %69 : vector<1x128xf32>
    %71 = arith.mulf %67, %67 : vector<4x128xf32>
    %cst_72 = arith.constant dense<0.000000e+00> : vector<128xf32>
    %72 = vector.multi_reduction <add>, %71, %cst_72 [0] : vector<4x128xf32> to vector<128xf32>
    %73 = vector.shape_cast %72 : vector<128xf32> to vector<1x128xf32>
    %74 = arith.addf %36, %73 : vector<1x128xf32>
    %75 = arith.truncf %67 : vector<4x128xf32> to vector<4x128xbf16>
    %c0_73 = arith.constant 0 : index
    %c1_74 = arith.constant 1 : index
    %c0_75 = arith.constant 0 : index
    %c0_76 = arith.constant 0 : index
    %76 = vector.load %arg4[%c0_73, %c1_74, %c0_75, %c0_76] : memref<1x4x4x128xbf16, #tpu.memory_space<vmem>>, vector<1x1x4x128xbf16>
    %77 = vector.shape_cast %76 : vector<1x1x4x128xbf16> to vector<4x128xbf16>
    %78 = vector.shape_cast %75 : vector<4x128xbf16> to vector<1x1x4x128xbf16>
    tpu.vector_store %arg4[%c0_73, %c1_74, %c0_75, %c0_76], %78 {strides = array<i32>} : memref<1x4x4x128xbf16, #tpu.memory_space<vmem>>, vector<1x1x4x128xbf16>,
    %cst_77 = arith.constant 0.000000e+00 : f32
    %79 = vector.broadcast %cst_77 : f32 to vector<4x128xf32>
    %c0_78 = arith.constant 0 : index
    %c2_79 = arith.constant 2 : index
    %c0_80 = arith.constant 0 : index
    %c0_81 = arith.constant 0 : index
    %80 = vector.load %arg1[%c0_78, %c2_79, %c0_80, %c0_81] : memref<1x5x5x512xbf16, #tpu.memory_space<vmem>>, vector<1x1x4x512xbf16>
    %81 = vector.shape_cast %80 : vector<1x1x4x512xbf16> to vector<4x512xbf16>
    %c0_82 = arith.constant 0 : index
    %c0_83 = arith.constant 0 : index
    %c0_84 = arith.constant 0 : index
    %82 = vector.load %arg2[%c0_82, %c0_83, %c0_84] : memref<4x512x128xbf16, #tpu.memory_space<vmem>>, vector<1x512x128xbf16>
    %83 = vector.shape_cast %82 : vector<1x512x128xbf16> to vector<512x128xbf16>
    %cst_85 = arith.constant dense<0.000000e+00> : vector<4x128xf32>
    %84 = tpu.matmul %81, %83, %cst_85 {dimension_numbers = #tpu.dot_dimension_numbers<[1], [0], [0], [1], [0, 0, 1, 1], [], []>} : vector<4x512xbf16>, vector<512x128xbf16>, vector<4x128xf32> -> vector<4x128xf32>
    %85 = arith.addf %79, %84 : vector<4x128xf32>
    %c0_86 = arith.constant 0 : index
    %c2_87 = arith.constant 2 : index
    %c1_88 = arith.constant 1 : index
    %c0_89 = arith.constant 0 : index
    %86 = vector.load %arg1[%c0_86, %c2_87, %c1_88, %c0_89] : memref<1x5x5x512xbf16, #tpu.memory_space<vmem>>, vector<1x1x4x512xbf16>
    %87 = vector.shape_cast %86 : vector<1x1x4x512xbf16> to vector<4x512xbf16>
    %c1_90 = arith.constant 1 : index
    %c0_91 = arith.constant 0 : index
    %c0_92 = arith.constant 0 : index
    %88 = vector.load %arg2[%c1_90, %c0_91, %c0_92] : memref<4x512x128xbf16, #tpu.memory_space<vmem>>, vector<1x512x128xbf16>
    %89 = vector.shape_cast %88 : vector<1x512x128xbf16> to vector<512x128xbf16>
    %cst_93 = arith.constant dense<0.000000e+00> : vector<4x128xf32>
    %90 = tpu.matmul %87, %89, %cst_93 {dimension_numbers = #tpu.dot_dimension_numbers<[1], [0], [0], [1], [0, 0, 1, 1], [], []>} : vector<4x512xbf16>, vector<512x128xbf16>, vector<4x128xf32> -> vector<4x128xf32>
    %91 = arith.addf %85, %90 : vector<4x128xf32>
    %c0_94 = arith.constant 0 : index
    %c3_95 = arith.constant 3 : index
    %c0_96 = arith.constant 0 : index
    %c0_97 = arith.constant 0 : index
    %92 = vector.load %arg1[%c0_94, %c3_95, %c0_96, %c0_97] : memref<1x5x5x512xbf16, #tpu.memory_space<vmem>>, vector<1x1x4x512xbf16>
    %93 = vector.shape_cast %92 : vector<1x1x4x512xbf16> to vector<4x512xbf16>
    %c2_98 = arith.constant 2 : index
    %c0_99 = arith.constant 0 : index
    %c0_100 = arith.constant 0 : index
    %94 = vector.load %arg2[%c2_98, %c0_99, %c0_100] : memref<4x512x128xbf16, #tpu.memory_space<vmem>>, vector<1x512x128xbf16>
    %95 = vector.shape_cast %94 : vector<1x512x128xbf16> to vector<512x128xbf16>
    %cst_101 = arith.constant dense<0.000000e+00> : vector<4x128xf32>
    %96 = tpu.matmul %93, %95, %cst_101 {dimension_numbers = #tpu.dot_dimension_numbers<[1], [0], [0], [1], [0, 0, 1, 1], [], []>} : vector<4x512xbf16>, vector<512x128xbf16>, vector<4x128xf32> -> vector<4x128xf32>
    %97 = arith.addf %91, %96 : vector<4x128xf32>
    %c0_102 = arith.constant 0 : index
    %c3_103 = arith.constant 3 : index
    %c1_104 = arith.constant 1 : index
    %c0_105 = arith.constant 0 : index
    %98 = vector.load %arg1[%c0_102, %c3_103, %c1_104, %c0_105] : memref<1x5x5x512xbf16, #tpu.memory_space<vmem>>, vector<1x1x4x512xbf16>
    %99 = vector.shape_cast %98 : vector<1x1x4x512xbf16> to vector<4x512xbf16>
    %c3_106 = arith.constant 3 : index
    %c0_107 = arith.constant 0 : index
    %c0_108 = arith.constant 0 : index
    %100 = vector.load %arg2[%c3_106, %c0_107, %c0_108] : memref<4x512x128xbf16, #tpu.memory_space<vmem>>, vector<1x512x128xbf16>
    %101 = vector.shape_cast %100 : vector<1x512x128xbf16> to vector<512x128xbf16>
    %cst_109 = arith.constant dense<0.000000e+00> : vector<4x128xf32>
    %102 = tpu.matmul %99, %101, %cst_109 {dimension_numbers = #tpu.dot_dimension_numbers<[1], [0], [0], [1], [0, 0, 1, 1], [], []>} : vector<4x512xbf16>, vector<512x128xbf16>, vector<4x128xf32> -> vector<4x128xf32>
    %103 = arith.addf %97, %102 : vector<4x128xf32>
    %104 = vector.broadcast %0 : vector<1x128xf32> to vector<4x128xf32>
    %105 = arith.addf %103, %104 : vector<4x128xf32>
    %cst_110 = arith.constant dense<0.000000e+00> : vector<128xf32>
    %106 = vector.multi_reduction <add>, %105, %cst_110 [0] : vector<4x128xf32> to vector<128xf32>
    %107 = vector.shape_cast %106 : vector<128xf32> to vector<1x128xf32>
    %108 = arith.addf %70, %107 : vector<1x128xf32>
    %109 = arith.mulf %105, %105 : vector<4x128xf32>
    %cst_111 = arith.constant dense<0.000000e+00> : vector<128xf32>
    %110 = vector.multi_reduction <add>, %109, %cst_111 [0] : vector<4x128xf32> to vector<128xf32>
    %111 = vector.shape_cast %110 : vector<128xf32> to vector<1x128xf32>
    %112 = arith.addf %74, %111 : vector<1x128xf32>
    %113 = arith.truncf %105 : vector<4x128xf32> to vector<4x128xbf16>
    %c0_112 = arith.constant 0 : index
    %c2_113 = arith.constant 2 : index
    %c0_114 = arith.constant 0 : index
    %c0_115 = arith.constant 0 : index
    %114 = vector.load %arg4[%c0_112, %c2_113, %c0_114, %c0_115] : memref<1x4x4x128xbf16, #tpu.memory_space<vmem>>, vector<1x1x4x128xbf16>
    %115 = vector.shape_cast %114 : vector<1x1x4x128xbf16> to vector<4x128xbf16>
    %116 = vector.shape_cast %113 : vector<4x128xbf16> to vector<1x1x4x128xbf16>
    tpu.vector_store %arg4[%c0_112, %c2_113, %c0_114, %c0_115], %116 {strides = array<i32>} : memref<1x4x4x128xbf16, #tpu.memory_space<vmem>>, vector<1x1x4x128xbf16>,
    %cst_116 = arith.constant 0.000000e+00 : f32
    %117 = vector.broadcast %cst_116 : f32 to vector<4x128xf32>
    %c0_117 = arith.constant 0 : index
    %c3_118 = arith.constant 3 : index
    %c0_119 = arith.constant 0 : index
    %c0_120 = arith.constant 0 : index
    %118 = vector.load %arg1[%c0_117, %c3_118, %c0_119, %c0_120] : memref<1x5x5x512xbf16, #tpu.memory_space<vmem>>, vector<1x1x4x512xbf16>
    %119 = vector.shape_cast %118 : vector<1x1x4x512xbf16> to vector<4x512xbf16>
    %c0_121 = arith.constant 0 : index
    %c0_122 = arith.constant 0 : index
    %c0_123 = arith.constant 0 : index
    %120 = vector.load %arg2[%c0_121, %c0_122, %c0_123] : memref<4x512x128xbf16, #tpu.memory_space<vmem>>, vector<1x512x128xbf16>
    %121 = vector.shape_cast %120 : vector<1x512x128xbf16> to vector<512x128xbf16>
    %cst_124 = arith.constant dense<0.000000e+00> : vector<4x128xf32>
    %122 = tpu.matmul %119, %121, %cst_124 {dimension_numbers = #tpu.dot_dimension_numbers<[1], [0], [0], [1], [0, 0, 1, 1], [], []>} : vector<4x512xbf16>, vector<512x128xbf16>, vector<4x128xf32> -> vector<4x128xf32>
    %123 = arith.addf %117, %122 : vector<4x128xf32>
    %c0_125 = arith.constant 0 : index
    %c3_126 = arith.constant 3 : index
    %c1_127 = arith.constant 1 : index
    %c0_128 = arith.constant 0 : index
    %124 = vector.load %arg1[%c0_125, %c3_126, %c1_127, %c0_128] : memref<1x5x5x512xbf16, #tpu.memory_space<vmem>>, vector<1x1x4x512xbf16>
    %125 = vector.shape_cast %124 : vector<1x1x4x512xbf16> to vector<4x512xbf16>
    %c1_129 = arith.constant 1 : index
    %c0_130 = arith.constant 0 : index
    %c0_131 = arith.constant 0 : index
    %126 = vector.load %arg2[%c1_129, %c0_130, %c0_131] : memref<4x512x128xbf16, #tpu.memory_space<vmem>>, vector<1x512x128xbf16>
    %127 = vector.shape_cast %126 : vector<1x512x128xbf16> to vector<512x128xbf16>
    %cst_132 = arith.constant dense<0.000000e+00> : vector<4x128xf32>
    %128 = tpu.matmul %125, %127, %cst_132 {dimension_numbers = #tpu.dot_dimension_numbers<[1], [0], [0], [1], [0, 0, 1, 1], [], []>} : vector<4x512xbf16>, vector<512x128xbf16>, vector<4x128xf32> -> vector<4x128xf32>
    %129 = arith.addf %123, %128 : vector<4x128xf32>
    %c0_133 = arith.constant 0 : index
    %c4 = arith.constant 4 : index
    %c0_134 = arith.constant 0 : index
    %c0_135 = arith.constant 0 : index
    %130 = vector.load %arg1[%c0_133, %c4, %c0_134, %c0_135] : memref<1x5x5x512xbf16, #tpu.memory_space<vmem>>, vector<1x1x4x512xbf16>
    %131 = vector.shape_cast %130 : vector<1x1x4x512xbf16> to vector<4x512xbf16>
    %c2_136 = arith.constant 2 : index
    %c0_137 = arith.constant 0 : index
    %c0_138 = arith.constant 0 : index
    %132 = vector.load %arg2[%c2_136, %c0_137, %c0_138] : memref<4x512x128xbf16, #tpu.memory_space<vmem>>, vector<1x512x128xbf16>
    %133 = vector.shape_cast %132 : vector<1x512x128xbf16> to vector<512x128xbf16>
    %cst_139 = arith.constant dense<0.000000e+00> : vector<4x128xf32>
    %134 = tpu.matmul %131, %133, %cst_139 {dimension_numbers = #tpu.dot_dimension_numbers<[1], [0], [0], [1], [0, 0, 1, 1], [], []>} : vector<4x512xbf16>, vector<512x128xbf16>, vector<4x128xf32> -> vector<4x128xf32>
    %135 = arith.addf %129, %134 : vector<4x128xf32>
    %c0_140 = arith.constant 0 : index
    %c4_141 = arith.constant 4 : index
    %c1_142 = arith.constant 1 : index
    %c0_143 = arith.constant 0 : index
    %136 = vector.load %arg1[%c0_140, %c4_141, %c1_142, %c0_143] : memref<1x5x5x512xbf16, #tpu.memory_space<vmem>>, vector<1x1x4x512xbf16>
    %137 = vector.shape_cast %136 : vector<1x1x4x512xbf16> to vector<4x512xbf16>
    %c3_144 = arith.constant 3 : index
    %c0_145 = arith.constant 0 : index
    %c0_146 = arith.constant 0 : index
    %138 = vector.load %arg2[%c3_144, %c0_145, %c0_146] : memref<4x512x128xbf16, #tpu.memory_space<vmem>>, vector<1x512x128xbf16>
    %139 = vector.shape_cast %138 : vector<1x512x128xbf16> to vector<512x128xbf16>
    %cst_147 = arith.constant dense<0.000000e+00> : vector<4x128xf32>
    %140 = tpu.matmul %137, %139, %cst_147 {dimension_numbers = #tpu.dot_dimension_numbers<[1], [0], [0], [1], [0, 0, 1, 1], [], []>} : vector<4x512xbf16>, vector<512x128xbf16>, vector<4x128xf32> -> vector<4x128xf32>
    %141 = arith.addf %135, %140 : vector<4x128xf32>
    %142 = vector.broadcast %0 : vector<1x128xf32> to vector<4x128xf32>
    %143 = arith.addf %141, %142 : vector<4x128xf32>
    %cst_148 = arith.constant dense<0.000000e+00> : vector<128xf32>
    %144 = vector.multi_reduction <add>, %143, %cst_148 [0] : vector<4x128xf32> to vector<128xf32>
    %145 = vector.shape_cast %144 : vector<128xf32> to vector<1x128xf32>
    %146 = arith.addf %108, %145 : vector<1x128xf32>
    %147 = arith.mulf %143, %143 : vector<4x128xf32>
    %cst_149 = arith.constant dense<0.000000e+00> : vector<128xf32>
    %148 = vector.multi_reduction <add>, %147, %cst_149 [0] : vector<4x128xf32> to vector<128xf32>
    %149 = vector.shape_cast %148 : vector<128xf32> to vector<1x128xf32>
    %150 = arith.addf %112, %149 : vector<1x128xf32>
    %151 = arith.truncf %143 : vector<4x128xf32> to vector<4x128xbf16>
    %c0_150 = arith.constant 0 : index
    %c3_151 = arith.constant 3 : index
    %c0_152 = arith.constant 0 : index
    %c0_153 = arith.constant 0 : index
    %152 = vector.load %arg4[%c0_150, %c3_151, %c0_152, %c0_153] : memref<1x4x4x128xbf16, #tpu.memory_space<vmem>>, vector<1x1x4x128xbf16>
    %153 = vector.shape_cast %152 : vector<1x1x4x128xbf16> to vector<4x128xbf16>
    %154 = vector.shape_cast %151 : vector<4x128xbf16> to vector<1x1x4x128xbf16>
    tpu.vector_store %arg4[%c0_150, %c3_151, %c0_152, %c0_153], %154 {strides = array<i32>} : memref<1x4x4x128xbf16, #tpu.memory_space<vmem>>, vector<1x1x4x128xbf16>,
    %c0_154 = arith.constant 0 : index
    %c0_155 = arith.constant 0 : index
    %c0_156 = arith.constant 0 : index
    %155 = vector.load %arg5[%c0_154, %c0_155, %c0_156] : memref<1x1x128xf32, #tpu.memory_space<vmem>>, vector<1x1x128xf32>
    %156 = vector.shape_cast %155 : vector<1x1x128xf32> to vector<1x128xf32>
    %157 = vector.shape_cast %146 : vector<1x128xf32> to vector<1x1x128xf32>
    tpu.vector_store %arg5[%c0_154, %c0_155, %c0_156], %157 {strides = array<i32>} : memref<1x1x128xf32, #tpu.memory_space<vmem>>, vector<1x1x128xf32>,
    %c0_157 = arith.constant 0 : index
    %c0_158 = arith.constant 0 : index
    %c0_159 = arith.constant 0 : index
    %158 = vector.load %arg6[%c0_157, %c0_158, %c0_159] : memref<1x1x128xf32, #tpu.memory_space<vmem>>, vector<1x1x128xf32>
    %159 = vector.shape_cast %158 : vector<1x1x128xf32> to vector<1x128xf32>
    %160 = vector.shape_cast %150 : vector<1x128xf32> to vector<1x1x128xf32>
    tpu.vector_store %arg6[%c0_157, %c0_158, %c0_159], %160 {strides = array<i32>} : memref<1x1x128xf32, #tpu.memory_space<vmem>>, vector<1x1x128xf32>,
    return
  }
  func.func @transform_0(%arg0: i32) -> (i32, i32, i32, i32) {
    %c0_i32 = arith.constant 0 : i32
    %c0_i32_0 = arith.constant 0 : i32
    %c0_i32_1 = arith.constant 0 : i32
    %c0_i32_2 = arith.constant 0 : i32
    return %arg0, %c0_i32, %c0_i32_0, %c0_i32_1 : i32, i32, i32, i32
  }
  func.func @transform_1(%arg0: i32) -> (i32, i32, i32) {
    %c0_i32 = arith.constant 0 : i32
    %c0_i32_0 = arith.constant 0 : i32
    %c0_i32_1 = arith.constant 0 : i32
    %c0_i32_2 = arith.constant 0 : i32
    return %c0_i32, %c0_i32_0, %c0_i32_1 : i32, i32, i32
  }
  func.func @transform_2(%arg0: i32) -> (i32, i32) {
    %c0_i32 = arith.constant 0 : i32
    %c0_i32_0 = arith.constant 0 : i32
    %c0_i32_1 = arith.constant 0 : i32
    return %c0_i32, %c0_i32_0 : i32, i32
  }
  func.func @transform_3(%arg0: i32) -> (i32, i32, i32, i32) {
    %c0_i32 = arith.constant 0 : i32
    %c0_i32_0 = arith.constant 0 : i32
    %c0_i32_1 = arith.constant 0 : i32
    %c0_i32_2 = arith.constant 0 : i32
    return %arg0, %c0_i32, %c0_i32_0, %c0_i32_1 : i32, i32, i32, i32
  }
  func.func @transform_4(%arg0: i32) -> (i32, i32, i32) {
    %c0_i32 = arith.constant 0 : i32
    %c0_i32_0 = arith.constant 0 : i32
    %c0_i32_1 = arith.constant 0 : i32
    return %arg0, %c0_i32, %c0_i32_0 : i32, i32, i32
  }
  func.func @transform_5(%arg0: i32) -> (i32, i32, i32) {
    %c0_i32 = arith.constant 0 : i32
    %c0_i32_0 = arith.constant 0 : i32
    %c0_i32_1 = arith.constant 0 : i32
    return %arg0, %c0_i32, %c0_i32_0 : i32, i32, i32
  }
}

module attributes {stable_mosaic.version = 11 : i64} {
  func.func @_conv_tap_kernel(%arg0: i32, %arg1: memref<1x3x3x512xbf16, #tpu.memory_space<vmem>>, %arg2: memref<4x512x128xbf16, #tpu.memory_space<vmem>>, %arg3: memref<1x128xf32, #tpu.memory_space<vmem>>, %arg4: memref<1x2x2x128xbf16, #tpu.memory_space<vmem>>, %arg5: memref<1x1x128xf32, #tpu.memory_space<vmem>>, %arg6: memref<1x1x128xf32, #tpu.memory_space<vmem>>) attributes {dimension_semantics = [#tpu.dimension_semantics<parallel>], iteration_bounds = array<i64: 2>, scalar_prefetch = 0 : i64, scratch_operands = 0 : i64, tpu.core_type = #tpu.core_type<tc>, window_params = [{transform_indices = @transform_0, window_bounds = array<i64: 1, 3, 3, 512>}, {pipeline_mode = #tpu.pipeline_mode<synchronous>, transform_indices = @transform_1, window_bounds = array<i64: 4, 512, 128>}, {pipeline_mode = #tpu.pipeline_mode<synchronous>, transform_indices = @transform_2, window_bounds = array<i64: 1, 128>}, {transform_indices = @transform_3, window_bounds = array<i64: 1, 2, 2, 128>}, {transform_indices = @transform_4, window_bounds = array<i64: 1, 1, 128>}, {transform_indices = @transform_5, window_bounds = array<i64: 1, 1, 128>}]} {
    %c0 = arith.constant 0 : index
    %c0_0 = arith.constant 0 : index
    %0 = vector.load %arg3[%c0, %c0_0] : memref<1x128xf32, #tpu.memory_space<vmem>>, vector<1x128xf32>
    %cst = arith.constant 0.000000e+00 : f32
    %1 = vector.broadcast %cst : f32 to vector<1x128xf32>
    %cst_1 = arith.constant 0.000000e+00 : f32
    %2 = vector.broadcast %cst_1 : f32 to vector<1x128xf32>
    %cst_2 = arith.constant 0.000000e+00 : f32
    %3 = vector.broadcast %cst_2 : f32 to vector<2x128xf32>
    %c0_3 = arith.constant 0 : index
    %c0_4 = arith.constant 0 : index
    %c0_5 = arith.constant 0 : index
    %c0_6 = arith.constant 0 : index
    %4 = vector.load %arg1[%c0_3, %c0_4, %c0_5, %c0_6] : memref<1x3x3x512xbf16, #tpu.memory_space<vmem>>, vector<1x1x2x512xbf16>
    %5 = vector.shape_cast %4 : vector<1x1x2x512xbf16> to vector<2x512xbf16>
    %c0_7 = arith.constant 0 : index
    %c0_8 = arith.constant 0 : index
    %c0_9 = arith.constant 0 : index
    %6 = vector.load %arg2[%c0_7, %c0_8, %c0_9] : memref<4x512x128xbf16, #tpu.memory_space<vmem>>, vector<1x512x128xbf16>
    %7 = vector.shape_cast %6 : vector<1x512x128xbf16> to vector<512x128xbf16>
    %cst_10 = arith.constant dense<0.000000e+00> : vector<2x128xf32>
    %8 = tpu.matmul %5, %7, %cst_10 {dimension_numbers = #tpu.dot_dimension_numbers<[1], [0], [0], [1], [0, 0, 1, 1], [], []>} : vector<2x512xbf16>, vector<512x128xbf16>, vector<2x128xf32> -> vector<2x128xf32>
    %9 = arith.addf %3, %8 : vector<2x128xf32>
    %c0_11 = arith.constant 0 : index
    %c0_12 = arith.constant 0 : index
    %c1 = arith.constant 1 : index
    %c0_13 = arith.constant 0 : index
    %10 = vector.load %arg1[%c0_11, %c0_12, %c1, %c0_13] : memref<1x3x3x512xbf16, #tpu.memory_space<vmem>>, vector<1x1x2x512xbf16>
    %11 = vector.shape_cast %10 : vector<1x1x2x512xbf16> to vector<2x512xbf16>
    %c1_14 = arith.constant 1 : index
    %c0_15 = arith.constant 0 : index
    %c0_16 = arith.constant 0 : index
    %12 = vector.load %arg2[%c1_14, %c0_15, %c0_16] : memref<4x512x128xbf16, #tpu.memory_space<vmem>>, vector<1x512x128xbf16>
    %13 = vector.shape_cast %12 : vector<1x512x128xbf16> to vector<512x128xbf16>
    %cst_17 = arith.constant dense<0.000000e+00> : vector<2x128xf32>
    %14 = tpu.matmul %11, %13, %cst_17 {dimension_numbers = #tpu.dot_dimension_numbers<[1], [0], [0], [1], [0, 0, 1, 1], [], []>} : vector<2x512xbf16>, vector<512x128xbf16>, vector<2x128xf32> -> vector<2x128xf32>
    %15 = arith.addf %9, %14 : vector<2x128xf32>
    %c0_18 = arith.constant 0 : index
    %c1_19 = arith.constant 1 : index
    %c0_20 = arith.constant 0 : index
    %c0_21 = arith.constant 0 : index
    %16 = vector.load %arg1[%c0_18, %c1_19, %c0_20, %c0_21] : memref<1x3x3x512xbf16, #tpu.memory_space<vmem>>, vector<1x1x2x512xbf16>
    %17 = vector.shape_cast %16 : vector<1x1x2x512xbf16> to vector<2x512xbf16>
    %c2 = arith.constant 2 : index
    %c0_22 = arith.constant 0 : index
    %c0_23 = arith.constant 0 : index
    %18 = vector.load %arg2[%c2, %c0_22, %c0_23] : memref<4x512x128xbf16, #tpu.memory_space<vmem>>, vector<1x512x128xbf16>
    %19 = vector.shape_cast %18 : vector<1x512x128xbf16> to vector<512x128xbf16>
    %cst_24 = arith.constant dense<0.000000e+00> : vector<2x128xf32>
    %20 = tpu.matmul %17, %19, %cst_24 {dimension_numbers = #tpu.dot_dimension_numbers<[1], [0], [0], [1], [0, 0, 1, 1], [], []>} : vector<2x512xbf16>, vector<512x128xbf16>, vector<2x128xf32> -> vector<2x128xf32>
    %21 = arith.addf %15, %20 : vector<2x128xf32>
    %c0_25 = arith.constant 0 : index
    %c1_26 = arith.constant 1 : index
    %c1_27 = arith.constant 1 : index
    %c0_28 = arith.constant 0 : index
    %22 = vector.load %arg1[%c0_25, %c1_26, %c1_27, %c0_28] : memref<1x3x3x512xbf16, #tpu.memory_space<vmem>>, vector<1x1x2x512xbf16>
    %23 = vector.shape_cast %22 : vector<1x1x2x512xbf16> to vector<2x512xbf16>
    %c3 = arith.constant 3 : index
    %c0_29 = arith.constant 0 : index
    %c0_30 = arith.constant 0 : index
    %24 = vector.load %arg2[%c3, %c0_29, %c0_30] : memref<4x512x128xbf16, #tpu.memory_space<vmem>>, vector<1x512x128xbf16>
    %25 = vector.shape_cast %24 : vector<1x512x128xbf16> to vector<512x128xbf16>
    %cst_31 = arith.constant dense<0.000000e+00> : vector<2x128xf32>
    %26 = tpu.matmul %23, %25, %cst_31 {dimension_numbers = #tpu.dot_dimension_numbers<[1], [0], [0], [1], [0, 0, 1, 1], [], []>} : vector<2x512xbf16>, vector<512x128xbf16>, vector<2x128xf32> -> vector<2x128xf32>
    %27 = arith.addf %21, %26 : vector<2x128xf32>
    %28 = vector.broadcast %0 : vector<1x128xf32> to vector<2x128xf32>
    %29 = arith.addf %27, %28 : vector<2x128xf32>
    %cst_32 = arith.constant dense<0.000000e+00> : vector<128xf32>
    %30 = vector.multi_reduction <add>, %29, %cst_32 [0] : vector<2x128xf32> to vector<128xf32>
    %31 = vector.shape_cast %30 : vector<128xf32> to vector<1x128xf32>
    %32 = arith.addf %1, %31 : vector<1x128xf32>
    %33 = arith.mulf %29, %29 : vector<2x128xf32>
    %cst_33 = arith.constant dense<0.000000e+00> : vector<128xf32>
    %34 = vector.multi_reduction <add>, %33, %cst_33 [0] : vector<2x128xf32> to vector<128xf32>
    %35 = vector.shape_cast %34 : vector<128xf32> to vector<1x128xf32>
    %36 = arith.addf %2, %35 : vector<1x128xf32>
    %37 = arith.truncf %29 : vector<2x128xf32> to vector<2x128xbf16>
    %c0_34 = arith.constant 0 : index
    %c0_35 = arith.constant 0 : index
    %c0_36 = arith.constant 0 : index
    %c0_37 = arith.constant 0 : index
    %38 = vector.load %arg4[%c0_34, %c0_35, %c0_36, %c0_37] : memref<1x2x2x128xbf16, #tpu.memory_space<vmem>>, vector<1x1x2x128xbf16>
    %39 = vector.shape_cast %38 : vector<1x1x2x128xbf16> to vector<2x128xbf16>
    %40 = vector.shape_cast %37 : vector<2x128xbf16> to vector<1x1x2x128xbf16>
    tpu.vector_store %arg4[%c0_34, %c0_35, %c0_36, %c0_37], %40 {strides = array<i32>} : memref<1x2x2x128xbf16, #tpu.memory_space<vmem>>, vector<1x1x2x128xbf16>,
    %cst_38 = arith.constant 0.000000e+00 : f32
    %41 = vector.broadcast %cst_38 : f32 to vector<2x128xf32>
    %c0_39 = arith.constant 0 : index
    %c1_40 = arith.constant 1 : index
    %c0_41 = arith.constant 0 : index
    %c0_42 = arith.constant 0 : index
    %42 = vector.load %arg1[%c0_39, %c1_40, %c0_41, %c0_42] : memref<1x3x3x512xbf16, #tpu.memory_space<vmem>>, vector<1x1x2x512xbf16>
    %43 = vector.shape_cast %42 : vector<1x1x2x512xbf16> to vector<2x512xbf16>
    %c0_43 = arith.constant 0 : index
    %c0_44 = arith.constant 0 : index
    %c0_45 = arith.constant 0 : index
    %44 = vector.load %arg2[%c0_43, %c0_44, %c0_45] : memref<4x512x128xbf16, #tpu.memory_space<vmem>>, vector<1x512x128xbf16>
    %45 = vector.shape_cast %44 : vector<1x512x128xbf16> to vector<512x128xbf16>
    %cst_46 = arith.constant dense<0.000000e+00> : vector<2x128xf32>
    %46 = tpu.matmul %43, %45, %cst_46 {dimension_numbers = #tpu.dot_dimension_numbers<[1], [0], [0], [1], [0, 0, 1, 1], [], []>} : vector<2x512xbf16>, vector<512x128xbf16>, vector<2x128xf32> -> vector<2x128xf32>
    %47 = arith.addf %41, %46 : vector<2x128xf32>
    %c0_47 = arith.constant 0 : index
    %c1_48 = arith.constant 1 : index
    %c1_49 = arith.constant 1 : index
    %c0_50 = arith.constant 0 : index
    %48 = vector.load %arg1[%c0_47, %c1_48, %c1_49, %c0_50] : memref<1x3x3x512xbf16, #tpu.memory_space<vmem>>, vector<1x1x2x512xbf16>
    %49 = vector.shape_cast %48 : vector<1x1x2x512xbf16> to vector<2x512xbf16>
    %c1_51 = arith.constant 1 : index
    %c0_52 = arith.constant 0 : index
    %c0_53 = arith.constant 0 : index
    %50 = vector.load %arg2[%c1_51, %c0_52, %c0_53] : memref<4x512x128xbf16, #tpu.memory_space<vmem>>, vector<1x512x128xbf16>
    %51 = vector.shape_cast %50 : vector<1x512x128xbf16> to vector<512x128xbf16>
    %cst_54 = arith.constant dense<0.000000e+00> : vector<2x128xf32>
    %52 = tpu.matmul %49, %51, %cst_54 {dimension_numbers = #tpu.dot_dimension_numbers<[1], [0], [0], [1], [0, 0, 1, 1], [], []>} : vector<2x512xbf16>, vector<512x128xbf16>, vector<2x128xf32> -> vector<2x128xf32>
    %53 = arith.addf %47, %52 : vector<2x128xf32>
    %c0_55 = arith.constant 0 : index
    %c2_56 = arith.constant 2 : index
    %c0_57 = arith.constant 0 : index
    %c0_58 = arith.constant 0 : index
    %54 = vector.load %arg1[%c0_55, %c2_56, %c0_57, %c0_58] : memref<1x3x3x512xbf16, #tpu.memory_space<vmem>>, vector<1x1x2x512xbf16>
    %55 = vector.shape_cast %54 : vector<1x1x2x512xbf16> to vector<2x512xbf16>
    %c2_59 = arith.constant 2 : index
    %c0_60 = arith.constant 0 : index
    %c0_61 = arith.constant 0 : index
    %56 = vector.load %arg2[%c2_59, %c0_60, %c0_61] : memref<4x512x128xbf16, #tpu.memory_space<vmem>>, vector<1x512x128xbf16>
    %57 = vector.shape_cast %56 : vector<1x512x128xbf16> to vector<512x128xbf16>
    %cst_62 = arith.constant dense<0.000000e+00> : vector<2x128xf32>
    %58 = tpu.matmul %55, %57, %cst_62 {dimension_numbers = #tpu.dot_dimension_numbers<[1], [0], [0], [1], [0, 0, 1, 1], [], []>} : vector<2x512xbf16>, vector<512x128xbf16>, vector<2x128xf32> -> vector<2x128xf32>
    %59 = arith.addf %53, %58 : vector<2x128xf32>
    %c0_63 = arith.constant 0 : index
    %c2_64 = arith.constant 2 : index
    %c1_65 = arith.constant 1 : index
    %c0_66 = arith.constant 0 : index
    %60 = vector.load %arg1[%c0_63, %c2_64, %c1_65, %c0_66] : memref<1x3x3x512xbf16, #tpu.memory_space<vmem>>, vector<1x1x2x512xbf16>
    %61 = vector.shape_cast %60 : vector<1x1x2x512xbf16> to vector<2x512xbf16>
    %c3_67 = arith.constant 3 : index
    %c0_68 = arith.constant 0 : index
    %c0_69 = arith.constant 0 : index
    %62 = vector.load %arg2[%c3_67, %c0_68, %c0_69] : memref<4x512x128xbf16, #tpu.memory_space<vmem>>, vector<1x512x128xbf16>
    %63 = vector.shape_cast %62 : vector<1x512x128xbf16> to vector<512x128xbf16>
    %cst_70 = arith.constant dense<0.000000e+00> : vector<2x128xf32>
    %64 = tpu.matmul %61, %63, %cst_70 {dimension_numbers = #tpu.dot_dimension_numbers<[1], [0], [0], [1], [0, 0, 1, 1], [], []>} : vector<2x512xbf16>, vector<512x128xbf16>, vector<2x128xf32> -> vector<2x128xf32>
    %65 = arith.addf %59, %64 : vector<2x128xf32>
    %66 = vector.broadcast %0 : vector<1x128xf32> to vector<2x128xf32>
    %67 = arith.addf %65, %66 : vector<2x128xf32>
    %cst_71 = arith.constant dense<0.000000e+00> : vector<128xf32>
    %68 = vector.multi_reduction <add>, %67, %cst_71 [0] : vector<2x128xf32> to vector<128xf32>
    %69 = vector.shape_cast %68 : vector<128xf32> to vector<1x128xf32>
    %70 = arith.addf %32, %69 : vector<1x128xf32>
    %71 = arith.mulf %67, %67 : vector<2x128xf32>
    %cst_72 = arith.constant dense<0.000000e+00> : vector<128xf32>
    %72 = vector.multi_reduction <add>, %71, %cst_72 [0] : vector<2x128xf32> to vector<128xf32>
    %73 = vector.shape_cast %72 : vector<128xf32> to vector<1x128xf32>
    %74 = arith.addf %36, %73 : vector<1x128xf32>
    %75 = arith.truncf %67 : vector<2x128xf32> to vector<2x128xbf16>
    %c0_73 = arith.constant 0 : index
    %c1_74 = arith.constant 1 : index
    %c0_75 = arith.constant 0 : index
    %c0_76 = arith.constant 0 : index
    %76 = vector.load %arg4[%c0_73, %c1_74, %c0_75, %c0_76] : memref<1x2x2x128xbf16, #tpu.memory_space<vmem>>, vector<1x1x2x128xbf16>
    %77 = vector.shape_cast %76 : vector<1x1x2x128xbf16> to vector<2x128xbf16>
    %78 = vector.shape_cast %75 : vector<2x128xbf16> to vector<1x1x2x128xbf16>
    tpu.vector_store %arg4[%c0_73, %c1_74, %c0_75, %c0_76], %78 {strides = array<i32>} : memref<1x2x2x128xbf16, #tpu.memory_space<vmem>>, vector<1x1x2x128xbf16>,
    %c0_77 = arith.constant 0 : index
    %c0_78 = arith.constant 0 : index
    %c0_79 = arith.constant 0 : index
    %79 = vector.load %arg5[%c0_77, %c0_78, %c0_79] : memref<1x1x128xf32, #tpu.memory_space<vmem>>, vector<1x1x128xf32>
    %80 = vector.shape_cast %79 : vector<1x1x128xf32> to vector<1x128xf32>
    %81 = vector.shape_cast %70 : vector<1x128xf32> to vector<1x1x128xf32>
    tpu.vector_store %arg5[%c0_77, %c0_78, %c0_79], %81 {strides = array<i32>} : memref<1x1x128xf32, #tpu.memory_space<vmem>>, vector<1x1x128xf32>,
    %c0_80 = arith.constant 0 : index
    %c0_81 = arith.constant 0 : index
    %c0_82 = arith.constant 0 : index
    %82 = vector.load %arg6[%c0_80, %c0_81, %c0_82] : memref<1x1x128xf32, #tpu.memory_space<vmem>>, vector<1x1x128xf32>
    %83 = vector.shape_cast %82 : vector<1x1x128xf32> to vector<1x128xf32>
    %84 = vector.shape_cast %74 : vector<1x128xf32> to vector<1x1x128xf32>
    tpu.vector_store %arg6[%c0_80, %c0_81, %c0_82], %84 {strides = array<i32>} : memref<1x1x128xf32, #tpu.memory_space<vmem>>, vector<1x1x128xf32>,
    return
  }
  func.func @transform_0(%arg0: i32) -> (i32, i32, i32, i32) {
    %c0_i32 = arith.constant 0 : i32
    %c0_i32_0 = arith.constant 0 : i32
    %c0_i32_1 = arith.constant 0 : i32
    %c0_i32_2 = arith.constant 0 : i32
    return %arg0, %c0_i32, %c0_i32_0, %c0_i32_1 : i32, i32, i32, i32
  }
  func.func @transform_1(%arg0: i32) -> (i32, i32, i32) {
    %c0_i32 = arith.constant 0 : i32
    %c0_i32_0 = arith.constant 0 : i32
    %c0_i32_1 = arith.constant 0 : i32
    %c0_i32_2 = arith.constant 0 : i32
    return %c0_i32, %c0_i32_0, %c0_i32_1 : i32, i32, i32
  }
  func.func @transform_2(%arg0: i32) -> (i32, i32) {
    %c0_i32 = arith.constant 0 : i32
    %c0_i32_0 = arith.constant 0 : i32
    %c0_i32_1 = arith.constant 0 : i32
    return %c0_i32, %c0_i32_0 : i32, i32
  }
  func.func @transform_3(%arg0: i32) -> (i32, i32, i32, i32) {
    %c0_i32 = arith.constant 0 : i32
    %c0_i32_0 = arith.constant 0 : i32
    %c0_i32_1 = arith.constant 0 : i32
    %c0_i32_2 = arith.constant 0 : i32
    return %arg0, %c0_i32, %c0_i32_0, %c0_i32_1 : i32, i32, i32, i32
  }
  func.func @transform_4(%arg0: i32) -> (i32, i32, i32) {
    %c0_i32 = arith.constant 0 : i32
    %c0_i32_0 = arith.constant 0 : i32
    %c0_i32_1 = arith.constant 0 : i32
    return %arg0, %c0_i32, %c0_i32_0 : i32, i32, i32
  }
  func.func @transform_5(%arg0: i32) -> (i32, i32, i32) {
    %c0_i32 = arith.constant 0 : i32
    %c0_i32_0 = arith.constant 0 : i32
    %c0_i32_1 = arith.constant 0 : i32
    return %arg0, %c0_i32, %c0_i32_0 : i32, i32, i32
  }
}

module attributes {stable_mosaic.version = 11 : i64} {
  func.func @_bn_act_kernel(%arg0: i32, %arg1: memref<8x128xbf16, #tpu.memory_space<vmem>>, %arg2: memref<1x128xf32, #tpu.memory_space<vmem>>, %arg3: memref<1x128xf32, #tpu.memory_space<vmem>>, %arg4: memref<8x128xbf16, #tpu.memory_space<vmem>>) attributes {dimension_semantics = [#tpu.dimension_semantics<parallel>], iteration_bounds = array<i64: 1>, scalar_prefetch = 0 : i64, scratch_operands = 0 : i64, tpu.core_type = #tpu.core_type<tc>, window_params = [{transform_indices = @transform_0, window_bounds = array<i64: 8, 128>}, {pipeline_mode = #tpu.pipeline_mode<synchronous>, transform_indices = @transform_1, window_bounds = array<i64: 1, 128>}, {pipeline_mode = #tpu.pipeline_mode<synchronous>, transform_indices = @transform_2, window_bounds = array<i64: 1, 128>}, {transform_indices = @transform_3, window_bounds = array<i64: 8, 128>}]} {
    %c0 = arith.constant 0 : index
    %c0_0 = arith.constant 0 : index
    %0 = vector.load %arg1[%c0, %c0_0] : memref<8x128xbf16, #tpu.memory_space<vmem>>, vector<8x128xbf16>
    %1 = arith.extf %0 : vector<8x128xbf16> to vector<8x128xf32>
    %c0_1 = arith.constant 0 : index
    %c0_2 = arith.constant 0 : index
    %2 = vector.load %arg2[%c0_1, %c0_2] : memref<1x128xf32, #tpu.memory_space<vmem>>, vector<1x128xf32>
    %3 = vector.broadcast %2 : vector<1x128xf32> to vector<8x128xf32>
    %4 = arith.mulf %1, %3 : vector<8x128xf32>
    %c0_3 = arith.constant 0 : index
    %c0_4 = arith.constant 0 : index
    %5 = vector.load %arg3[%c0_3, %c0_4] : memref<1x128xf32, #tpu.memory_space<vmem>>, vector<1x128xf32>
    %6 = vector.broadcast %5 : vector<1x128xf32> to vector<8x128xf32>
    %7 = arith.addf %4, %6 : vector<8x128xf32>
    %cst = arith.constant 0.000000e+00 : f32
    %8 = vector.broadcast %cst : f32 to vector<8x128xf32>
    %9 = arith.cmpf oge, %7, %8 : vector<8x128xf32>
    %cst_5 = arith.constant 2.000000e-01 : f32
    %10 = vector.broadcast %cst_5 : f32 to vector<8x128xf32>
    %11 = arith.mulf %10, %7 : vector<8x128xf32>
    %12 = arith.select %9, %7, %11 : vector<8x128xi1>, vector<8x128xf32>
    %13 = arith.truncf %12 : vector<8x128xf32> to vector<8x128xbf16>
    %c0_6 = arith.constant 0 : index
    %c0_7 = arith.constant 0 : index
    %14 = vector.load %arg4[%c0_6, %c0_7] : memref<8x128xbf16, #tpu.memory_space<vmem>>, vector<8x128xbf16>
    tpu.vector_store %arg4[%c0_6, %c0_7], %13 {strides = array<i32>} : memref<8x128xbf16, #tpu.memory_space<vmem>>, vector<8x128xbf16>,
    return
  }
  func.func @transform_0(%arg0: i32) -> (i32, i32) {
    %c0_i32 = arith.constant 0 : i32
    %c0_i32_0 = arith.constant 0 : i32
    return %arg0, %c0_i32 : i32, i32
  }
  func.func @transform_1(%arg0: i32) -> (i32, i32) {
    %c0_i32 = arith.constant 0 : i32
    %c0_i32_0 = arith.constant 0 : i32
    %c0_i32_1 = arith.constant 0 : i32
    return %c0_i32, %c0_i32_0 : i32, i32
  }
  func.func @transform_2(%arg0: i32) -> (i32, i32) {
    %c0_i32 = arith.constant 0 : i32
    %c0_i32_0 = arith.constant 0 : i32
    %c0_i32_1 = arith.constant 0 : i32
    return %c0_i32, %c0_i32_0 : i32, i32
  }
  func.func @transform_3(%arg0: i32) -> (i32, i32) {
    %c0_i32 = arith.constant 0 : i32
    %c0_i32_0 = arith.constant 0 : i32
    return %arg0, %c0_i32 : i32, i32
  }
}

module attributes {stable_mosaic.version = 11 : i64} {
  func.func @_conv_tap_kernel(%arg0: i32, %arg1: memref<1x2x2x512xbf16, #tpu.memory_space<vmem>>, %arg2: memref<4x512x128xbf16, #tpu.memory_space<vmem>>, %arg3: memref<1x128xf32, #tpu.memory_space<vmem>>, %arg4: memref<1x1x1x128xf32, #tpu.memory_space<vmem>>) attributes {dimension_semantics = [#tpu.dimension_semantics<parallel>], iteration_bounds = array<i64: 2>, scalar_prefetch = 0 : i64, scratch_operands = 0 : i64, tpu.core_type = #tpu.core_type<tc>, window_params = [{transform_indices = @transform_0, window_bounds = array<i64: 1, 2, 2, 512>}, {pipeline_mode = #tpu.pipeline_mode<synchronous>, transform_indices = @transform_1, window_bounds = array<i64: 4, 512, 128>}, {pipeline_mode = #tpu.pipeline_mode<synchronous>, transform_indices = @transform_2, window_bounds = array<i64: 1, 128>}, {transform_indices = @transform_3, window_bounds = array<i64: 1, 1, 1, 128>}]} {
    %c0 = arith.constant 0 : index
    %c0_0 = arith.constant 0 : index
    %0 = vector.load %arg3[%c0, %c0_0] : memref<1x128xf32, #tpu.memory_space<vmem>>, vector<1x128xf32>
    %cst = arith.constant 0.000000e+00 : f32
    %1 = vector.broadcast %cst : f32 to vector<1x128xf32>
    %c0_1 = arith.constant 0 : index
    %c0_2 = arith.constant 0 : index
    %c0_3 = arith.constant 0 : index
    %c0_4 = arith.constant 0 : index
    %2 = vector.load %arg1[%c0_1, %c0_2, %c0_3, %c0_4] : memref<1x2x2x512xbf16, #tpu.memory_space<vmem>>, vector<1x1x1x512xbf16>
    %3 = vector.shape_cast %2 : vector<1x1x1x512xbf16> to vector<1x512xbf16>
    %c0_5 = arith.constant 0 : index
    %c0_6 = arith.constant 0 : index
    %c0_7 = arith.constant 0 : index
    %4 = vector.load %arg2[%c0_5, %c0_6, %c0_7] : memref<4x512x128xbf16, #tpu.memory_space<vmem>>, vector<1x512x128xbf16>
    %5 = vector.shape_cast %4 : vector<1x512x128xbf16> to vector<512x128xbf16>
    %cst_8 = arith.constant dense<0.000000e+00> : vector<1x128xf32>
    %6 = tpu.matmul %3, %5, %cst_8 {dimension_numbers = #tpu.dot_dimension_numbers<[1], [0], [0], [1], [0, 0, 1, 1], [], []>} : vector<1x512xbf16>, vector<512x128xbf16>, vector<1x128xf32> -> vector<1x128xf32>
    %7 = arith.addf %1, %6 : vector<1x128xf32>
    %c0_9 = arith.constant 0 : index
    %c0_10 = arith.constant 0 : index
    %c1 = arith.constant 1 : index
    %c0_11 = arith.constant 0 : index
    %8 = vector.load %arg1[%c0_9, %c0_10, %c1, %c0_11] : memref<1x2x2x512xbf16, #tpu.memory_space<vmem>>, vector<1x1x1x512xbf16>
    %9 = vector.shape_cast %8 : vector<1x1x1x512xbf16> to vector<1x512xbf16>
    %c1_12 = arith.constant 1 : index
    %c0_13 = arith.constant 0 : index
    %c0_14 = arith.constant 0 : index
    %10 = vector.load %arg2[%c1_12, %c0_13, %c0_14] : memref<4x512x128xbf16, #tpu.memory_space<vmem>>, vector<1x512x128xbf16>
    %11 = vector.shape_cast %10 : vector<1x512x128xbf16> to vector<512x128xbf16>
    %cst_15 = arith.constant dense<0.000000e+00> : vector<1x128xf32>
    %12 = tpu.matmul %9, %11, %cst_15 {dimension_numbers = #tpu.dot_dimension_numbers<[1], [0], [0], [1], [0, 0, 1, 1], [], []>} : vector<1x512xbf16>, vector<512x128xbf16>, vector<1x128xf32> -> vector<1x128xf32>
    %13 = arith.addf %7, %12 : vector<1x128xf32>
    %c0_16 = arith.constant 0 : index
    %c1_17 = arith.constant 1 : index
    %c0_18 = arith.constant 0 : index
    %c0_19 = arith.constant 0 : index
    %14 = vector.load %arg1[%c0_16, %c1_17, %c0_18, %c0_19] : memref<1x2x2x512xbf16, #tpu.memory_space<vmem>>, vector<1x1x1x512xbf16>
    %15 = vector.shape_cast %14 : vector<1x1x1x512xbf16> to vector<1x512xbf16>
    %c2 = arith.constant 2 : index
    %c0_20 = arith.constant 0 : index
    %c0_21 = arith.constant 0 : index
    %16 = vector.load %arg2[%c2, %c0_20, %c0_21] : memref<4x512x128xbf16, #tpu.memory_space<vmem>>, vector<1x512x128xbf16>
    %17 = vector.shape_cast %16 : vector<1x512x128xbf16> to vector<512x128xbf16>
    %cst_22 = arith.constant dense<0.000000e+00> : vector<1x128xf32>
    %18 = tpu.matmul %15, %17, %cst_22 {dimension_numbers = #tpu.dot_dimension_numbers<[1], [0], [0], [1], [0, 0, 1, 1], [], []>} : vector<1x512xbf16>, vector<512x128xbf16>, vector<1x128xf32> -> vector<1x128xf32>
    %19 = arith.addf %13, %18 : vector<1x128xf32>
    %c0_23 = arith.constant 0 : index
    %c1_24 = arith.constant 1 : index
    %c1_25 = arith.constant 1 : index
    %c0_26 = arith.constant 0 : index
    %20 = vector.load %arg1[%c0_23, %c1_24, %c1_25, %c0_26] : memref<1x2x2x512xbf16, #tpu.memory_space<vmem>>, vector<1x1x1x512xbf16>
    %21 = vector.shape_cast %20 : vector<1x1x1x512xbf16> to vector<1x512xbf16>
    %c3 = arith.constant 3 : index
    %c0_27 = arith.constant 0 : index
    %c0_28 = arith.constant 0 : index
    %22 = vector.load %arg2[%c3, %c0_27, %c0_28] : memref<4x512x128xbf16, #tpu.memory_space<vmem>>, vector<1x512x128xbf16>
    %23 = vector.shape_cast %22 : vector<1x512x128xbf16> to vector<512x128xbf16>
    %cst_29 = arith.constant dense<0.000000e+00> : vector<1x128xf32>
    %24 = tpu.matmul %21, %23, %cst_29 {dimension_numbers = #tpu.dot_dimension_numbers<[1], [0], [0], [1], [0, 0, 1, 1], [], []>} : vector<1x512xbf16>, vector<512x128xbf16>, vector<1x128xf32> -> vector<1x128xf32>
    %25 = arith.addf %19, %24 : vector<1x128xf32>
    %26 = arith.addf %25, %0 : vector<1x128xf32>
    %c0_30 = arith.constant 0 : index
    %c0_31 = arith.constant 0 : index
    %c0_32 = arith.constant 0 : index
    %c0_33 = arith.constant 0 : index
    %27 = vector.load %arg4[%c0_30, %c0_31, %c0_32, %c0_33] : memref<1x1x1x128xf32, #tpu.memory_space<vmem>>, vector<1x1x1x128xf32>
    %28 = vector.shape_cast %27 : vector<1x1x1x128xf32> to vector<1x128xf32>
    %29 = vector.shape_cast %26 : vector<1x128xf32> to vector<1x1x1x128xf32>
    tpu.vector_store %arg4[%c0_30, %c0_31, %c0_32, %c0_33], %29 {strides = array<i32>} : memref<1x1x1x128xf32, #tpu.memory_space<vmem>>, vector<1x1x1x128xf32>,
    return
  }
  func.func @transform_0(%arg0: i32) -> (i32, i32, i32, i32) {
    %c0_i32 = arith.constant 0 : i32
    %c0_i32_0 = arith.constant 0 : i32
    %c0_i32_1 = arith.constant 0 : i32
    %c0_i32_2 = arith.constant 0 : i32
    return %arg0, %c0_i32, %c0_i32_0, %c0_i32_1 : i32, i32, i32, i32
  }
  func.func @transform_1(%arg0: i32) -> (i32, i32, i32) {
    %c0_i32 = arith.constant 0 : i32
    %c0_i32_0 = arith.constant 0 : i32
    %c0_i32_1 = arith.constant 0 : i32
    %c0_i32_2 = arith.constant 0 : i32
    return %c0_i32, %c0_i32_0, %c0_i32_1 : i32, i32, i32
  }
  func.func @transform_2(%arg0: i32) -> (i32, i32) {
    %c0_i32 = arith.constant 0 : i32
    %c0_i32_0 = arith.constant 0 : i32
    %c0_i32_1 = arith.constant 0 : i32
    return %c0_i32, %c0_i32_0 : i32, i32
  }
  func.func @transform_3(%arg0: i32) -> (i32, i32, i32, i32) {
    %c0_i32 = arith.constant 0 : i32
    %c0_i32_0 = arith.constant 0 : i32
    %c0_i32_1 = arith.constant 0 : i32
    %c0_i32_2 = arith.constant 0 : i32
    return %arg0, %c0_i32, %c0_i32_0, %c0_i32_1 : i32, i32, i32, i32
  }
}

module attributes {stable_mosaic.version = 11 : i64} {
  func.func @_fused_fc_kernel(%arg0: i32, %arg1: i32, %arg2: memref<2x128xbf16, #tpu.memory_space<vmem>>, %arg3: memref<128x128xbf16, #tpu.memory_space<vmem>>, %arg4: memref<1x128xf32, #tpu.memory_space<vmem>>, %arg5: memref<128x128xbf16, #tpu.memory_space<vmem>>, %arg6: memref<1x128xf32, #tpu.memory_space<vmem>>, %arg7: memref<2x128xf32, #tpu.memory_space<vmem>>, %arg8: memref<2x128xf32, #tpu.memory_space<vmem>>) attributes {dimension_semantics = [#tpu.dimension_semantics<parallel>, #tpu.dimension_semantics<arbitrary>], iteration_bounds = array<i64: 1, 1>, scalar_prefetch = 0 : i64, scratch_operands = 1 : i64, tpu.core_type = #tpu.core_type<tc>, window_params = [{transform_indices = @transform_0, window_bounds = array<i64: 2, 128>}, {transform_indices = @transform_1, window_bounds = array<i64: 128, 128>}, {pipeline_mode = #tpu.pipeline_mode<synchronous>, transform_indices = @transform_2, window_bounds = array<i64: 1, 128>}, {pipeline_mode = #tpu.pipeline_mode<synchronous>, transform_indices = @transform_3, window_bounds = array<i64: 128, 128>}, {pipeline_mode = #tpu.pipeline_mode<synchronous>, transform_indices = @transform_4, window_bounds = array<i64: 1, 128>}, {transform_indices = @transform_5, window_bounds = array<i64: 2, 128>}]} {
    %c0_i32 = arith.constant 0 : i32
    %0 = arith.cmpi eq, %arg1, %c0_i32 : i32
    %1 = arith.extui %0 : i1 to i32
    %c0_i32_0 = arith.constant 0 : i32
    %2 = arith.cmpi ne, %1, %c0_i32_0 : i32
    scf.if %2 {
      %cst_10 = arith.constant 0.000000e+00 : f32
      %12 = vector.broadcast %cst_10 : f32 to vector<2x128xf32>
      %c0_11 = arith.constant 0 : index
      %c0_12 = arith.constant 0 : index
      %13 = vector.load %arg8[%c0_11, %c0_12] : memref<2x128xf32, #tpu.memory_space<vmem>>, vector<2x128xf32>
      tpu.vector_store %arg8[%c0_11, %c0_12], %12 {strides = array<i32>} : memref<2x128xf32, #tpu.memory_space<vmem>>, vector<2x128xf32>,
    } else {
    }
    %c0 = arith.constant 0 : index
    %c0_1 = arith.constant 0 : index
    %3 = vector.load %arg8[%c0, %c0_1] : memref<2x128xf32, #tpu.memory_space<vmem>>, vector<2x128xf32>
    %c0_2 = arith.constant 0 : index
    %c0_3 = arith.constant 0 : index
    %4 = vector.load %arg2[%c0_2, %c0_3] : memref<2x128xbf16, #tpu.memory_space<vmem>>, vector<2x128xbf16>
    %c0_4 = arith.constant 0 : index
    %c0_5 = arith.constant 0 : index
    %5 = vector.load %arg3[%c0_4, %c0_5] : memref<128x128xbf16, #tpu.memory_space<vmem>>, vector<128x128xbf16>
    %cst = arith.constant dense<0.000000e+00> : vector<2x128xf32>
    %6 = tpu.matmul %4, %5, %cst {dimension_numbers = #tpu.dot_dimension_numbers<[1], [0], [0], [1], [0, 0, 1, 1], [], []>} : vector<2x128xbf16>, vector<128x128xbf16>, vector<2x128xf32> -> vector<2x128xf32>
    %7 = arith.addf %3, %6 : vector<2x128xf32>
    %c0_6 = arith.constant 0 : index
    %c0_7 = arith.constant 0 : index
    %8 = vector.load %arg8[%c0_6, %c0_7] : memref<2x128xf32, #tpu.memory_space<vmem>>, vector<2x128xf32>
    tpu.vector_store %arg8[%c0_6, %c0_7], %7 {strides = array<i32>} : memref<2x128xf32, #tpu.memory_space<vmem>>, vector<2x128xf32>,
    %c0_i32_8 = arith.constant 0 : i32
    %9 = arith.cmpi eq, %arg1, %c0_i32_8 : i32
    %10 = arith.extui %9 : i1 to i32
    %c0_i32_9 = arith.constant 0 : i32
    %11 = arith.cmpi ne, %10, %c0_i32_9 : i32
    scf.if %11 {
      %c0_10 = arith.constant 0 : index
      %c0_11 = arith.constant 0 : index
      %12 = vector.load %arg8[%c0_10, %c0_11] : memref<2x128xf32, #tpu.memory_space<vmem>>, vector<2x128xf32>
      %c0_12 = arith.constant 0 : index
      %c0_13 = arith.constant 0 : index
      %13 = vector.load %arg4[%c0_12, %c0_13] : memref<1x128xf32, #tpu.memory_space<vmem>>, vector<1x128xf32>
      %14 = vector.broadcast %13 : vector<1x128xf32> to vector<2x128xf32>
      %15 = arith.addf %12, %14 : vector<2x128xf32>
      %cst_14 = arith.constant 0.000000e+00 : f32
      %16 = vector.broadcast %cst_14 : f32 to vector<2x128xf32>
      %17 = arith.cmpf oge, %15, %16 : vector<2x128xf32>
      %cst_15 = arith.constant 2.000000e-01 : f32
      %18 = vector.broadcast %cst_15 : f32 to vector<2x128xf32>
      %19 = arith.mulf %18, %15 : vector<2x128xf32>
      %20 = arith.select %17, %15, %19 : vector<2x128xi1>, vector<2x128xf32>
      %21 = arith.truncf %20 : vector<2x128xf32> to vector<2x128xbf16>
      %c0_16 = arith.constant 0 : index
      %c0_17 = arith.constant 0 : index
      %22 = vector.load %arg5[%c0_16, %c0_17] : memref<128x128xbf16, #tpu.memory_space<vmem>>, vector<128x128xbf16>
      %cst_18 = arith.constant dense<0.000000e+00> : vector<2x128xf32>
      %23 = tpu.matmul %21, %22, %cst_18 {dimension_numbers = #tpu.dot_dimension_numbers<[1], [0], [0], [1], [0, 0, 1, 1], [], []>} : vector<2x128xbf16>, vector<128x128xbf16>, vector<2x128xf32> -> vector<2x128xf32>
      %c0_19 = arith.constant 0 : index
      %c0_20 = arith.constant 0 : index
      %24 = vector.load %arg6[%c0_19, %c0_20] : memref<1x128xf32, #tpu.memory_space<vmem>>, vector<1x128xf32>
      %25 = vector.broadcast %24 : vector<1x128xf32> to vector<2x128xf32>
      %26 = arith.addf %23, %25 : vector<2x128xf32>
      %c0_21 = arith.constant 0 : index
      %c0_22 = arith.constant 0 : index
      %27 = vector.load %arg7[%c0_21, %c0_22] : memref<2x128xf32, #tpu.memory_space<vmem>>, vector<2x128xf32>
      tpu.vector_store %arg7[%c0_21, %c0_22], %26 {strides = array<i32>} : memref<2x128xf32, #tpu.memory_space<vmem>>, vector<2x128xf32>,
    } else {
    }
    return
  }
  func.func @transform_0(%arg0: i32, %arg1: i32) -> (i32, i32) {
    %c0_i32 = arith.constant 0 : i32
    return %arg0, %arg1 : i32, i32
  }
  func.func @transform_1(%arg0: i32, %arg1: i32) -> (i32, i32) {
    %c0_i32 = arith.constant 0 : i32
    %c0_i32_0 = arith.constant 0 : i32
    return %arg1, %c0_i32 : i32, i32
  }
  func.func @transform_2(%arg0: i32, %arg1: i32) -> (i32, i32) {
    %c0_i32 = arith.constant 0 : i32
    %c0_i32_0 = arith.constant 0 : i32
    %c0_i32_1 = arith.constant 0 : i32
    return %c0_i32, %c0_i32_0 : i32, i32
  }
  func.func @transform_3(%arg0: i32, %arg1: i32) -> (i32, i32) {
    %c0_i32 = arith.constant 0 : i32
    %c0_i32_0 = arith.constant 0 : i32
    %c0_i32_1 = arith.constant 0 : i32
    return %c0_i32, %c0_i32_0 : i32, i32
  }
  func.func @transform_4(%arg0: i32, %arg1: i32) -> (i32, i32) {
    %c0_i32 = arith.constant 0 : i32
    %c0_i32_0 = arith.constant 0 : i32
    %c0_i32_1 = arith.constant 0 : i32
    return %c0_i32, %c0_i32_0 : i32, i32
  }
  func.func @transform_5(%arg0: i32, %arg1: i32) -> (i32, i32) {
    %c0_i32 = arith.constant 0 : i32
    %c0_i32_0 = arith.constant 0 : i32
    return %arg0, %c0_i32 : i32, i32
  }
}

</mosaic_0001>

<bundles_post_ra>
// kernel: encoder_forward.9
= control target key start
LH: loop header
LB: loop body
LE: loop exit
PB: predicated region body
PF: predicated region fallthrough
CT: control target
= control target key end

     0   :  { %s148_s0 = inlined_call_operand.vmem [shape: bf16[32,128], index: 0, kind: input, shape index: {}]   ;;  %s149_s1 = inlined_call_operand.vmem [shape: f32[1,128], index: 1, kind: input, shape index: {}]   ;;  %s150_s2 = inlined_call_operand.vmem [shape: f32[1,128], index: 2, kind: input, shape index: {}]   ;;  %s151_s3 = inlined_call_operand.vmem [shape: bf16[32,128], index: 3, kind: output, shape index: {}]  }
   0x1   :  { %v91_v0 = vld [vmem:[%s148_s0] sm:$0xff]   ;;  %v108_v4 = vld [vmem:[%s148_s0 + $0x8] sm:$0xff]  }
   0x2   :  { %v80_v1 = vld [vmem:[%s149_s1] ss:$0 sm:$0xff]  ;;  %v92_v2 = vunpack.c.l.bf16 %v91_v0  ;;  %v93_v3 = vunpack.c.h.bf16 %v91_v0  ;;  %v96_v6 = vunpack.c.l.bf16 %v108_v4  ;;  %v97_v7 = vunpack.c.h.bf16 %v108_v4 }
   0x3   :  { %v81_v5 = vld [vmem:[%s150_s2] ss:$0 sm:$0xff] }
   0x4   :  { %v29_v8 = vmul.f32 %v92_v2, %v80_v1  ;;  %v30_v9 = vmul.f32 %v93_v3, %v80_v1  ;;  %v31_v10 = vmul.f32 %v96_v6, %v80_v1  ;;  %v32_v11 = vmul.f32 %v97_v7, %v80_v1 }
   0x6   :  { %v40_v12 = vadd.f32 %v81_v5, %v29_v8  ;;  %v41_v13 = vadd.f32 %v81_v5, %v30_v9  ;;  %v42_v14 = vadd.f32 %v81_v5, %v31_v10  ;;  %v43_v15 = vadd.f32 %v81_v5, %v32_v11 }
   0x8   :  { %vm44_vm0 = vcmp.ge.f32.partialorder %v40_v12, 0.0  ;;  %vm45_vm1 = vcmp.ge.f32.partialorder %v41_v13, 0.0  ;;  %v48_v16 = vmul.f32 0.2, %v40_v12  ;;  %v49_v17 = vmul.f32 0.2, %v41_v13 }
   0x9   :  { %vm46_vm2 = vcmp.ge.f32.partialorder %v42_v14, 0.0  ;;  %vm47_vm3 = vcmp.ge.f32.partialorder %v43_v15, 0.0  ;;  %v50_v18 = vmul.f32 0.2, %v42_v14  ;;  %v51_v19 = vmul.f32 0.2, %v43_v15 }
   0xa   :  { %v52_v20 = vsel %vm44_vm0, %v40_v12, %v48_v16  ;;  %v53_v21 = vsel %vm45_vm1, %v41_v13, %v49_v17 }
   0xb   :  { %v101_v22 = vpack.c.bf16 %v53_v21, %v52_v20  ;;  %v54_v23 = vsel %vm46_vm2, %v42_v14, %v50_v18  ;;  %v55_v24 = vsel %vm47_vm3, %v43_v15, %v51_v19 }
   0xc   :  { %v106_v25 = vpack.c.bf16 %v55_v24, %v54_v23 }
   0xd   :  { %102 = vst [vmem:[%s151_s3] sm:$0xff] %v101_v22  }
   0xe   :  { %109 = vst [vmem:[%s151_s3 + $0x8] sm:$0xff] %v106_v25  }

// kernel: encoder_forward.11
= control target key start
LH: loop header
LB: loop body
LE: loop exit
PB: predicated region body
PF: predicated region fallthrough
CT: control target
= control target key end

     0   :  { %s75_s0 = inlined_call_operand.vmem [shape: bf16[8,128], index: 0, kind: input, shape index: {}]   ;;  %s76_s1 = inlined_call_operand.vmem [shape: f32[1,128], index: 1, kind: input, shape index: {}]   ;;  %s77_s2 = inlined_call_operand.vmem [shape: f32[1,128], index: 2, kind: input, shape index: {}]   ;;  %s78_s3 = inlined_call_operand.vmem [shape: bf16[8,128], index: 3, kind: output, shape index: {}]  }
   0x1   :  { %v14_v0 = vld [vmem:[%s75_s0] sm:$0xf] }
   0x2   :  { %v41_v1 = vld [vmem:[%s76_s1] ss:$0 sm:$0xff]  ;;  %v15_v2 = vunpack.c.l.bf16 %v14_v0 }
   0x3   :  { %v42_v3 = vld [vmem:[%s77_s2] ss:$0 sm:$0xff] }
   0x4   :  { %v23_v4 = vmul.f32 %v41_v1, %v15_v2 }
   0x6   :  { %v31_v5 = vadd.f32 %v42_v3, %v23_v4 }
   0x8   :  { %vm32_vm0 = vcmp.ge.f32.partialorder %v31_v5, 0.0  ;;  %v33_v6 = vmul.f32 0.2, %v31_v5 }
   0xa   :  { %v34_v7 = vsel %vm32_vm0, %v31_v5, %v33_v6 }
   0xb   :  { %v35_v8 = vpack.c.bf16 %v34_v7, %v34_v7 }
   0xd   :  { %36 = vst [vmem:[%s78_s3] sm:$0xf] %v35_v8 }

// kernel: encoder_forward.7
= control target key start
LH: loop header
LB: loop body
LE: loop exit
PB: predicated region body
PF: predicated region fallthrough
CT: control target
= control target key end

     0   :  { %s2711_s12 = smov 0   ;;  %s3013_s0 = inlined_call_operand.vmem [shape: bf16[2,9,9,16], index: 0, kind: input, shape index: {}]   ;;  %s3014_s1 = inlined_call_operand.vmem [shape: bf16[4,16,128], index: 1, kind: input, shape index: {}]   ;;  %s3015_s2 = inlined_call_operand.vmem [shape: f32[1,128], index: 2, kind: input, shape index: {}]   ;;  %s3016_s3 = inlined_call_operand.vmem [shape: bf16[2,8,8,128], index: 3, kind: output, shape index: {}]  }
   0x1 LB: > { %s2181_s13 = sadd.s32 4294967295, %s2687_s12   ;;  %p2185_p0 = scmp.ge.s32.totalorder %s2687_s12, 1  ;;  %s2687_s12 = sphi %s2711_s12, %s13_s12  }
   0x2   : > { %p137_p1 = scmp.lt.s32.totalorder %s2687_s12, 3 }
   0x4   : > { %p138_p2 = pnand %p2185_p0, %p137_p1 }
   0x5   : > { %p161_p3 = scmp.lt.s32.totalorder (!%p138_p2), %s2181_s13, 1 }
   0x6   : > { %141 = sbr.rel (%p138_p2) target bundleno = 349 (0x15d), region = 32 }
   0xb   : > { %v2633_v0 = vld [vmem:[%s3014_s1] sm:$0xff]   ;;  %v2689_v1 = vmov 0.0   ;;  %v2634_v2 = vld [vmem:[%s3014_s1 + $0x8] sm:$0xff]   ;;  %vm2690_vm0 = vmmov 0   ;;  %s3018_s13 = smov (!%p161_p3, %s2181_s13), 1  ;;  %vm198_vm1 = vcmask 130048  }
   0xc   : > { %2436 = vmatprep.subr.bf16.mxu1 %v2689_v1  ;;  %2430 = vmatprep.subr.bf16.mxu0 %v2689_v1  ;;  %s2622_s18 = smul.u32 72, %s3018_s13  ;;  %v2637_v3 = vld [vmem:[%s3014_s1 + $0x18] sm:$0xff]   ;;  %v2636_v14 = vld [vmem:[%s3014_s1 + $0x10] sm:$0xff]   ;;  %v2640_v19 = vld [vmem:[%s3014_s1] sm:$0xff]   ;;  %s2365_s8 = sshll.u32 %s3018_s13, 5 }
   0xd   : > { %2437 = vmatpush3.bf16.msra.mxu1 %v2633_v0  ;;  %2438 = vmatprep.mubr.msk.bf16.mxu1 %vm2690_vm0, %v2689_v1  ;;  %v2639_v22 = vld [vmem:[%s3014_s1 + $0x8] sm:$0xff]   ;;  %v2643_v26 = vld [vmem:[%s3014_s1 + $0x18] sm:$0xff]   ;;  %v2642_v35 = vld [vmem:[%s3014_s1 + $0x10] sm:$0xff]   ;;  %s2993_s11 = scalar_lea.vmem %s3016_s3, %s2365_s8 }
   0xe   : > { %2431 = vmatpush3.bf16.msra.mxu0 %v2634_v2  ;;  %2432 = vmatprep.mubr.msk.bf16.mxu0 %vm2690_vm0, %v2689_v1  ;;  %s2742_s23 = scalar_lea.vmem %s3013_s0, %s2622_s18  ;;  %v2646_v36 = vld [vmem:[%s3014_s1] sm:$0xff]   ;;  %v2645_v42 = vld [vmem:[%s3014_s1 + $0x8] sm:$0xff]   ;;  %v2649_v43 = vld [vmem:[%s3014_s1 + $0x18] sm:$0xff]  }
   0xf   : > { %2442 = vmatprep.subr.bf16.mxu0 %v2689_v1  ;;  %2448 = vmatprep.subr.bf16.mxu1 %v2689_v1  ;;  %v173_v4 = vld [vmem:[%s2742_s23] sm:$0xf]  ;;  %v176_v5 = vld [vmem:[%s2742_s23 + $0x4] sm:$0x1]  ;;  %v2638_v7 = vld [vmem:[%s2742_s23 + $0x8] sm:$0x1f]  }
  0x10   : > { %v2191_v6 = vcombine.low %v173_v4, %v176_v5  ;;  %2439 = vmatmul.mubr.msk.bf16.vlgmr.msra.gmra.mxu1 %vm198_vm1, %v173_v4  ;;  %v357_v10 = vshrl.u32 %v2638_v7, 16  ;;  %v359_v11 = vshll.u32 %v2638_v7, 16  ;;  %v2209_v15 = vld [vmem:[%s2742_s23 + $0x8] sm:$0xf]  ;;  %v2210_v16 = vld [vmem:[%s2742_s23 + $0xc] sm:$0x1] }
  0x11   : > { %2449 = vmatpush3.bf16.msra.mxu1 %v2637_v3  ;;  %2450 = vmatprep.mubr.msk.bf16.mxu1 %vm2690_vm0, %v2689_v1  ;;  %v2213_v20 = vcombine.low %v2209_v15, %v2210_v16  ;;  %v2644_v21 = vld [vmem:[%s2742_s23 + $0x10] sm:$0x1f]   ;;  %v2196_v25 = vld [vmem:[%s2742_s23 + $0x8] sm:$0xf]  ;;  %v2650_v38 = vld [vmem:[%s2742_s23 + $0x18] sm:$0x1f]  }
  0x12   : > { %v186_v8 = vshrl.u32 %v2191_v6, 16  ;;  %v188_v9 = vshll.u32 %v2191_v6, 16  ;;  %2460 = vmatprep.subr.bf16.mxu1 %v2689_v1  ;;  %v361_v13 = vrot.slane %v359_v11, 1  ;;  %v607_v24 = vshll.u32 %v2644_v21, 16  ;;  %v2231_v31 = vld [vmem:[%s2742_s23 + $0x10] sm:$0xf] }
  0x13   : > { %v439_v23 = vshll.u32 %v2213_v20, 16  ;;  %v437_v27 = vshrl.u32 %v2213_v20, 16  ;;  %v605_v29 = vshrl.u32 %v2644_v21, 16  ;;  %v2232_v34 = vld [vmem:[%s2742_s23 + $0x14] sm:$0x1]  ;;  %v850_v40 = vshll.u32 %v2650_v38, 16 }
  0x14   : > { %v190_v12 = vrot.slane %v188_v9, 1  ;;  %v362_v18 = vor.u32 %v361_v13, %v357_v10  ;;  %v609_v30 = vrot.slane %v607_v24, 1  ;;  %v2235_v37 = vcombine.low %v2231_v31, %v2232_v34  ;;  %v2218_v41 = vld [vmem:[%s2742_s23 + $0x10] sm:$0xf]  ;;  %v2253_v51 = vld [vmem:[%s2742_s23 + $0x18] sm:$0xf] }
  0x15   : > { %v441_v28 = vrot.slane %v439_v23, 1  ;;  %v848_v46 = vshrl.u32 %v2650_v38, 16  ;;  %v852_v47 = vrot.slane %v850_v40, 1  ;;  %v2648_v49 = vld [vmem:[%s3014_s1 + $0x10] sm:$0xff]   ;;  %v2254_v52 = vld [vmem:[%s2742_s23 + $0x1c] sm:$0x1] }
  0x16   : > { %v191_v17 = vor.u32 %v190_v12, %v186_v8  ;;  %v610_v33 = vor.u32 %v609_v30, %v605_v29  ;;  %v682_v39 = vshll.u32 %v2235_v37, 16  ;;  %v680_v44 = vshrl.u32 %v2235_v37, 16  ;;  %v2652_v53 = vld [vmem:[%s3014_s1] sm:$0xff]   ;;  %v2240_v58 = vld [vmem:[%s2742_s23 + $0x18] sm:$0xf]  ;;  %v2651_v59 = vld [vmem:[%s3014_s1 + $0x8] sm:$0xff]  }
  0x17   : > { %v442_v32 = vor.u32 %v441_v28, %v437_v27  ;;  %v853_v50 = vor.u32 %v852_v47, %v848_v46  ;;  %v2257_v54 = vcombine.low %v2253_v51, %v2254_v52  ;;  %v2656_v55 = vld [vmem:[%s2742_s23 + $0x20] sm:$0x1f]   ;;  %v2655_v60 = vld [vmem:[%s3014_s1 + $0x18] sm:$0xff]   ;;  %v2654_v4 = vld [vmem:[%s3014_s1 + $0x10] sm:$0xff]  }
  0x18   : > { %2433 = vmatmul.mubr.msk.bf16.vlgmr.msra.gmra.mxu0 %vm198_vm1, %v191_v17  ;;  %2451 = vmatmul.mubr.msk.bf16.vlgmr.msra.gmra.mxu1 %vm198_vm1, %v362_v18  ;;  %v684_v45 = vrot.slane %v682_v39, 1  ;;  %v1093_v57 = vshll.u32 %v2656_v55, 16  ;;  %v1091_v63 = vshrl.u32 %v2656_v55, 16  ;;  %v2275_v5 = vld [vmem:[%s2742_s23 + $0x20] sm:$0xf]  ;;  %v2657_v13 = vld [vmem:[%s3014_s1 + $0x8] sm:$0xff]  }
  0x19   : > { %2443 = vmatpush3.bf16.msra.mxu0 %v2636_v14  ;;  %2444 = vmatprep.mubr.msk.bf16.mxu0 %vm2690_vm0, %v2689_v1  ;;  %v925_v56 = vshll.u32 %v2257_v54, 16  ;;  %v923_v61 = vshrl.u32 %v2257_v54, 16  ;;  %v2276_v6 = vld [vmem:[%s2742_s23 + $0x24] sm:$0x1]  ;;  %v2662_v9 = vld [vmem:[%s2742_s23 + $0x28] sm:$0x1f]  }
  0x1a   : > { %2454 = vmatprep.subr.bf16.mxu0 %v2689_v1  ;;  %2461 = vmatpush3.bf16.msra.mxu1 %v2640_v19  ;;  %v685_v48 = vor.u32 %v684_v45, %v680_v44  ;;  %v1095_v0 = vrot.slane %v1093_v57, 1  ;;  %v2658_v7 = vld [vmem:[%s3014_s1] sm:$0xff]   ;;  %v2279_v8 = vcombine.low %v2275_v5, %v2276_v6  ;;  %v1336_v11 = vshll.u32 %v2662_v9, 16  ;;  %v2661_v14 = vld [vmem:[%s3014_s1 + $0x18] sm:$0xff]   ;;  %v2660_v21 = vld [vmem:[%s3014_s1 + $0x10] sm:$0xff]  }
  0x1b   : > { %2462 = vmatprep.mubr.msk.bf16.mxu1 %vm2690_vm0, %v2689_v1  ;;  %2472 = vmatprep.subr.bf16.mxu1 %v2689_v1  ;;  %v927_v62 = vrot.slane %v925_v56, 1  ;;  %v2262_v12 = vld [vmem:[%s2742_s23 + $0x20] sm:$0xf]  ;;  %v1334_v17 = vshrl.u32 %v2662_v9, 16  ;;  %v2298_v23 = vld [vmem:[%s2742_s23 + $0x2c] sm:$0x1] }
  0x1c   : > { %v1096_v3 = vor.u32 %v1095_v0, %v1091_v63  ;;  %v1168_v10 = vshll.u32 %v2279_v8, 16  ;;  %v1338_v18 = vrot.slane %v1336_v11, 1  ;;  %v2664_v24 = vld [vmem:[%s3014_s1] sm:$0xff]   ;;  %v2284_v29 = vld [vmem:[%s2742_s23 + $0x28] sm:$0xf]  ;;  %v2666_v38 = vld [vmem:[%s3014_s1 + $0x10] sm:$0xff]  }
  0x1d   : > { %v928_v2 = vor.u32 %v927_v62, %v923_v61  ;;  %v2663_v30 = vld [vmem:[%s3014_s1 + $0x8] sm:$0xff]   ;;  %v2319_v39 = vld [vmem:[%s2742_s23 + $0x30] sm:$0xf]  ;;  %v2320_v40 = vld [vmem:[%s2742_s23 + $0x34] sm:$0x1] }
  0x1e   : > { %v1170_v16 = vrot.slane %v1168_v10, 1  ;;  %v1339_v20 = vor.u32 %v1338_v18, %v1334_v17  ;;  %v2306_v46 = vld [vmem:[%s2742_s23 + $0x30] sm:$0xf]  ;;  %v2669_v47 = vld [vmem:[%s3014_s1 + $0x8] sm:$0xff]   ;;  %v2341_v56 = vld [vmem:[%s2742_s23 + $0x38] sm:$0xf] }
  0x1f   : > { %v2672_v55 = vld [vmem:[%s3014_s1 + $0x10] sm:$0xff]   ;;  %v2342_v57 = vld [vmem:[%s2742_s23 + $0x3c] sm:$0x1]  ;;  %v2328_v63 = vld [vmem:[%s2742_s23 + $0x38] sm:$0xf] }
  0x20   : > { %2445 = vmatmul.mubr.msk.bf16.vlgmr.msra.gmra.mxu0 %vm198_vm1, %v2196_v25  ;;  %2463 = vmatmul.mubr.msk.bf16.vlgmr.msra.gmra.mxu1 %vm198_vm1, %v2209_v15  ;;  %v1166_v15 = vshrl.u32 %v2279_v8, 16  ;;  %v2675_v0 = vld [vmem:[%s3014_s1 + $0x8] sm:$0xff]   ;;  %v2678_v9 = vld [vmem:[%s3014_s1 + $0x10] sm:$0xff]   ;;  %v2350_v10 = vld [vmem:[%s2742_s23 + $0x40] sm:$0xf] }
  0x21   : > { %2455 = vmatpush3.bf16.msra.mxu0 %v2639_v22  ;;  %2456 = vmatprep.mubr.msk.bf16.mxu0 %vm2690_vm0, %v2689_v1  ;;  %v2297_v22 = vld [vmem:[%s2742_s23 + $0x28] sm:$0xf] }
  0x22   : > { %2466 = vmatprep.subr.bf16.mxu0 %v2689_v1  ;;  %2473 = vmatpush3.bf16.msra.mxu1 %v2643_v26  ;;  %v1171_v19 = vor.u32 %v1170_v16, %v1166_v15  ;;  %v2301_v25 = vcombine.low %v2297_v22, %v2298_v23  ;;  %v2668_v26 = vld [vmem:[%s2742_s23 + $0x30] sm:$0x1f]  }
  0x23   : > { %2474 = vmatprep.mubr.msk.bf16.mxu1 %vm2690_vm0, %v2689_v1  ;;  %2484 = vmatprep.subr.bf16.mxu1 %v2689_v1  ;;  %v1579_v28 = vshll.u32 %v2668_v26, 16  ;;  %v1577_v34 = vshrl.u32 %v2668_v26, 16  ;;  %v2986_v26 = vld [vmem:[%s3015_s2] ss:$0 sm:$0xff] }
  0x24   : > { %v1411_v27 = vshll.u32 %v2301_v25, 16 }
  0x28   : > { %2457 = vmatmul.mubr.msk.bf16.vlgmr.msra.gmra.mxu0 %vm198_vm1, %v442_v32  ;;  %2475 = vmatmul.mubr.msk.bf16.vlgmr.msra.gmra.mxu1 %vm198_vm1, %v610_v33  ;;  %v1409_v32 = vshrl.u32 %v2301_v25, 16  ;;  %v1413_v33 = vrot.slane %v1411_v27, 1 }
  0x29   : > { %2467 = vmatpush3.bf16.msra.mxu0 %v2642_v35  ;;  %2468 = vmatprep.mubr.msk.bf16.mxu0 %vm2690_vm0, %v2689_v1  ;;  %v1581_v35 = vrot.slane %v1579_v28, 1 }
  0x2a   : > { %2478 = vmatprep.subr.bf16.mxu0 %v2689_v1  ;;  %2485 = vmatpush3.bf16.msra.mxu1 %v2646_v36  ;;  %v1414_v36 = vor.u32 %v1413_v33, %v1409_v32 }
  0x2b   : > { %2486 = vmatprep.mubr.msk.bf16.mxu1 %vm2690_vm0, %v2689_v1  ;;  %2496 = vmatprep.subr.bf16.mxu1 %v2689_v1  ;;  %v1582_v37 = vor.u32 %v1581_v35, %v1577_v34 }
  0x30   : > { %2469 = vmatmul.mubr.msk.bf16.vlgmr.msra.gmra.mxu0 %vm198_vm1, %v2218_v41  ;;  %2487 = vmatmul.mubr.msk.bf16.vlgmr.msra.gmra.mxu1 %vm198_vm1, %v2231_v31  ;;  %v2667_v31 = vld [vmem:[%s3014_s1 + $0x18] sm:$0xff]   ;;  %v2670_v41 = vld [vmem:[%s3014_s1] sm:$0xff]  }
  0x31   : > { %2479 = vmatpush3.bf16.msra.mxu0 %v2645_v42  ;;  %2480 = vmatprep.mubr.msk.bf16.mxu0 %vm2690_vm0, %v2689_v1  ;;  %v2323_v42 = vcombine.low %v2319_v39, %v2320_v40 }
  0x32   : > { %2490 = vmatprep.subr.bf16.mxu0 %v2689_v1  ;;  %2497 = vmatpush3.bf16.msra.mxu1 %v2649_v43  ;;  %v2674_v43 = vld [vmem:[%s2742_s23 + $0x38] sm:$0x1f]  }
  0x33   : > { %2498 = vmatprep.mubr.msk.bf16.mxu1 %vm2690_vm0, %v2689_v1  ;;  %2508 = vmatprep.subr.bf16.mxu1 %v2689_v1  ;;  %v1654_v44 = vshll.u32 %v2323_v42, 16  ;;  %v1822_v45 = vshll.u32 %v2674_v43, 16 }
  0x35   : > { %v1824_v52 = vrot.slane %v1822_v45, 1 }
  0x38   : > { %2481 = vmatmul.mubr.msk.bf16.vlgmr.msra.gmra.mxu0 %vm198_vm1, %v685_v48  ;;  %2499 = vmatmul.mubr.msk.bf16.vlgmr.msra.gmra.mxu1 %vm198_vm1, %v853_v50  ;;  %v2673_v48 = vld [vmem:[%s3014_s1 + $0x18] sm:$0xff]   ;;  %v1656_v50 = vrot.slane %v1654_v44, 1 }
  0x39   : > { %2491 = vmatpush3.bf16.msra.mxu0 %v2648_v49  ;;  %2492 = vmatprep.mubr.msk.bf16.mxu0 %vm2690_vm0, %v2689_v1  ;;  %v1652_v49 = vshrl.u32 %v2323_v42, 16 }
  0x3a   : > { %2502 = vmatprep.subr.bf16.mxu0 %v2689_v1  ;;  %2509 = vmatpush3.bf16.msra.mxu1 %v2652_v53 }
  0x3b   : > { %2510 = vmatprep.mubr.msk.bf16.mxu1 %vm2690_vm0, %v2689_v1  ;;  %2520 = vmatprep.subr.bf16.mxu1 %v2689_v1  ;;  %v1657_v53 = vor.u32 %v1656_v50, %v1652_v49 }
  0x40   : > { %2493 = vmatmul.mubr.msk.bf16.vlgmr.msra.gmra.mxu0 %vm198_vm1, %v2240_v58  ;;  %2511 = vmatmul.mubr.msk.bf16.vlgmr.msra.gmra.mxu1 %vm198_vm1, %v2253_v51  ;;  %v1820_v51 = vshrl.u32 %v2674_v43, 16  ;;  %v2676_v58 = vld [vmem:[%s3014_s1] sm:$0xff]  }
  0x41   : > { %2503 = vmatpush3.bf16.msra.mxu0 %v2651_v59  ;;  %2504 = vmatprep.mubr.msk.bf16.mxu0 %vm2690_vm0, %v2689_v1  ;;  %v2345_v59 = vcombine.low %v2341_v56, %v2342_v57 }
  0x42   : > { %2514 = vmatprep.subr.bf16.mxu0 %v2689_v1  ;;  %2521 = vmatpush3.bf16.msra.mxu1 %v2655_v60  ;;  %v1825_v54 = vor.u32 %v1824_v52, %v1820_v51  ;;  %v2680_v60 = vld [vmem:[%s2742_s23 + $0x40] sm:$0x1f]  }
  0x43   : > { %2522 = vmatprep.mubr.msk.bf16.mxu1 %vm2690_vm0, %v2689_v1  ;;  %2532 = vmatprep.subr.bf16.mxu1 %v2689_v1  ;;  %v1897_v61 = vshll.u32 %v2345_v59, 16  ;;  %v2065_v62 = vshll.u32 %v2680_v60, 16 }
  0x45   : > { %v2067_v6 = vrot.slane %v2065_v62, 1 }
  0x48   : > { %2505 = vmatmul.mubr.msk.bf16.vlgmr.msra.gmra.mxu0 %vm198_vm1, %v928_v2  ;;  %2523 = vmatmul.mubr.msk.bf16.vlgmr.msra.gmra.mxu1 %vm198_vm1, %v1096_v3  ;;  %v2679_v2 = vld [vmem:[%s3014_s1 + $0x18] sm:$0xff]   ;;  %v1895_v3 = vshrl.u32 %v2345_v59, 16 }
  0x49   : > { %2515 = vmatpush3.bf16.msra.mxu0 %v2654_v4  ;;  %2516 = vmatprep.mubr.msk.bf16.mxu0 %vm2690_vm0, %v2689_v1  ;;  %v1899_v4 = vrot.slane %v1897_v61, 1 }
  0x4a   : > { %2526 = vmatprep.subr.bf16.mxu0 %v2689_v1  ;;  %2533 = vmatpush3.bf16.msra.mxu1 %v2658_v7 }
  0x4b   : > { %2534 = vmatprep.mubr.msk.bf16.mxu1 %vm2690_vm0, %v2689_v1  ;;  %2544 = vmatprep.subr.bf16.mxu1 %v2689_v1  ;;  %v1900_v7 = vor.u32 %v1899_v4, %v1895_v3 }
  0x50   : > { %2517 = vmatmul.mubr.msk.bf16.vlgmr.msra.gmra.mxu0 %vm198_vm1, %v2262_v12  ;;  %2535 = vmatmul.mubr.msk.bf16.vlgmr.msra.gmra.mxu1 %vm198_vm1, %v2275_v5  ;;  %v2063_v5 = vshrl.u32 %v2680_v60, 16 }
  0x51   : > { %2527 = vmatpush3.bf16.msra.mxu0 %v2657_v13  ;;  %2528 = vmatprep.mubr.msk.bf16.mxu0 %vm2690_vm0, %v2689_v1 }
  0x52   : > { %2538 = vmatprep.subr.bf16.mxu0 %v2689_v1  ;;  %2545 = vmatpush3.bf16.msra.mxu1 %v2661_v14  ;;  %v2068_v8 = vor.u32 %v2067_v6, %v2063_v5 }
  0x53   : > { %2546 = vmatprep.mubr.msk.bf16.mxu1 %vm2690_vm0, %v2689_v1  ;;  %2556 = vmatprep.subr.bf16.mxu1 %v2689_v1 }
  0x58   : > { %2529 = vmatmul.mubr.msk.bf16.vlgmr.msra.gmra.mxu0 %vm198_vm1, %v1171_v19  ;;  %2547 = vmatmul.mubr.msk.bf16.vlgmr.msra.gmra.mxu1 %vm198_vm1, %v1339_v20 }
  0x59   : > { %2539 = vmatpush3.bf16.msra.mxu0 %v2660_v21  ;;  %2540 = vmatprep.mubr.msk.bf16.mxu0 %vm2690_vm0, %v2689_v1 }
  0x5a   : > { %2550 = vmatprep.subr.bf16.mxu0 %v2689_v1  ;;  %2557 = vmatpush3.bf16.msra.mxu1 %v2664_v24 }
  0x5b   : > { %2558 = vmatprep.mubr.msk.bf16.mxu1 %vm2690_vm0, %v2689_v1  ;;  %2568 = vmatprep.subr.bf16.mxu1 %v2689_v1 }
  0x60   : > { %2541 = vmatmul.mubr.msk.bf16.vlgmr.msra.gmra.mxu0 %vm198_vm1, %v2284_v29  ;;  %2559 = vmatmul.mubr.msk.bf16.vlgmr.msra.gmra.mxu1 %vm198_vm1, %v2297_v22 }
  0x61   : > { %2551 = vmatpush3.bf16.msra.mxu0 %v2663_v30  ;;  %2552 = vmatprep.mubr.msk.bf16.mxu0 %vm2690_vm0, %v2689_v1 }
  0x62   : > { %2562 = vmatprep.subr.bf16.mxu0 %v2689_v1  ;;  %2569 = vmatpush3.bf16.msra.mxu1 %v2667_v31 }
  0x63   : > { %2570 = vmatprep.mubr.msk.bf16.mxu1 %vm2690_vm0, %v2689_v1  ;;  %2580 = vmatprep.subr.bf16.mxu1 %v2689_v1 }
  0x68   : > { %2553 = vmatmul.mubr.msk.bf16.vlgmr.msra.gmra.mxu0 %vm198_vm1, %v1414_v36  ;;  %2571 = vmatmul.mubr.msk.bf16.vlgmr.msra.gmra.mxu1 %vm198_vm1, %v1582_v37 }
  0x69   : > { %2563 = vmatpush3.bf16.msra.mxu0 %v2666_v38  ;;  %2564 = vmatprep.mubr.msk.bf16.mxu0 %vm2690_vm0, %v2689_v1 }
  0x6a   : > { %2574 = vmatprep.subr.bf16.mxu0 %v2689_v1  ;;  %2581 = vmatpush3.bf16.msra.mxu1 %v2670_v41 }
  0x6b   : > { %2582 = vmatprep.mubr.msk.bf16.mxu1 %vm2690_vm0, %v2689_v1  ;;  %2592 = vmatprep.subr.bf16.mxu1 %v2689_v1 }
  0x70   : > { %2565 = vmatmul.mubr.msk.bf16.vlgmr.msra.gmra.mxu0 %vm198_vm1, %v2306_v46  ;;  %2583 = vmatmul.mubr.msk.bf16.vlgmr.msra.gmra.mxu1 %vm198_vm1, %v2319_v39 }
  0x71   : > { %2575 = vmatpush3.bf16.msra.mxu0 %v2669_v47  ;;  %2576 = vmatprep.mubr.msk.bf16.mxu0 %vm2690_vm0, %v2689_v1 }
  0x72   : > { %2586 = vmatprep.subr.bf16.mxu0 %v2689_v1  ;;  %2593 = vmatpush3.bf16.msra.mxu1 %v2673_v48 }
  0x73   : > { %2594 = vmatprep.mubr.msk.bf16.mxu1 %vm2690_vm0, %v2689_v1  ;;  %2604 = vmatprep.subr.bf16.mxu1 %v2689_v1 }
  0x78   : > { %2577 = vmatmul.mubr.msk.bf16.vlgmr.msra.gmra.mxu0 %vm198_vm1, %v1657_v53  ;;  %2595 = vmatmul.mubr.msk.bf16.vlgmr.msra.gmra.mxu1 %vm198_vm1, %v1825_v54 }
  0x79   : > { %2587 = vmatpush3.bf16.msra.mxu0 %v2672_v55  ;;  %2588 = vmatprep.mubr.msk.bf16.mxu0 %vm2690_vm0, %v2689_v1 }
  0x7a   : > { %2598 = vmatprep.subr.bf16.mxu0 %v2689_v1  ;;  %2605 = vmatpush3.bf16.msra.mxu1 %v2676_v58 }
  0x7b   : > { %2606 = vmatprep.mubr.msk.bf16.mxu1 %vm2690_vm0, %v2689_v1  ;;  %2616 = vmatprep.subr.bf16.mxu1 %v2689_v1 }
  0x80   : > { %2589 = vmatmul.mubr.msk.bf16.vlgmr.msra.gmra.mxu0 %vm198_vm1, %v2328_v63  ;;  %2607 = vmatmul.mubr.msk.bf16.vlgmr.msra.gmra.mxu1 %vm198_vm1, %v2341_v56 }
  0x81   : > { %2599 = vmatpush3.bf16.msra.mxu0 %v2675_v0  ;;  %2600 = vmatprep.mubr.msk.bf16.mxu0 %vm2690_vm0, %v2689_v1 }
  0x82   : > { %2610 = vmatprep.subr.bf16.mxu0 %v2689_v1  ;;  %2617 = vmatpush3.bf16.msra.mxu1 %v2679_v2 }
  0x83   : > { %2618 = vmatprep.mubr.msk.bf16.mxu1 %vm2690_vm0, %v2689_v1 }
  0x88   : > { %2601 = vmatmul.mubr.msk.bf16.vlgmr.msra.gmra.mxu0 %vm198_vm1, %v1900_v7  ;;  %2619 = vmatmul.mubr.msk.bf16.vlgmr.msra.gmra.mxu1 %vm198_vm1, %v2068_v8 }
  0x89   : > { %2611 = vmatpush3.bf16.msra.mxu0 %v2678_v9  ;;  %2612 = vmatprep.mubr.msk.bf16.mxu0 %vm2690_vm0, %v2689_v1 }
  0x90   : > { %2613 = vmatmul.mubr.msk.bf16.vlgmr.msra.gmra.mxu0 %vm198_vm1, %v2350_v10 }
  0xd0   : > { %v285_v11 = vpop.f32.mrf.mxu1 }
  0xd2   : > { %v2440_v12 = vpop.f32.mrf.mxu1 }
  0xd4   : > { %v288_v13 = vpop.f32.mrf.mxu1 }
  0xd6   : > { %v2441_v14 = vpop.f32.mrf.mxu1 }
  0xd8   : > { %v236_v15 = vpop.f32.mrf.mxu0  ;;  %v406_v16 = vpop.f32.mrf.mxu1 }
  0xd9   : > { %v286_v23 = vadd.f32 %v285_v11, %v236_v15 }
  0xda   : > { %v2434_v17 = vpop.f32.mrf.mxu0  ;;  %v2452_v18 = vpop.f32.mrf.mxu1 }
  0xdc   : > { %v239_v19 = vpop.f32.mrf.mxu0  ;;  %v409_v20 = vpop.f32.mrf.mxu1 }
  0xde   : > { %v2435_v21 = vpop.f32.mrf.mxu0  ;;  %v2453_v22 = vpop.f32.mrf.mxu1 }
  0xe0   : > { %v339_v24 = vpop.f32.mrf.mxu0  ;;  %v535_v25 = vpop.f32.mrf.mxu1 }
  0xe1   : > { %v345_v1 = vadd.f32 %v339_v24, %v286_v23 }
  0xe2   : > { %v2446_v27 = vpop.f32.mrf.mxu0  ;;  %v2464_v28 = vpop.f32.mrf.mxu1 }
  0xe3   : > { %v412_v29 = vadd.f32 %v406_v16, %v345_v1 }
  0xe4   : > { %v342_v30 = vpop.f32.mrf.mxu0  ;;  %v538_v31 = vpop.f32.mrf.mxu1 }
  0xe5   : > { %v419_v32 = vadd.f32 %v2986_v26, %v412_v29 }
  0xe6   : > { %v2447_v33 = vpop.f32.mrf.mxu0  ;;  %v2465_v34 = vpop.f32.mrf.mxu1 }
  0xe7   : > { %vm420_vm2 = vcmp.ge.f32.partialorder %v419_v32, 0.0  ;;  %v421_v35 = vmul.f32 0.2, %v419_v32 }
  0xe8   : > { %v486_v36 = vpop.f32.mrf.mxu0  ;;  %v654_v37 = vpop.f32.mrf.mxu1 }
  0xe9   : > { %v422_v38 = vsel %vm420_vm2, %v419_v32, %v421_v35  ;;  %v536_v46 = vadd.f32 %v535_v25, %v486_v36 }
  0xea   : > { %v423_v39 = vpack.c.bf16 %v422_v38, %v422_v38  ;;  %v2458_v40 = vpop.f32.mrf.mxu0  ;;  %v2476_v41 = vpop.f32.mrf.mxu1 }
  0xec   : > { %424 = vst [vmem:[%s2993_s11] sm:$0xf] %v423_v39  ;;  %v489_v42 = vpop.f32.mrf.mxu0  ;;  %v657_v43 = vpop.f32.mrf.mxu1 }
  0xee   : > { %v2459_v44 = vpop.f32.mrf.mxu0  ;;  %v2477_v45 = vpop.f32.mrf.mxu1 }
  0xf0   : > { %v588_v47 = vpop.f32.mrf.mxu0  ;;  %v778_v48 = vpop.f32.mrf.mxu1 }
  0xf1   : > { %v594_v49 = vadd.f32 %v588_v47, %v536_v46 }
  0xf2   : > { %v2470_v50 = vpop.f32.mrf.mxu0  ;;  %v2488_v51 = vpop.f32.mrf.mxu1 }
  0xf3   : > { %v660_v52 = vadd.f32 %v654_v37, %v594_v49 }
  0xf4   : > { %v591_v53 = vpop.f32.mrf.mxu0  ;;  %v781_v54 = vpop.f32.mrf.mxu1 }
  0xf5   : > { %v661_v55 = vadd.f32 %v2986_v26, %v660_v52 }
  0xf6   : > { %v2471_v56 = vpop.f32.mrf.mxu0  ;;  %v2489_v57 = vpop.f32.mrf.mxu1 }
  0xf7   : > { %vm662_vm3 = vcmp.ge.f32.partialorder %v661_v55, 0.0  ;;  %v663_v58 = vmul.f32 0.2, %v661_v55 }
  0xf8   : > { %v729_v59 = vpop.f32.mrf.mxu0  ;;  %v897_v60 = vpop.f32.mrf.mxu1 }
  0xf9   : > { %v664_v61 = vsel %vm662_vm3, %v661_v55, %v663_v58  ;;  %v779_v6 = vadd.f32 %v778_v48, %v729_v59 }
  0xfa   : > { %v665_v62 = vpack.c.bf16 %v664_v61, %v664_v61  ;;  %v2482_v63 = vpop.f32.mrf.mxu0  ;;  %v2500_v0 = vpop.f32.mrf.mxu1 }
  0xfc   : > { %2230 = vst [vmem:[%s2993_s11 + $0x4] sm:$0xf] %v665_v62  ;;  %v732_v2 = vpop.f32.mrf.mxu0  ;;  %v900_v3 = vpop.f32.mrf.mxu1 }
  0xfe   : > { %v2483_v4 = vpop.f32.mrf.mxu0  ;;  %v2501_v5 = vpop.f32.mrf.mxu1 }
 0x100   : > { %v831_v7 = vpop.f32.mrf.mxu0  ;;  %v1021_v8 = vpop.f32.mrf.mxu1 }
 0x101   : > { %v837_v9 = vadd.f32 %v831_v7, %v779_v6 }
 0x102   : > { %v2494_v10 = vpop.f32.mrf.mxu0  ;;  %v2512_v11 = vpop.f32.mrf.mxu1 }
 0x103   : > { %v903_v12 = vadd.f32 %v897_v60, %v837_v9 }
 0x104   : > { %v834_v13 = vpop.f32.mrf.mxu0  ;;  %v1024_v14 = vpop.f32.mrf.mxu1 }
 0x105   : > { %v904_v15 = vadd.f32 %v2986_v26, %v903_v12 }
 0x106   : > { %v2495_v16 = vpop.f32.mrf.mxu0  ;;  %v2513_v17 = vpop.f32.mrf.mxu1 }
 0x107   : > { %vm905_vm4 = vcmp.ge.f32.partialorder %v904_v15, 0.0  ;;  %v906_v18 = vmul.f32 0.2, %v904_v15 }
 0x108   : > { %v972_v19 = vpop.f32.mrf.mxu0  ;;  %v1140_v20 = vpop.f32.mrf.mxu1 }
 0x109   : > { %v907_v21 = vsel %vm905_vm4, %v904_v15, %v906_v18  ;;  %v1022_v29 = vadd.f32 %v1021_v8, %v972_v19 }
 0x10a   : > { %v908_v22 = vpack.c.bf16 %v907_v21, %v907_v21  ;;  %v2506_v23 = vpop.f32.mrf.mxu0  ;;  %v2524_v24 = vpop.f32.mrf.mxu1 }
 0x10c   : > { %2252 = vst [vmem:[%s2993_s11 + $0x8] sm:$0xf] %v908_v22  ;;  %v975_v25 = vpop.f32.mrf.mxu0  ;;  %v1143_v1 = vpop.f32.mrf.mxu1 }
 0x10e   : > { %v2507_v27 = vpop.f32.mrf.mxu0  ;;  %v2525_v28 = vpop.f32.mrf.mxu1 }
 0x110   : > { %v1074_v30 = vpop.f32.mrf.mxu0  ;;  %v1264_v31 = vpop.f32.mrf.mxu1 }
 0x111   : > { %v1080_v32 = vadd.f32 %v1074_v30, %v1022_v29 }
 0x112   : > { %v2518_v33 = vpop.f32.mrf.mxu0  ;;  %v2536_v34 = vpop.f32.mrf.mxu1 }
 0x113   : > { %v1146_v35 = vadd.f32 %v1140_v20, %v1080_v32 }
 0x114   : > { %v1077_v36 = vpop.f32.mrf.mxu0  ;;  %v1267_v37 = vpop.f32.mrf.mxu1 }
 0x115   : > { %v1147_v38 = vadd.f32 %v2986_v26, %v1146_v35 }
 0x116   : > { %v2519_v39 = vpop.f32.mrf.mxu0  ;;  %v2537_v40 = vpop.f32.mrf.mxu1 }
 0x117   : > { %vm1148_vm5 = vcmp.ge.f32.partialorder %v1147_v38, 0.0  ;;  %v1149_v41 = vmul.f32 0.2, %v1147_v38 }
 0x118   : > { %v1215_v42 = vpop.f32.mrf.mxu0  ;;  %v1383_v43 = vpop.f32.mrf.mxu1 }
 0x119   : > { %v1150_v44 = vsel %vm1148_vm5, %v1147_v38, %v1149_v41  ;;  %v1265_v52 = vadd.f32 %v1264_v31, %v1215_v42 }
 0x11a   : > { %v1151_v45 = vpack.c.bf16 %v1150_v44, %v1150_v44  ;;  %v2530_v46 = vpop.f32.mrf.mxu0  ;;  %v2548_v47 = vpop.f32.mrf.mxu1 }
 0x11c   : > { %2274 = vst [vmem:[%s2993_s11 + $0xc] sm:$0xf] %v1151_v45  ;;  %v1218_v48 = vpop.f32.mrf.mxu0  ;;  %v1386_v49 = vpop.f32.mrf.mxu1 }
 0x11e   : > { %v2531_v50 = vpop.f32.mrf.mxu0  ;;  %v2549_v51 = vpop.f32.mrf.mxu1 }
 0x120   : > { %v1317_v53 = vpop.f32.mrf.mxu0  ;;  %v1507_v54 = vpop.f32.mrf.mxu1 }
 0x121   : > { %v1323_v55 = vadd.f32 %v1317_v53, %v1265_v52 }
 0x122   : > { %v2542_v56 = vpop.f32.mrf.mxu0  ;;  %v2560_v57 = vpop.f32.mrf.mxu1 }
 0x123   : > { %v1389_v58 = vadd.f32 %v1383_v43, %v1323_v55 }
 0x124   : > { %v1320_v59 = vpop.f32.mrf.mxu0  ;;  %v1510_v60 = vpop.f32.mrf.mxu1 }
 0x125   : > { %v1390_v61 = vadd.f32 %v2986_v26, %v1389_v58 }
 0x126   : > { %v2543_v62 = vpop.f32.mrf.mxu0  ;;  %v2561_v63 = vpop.f32.mrf.mxu1 }
 0x127   : > { %vm1391_vm6 = vcmp.ge.f32.partialorder %v1390_v61, 0.0  ;;  %v1392_v0 = vmul.f32 0.2, %v1390_v61 }
 0x128   : > { %v1458_v2 = vpop.f32.mrf.mxu0  ;;  %v1626_v3 = vpop.f32.mrf.mxu1 }
 0x129   : > { %v1393_v4 = vsel %vm1391_vm6, %v1390_v61, %v1392_v0  ;;  %v1508_v12 = vadd.f32 %v1507_v54, %v1458_v2 }
 0x12a   : > { %v1394_v5 = vpack.c.bf16 %v1393_v4, %v1393_v4  ;;  %v2554_v6 = vpop.f32.mrf.mxu0  ;;  %v2572_v7 = vpop.f32.mrf.mxu1 }
 0x12c   : > { %2296 = vst [vmem:[%s2993_s11 + $0x10] sm:$0xf] %v1394_v5  ;;  %v1461_v8 = vpop.f32.mrf.mxu0  ;;  %v1629_v9 = vpop.f32.mrf.mxu1 }
 0x12e   : > { %v2555_v10 = vpop.f32.mrf.mxu0  ;;  %v2573_v11 = vpop.f32.mrf.mxu1 }
 0x130   : > { %v1560_v13 = vpop.f32.mrf.mxu0  ;;  %v1750_v14 = vpop.f32.mrf.mxu1 }
 0x131   : > { %v1566_v15 = vadd.f32 %v1560_v13, %v1508_v12 }
 0x132   : > { %v2566_v16 = vpop.f32.mrf.mxu0  ;;  %v2584_v17 = vpop.f32.mrf.mxu1 }
 0x133   : > { %v1632_v18 = vadd.f32 %v1626_v3, %v1566_v15 }
 0x134   : > { %v1563_v19 = vpop.f32.mrf.mxu0  ;;  %v1753_v20 = vpop.f32.mrf.mxu1 }
 0x135   : > { %v1633_v21 = vadd.f32 %v2986_v26, %v1632_v18 }
 0x136   : > { %v2567_v22 = vpop.f32.mrf.mxu0  ;;  %v2585_v23 = vpop.f32.mrf.mxu1 }
 0x137   : > { %vm1634_vm7 = vcmp.ge.f32.partialorder %v1633_v21, 0.0  ;;  %v1635_v24 = vmul.f32 0.2, %v1633_v21 }
 0x138   : > { %v1701_v25 = vpop.f32.mrf.mxu0  ;;  %v1869_v1 = vpop.f32.mrf.mxu1 }
 0x139   : > { %v1636_v27 = vsel %vm1634_vm7, %v1633_v21, %v1635_v24  ;;  %v1751_v35 = vadd.f32 %v1750_v14, %v1701_v25 }
 0x13a   : > { %v1637_v28 = vpack.c.bf16 %v1636_v27, %v1636_v27  ;;  %v2578_v29 = vpop.f32.mrf.mxu0  ;;  %v2596_v30 = vpop.f32.mrf.mxu1 }
 0x13c   : > { %2318 = vst [vmem:[%s2993_s11 + $0x14] sm:$0xf] %v1637_v28  ;;  %v1704_v31 = vpop.f32.mrf.mxu0  ;;  %v1872_v32 = vpop.f32.mrf.mxu1 }
 0x13e   : > { %v2579_v33 = vpop.f32.mrf.mxu0  ;;  %v2597_v34 = vpop.f32.mrf.mxu1 }
 0x140   : > { %v1803_v36 = vpop.f32.mrf.mxu0  ;;  %v1993_v37 = vpop.f32.mrf.mxu1 }
 0x141   : > { %v1809_v38 = vadd.f32 %v1803_v36, %v1751_v35 }
 0x142   : > { %v2590_v39 = vpop.f32.mrf.mxu0  ;;  %v2608_v40 = vpop.f32.mrf.mxu1 }
 0x143   : > { %v1875_v41 = vadd.f32 %v1869_v1, %v1809_v38 }
 0x144   : > { %v1806_v42 = vpop.f32.mrf.mxu0  ;;  %v1996_v43 = vpop.f32.mrf.mxu1 }
 0x145   : > { %v1876_v44 = vadd.f32 %v2986_v26, %v1875_v41 }
 0x146   : > { %v2591_v45 = vpop.f32.mrf.mxu0  ;;  %v2609_v46 = vpop.f32.mrf.mxu1 }
 0x147   : > { %vm1877_vm8 = vcmp.ge.f32.partialorder %v1876_v44, 0.0  ;;  %v1878_v47 = vmul.f32 0.2, %v1876_v44 }
 0x148   : > { %v1944_v48 = vpop.f32.mrf.mxu0  ;;  %v2112_v49 = vpop.f32.mrf.mxu1 }
 0x149   : > { %v1879_v50 = vsel %vm1877_vm8, %v1876_v44, %v1878_v47  ;;  %v1994_v58 = vadd.f32 %v1993_v37, %v1944_v48 }
 0x14a   : > { %v1880_v51 = vpack.c.bf16 %v1879_v50, %v1879_v50  ;;  %v2602_v52 = vpop.f32.mrf.mxu0  ;;  %v2620_v53 = vpop.f32.mrf.mxu1 }
 0x14c   : > { %2340 = vst [vmem:[%s2993_s11 + $0x18] sm:$0xf] %v1880_v51  ;;  %v1947_v54 = vpop.f32.mrf.mxu0  ;;  %v2115_v55 = vpop.f32.mrf.mxu1 }
 0x14e   : > { %v2603_v56 = vpop.f32.mrf.mxu0  ;;  %v2621_v57 = vpop.f32.mrf.mxu1 }
 0x150   : > { %v2046_v59 = vpop.f32.mrf.mxu0 }
 0x151   : > { %v2052_v60 = vadd.f32 %v2046_v59, %v1994_v58 }
 0x152   : > { %v2614_v61 = vpop.f32.mrf.mxu0 }
 0x153   : > { %v2118_v62 = vadd.f32 %v2112_v49, %v2052_v60 }
 0x154   : > { %v2049_v63 = vpop.f32.mrf.mxu0 }
 0x155   : > { %v2119_v0 = vadd.f32 %v2986_v26, %v2118_v62 }
 0x156   : > { %v2615_v2 = vpop.f32.mrf.mxu0 }
 0x157   : > { %vm2120_vm9 = vcmp.ge.f32.partialorder %v2119_v0, 0.0  ;;  %v2121_v3 = vmul.f32 0.2, %v2119_v0 }
 0x159   : > { %v2122_v4 = vsel %vm2120_vm9, %v2119_v0, %v2121_v3 }
 0x15a   : > { %v2123_v5 = vpack.c.bf16 %v2122_v4, %v2122_v4 }
 0x15c   : > { %2362 = vst [vmem:[%s2993_s11 + $0x1c] sm:$0xf] %v2123_v5 }
 0x15d PF: > { %s13_s12 = sadd.s32 1, %s2687_s12  }
 0x15e   : > { %p10_p4 = scmp.ge.s32.totalorder %s13_s12, 4  }
 0x160   :  { %12 = sbr.rel (!%p10_p4) target bundleno = 1 (0x1), region = 80 }

// kernel: encoder_forward.10
= control target key start
LH: loop header
LB: loop body
LE: loop exit
PB: predicated region body
PF: predicated region fallthrough
CT: control target
= control target key end

     0   :  { %s4709_s18 = smov 0   ;;  %s5561_s0 = inlined_call_operand.vmem [shape: bf16[2,3,3,512], index: 0, kind: input, shape index: {}]   ;;  %s5562_s1 = inlined_call_operand.vmem [shape: bf16[4,512,128], index: 1, kind: input, shape index: {}]   ;;  %s5563_s2 = inlined_call_operand.vmem [shape: f32[1,128], index: 2, kind: input, shape index: {}]   ;;  %s5564_s3 = inlined_call_operand.vmem [shape: bf16[2,2,2,128], index: 3, kind: output, shape index: {0}]   ;;  %s5565_s4 = inlined_call_operand.vmem [shape: f32[2,1,128], index: 4, kind: output, shape index: {1}]   ;;  %s5566_s5 = inlined_call_operand.vmem [shape: f32[2,1,128], index: 5, kind: output, shape index: {2}]  }
   0x1 LB: > { %s3388_s19 = sadd.s32 4294967295, %s4676_s18   ;;  %p3392_p0 = scmp.ge.s32.totalorder %s4676_s18, 1  ;;  %s4676_s18 = sphi %s4709_s18, %s16_s18  }
   0x2   : > { %p192_p1 = scmp.lt.s32.totalorder %s4676_s18, 3 }
   0x4   : > { %p193_p2 = pnand %p3392_p0, %p192_p1 }
   0x5   : > { %p225_p3 = scmp.lt.s32.totalorder (!%p193_p2), %s3388_s19, 1 }
   0x6   : > { %196 = sbr.rel (%p193_p2) target bundleno = 491 (0x1eb), region = 32 }
   0xb   : > { %v4407_v0 = vld [vmem:[%s5562_s1 + $0x178] sm:$0xff]   ;;  %v4411_v4 = vld [vmem:[%s5562_s1 + $0x170] sm:$0xff]   ;;  %v4415_v8 = vld [vmem:[%s5562_s1 + $0x168] sm:$0xff]   ;;  %s5568_s19 = smov (!%p225_p3, %s3388_s19), 1  ;;  %v378_v28 = vlaneseq  ;;  %v4678_v36 = vmov 1983009808  }
   0xc   : > { %v4408_v1 = vld [vmem:[%s5562_s1 + $0x1f8] sm:$0xff]   ;;  %4045 = vmatprep.subr.bf16.mxu0 %v4407_v0  ;;  %v4412_v5 = vld [vmem:[%s5562_s1 + $0x1f0] sm:$0xff]   ;;  %v4416_v9 = vld [vmem:[%s5562_s1 + $0x1e8] sm:$0xff]   ;;  %s4397_s26 = smul.u32 24, %s5568_s19  ;;  %v376_v37 = vunpack.c.l.s4 %v4678_v36  ;;  %s3394_s28 = sshll.u32 %s5568_s19, 1  ;;  %vm1747_vm0 = vcmask 1041408  }
   0xd   : > { %v4409_v2 = vld [vmem:[%s5562_s1 + $0x138] sm:$0xff]   ;;  %4067 = vmatprep.subr.bf16.mxu1 %v4408_v1  ;;  %v4413_v6 = vld [vmem:[%s5562_s1 + $0x130] sm:$0xff]   ;;  %v4417_v10 = vld [vmem:[%s5562_s1 + $0x128] sm:$0xff]   ;;  %v379_v33 = vshrl.u32 %v378_v28, 7  ;;  %s5541_s6 = scalar_lea.vmem %s5564_s3, %s3394_s28  ;;  %s236_s9 = scalar_lea.vmem %s5565_s4, %s5568_s19 }
   0xe   : > { %v4410_v3 = vld [vmem:[%s5562_s1 + $0x1b8] sm:$0xff]   ;;  %4046 = vmatpush3.bf16.msra.mxu0 %v4409_v2  ;;  %v4414_v7 = vld [vmem:[%s5562_s1 + $0x1b0] sm:$0xff]   ;;  %v4418_v11 = vld [vmem:[%s5562_s1 + $0x1a8] sm:$0xff]   ;;  %s4817_s12 = scalar_lea.vmem %s5561_s0, %s4397_s26  ;;  %v377_v39 = vunpack.c.0.s8 %v376_v37  ;;  %s239_s13 = scalar_lea.vmem %s5566_s5, %s5568_s19 }
   0xf   : > { %4068 = vmatpush3.bf16.msra.mxu1 %v4410_v3  ;;  %4047 = vmatprep.subr.bf16.mxu0 %v4411_v4  ;;  %v4419_v12 = vld [vmem:[%s5562_s1 + $0x160] sm:$0xff]   ;;  %v4423_v16 = vld [vmem:[%s5562_s1 + $0x158] sm:$0xff]   ;;  %v4427_v20 = vld [vmem:[%s5562_s1 + $0x150] sm:$0xff]  }
  0x10   : > { %4069 = vmatprep.subr.bf16.mxu1 %v4412_v5  ;;  %v4420_v13 = vld [vmem:[%s5562_s1 + $0x1e0] sm:$0xff]   ;;  %v4424_v17 = vld [vmem:[%s5562_s1 + $0x1d8] sm:$0xff]   ;;  %v4428_v21 = vld [vmem:[%s5562_s1 + $0x1d0] sm:$0xff]   ;;  %v4832_v41 = vsub.s32 %v377_v39, %v379_v33 }
  0x11   : > { %v4421_v14 = vld [vmem:[%s5562_s1 + $0x120] sm:$0xff]   ;;  %v4425_v18 = vld [vmem:[%s5562_s1 + $0x118] sm:$0xff]   ;;  %v4429_v22 = vld [vmem:[%s5562_s1 + $0x110] sm:$0xff]  }
  0x12   : > { %4048 = vmatpush3.bf16.msra.mxu0 %v4413_v6  ;;  %v4422_v15 = vld [vmem:[%s5562_s1 + $0x1a0] sm:$0xff]   ;;  %v4426_v19 = vld [vmem:[%s5562_s1 + $0x198] sm:$0xff]   ;;  %v4430_v23 = vld [vmem:[%s5562_s1 + $0x190] sm:$0xff]  }
  0x13   : > { %4070 = vmatpush3.bf16.msra.mxu1 %v4414_v7  ;;  %4049 = vmatprep.subr.bf16.mxu0 %v4415_v8  ;;  %v4431_v24 = vld [vmem:[%s5562_s1 + $0x148] sm:$0xff]   ;;  %v4435_v29 = vld [vmem:[%s5562_s1 + $0x140] sm:$0xff]   ;;  %v4440_v35 = vld [vmem:[%s5562_s1 + $0x78] sm:$0xff]  }
  0x14   : > { %4071 = vmatprep.subr.bf16.mxu1 %v4416_v9  ;;  %v4432_v25 = vld [vmem:[%s5562_s1 + $0x1c8] sm:$0xff]   ;;  %v4436_v30 = vld [vmem:[%s5562_s1 + $0x1c0] sm:$0xff]   ;;  %v4441_v38 = vld [vmem:[%s5562_s1 + $0xf8] sm:$0xff]  }
  0x15   : > { %v4433_v26 = vld [vmem:[%s5562_s1 + $0x108] sm:$0xff]   ;;  %v4437_v31 = vld [vmem:[%s5562_s1 + $0x100] sm:$0xff]   ;;  %v4442_v58 = vld [vmem:[%s5562_s1 + $0x38] sm:$0xff]  }
  0x16   : > { %4050 = vmatpush3.bf16.msra.mxu0 %v4417_v10  ;;  %v4434_v27 = vld [vmem:[%s5562_s1 + $0x188] sm:$0xff]   ;;  %v4438_v32 = vld [vmem:[%s5562_s1 + $0x180] sm:$0xff]   ;;  %v4443_v61 = vld [vmem:[%s5562_s1 + $0xb8] sm:$0xff]  }
  0x17   : > { %4072 = vmatpush3.bf16.msra.mxu1 %v4418_v11  ;;  %4051 = vmatprep.subr.bf16.mxu0 %v4419_v12  ;;  %v307_v34 = vld [vmem:[%s4817_s12] sm:$0xff]  ;;  %v4444_v0 = vld [vmem:[%s5562_s1 + $0x70] sm:$0xff]   ;;  %v4448_v4 = vld [vmem:[%s5562_s1 + $0x68] sm:$0xff]  }
  0x18   : > { %4073 = vmatprep.subr.bf16.mxu1 %v4420_v13  ;;  %v374_v40 = vcombine.high %v307_v34, %v307_v34  ;;  %v381_v42 = vrot.slane %v307_v34, %v4832_v41  ;;  %v4445_v1 = vld [vmem:[%s5562_s1 + $0xf0] sm:$0xff]   ;;  %v4449_v5 = vld [vmem:[%s5562_s1 + $0xe8] sm:$0xff]   ;;  %v4452_v8 = vld [vmem:[%s5562_s1 + $0x60] sm:$0xff]  }
  0x19   : > { %v4446_v2 = vld [vmem:[%s5562_s1 + $0x30] sm:$0xff]   ;;  %v4450_v6 = vld [vmem:[%s5562_s1 + $0x28] sm:$0xff]   ;;  %v4453_v9 = vld [vmem:[%s5562_s1 + $0xe0] sm:$0xff]  }
  0x1a   : > { %4052 = vmatpush3.bf16.msra.mxu0 %v4421_v14  ;;  %v388_v43 = vrot.slane %v374_v40, %v4832_v41  ;;  %v389_v44 = vcombine.high %v381_v42, %v381_v42  ;;  %v392_v46 = vshrl.u32 %v381_v42, 16  ;;  %v394_v47 = vshll.u32 %v381_v42, 16  ;;  %v4447_v3 = vld [vmem:[%s5562_s1 + $0xb0] sm:$0xff]   ;;  %v4451_v7 = vld [vmem:[%s5562_s1 + $0xa8] sm:$0xff]   ;;  %v4454_v10 = vld [vmem:[%s5562_s1 + $0x20] sm:$0xff]  }
  0x1b   : > { %4074 = vmatpush3.bf16.msra.mxu1 %v4422_v15  ;;  %4053 = vmatprep.subr.bf16.mxu0 %v4423_v16  ;;  %v4455_v11 = vld [vmem:[%s5562_s1 + $0xa0] sm:$0xff]   ;;  %v4456_v12 = vld [vmem:[%s5562_s1 + $0x58] sm:$0xff]   ;;  %v4460_v16 = vld [vmem:[%s5562_s1 + $0x50] sm:$0xff]  }
  0x1c   : > { %4075 = vmatprep.subr.bf16.mxu1 %v4424_v17  ;;  %v390_v45 = vcombine.high %v388_v43, %v388_v43  ;;  %v406_v48 = vshrl.u32 %v388_v43, 16  ;;  %v408_v49 = vshll.u32 %v388_v43, 16  ;;  %v399_v50 = vshrl.u32 %v389_v44, 16  ;;  %v4457_v13 = vld [vmem:[%s5562_s1 + $0xd8] sm:$0xff]   ;;  %v4461_v17 = vld [vmem:[%s5562_s1 + $0xd0] sm:$0xff]   ;;  %v4467_v28 = vld [vmem:[%s5562_s1 + $0x88] sm:$0xff]  }
  0x1d   : > { %v401_v51 = vshll.u32 %v389_v44, 16  ;;  %v396_v54 = vrot.slane %v394_v47, 1  ;;  %v4458_v14 = vld [vmem:[%s5562_s1 + $0x18] sm:$0xff]   ;;  %v4471_v33 = vld [vmem:[%s5562_s1 + $0x80] sm:$0xff]   ;;  %v4478_v39 = vld [vmem:[%s5562_s1 + $0x2f0] sm:$0xff]  }
  0x1e   : > { %4054 = vmatpush3.bf16.msra.mxu0 %v4425_v18  ;;  %v413_v52 = vshrl.u32 %v390_v45, 16  ;;  %v415_v53 = vshll.u32 %v390_v45, 16  ;;  %v410_v55 = vrot.slane %v408_v49, 1  ;;  %v4459_v15 = vld [vmem:[%s5562_s1 + $0x98] sm:$0xff]   ;;  %v4462_v18 = vld [vmem:[%s5562_s1 + $0x10] sm:$0xff]   ;;  %v4481_v43 = vld [vmem:[%s5562_s1 + $0x268] sm:$0xff]  }
  0x1f   : > { %4076 = vmatpush3.bf16.msra.mxu1 %v4426_v19  ;;  %4055 = vmatprep.subr.bf16.mxu0 %v4427_v20  ;;  %v403_v56 = vrot.slane %v401_v51, 1  ;;  %v397_v59 = vor.u32 %v396_v54, %v392_v46  ;;  %v242_v19 = vld [vmem:[%s4817_s12] sm:$0x55]  ;;  %v4463_v20 = vld [vmem:[%s5562_s1 + $0x90] sm:$0xff]   ;;  %v4473_v34 = vld [vmem:[%s5562_s1 + $0x278] sm:$0xff]  }
  0x20   : > { %4077 = vmatprep.subr.bf16.mxu1 %v4428_v21  ;;  %v417_v57 = vrot.slane %v415_v53, 1  ;;  %v411_v60 = vor.u32 %v410_v55, %v406_v48  ;;  %v703_v21 = vrot.slane %v242_v19, %v4832_v41  ;;  %v4475_v36 = vld [vmem:[%s5562_s1 + $0x238] sm:$0xff]   ;;  %v4479_v40 = vld [vmem:[%s5562_s1 + $0x230] sm:$0xff]   ;;  %v4482_v44 = vld [vmem:[%s5562_s1 + $0x2e8] sm:$0xff]  }
  0x21   : > { %v404_v62 = vor.u32 %v403_v56, %v399_v50  ;;  %v4476_v37 = vld [vmem:[%s5562_s1 + $0x2b8] sm:$0xff]   ;;  %v4480_v42 = vld [vmem:[%s5562_s1 + $0x2b0] sm:$0xff]   ;;  %v4483_v45 = vld [vmem:[%s5562_s1 + $0x228] sm:$0xff]  }
  0x22   : > { %4056 = vmatpush3.bf16.msra.mxu0 %v4429_v22  ;;  %v418_v63 = vor.u32 %v417_v57, %v413_v52  ;;  %v696_v22 = vcombine.high %v242_v19, %v242_v19  ;;  %v4484_v46 = vld [vmem:[%s5562_s1 + $0x2a8] sm:$0xff]   ;;  %v4485_v47 = vld [vmem:[%s5562_s1 + $0x260] sm:$0xff]   ;;  %v4489_v51 = vld [vmem:[%s5562_s1 + $0x258] sm:$0xff]  }
  0x23   : > { %4078 = vmatpush3.bf16.msra.mxu1 %v4430_v23  ;;  %4057 = vmatprep.subr.bf16.mxu0 %v4431_v24  ;;  %v4464_v23 = vld [vmem:[%s5562_s1 + $0x48] sm:$0xff]   ;;  %v4486_v48 = vld [vmem:[%s5562_s1 + $0x2e0] sm:$0xff]   ;;  %v4490_v52 = vld [vmem:[%s5562_s1 + $0x2d8] sm:$0xff]  }
  0x24   : > { %4079 = vmatprep.subr.bf16.mxu1 %v4432_v25  ;;  %647 = vmatprep.mubr.bf16.mxu0 %v404_v62  ;;  %v4465_v24 = vld [vmem:[%s5562_s1 + $0xc8] sm:$0xff]   ;;  %v711_v25 = vcombine.high %v703_v21, %v703_v21  ;;  %v4487_v49 = vld [vmem:[%s5562_s1 + $0x220] sm:$0xff]   ;;  %v4491_v53 = vld [vmem:[%s5562_s1 + $0x218] sm:$0xff]  }
  0x25   : > { %687 = vmatprep.mubr.bf16.mxu1 %v418_v63  ;;  %v4488_v50 = vld [vmem:[%s5562_s1 + $0x2a0] sm:$0xff]   ;;  %v4492_v54 = vld [vmem:[%s5562_s1 + $0x298] sm:$0xff]   ;;  %v4493_v55 = vld [vmem:[%s5562_s1 + $0x250] sm:$0xff]  }
  0x26   : > { %4058 = vmatpush3.bf16.msra.mxu0 %v4433_v26  ;;  %v710_v26 = vrot.slane %v696_v22, %v4832_v41  ;;  %v4494_v56 = vld [vmem:[%s5562_s1 + $0x2d0] sm:$0xff]   ;;  %v4498_v63 = vld [vmem:[%s5562_s1 + $0x2c8] sm:$0xff]   ;;  %v4519_v22 = vld [vmem:[%s5562_s1 + $0x3e0] sm:$0xff]  }
  0x27   : > { %4080 = vmatpush3.bf16.msra.mxu1 %v4434_v27  ;;  %4059 = vmatprep.subr.bf16.mxu0 %v4435_v29  ;;  %v4466_v27 = vld [vmem:[%s5562_s1 + $0x8] sm:$0xff]   ;;  %v4495_v57 = vld [vmem:[%s5562_s1 + $0x210] sm:$0xff]  }
  0x28   : > { %4081 = vmatprep.subr.bf16.mxu1 %v4436_v30  ;;  %v712_v29 = vcombine.high %v710_v26, %v710_v26  ;;  %v4468_v30 = vld [vmem:[%s5562_s1 + $0x40] sm:$0xff]   ;;  %v4516_v19 = vld [vmem:[%s5562_s1 + $0x328] sm:$0xff]  }
  0x2a   : > { %4060 = vmatpush3.bf16.msra.mxu0 %v4437_v31  ;;  %v4469_v31 = vld [vmem:[%s5562_s1 + $0xc0] sm:$0xff]  }
  0x2b   : > { %4082 = vmatpush3.bf16.msra.mxu1 %v4438_v32  ;;  %4089 = vmatprep.subr.bf16.mxu0 %v4440_v35  ;;  %v4470_v32 = vld [vmem:[%s5562_s1] sm:$0xff]   ;;  %v4474_v35 = vld [vmem:[%s5562_s1 + $0x2f8] sm:$0xff]  }
  0x2c   : > { %4111 = vmatprep.subr.bf16.mxu1 %v4441_v38  ;;  %v4477_v38 = vld [vmem:[%s5562_s1 + $0x270] sm:$0xff]  }
  0x2d   : > { %648 = vmatmul.mubr.bf16.vlgmr.msra.gmra.mxu0 %v397_v59  ;;  %v3523_v59 = vld [vmem:[%s4817_s12 + $0x8] sm:$0x55] }
  0x2e   : > { %688 = vmatmul.mubr.bf16.vlgmr.msra.gmra.mxu1 %v411_v60  ;;  %4090 = vmatpush3.bf16.msra.mxu0 %v4442_v58  ;;  %v4496_v58 = vld [vmem:[%s5562_s1 + $0x290] sm:$0xff]   ;;  %v4497_v60 = vld [vmem:[%s5562_s1 + $0x248] sm:$0xff]   ;;  %v1057_v62 = vcombine.high %v3523_v59, %v3523_v59 }
  0x2f   : > { %4112 = vmatpush3.bf16.msra.mxu1 %v4443_v61  ;;  %4091 = vmatprep.subr.bf16.mxu0 %v4444_v0  ;;  %v1064_v61 = vrot.slane %v3523_v59, %v4832_v41  ;;  %v4499_v0 = vld [vmem:[%s5562_s1 + $0x208] sm:$0xff]  }
  0x30   : > { %4113 = vmatprep.subr.bf16.mxu1 %v4445_v1  ;;  %941 = vmatprep.mubr.bf16.mxu0 %v711_v25  ;;  %v4522_v25 = vld [vmem:[%s5562_s1 + $0x358] sm:$0xff]  }
  0x31   : > { %981 = vmatprep.mubr.bf16.mxu1 %v712_v29  ;;  %v1072_v1 = vcombine.high %v1064_v61, %v1064_v61  ;;  %v4526_v29 = vld [vmem:[%s5562_s1 + $0x350] sm:$0xff]  }
  0x32   : > { %4092 = vmatpush3.bf16.msra.mxu0 %v4446_v2  ;;  %v1071_v2 = vrot.slane %v1057_v62, %v4832_v41  ;;  %v4540_v62 = vld [vmem:[%s5562_s1 + $0x1f8] sm:$0xff]  }
  0x33   : > { %4114 = vmatpush3.bf16.msra.mxu1 %v4447_v3  ;;  %4093 = vmatprep.subr.bf16.mxu0 %v4448_v4  ;;  %v4500_v3 = vld [vmem:[%s5562_s1 + $0x288] sm:$0xff]   ;;  %v4501_v4 = vld [vmem:[%s5562_s1 + $0x240] sm:$0xff]  }
  0x34   : > { %4115 = vmatprep.subr.bf16.mxu1 %v4449_v5  ;;  %v1073_v5 = vcombine.high %v1071_v2, %v1071_v2 }
  0x36   : > { %4094 = vmatpush3.bf16.msra.mxu0 %v4450_v6  ;;  %v4502_v6 = vld [vmem:[%s5562_s1 + $0x2c0] sm:$0xff]  }
  0x37   : > { %4116 = vmatpush3.bf16.msra.mxu1 %v4451_v7  ;;  %4095 = vmatprep.subr.bf16.mxu0 %v4452_v8  ;;  %v4503_v7 = vld [vmem:[%s5562_s1 + $0x200] sm:$0xff]  }
  0x38   : > { %4117 = vmatprep.subr.bf16.mxu1 %v4453_v9  ;;  %v4504_v8 = vld [vmem:[%s5562_s1 + $0x280] sm:$0xff]   ;;  %v4506_v9 = vld [vmem:[%s5562_s1 + $0x378] sm:$0xff]  }
  0x3a   : > { %4096 = vmatpush3.bf16.msra.mxu0 %v4454_v10  ;;  %v4507_v10 = vld [vmem:[%s5562_s1 + $0x3f8] sm:$0xff]  }
  0x3b   : > { %4118 = vmatpush3.bf16.msra.mxu1 %v4455_v11  ;;  %4097 = vmatprep.subr.bf16.mxu0 %v4456_v12  ;;  %v4508_v11 = vld [vmem:[%s5562_s1 + $0x338] sm:$0xff]  }
  0x3c   : > { %4119 = vmatprep.subr.bf16.mxu1 %v4457_v13  ;;  %v4509_v12 = vld [vmem:[%s5562_s1 + $0x3b8] sm:$0xff]   ;;  %v4510_v13 = vld [vmem:[%s5562_s1 + $0x370] sm:$0xff]  }
  0x3e   : > { %4098 = vmatpush3.bf16.msra.mxu0 %v4458_v14  ;;  %v4511_v14 = vld [vmem:[%s5562_s1 + $0x3f0] sm:$0xff]  }
  0x3f   : > { %4120 = vmatpush3.bf16.msra.mxu1 %v4459_v15  ;;  %4099 = vmatprep.subr.bf16.mxu0 %v4460_v16  ;;  %v4512_v15 = vld [vmem:[%s5562_s1 + $0x330] sm:$0xff]  }
  0x40   : > { %4121 = vmatprep.subr.bf16.mxu1 %v4461_v17  ;;  %v4513_v16 = vld [vmem:[%s5562_s1 + $0x3b0] sm:$0xff]   ;;  %v4514_v17 = vld [vmem:[%s5562_s1 + $0x368] sm:$0xff]  }
  0x42   : > { %4100 = vmatpush3.bf16.msra.mxu0 %v4462_v18  ;;  %v4515_v18 = vld [vmem:[%s5562_s1 + $0x3e8] sm:$0xff]  }
  0x43   : > { %4122 = vmatpush3.bf16.msra.mxu1 %v4463_v20  ;;  %4101 = vmatprep.subr.bf16.mxu0 %v4464_v23  ;;  %v4517_v20 = vld [vmem:[%s5562_s1 + $0x3a8] sm:$0xff]   ;;  %v4520_v23 = vld [vmem:[%s5562_s1 + $0x320] sm:$0xff]  }
  0x44   : > { %4123 = vmatprep.subr.bf16.mxu1 %v4465_v24  ;;  %v4521_v24 = vld [vmem:[%s5562_s1 + $0x3a0] sm:$0xff]  }
  0x46   : > { %4102 = vmatpush3.bf16.msra.mxu0 %v4466_v27  ;;  %v4524_v27 = vld [vmem:[%s5562_s1 + $0x318] sm:$0xff]  }
  0x47   : > { %4124 = vmatpush3.bf16.msra.mxu1 %v4467_v28  ;;  %4103 = vmatprep.subr.bf16.mxu0 %v4468_v30  ;;  %v4525_v28 = vld [vmem:[%s5562_s1 + $0x398] sm:$0xff]   ;;  %v4527_v30 = vld [vmem:[%s5562_s1 + $0x3d0] sm:$0xff]  }
  0x48   : > { %4125 = vmatprep.subr.bf16.mxu1 %v4469_v31  ;;  %v4528_v31 = vld [vmem:[%s5562_s1 + $0x310] sm:$0xff]  }
  0x4a   : > { %4104 = vmatpush3.bf16.msra.mxu0 %v4470_v32  ;;  %v4529_v32 = vld [vmem:[%s5562_s1 + $0x390] sm:$0xff]  }
  0x4b   : > { %4126 = vmatpush3.bf16.msra.mxu1 %v4471_v33  ;;  %4133 = vmatprep.subr.bf16.mxu0 %v4473_v34  ;;  %v3620_v33 = vld [vmem:[%s4817_s12 + $0x8] sm:$0xff] }
  0x4c   : > { %4155 = vmatprep.subr.bf16.mxu1 %v4474_v35  ;;  %v4530_v34 = vld [vmem:[%s5562_s1 + $0x348] sm:$0xff]   ;;  %v1425_v35 = vrot.slane %v3620_v33, %v4832_v41 }
  0x4d   : > { %942 = vmatmul.mubr.bf16.vlgmr.msra.gmra.mxu0 %v703_v21  ;;  %v4518_v21 = vld [vmem:[%s5562_s1 + $0x360] sm:$0xff]  }
  0x4e   : > { %982 = vmatmul.mubr.bf16.vlgmr.msra.gmra.mxu1 %v710_v26  ;;  %4134 = vmatpush3.bf16.msra.mxu0 %v4475_v36  ;;  %v4523_v26 = vld [vmem:[%s5562_s1 + $0x3d8] sm:$0xff]   ;;  %v1418_v36 = vcombine.high %v3620_v33, %v3620_v33 }
  0x4f   : > { %4156 = vmatpush3.bf16.msra.mxu1 %v4476_v37  ;;  %4135 = vmatprep.subr.bf16.mxu0 %v4477_v38  ;;  %v4531_v37 = vld [vmem:[%s5562_s1 + $0x3c8] sm:$0xff]   ;;  %v4572_v33 = vld [vmem:[%s5562_s1 + $0xf8] sm:$0xff]  }
  0x50   : > { %4157 = vmatprep.subr.bf16.mxu1 %v4478_v39  ;;  %1302 = vmatprep.mubr.bf16.mxu0 %v1072_v1  ;;  %v4532_v38 = vld [vmem:[%s5562_s1 + $0x308] sm:$0xff]  }
  0x51   : > { %1342 = vmatprep.mubr.bf16.mxu1 %v1073_v5  ;;  %v4533_v39 = vld [vmem:[%s5562_s1 + $0x388] sm:$0xff]   ;;  %v4544_v5 = vld [vmem:[%s5562_s1 + $0x1f0] sm:$0xff]  }
  0x52   : > { %4136 = vmatpush3.bf16.msra.mxu0 %v4479_v40  ;;  %v1433_v40 = vcombine.high %v1425_v35, %v1425_v35 }
  0x53   : > { %4158 = vmatpush3.bf16.msra.mxu1 %v4480_v42  ;;  %4137 = vmatprep.subr.bf16.mxu0 %v4481_v43  ;;  %v1432_v42 = vrot.slane %v1418_v36, %v4832_v41  ;;  %v1438_v43 = vshll.u32 %v1425_v35, 16  ;;  %v4575_v36 = vld [vmem:[%s5562_s1 + $0x70] sm:$0xff]  }
  0x54   : > { %4159 = vmatprep.subr.bf16.mxu1 %v4482_v44  ;;  %v4534_v44 = vld [vmem:[%s5562_s1 + $0x340] sm:$0xff]  }
  0x56   : > { %4138 = vmatpush3.bf16.msra.mxu0 %v4483_v45  ;;  %v4535_v45 = vld [vmem:[%s5562_s1 + $0x3c0] sm:$0xff]  }
  0x57   : > { %4160 = vmatpush3.bf16.msra.mxu1 %v4484_v46  ;;  %4139 = vmatprep.subr.bf16.mxu0 %v4485_v47  ;;  %v1443_v46 = vshrl.u32 %v1433_v40, 16  ;;  %v1445_v47 = vshll.u32 %v1433_v40, 16  ;;  %v4579_v40 = vld [vmem:[%s5562_s1 + $0x68] sm:$0xff]  }
  0x58   : > { %4161 = vmatprep.subr.bf16.mxu1 %v4486_v48  ;;  %v1434_v48 = vcombine.high %v1432_v42, %v1432_v42 }
  0x5a   : > { %4140 = vmatpush3.bf16.msra.mxu0 %v4487_v49  ;;  %v1436_v49 = vshrl.u32 %v1425_v35, 16  ;;  %v4574_v35 = vld [vmem:[%s5562_s1 + $0xb8] sm:$0xff]  }
  0x5b   : > { %4162 = vmatpush3.bf16.msra.mxu1 %v4488_v50  ;;  %4141 = vmatprep.subr.bf16.mxu0 %v4489_v51  ;;  %v1452_v50 = vshll.u32 %v1432_v42, 16  ;;  %v4536_v51 = vld [vmem:[%s5562_s1 + $0x300] sm:$0xff]  }
  0x5c   : > { %4163 = vmatprep.subr.bf16.mxu1 %v4490_v52  ;;  %v4537_v52 = vld [vmem:[%s5562_s1 + $0x380] sm:$0xff]  }
  0x5e   : > { %4142 = vmatpush3.bf16.msra.mxu0 %v4491_v53  ;;  %v1447_v53 = vrot.slane %v1445_v47, 1  ;;  %v4585_v47 = vld [vmem:[%s5562_s1 + $0x20] sm:$0xff]  }
  0x5f   : > { %4164 = vmatpush3.bf16.msra.mxu1 %v4492_v54  ;;  %4143 = vmatprep.subr.bf16.mxu0 %v4493_v55  ;;  %v1457_v54 = vshrl.u32 %v1434_v48, 16  ;;  %v1459_v55 = vshll.u32 %v1434_v48, 16  ;;  %v4586_v48 = vld [vmem:[%s5562_s1 + $0xa0] sm:$0xff]  }
  0x60   : > { %4165 = vmatprep.subr.bf16.mxu1 %v4494_v56  ;;  %v1440_v56 = vrot.slane %v1438_v43, 1  ;;  %v1448_v59 = vor.u32 %v1447_v53, %v1443_v46  ;;  %v4581_v43 = vld [vmem:[%s5562_s1 + $0x28] sm:$0xff]   ;;  %v4584_v46 = vld [vmem:[%s5562_s1 + $0xe0] sm:$0xff]   ;;  %v4591_v53 = vld [vmem:[%s5562_s1 + $0x50] sm:$0xff]  }
  0x62   : > { %4144 = vmatpush3.bf16.msra.mxu0 %v4495_v57  ;;  %v1450_v57 = vshrl.u32 %v1432_v42, 16  ;;  %v5136_v1 = vor.u32 %v1440_v56, %v1436_v49  ;;  %v4580_v42 = vld [vmem:[%s5562_s1 + $0xe8] sm:$0xff]   ;;  %v4587_v49 = vld [vmem:[%s5562_s1 + $0x58] sm:$0xff]   ;;  %v4594_v56 = vld [vmem:[%s5562_s1 + $0x90] sm:$0xff]  }
  0x63   : > { %4166 = vmatpush3.bf16.msra.mxu1 %v4496_v58  ;;  %4145 = vmatprep.subr.bf16.mxu0 %v4497_v60  ;;  %v1454_v58 = vrot.slane %v1452_v50, 1  ;;  %v1461_v60 = vrot.slane %v1459_v55, 1  ;;  %v4588_v50 = vld [vmem:[%s5562_s1 + $0xd8] sm:$0xff]   ;;  %v4593_v55 = vld [vmem:[%s5562_s1 + $0x10] sm:$0xff]  }
  0x64   : > { %4167 = vmatprep.subr.bf16.mxu1 %v4498_v63 }
  0x65   : > { %v1462_v63 = vor.u32 %v1461_v60, %v1457_v54  ;;  %v4592_v54 = vld [vmem:[%s5562_s1 + $0xd0] sm:$0xff]  }
  0x66   : > { %4146 = vmatpush3.bf16.msra.mxu0 %v4499_v0  ;;  %v4541_v0 = vld [vmem:[%s5562_s1 + $0x138] sm:$0xff]  }
  0x67   : > { %4168 = vmatpush3.bf16.msra.mxu1 %v4500_v3  ;;  %4147 = vmatprep.subr.bf16.mxu0 %v4501_v4  ;;  %v4542_v3 = vld [vmem:[%s5562_s1 + $0x1b8] sm:$0xff]   ;;  %v4543_v4 = vld [vmem:[%s5562_s1 + $0x170] sm:$0xff]  }
  0x68   : > { %4169 = vmatprep.subr.bf16.mxu1 %v4502_v6  ;;  %v4545_v6 = vld [vmem:[%s5562_s1 + $0x130] sm:$0xff]  }
  0x6a   : > { %4148 = vmatpush3.bf16.msra.mxu0 %v4503_v7  ;;  %v4546_v7 = vld [vmem:[%s5562_s1 + $0x1b0] sm:$0xff]  }
  0x6b   : > { %4170 = vmatpush3.bf16.msra.mxu1 %v4504_v8  ;;  %4177 = vmatprep.subr.bf16.mxu0 %v4506_v9  ;;  %v4547_v8 = vld [vmem:[%s5562_s1 + $0x168] sm:$0xff]  }
  0x6c   : > { %4199 = vmatprep.subr.bf16.mxu1 %v4507_v10  ;;  %v4548_v9 = vld [vmem:[%s5562_s1 + $0x1e8] sm:$0xff]  }
  0x6d   : > { %1303 = vmatmul.mubr.bf16.vlgmr.msra.gmra.mxu0 %v1064_v61  ;;  %v4539_v61 = vld [vmem:[%s5562_s1 + $0x178] sm:$0xff]   ;;  %v4549_v10 = vld [vmem:[%s5562_s1 + $0x128] sm:$0xff]  }
  0x6e   : > { %1343 = vmatmul.mubr.bf16.vlgmr.msra.gmra.mxu1 %v1071_v2  ;;  %4178 = vmatpush3.bf16.msra.mxu0 %v4508_v11  ;;  %v5138_v2 = vor.u32 %v1454_v58, %v1450_v57  ;;  %v4550_v11 = vld [vmem:[%s5562_s1 + $0x1a8] sm:$0xff]  }
  0x6f   : > { %4200 = vmatpush3.bf16.msra.mxu1 %v4509_v12  ;;  %4179 = vmatprep.subr.bf16.mxu0 %v4510_v13  ;;  %v4551_v12 = vld [vmem:[%s5562_s1 + $0x160] sm:$0xff]   ;;  %v4595_v57 = vld [vmem:[%s5562_s1 + $0x48] sm:$0xff]  }
  0x70   : > { %4201 = vmatprep.subr.bf16.mxu1 %v4511_v14  ;;  %1691 = vmatprep.mubr.bf16.mxu0 %v1448_v59  ;;  %v4552_v13 = vld [vmem:[%s5562_s1 + $0x1e0] sm:$0xff]   ;;  %v3718_v58 = vld [vmem:[%s4817_s12 + $0x8] sm:$0x55] }
  0x71   : > { %1731 = vmatprep.mubr.bf16.mxu1 %v1462_v63  ;;  %v4553_v14 = vld [vmem:[%s5562_s1 + $0x120] sm:$0xff]   ;;  %v2227_v60 = vrot.slane %v3718_v58, %v4832_v41 }
  0x72   : > { %4180 = vmatpush3.bf16.msra.mxu0 %v4512_v15  ;;  %v4554_v15 = vld [vmem:[%s5562_s1 + $0x1a0] sm:$0xff]  }
  0x73   : > { %4202 = vmatpush3.bf16.msra.mxu1 %v4513_v16  ;;  %4181 = vmatprep.subr.bf16.mxu0 %v4514_v17  ;;  %v4555_v16 = vld [vmem:[%s5562_s1 + $0x158] sm:$0xff]  }
  0x74   : > { %4203 = vmatprep.subr.bf16.mxu1 %v4515_v18  ;;  %v4556_v17 = vld [vmem:[%s5562_s1 + $0x1d8] sm:$0xff]  }
  0x75   : > { %v4557_v18 = vld [vmem:[%s5562_s1 + $0x118] sm:$0xff]  }
  0x76   : > { %4182 = vmatpush3.bf16.msra.mxu0 %v4516_v19  ;;  %v4558_v19 = vld [vmem:[%s5562_s1 + $0x198] sm:$0xff]  }
  0x77   : > { %4204 = vmatpush3.bf16.msra.mxu1 %v4517_v20  ;;  %4183 = vmatprep.subr.bf16.mxu0 %v4518_v21  ;;  %v4559_v20 = vld [vmem:[%s5562_s1 + $0x150] sm:$0xff]  }
  0x78   : > { %4205 = vmatprep.subr.bf16.mxu1 %v4519_v22  ;;  %v4560_v21 = vld [vmem:[%s5562_s1 + $0x1d0] sm:$0xff]  }
  0x79   : > { %v4561_v22 = vld [vmem:[%s5562_s1 + $0x110] sm:$0xff]  }
  0x7a   : > { %4184 = vmatpush3.bf16.msra.mxu0 %v4520_v23  ;;  %v4562_v23 = vld [vmem:[%s5562_s1 + $0x190] sm:$0xff]  }
  0x7b   : > { %4206 = vmatpush3.bf16.msra.mxu1 %v4521_v24  ;;  %4185 = vmatprep.subr.bf16.mxu0 %v4522_v25  ;;  %v4563_v24 = vld [vmem:[%s5562_s1 + $0x148] sm:$0xff]  }
  0x7c   : > { %4207 = vmatprep.subr.bf16.mxu1 %v4523_v26  ;;  %v4564_v25 = vld [vmem:[%s5562_s1 + $0x1c8] sm:$0xff]  }
  0x7d   : > { %v4565_v26 = vld [vmem:[%s5562_s1 + $0x108] sm:$0xff]  }
  0x7e   : > { %4186 = vmatpush3.bf16.msra.mxu0 %v4524_v27  ;;  %v4566_v27 = vld [vmem:[%s5562_s1 + $0x188] sm:$0xff]  }
  0x7f   : > { %4208 = vmatpush3.bf16.msra.mxu1 %v4525_v28  ;;  %4187 = vmatprep.subr.bf16.mxu0 %v4526_v29  ;;  %v4567_v28 = vld [vmem:[%s5562_s1 + $0x140] sm:$0xff]  }
  0x80   : > { %4209 = vmatprep.subr.bf16.mxu1 %v4527_v30  ;;  %v4568_v29 = vld [vmem:[%s5562_s1 + $0x1c0] sm:$0xff]  }
  0x81   : > { %v4569_v30 = vld [vmem:[%s5562_s1 + $0x100] sm:$0xff]  }
  0x82   : > { %4188 = vmatpush3.bf16.msra.mxu0 %v4528_v31  ;;  %v4570_v31 = vld [vmem:[%s5562_s1 + $0x180] sm:$0xff]  }
  0x83   : > { %4210 = vmatpush3.bf16.msra.mxu1 %v4529_v32  ;;  %4189 = vmatprep.subr.bf16.mxu0 %v4530_v34  ;;  %v4571_v32 = vld [vmem:[%s5562_s1 + $0x78] sm:$0xff]  }
  0x84   : > { %4211 = vmatprep.subr.bf16.mxu1 %v4531_v37  ;;  %v4573_v34 = vld [vmem:[%s5562_s1 + $0x38] sm:$0xff]   ;;  %v4576_v37 = vld [vmem:[%s5562_s1 + $0xf0] sm:$0xff]  }
  0x86   : > { %4190 = vmatpush3.bf16.msra.mxu0 %v4532_v38  ;;  %v4577_v38 = vld [vmem:[%s5562_s1 + $0x30] sm:$0xff]  }
  0x87   : > { %4212 = vmatpush3.bf16.msra.mxu1 %v4533_v39  ;;  %4191 = vmatprep.subr.bf16.mxu0 %v4534_v44  ;;  %v4578_v39 = vld [vmem:[%s5562_s1 + $0xb0] sm:$0xff]   ;;  %v4582_v44 = vld [vmem:[%s5562_s1 + $0xa8] sm:$0xff]  }
  0x88   : > { %4213 = vmatprep.subr.bf16.mxu1 %v4535_v45  ;;  %v4583_v45 = vld [vmem:[%s5562_s1 + $0x60] sm:$0xff]  }
  0x8a   : > { %4192 = vmatpush3.bf16.msra.mxu0 %v4536_v51  ;;  %v4589_v51 = vld [vmem:[%s5562_s1 + $0x18] sm:$0xff]  }
  0x8b   : > { %4214 = vmatpush3.bf16.msra.mxu1 %v4537_v52  ;;  %4221 = vmatprep.subr.bf16.mxu0 %v4539_v61  ;;  %v4590_v52 = vld [vmem:[%s5562_s1 + $0x98] sm:$0xff]   ;;  %v2220_v61 = vcombine.high %v3718_v58, %v3718_v58 }
  0x8c   : > { %4243 = vmatprep.subr.bf16.mxu1 %v4540_v62  ;;  %v4597_v62 = vld [vmem:[%s5562_s1 + $0x8] sm:$0xff]  }
  0x8d   : > { %1692 = vmatmul.mubr.bf16.vlgmr.msra.gmra.mxu0 %v5136_v1 }
  0x8e   : > { %1732 = vmatmul.mubr.bf16.vlgmr.msra.gmra.mxu1 %v5138_v2  ;;  %4222 = vmatpush3.bf16.msra.mxu0 %v4541_v0  ;;  %v2235_v0 = vcombine.high %v2227_v60, %v2227_v60 }
  0x8f   : > { %4244 = vmatpush3.bf16.msra.mxu1 %v4542_v3  ;;  %4223 = vmatprep.subr.bf16.mxu0 %v4543_v4  ;;  %v4600_v3 = vld [vmem:[%s5562_s1 + $0xc0] sm:$0xff]  }
  0x90   : > { %4245 = vmatprep.subr.bf16.mxu1 %v4544_v5  ;;  %2171 = vmatprep.mubr.bf16.mxu0 %v1448_v59  ;;  %v4596_v59 = vld [vmem:[%s5562_s1 + $0xc8] sm:$0xff]   ;;  %v4601_v5 = vld [vmem:[%s5562_s1] sm:$0xff]  }
  0x91   : > { %2211 = vmatprep.mubr.bf16.mxu1 %v1462_v63  ;;  %v4598_v63 = vld [vmem:[%s5562_s1 + $0x88] sm:$0xff]  }
  0x92   : > { %4224 = vmatpush3.bf16.msra.mxu0 %v4545_v6  ;;  %v4602_v6 = vld [vmem:[%s5562_s1 + $0x80] sm:$0xff]  }
  0x93   : > { %4246 = vmatpush3.bf16.msra.mxu1 %v4546_v7  ;;  %4225 = vmatprep.subr.bf16.mxu0 %v4547_v8  ;;  %v4604_v7 = vld [vmem:[%s5562_s1 + $0x278] sm:$0xff]  }
  0x94   : > { %4247 = vmatprep.subr.bf16.mxu1 %v4548_v9  ;;  %v4605_v8 = vld [vmem:[%s5562_s1 + $0x2f8] sm:$0xff]  }
  0x95   : > { %v4606_v9 = vld [vmem:[%s5562_s1 + $0x238] sm:$0xff]  }
  0x96   : > { %4226 = vmatpush3.bf16.msra.mxu0 %v4549_v10  ;;  %v4607_v10 = vld [vmem:[%s5562_s1 + $0x2b8] sm:$0xff]  }
  0x97   : > { %4248 = vmatpush3.bf16.msra.mxu1 %v4550_v11  ;;  %4227 = vmatprep.subr.bf16.mxu0 %v4551_v12  ;;  %v4608_v11 = vld [vmem:[%s5562_s1 + $0x270] sm:$0xff]  }
  0x98   : > { %4249 = vmatprep.subr.bf16.mxu1 %v4552_v13  ;;  %v4609_v12 = vld [vmem:[%s5562_s1 + $0x2f0] sm:$0xff]  }
  0x99   : > { %v4610_v13 = vld [vmem:[%s5562_s1 + $0x230] sm:$0xff]  }
  0x9a   : > { %4228 = vmatpush3.bf16.msra.mxu0 %v4553_v14  ;;  %v4611_v14 = vld [vmem:[%s5562_s1 + $0x2b0] sm:$0xff]  }
  0x9b   : > { %4250 = vmatpush3.bf16.msra.mxu1 %v4554_v15  ;;  %4229 = vmatprep.subr.bf16.mxu0 %v4555_v16  ;;  %v4612_v15 = vld [vmem:[%s5562_s1 + $0x268] sm:$0xff]  }
  0x9c   : > { %4251 = vmatprep.subr.bf16.mxu1 %v4556_v17  ;;  %v4613_v16 = vld [vmem:[%s5562_s1 + $0x2e8] sm:$0xff]  }
  0x9d   : > { %v4614_v17 = vld [vmem:[%s5562_s1 + $0x228] sm:$0xff]  }
  0x9e   : > { %4230 = vmatpush3.bf16.msra.mxu0 %v4557_v18  ;;  %v4615_v18 = vld [vmem:[%s5562_s1 + $0x2a8] sm:$0xff]  }
  0x9f   : > { %4252 = vmatpush3.bf16.msra.mxu1 %v4558_v19  ;;  %4231 = vmatprep.subr.bf16.mxu0 %v4559_v20  ;;  %v4616_v19 = vld [vmem:[%s5562_s1 + $0x260] sm:$0xff]  }
  0xa0   : > { %4253 = vmatprep.subr.bf16.mxu1 %v4560_v21  ;;  %v4617_v20 = vld [vmem:[%s5562_s1 + $0x2e0] sm:$0xff]  }
  0xa1   : > { %v4618_v21 = vld [vmem:[%s5562_s1 + $0x220] sm:$0xff]  }
  0xa2   : > { %4232 = vmatpush3.bf16.msra.mxu0 %v4561_v22  ;;  %v4619_v22 = vld [vmem:[%s5562_s1 + $0x2a0] sm:$0xff]  }
  0xa3   : > { %4254 = vmatpush3.bf16.msra.mxu1 %v4562_v23  ;;  %4233 = vmatprep.subr.bf16.mxu0 %v4563_v24  ;;  %v4620_v23 = vld [vmem:[%s5562_s1 + $0x258] sm:$0xff]  }
  0xa4   : > { %4255 = vmatprep.subr.bf16.mxu1 %v4564_v25  ;;  %v4621_v24 = vld [vmem:[%s5562_s1 + $0x2d8] sm:$0xff]  }
  0xa5   : > { %v4622_v25 = vld [vmem:[%s5562_s1 + $0x218] sm:$0xff]  }
  0xa6   : > { %4234 = vmatpush3.bf16.msra.mxu0 %v4565_v26  ;;  %v4623_v26 = vld [vmem:[%s5562_s1 + $0x298] sm:$0xff]  }
  0xa7   : > { %4256 = vmatpush3.bf16.msra.mxu1 %v4566_v27  ;;  %4235 = vmatprep.subr.bf16.mxu0 %v4567_v28  ;;  %v4624_v27 = vld [vmem:[%s5562_s1 + $0x250] sm:$0xff]  }
  0xa8   : > { %4257 = vmatprep.subr.bf16.mxu1 %v4568_v29  ;;  %v4625_v28 = vld [vmem:[%s5562_s1 + $0x2d0] sm:$0xff]  }
  0xa9   : > { %v4626_v29 = vld [vmem:[%s5562_s1 + $0x210] sm:$0xff]  }
  0xaa   : > { %4236 = vmatpush3.bf16.msra.mxu0 %v4569_v30  ;;  %v4627_v30 = vld [vmem:[%s5562_s1 + $0x290] sm:$0xff]  }
  0xab   : > { %4258 = vmatpush3.bf16.msra.mxu1 %v4570_v31  ;;  %4265 = vmatprep.subr.bf16.mxu0 %v4571_v32  ;;  %v4628_v31 = vld [vmem:[%s5562_s1 + $0x248] sm:$0xff]  }
  0xac   : > { %4287 = vmatprep.subr.bf16.mxu1 %v4572_v33  ;;  %v4629_v32 = vld [vmem:[%s5562_s1 + $0x2c8] sm:$0xff]   ;;  %v3848_v33 = vld [vmem:[%s4817_s12 + $0x10] sm:$0x55] }
  0xad   : > { %2172 = vmatmul.mubr.bf16.vlgmr.msra.gmra.mxu0 %v5136_v1  ;;  %v2234_v1 = vrot.slane %v2220_v61, %v4832_v41 }
  0xae   : > { %2212 = vmatmul.mubr.bf16.vlgmr.msra.gmra.mxu1 %v5138_v2  ;;  %4266 = vmatpush3.bf16.msra.mxu0 %v4573_v34  ;;  %v4599_v2 = vld [vmem:[%s5562_s1 + $0x40] sm:$0xff]   ;;  %v4630_v34 = vld [vmem:[%s5562_s1 + $0x208] sm:$0xff]  }
  0xaf   : > { %4288 = vmatpush3.bf16.msra.mxu1 %v4574_v35  ;;  %4267 = vmatprep.subr.bf16.mxu0 %v4575_v36  ;;  %v2236_v4 = vcombine.high %v2234_v1, %v2234_v1  ;;  %v2587_v35 = vrot.slane %v3848_v33, %v4832_v41  ;;  %v2580_v36 = vcombine.high %v3848_v33, %v3848_v33 }
  0xb0   : > { %4289 = vmatprep.subr.bf16.mxu1 %v4576_v37  ;;  %2465 = vmatprep.mubr.bf16.mxu0 %v2235_v0  ;;  %v4631_v37 = vld [vmem:[%s5562_s1 + $0x288] sm:$0xff]  }
  0xb1   : > { %2505 = vmatprep.mubr.bf16.mxu1 %v2236_v4 }
  0xb2   : > { %4268 = vmatpush3.bf16.msra.mxu0 %v4577_v38  ;;  %v4632_v38 = vld [vmem:[%s5562_s1 + $0x240] sm:$0xff]  }
  0xb3   : > { %4290 = vmatpush3.bf16.msra.mxu1 %v4578_v39  ;;  %4269 = vmatprep.subr.bf16.mxu0 %v4579_v40  ;;  %v2595_v39 = vcombine.high %v2587_v35, %v2587_v35  ;;  %v2594_v40 = vrot.slane %v2580_v36, %v4832_v41  ;;  %v4668_v36 = vld [vmem:[%s5562_s1 + $0x380] sm:$0xff]  }
  0xb4   : > { %4291 = vmatprep.subr.bf16.mxu1 %v4580_v42  ;;  %v4633_v42 = vld [vmem:[%s5562_s1 + $0x2c0] sm:$0xff]  }
  0xb6   : > { %4270 = vmatpush3.bf16.msra.mxu0 %v4581_v43  ;;  %v4634_v43 = vld [vmem:[%s5562_s1 + $0x200] sm:$0xff]  }
  0xb7   : > { %4292 = vmatpush3.bf16.msra.mxu1 %v4582_v44  ;;  %4271 = vmatprep.subr.bf16.mxu0 %v4583_v45  ;;  %v2596_v44 = vcombine.high %v2594_v40, %v2594_v40  ;;  %v4635_v45 = vld [vmem:[%s5562_s1 + $0x280] sm:$0xff]  }
  0xb8   : > { %4293 = vmatprep.subr.bf16.mxu1 %v4584_v46  ;;  %v4637_v46 = vld [vmem:[%s5562_s1 + $0x378] sm:$0xff]  }
  0xba   : > { %4272 = vmatpush3.bf16.msra.mxu0 %v4585_v47  ;;  %v4638_v47 = vld [vmem:[%s5562_s1 + $0x3f8] sm:$0xff]  }
  0xbb   : > { %4294 = vmatpush3.bf16.msra.mxu1 %v4586_v48  ;;  %4273 = vmatprep.subr.bf16.mxu0 %v4587_v49  ;;  %v4639_v48 = vld [vmem:[%s5562_s1 + $0x338] sm:$0xff]  }
  0xbc   : > { %4295 = vmatprep.subr.bf16.mxu1 %v4588_v50  ;;  %v4640_v49 = vld [vmem:[%s5562_s1 + $0x3b8] sm:$0xff]   ;;  %v4641_v50 = vld [vmem:[%s5562_s1 + $0x370] sm:$0xff]  }
  0xbe   : > { %4274 = vmatpush3.bf16.msra.mxu0 %v4589_v51  ;;  %v4642_v51 = vld [vmem:[%s5562_s1 + $0x3f0] sm:$0xff]  }
  0xbf   : > { %4296 = vmatpush3.bf16.msra.mxu1 %v4590_v52  ;;  %4275 = vmatprep.subr.bf16.mxu0 %v4591_v53  ;;  %v4643_v52 = vld [vmem:[%s5562_s1 + $0x330] sm:$0xff]  }
  0xc0   : > { %4297 = vmatprep.subr.bf16.mxu1 %v4592_v54 }
  0xc2   : > { %4276 = vmatpush3.bf16.msra.mxu0 %v4593_v55  ;;  %v4644_v55 = vld [vmem:[%s5562_s1 + $0x3b0] sm:$0xff]  }
  0xc3   : > { %4298 = vmatpush3.bf16.msra.mxu1 %v4594_v56  ;;  %4277 = vmatprep.subr.bf16.mxu0 %v4595_v57  ;;  %v4645_v56 = vld [vmem:[%s5562_s1 + $0x368] sm:$0xff]  }
  0xc4   : > { %4299 = vmatprep.subr.bf16.mxu1 %v4596_v59  ;;  %v4646_v59 = vld [vmem:[%s5562_s1 + $0x3e8] sm:$0xff]  }
  0xc6   : > { %4278 = vmatpush3.bf16.msra.mxu0 %v4597_v62  ;;  %v4647_v62 = vld [vmem:[%s5562_s1 + $0x328] sm:$0xff]  }
  0xc7   : > { %4300 = vmatpush3.bf16.msra.mxu1 %v4598_v63  ;;  %4279 = vmatprep.subr.bf16.mxu0 %v4599_v2 }
  0xc8   : > { %4301 = vmatprep.subr.bf16.mxu1 %v4600_v3  ;;  %v4649_v3 = vld [vmem:[%s5562_s1 + $0x360] sm:$0xff]  }
  0xca   : > { %4280 = vmatpush3.bf16.msra.mxu0 %v4601_v5 }
  0xcb   : > { %4302 = vmatpush3.bf16.msra.mxu1 %v4602_v6  ;;  %4309 = vmatprep.subr.bf16.mxu0 %v4604_v7  ;;  %v4650_v6 = vld [vmem:[%s5562_s1 + $0x3e0] sm:$0xff]  }
  0xcc   : > { %4331 = vmatprep.subr.bf16.mxu1 %v4605_v8  ;;  %v4651_v7 = vld [vmem:[%s5562_s1 + $0x320] sm:$0xff]  }
  0xcd   : > { %2466 = vmatmul.mubr.bf16.vlgmr.msra.gmra.mxu0 %v2227_v60  ;;  %v4652_v8 = vld [vmem:[%s5562_s1 + $0x3a0] sm:$0xff]  }
  0xce   : > { %2506 = vmatmul.mubr.bf16.vlgmr.msra.gmra.mxu1 %v2234_v1  ;;  %4310 = vmatpush3.bf16.msra.mxu0 %v4606_v9  ;;  %v4648_v1 = vld [vmem:[%s5562_s1 + $0x3a8] sm:$0xff]   ;;  %v4653_v9 = vld [vmem:[%s5562_s1 + $0x358] sm:$0xff]  }
  0xcf   : > { %4332 = vmatpush3.bf16.msra.mxu1 %v4607_v10  ;;  %4311 = vmatprep.subr.bf16.mxu0 %v4608_v11  ;;  %v4654_v10 = vld [vmem:[%s5562_s1 + $0x3d8] sm:$0xff]  }
  0xd0   : > { %4333 = vmatprep.subr.bf16.mxu1 %v4609_v12  ;;  %2825 = vmatprep.mubr.bf16.mxu0 %v2595_v39  ;;  %v4655_v11 = vld [vmem:[%s5562_s1 + $0x318] sm:$0xff]  }
  0xd1   : > { %2865 = vmatprep.mubr.bf16.mxu1 %v2596_v44  ;;  %v4656_v12 = vld [vmem:[%s5562_s1 + $0x398] sm:$0xff]  }
  0xd2   : > { %4312 = vmatpush3.bf16.msra.mxu0 %v4610_v13  ;;  %v4657_v13 = vld [vmem:[%s5562_s1 + $0x350] sm:$0xff]  }
  0xd3   : > { %4334 = vmatpush3.bf16.msra.mxu1 %v4611_v14  ;;  %4313 = vmatprep.subr.bf16.mxu0 %v4612_v15  ;;  %v4658_v14 = vld [vmem:[%s5562_s1 + $0x3d0] sm:$0xff]  }
  0xd4   : > { %4335 = vmatprep.subr.bf16.mxu1 %v4613_v16  ;;  %v4659_v15 = vld [vmem:[%s5562_s1 + $0x310] sm:$0xff]  }
  0xd5   : > { %v4660_v16 = vld [vmem:[%s5562_s1 + $0x390] sm:$0xff]  }
  0xd6   : > { %4314 = vmatpush3.bf16.msra.mxu0 %v4614_v17  ;;  %v4661_v17 = vld [vmem:[%s5562_s1 + $0x348] sm:$0xff]  }
  0xd7   : > { %4336 = vmatpush3.bf16.msra.mxu1 %v4615_v18  ;;  %4315 = vmatprep.subr.bf16.mxu0 %v4616_v19  ;;  %v4662_v18 = vld [vmem:[%s5562_s1 + $0x3c8] sm:$0xff]   ;;  %v3945_v19 = vld [vmem:[%s4817_s12 + $0x10] sm:$0xff] }
  0xd8   : > { %4337 = vmatprep.subr.bf16.mxu1 %v4617_v20  ;;  %v2947_v20 = vrot.slane %v3945_v19, %v4832_v41 }
  0xda   : > { %4316 = vmatpush3.bf16.msra.mxu0 %v4618_v21  ;;  %v2940_v21 = vcombine.high %v3945_v19, %v3945_v19 }
  0xdb   : > { %4338 = vmatpush3.bf16.msra.mxu1 %v4619_v22  ;;  %4317 = vmatprep.subr.bf16.mxu0 %v4620_v23  ;;  %v4663_v22 = vld [vmem:[%s5562_s1 + $0x308] sm:$0xff]  }
  0xdc   : > { %4339 = vmatprep.subr.bf16.mxu1 %v4621_v24  ;;  %v4664_v23 = vld [vmem:[%s5562_s1 + $0x388] sm:$0xff]   ;;  %v2955_v24 = vcombine.high %v2947_v20, %v2947_v20 }
  0xde   : > { %4318 = vmatpush3.bf16.msra.mxu0 %v4622_v25  ;;  %v2954_v25 = vrot.slane %v2940_v21, %v4832_v41  ;;  %v4667_v41 = vld [vmem:[%s5562_s1 + $0x300] sm:$0xff]  }
  0xdf   : > { %4340 = vmatpush3.bf16.msra.mxu1 %v4623_v26  ;;  %4319 = vmatprep.subr.bf16.mxu0 %v4624_v27  ;;  %v2960_v26 = vshll.u32 %v2947_v20, 16  ;;  %v4665_v27 = vld [vmem:[%s5562_s1 + $0x340] sm:$0xff]  }
  0xe0   : > { %4341 = vmatprep.subr.bf16.mxu1 %v4625_v28  ;;  %v4666_v28 = vld [vmem:[%s5562_s1 + $0x3c0] sm:$0xff]  }
  0xe1   : > { %v2962_v33 = vrot.slane %v2960_v26, 1 }
  0xe2   : > { %4320 = vmatpush3.bf16.msra.mxu0 %v4626_v29  ;;  %v2965_v29 = vshrl.u32 %v2955_v24, 16 }
  0xe3   : > { %4342 = vmatpush3.bf16.msra.mxu1 %v4627_v30  ;;  %4321 = vmatprep.subr.bf16.mxu0 %v4628_v31  ;;  %v2967_v30 = vshll.u32 %v2955_v24, 16  ;;  %v2956_v31 = vcombine.high %v2954_v25, %v2954_v25 }
  0xe4   : > { %4343 = vmatprep.subr.bf16.mxu1 %v4629_v32  ;;  %v2958_v32 = vshrl.u32 %v2947_v20, 16 }
  0xe5   : > { %v2981_v39 = vshll.u32 %v2956_v31, 16 }
  0xe6   : > { %4322 = vmatpush3.bf16.msra.mxu0 %v4630_v34  ;;  %v2972_v34 = vshrl.u32 %v2954_v25, 16  ;;  %v2963_v44 = vor.u32 %v2962_v33, %v2958_v32 }
  0xe7   : > { %4344 = vmatpush3.bf16.msra.mxu1 %v4631_v37  ;;  %4323 = vmatprep.subr.bf16.mxu0 %v4632_v38  ;;  %v2969_v37 = vrot.slane %v2967_v30, 1  ;;  %v2979_v38 = vshrl.u32 %v2956_v31, 16 }
  0xe8   : > { %4345 = vmatprep.subr.bf16.mxu1 %v4633_v42 }
  0xe9   : > { %v2970_v42 = vor.u32 %v2969_v37, %v2965_v29 }
  0xea   : > { %4324 = vmatpush3.bf16.msra.mxu0 %v4634_v43  ;;  %v2983_v43 = vrot.slane %v2981_v39, 1 }
  0xeb   : > { %4346 = vmatpush3.bf16.msra.mxu1 %v4635_v45  ;;  %4353 = vmatprep.subr.bf16.mxu0 %v4637_v46 }
  0xec   : > { %4375 = vmatprep.subr.bf16.mxu1 %v4638_v47  ;;  %v2984_v46 = vor.u32 %v2983_v43, %v2979_v38 }
  0xed   : > { %v4061_v53 = vpop.f32.mrf.mxu0  ;;  %2826 = vmatmul.mubr.bf16.vlgmr.msra.gmra.mxu0 %v2587_v35  ;;  %v2974_v35 = vshll.u32 %v2954_v25, 16 }
  0xee   : > { %v4083_v54 = vpop.f32.mrf.mxu1  ;;  %2866 = vmatmul.mubr.bf16.vlgmr.msra.gmra.mxu1 %v2594_v40  ;;  %4354 = vmatpush3.bf16.msra.mxu0 %v4639_v48 }
  0xef   : > { %4376 = vmatpush3.bf16.msra.mxu1 %v4640_v49  ;;  %v4062_v57 = vpop.f32.mrf.mxu0  ;;  %4355 = vmatprep.subr.bf16.mxu0 %v4641_v50  ;;  %v2976_v40 = vrot.slane %v2974_v35, 1 }
  0xf0   : > { %v4084_v58 = vpop.f32.mrf.mxu1  ;;  %4377 = vmatprep.subr.bf16.mxu1 %v4642_v51  ;;  %v4063_v60 = vadd.f32 %v4062_v57, %v4061_v53  ;;  %3213 = vmatprep.mubr.bf16.mxu0 %v2970_v42 }
  0xf1   : > { %v4085_v61 = vadd.f32 %v4084_v58, %v4083_v54  ;;  %v4064_v63 = vpop.f32.mrf.mxu0  ;;  %v2977_v45 = vor.u32 %v2976_v40, %v2972_v34  ;;  %3253 = vmatprep.mubr.bf16.mxu1 %v2984_v46 }
  0xf2   : > { %v4086_v0 = vpop.f32.mrf.mxu1  ;;  %4356 = vmatpush3.bf16.msra.mxu0 %v4643_v52 }
  0xf3   : > { %v5465_v2 = vadd.f32 %v4085_v61, %v4063_v60  ;;  %4378 = vmatpush3.bf16.msra.mxu1 %v4644_v55  ;;  %v4065_v4 = vpop.f32.mrf.mxu0  ;;  %4357 = vmatprep.subr.bf16.mxu0 %v4645_v56 }
  0xf4   : > { %v4087_v5 = vpop.f32.mrf.mxu1  ;;  %4379 = vmatprep.subr.bf16.mxu1 %v4646_v59 }
  0xf6   : > { %4358 = vmatpush3.bf16.msra.mxu0 %v4647_v62 }
  0xf7   : > { %4380 = vmatpush3.bf16.msra.mxu1 %v4648_v1  ;;  %4359 = vmatprep.subr.bf16.mxu0 %v4649_v3 }
  0xf8   : > { %4381 = vmatprep.subr.bf16.mxu1 %v4650_v6 }
  0xfa   : > { %4360 = vmatpush3.bf16.msra.mxu0 %v4651_v7 }
  0xfb   : > { %4382 = vmatpush3.bf16.msra.mxu1 %v4652_v8  ;;  %4361 = vmatprep.subr.bf16.mxu0 %v4653_v9 }
  0xfc   : > { %4383 = vmatprep.subr.bf16.mxu1 %v4654_v10 }
  0xfe   : > { %4362 = vmatpush3.bf16.msra.mxu0 %v4655_v11 }
  0xff   : > { %4384 = vmatpush3.bf16.msra.mxu1 %v4656_v12  ;;  %4363 = vmatprep.subr.bf16.mxu0 %v4657_v13 }
 0x100   : > { %4385 = vmatprep.subr.bf16.mxu1 %v4658_v14 }
 0x102   : > { %4364 = vmatpush3.bf16.msra.mxu0 %v4659_v15 }
 0x103   : > { %4386 = vmatpush3.bf16.msra.mxu1 %v4660_v16  ;;  %4365 = vmatprep.subr.bf16.mxu0 %v4661_v17  ;;  %v5534_v16 = vld [vmem:[%s5563_s2] ss:$0 sm:$0xff] }
 0x104   : > { %4387 = vmatprep.subr.bf16.mxu1 %v4662_v18 }
 0x106   : > { %4366 = vmatpush3.bf16.msra.mxu0 %v4663_v22 }
 0x107   : > { %4388 = vmatpush3.bf16.msra.mxu1 %v4664_v23  ;;  %4367 = vmatprep.subr.bf16.mxu0 %v4665_v27 }
 0x108   : > { %4389 = vmatprep.subr.bf16.mxu1 %v4666_v28 }
 0x10a   : > { %4368 = vmatpush3.bf16.msra.mxu0 %v4667_v41 }
 0x10b   : > { %4390 = vmatpush3.bf16.msra.mxu1 %v4668_v36 }
 0x10d   : > { %v4105_v47 = vpop.f32.mrf.mxu0  ;;  %3214 = vmatmul.mubr.bf16.vlgmr.msra.gmra.mxu0 %v2963_v44 }
 0x10e   : > { %v4127_v48 = vpop.f32.mrf.mxu1  ;;  %3254 = vmatmul.mubr.bf16.vlgmr.msra.gmra.mxu1 %v2977_v45 }
 0x10f   : > { %v4106_v49 = vpop.f32.mrf.mxu0 }
 0x110   : > { %v4128_v50 = vpop.f32.mrf.mxu1  ;;  %v4107_v51 = vadd.f32 %v4106_v49, %v4105_v47 }
 0x111   : > { %v4108_v52 = vpop.f32.mrf.mxu0  ;;  %v4129_v55 = vadd.f32 %v4128_v50, %v4127_v48 }
 0x112   : > { %v4130_v53 = vpop.f32.mrf.mxu1  ;;  %v944_v54 = vadd.f32 %v4107_v51, %v5465_v2 }
 0x113   : > { %v4109_v56 = vpop.f32.mrf.mxu0 }
 0x114   : > { %v4131_v57 = vpop.f32.mrf.mxu1  ;;  %v984_v58 = vadd.f32 %v4129_v55, %v944_v54 }
 0x12d   : > { %v4149_v59 = vpop.f32.mrf.mxu0 }
 0x12e   : > { %v4171_v60 = vpop.f32.mrf.mxu1 }
 0x12f   : > { %v4150_v61 = vpop.f32.mrf.mxu0 }
 0x130   : > { %v4172_v62 = vpop.f32.mrf.mxu1  ;;  %v4151_v4 = vadd.f32 %v4150_v61, %v4149_v59 }
 0x131   : > { %v4152_v63 = vpop.f32.mrf.mxu0  ;;  %v4173_v5 = vadd.f32 %v4172_v62, %v4171_v60 }
 0x132   : > { %v4174_v0 = vpop.f32.mrf.mxu1 }
 0x133   : > { %v4153_v1 = vpop.f32.mrf.mxu0  ;;  %v1345_v8 = vadd.f32 %v4173_v5, %v4151_v4 }
 0x134   : > { %v4175_v3 = vpop.f32.mrf.mxu1 }
 0x135   : > { %v1350_v14 = vadd.f32 %v1345_v8, %v984_v58 }
 0x14d   : > { %v4193_v6 = vpop.f32.mrf.mxu0 }
 0x14e   : > { %v4215_v7 = vpop.f32.mrf.mxu1 }
 0x14f   : > { %v4194_v9 = vpop.f32.mrf.mxu0 }
 0x150   : > { %v4216_v2 = vpop.f32.mrf.mxu1  ;;  %v4195_v10 = vadd.f32 %v4194_v9, %v4193_v6 }
 0x151   : > { %v4217_v11 = vadd.f32 %v4216_v2, %v4215_v7  ;;  %v4196_v12 = vpop.f32.mrf.mxu0 }
 0x152   : > { %v4218_v13 = vpop.f32.mrf.mxu1 }
 0x153   : > { %v1734_v15 = vadd.f32 %v4217_v11, %v4195_v10  ;;  %v4197_v17 = vpop.f32.mrf.mxu0 }
 0x154   : > { %v4219_v18 = vpop.f32.mrf.mxu1 }
 0x155   : > { %v1739_v19 = vadd.f32 %v1734_v15, %v1350_v14 }
 0x157   : > { %v1746_v20 = vadd.f32 %v5534_v16, %v1739_v19 }
 0x159   : > { %v1765_v21 = vpack.c.bf16 %v1746_v20, %v1746_v20  ;;  %v1756_v53 = vmul.f32 %v1746_v20, %v1746_v20  ;;  %v1748_v56 = vsel %vm1747_vm0, %v1746_v20, 0.0 }
 0x15a   : > { %v1749_v61 = vrot.slane %v1748_v56, 4 }
 0x15b   : > { %1766 = vst [vmem:[%s5541_s6] sm:$0x1] %v1765_v21  ;;  %v1757_v59 = vsel %vm1747_vm0, %v1756_v53, 0.0 }
 0x15c   : > { %v1758_v3 = vrot.slane %v1757_v59, 4  ;;  %v1750_v8 = vadd.f32 %v1749_v61, %v1748_v56 }
 0x15e   : > { %v1759_v11 = vadd.f32 %v1758_v3, %v1757_v59  ;;  %v1751_v13 = vrot.slane %v1750_v8, 2 }
 0x160   : > { %v1760_v18 = vrot.slane %v1759_v11, 2  ;;  %v1752_v21 = vadd.f32 %v1751_v13, %v1750_v8 }
 0x16d   : > { %v4237_v22 = vpop.f32.mrf.mxu0 }
 0x16e   : > { %v4259_v23 = vpop.f32.mrf.mxu1 }
 0x16f   : > { %v4238_v24 = vpop.f32.mrf.mxu0 }
 0x170   : > { %v4260_v25 = vpop.f32.mrf.mxu1  ;;  %v4239_v26 = vadd.f32 %v4238_v24, %v4237_v22  ;;  %v1761_v24 = vadd.f32 %v1760_v18, %v1759_v11 }
 0x171   : > { %v4261_v27 = vadd.f32 %v4260_v25, %v4259_v23  ;;  %v4240_v28 = vpop.f32.mrf.mxu0 }
 0x172   : > { %v4262_v29 = vpop.f32.mrf.mxu1 }
 0x173   : > { %v2214_v30 = vadd.f32 %v4261_v27, %v4239_v26  ;;  %v4241_v31 = vpop.f32.mrf.mxu0  ;;  %v1753_v27 = vrot.slane %v1752_v21, 1  ;;  %v1762_v29 = vrot.slane %v1761_v24, 1 }
 0x174   : > { %v4263_v32 = vpop.f32.mrf.mxu1 }
 0x175   : > { %v1754_v32 = vadd.f32 %v1753_v27, %v1752_v21 }
 0x18d   : > { %v4281_v33 = vpop.f32.mrf.mxu0 }
 0x18e   : > { %v4303_v34 = vpop.f32.mrf.mxu1 }
 0x18f   : > { %v4282_v35 = vpop.f32.mrf.mxu0 }
 0x190   : > { %v4304_v41 = vpop.f32.mrf.mxu1  ;;  %v4283_v36 = vadd.f32 %v4282_v35, %v4281_v33  ;;  %v1763_v35 = vadd.f32 %v1762_v29, %v1761_v24 }
 0x191   : > { %v4284_v37 = vpop.f32.mrf.mxu0  ;;  %v4305_v40 = vadd.f32 %v4304_v41, %v4303_v34 }
 0x192   : > { %v4306_v38 = vpop.f32.mrf.mxu1  ;;  %v2468_v39 = vadd.f32 %v4283_v36, %v2214_v30 }
 0x193   : > { %v4285_v42 = vpop.f32.mrf.mxu0 }
 0x194   : > { %v4307_v43 = vpop.f32.mrf.mxu1  ;;  %v2508_v44 = vadd.f32 %v4305_v40, %v2468_v39 }
 0x1ad   : > { %v4325_v45 = vpop.f32.mrf.mxu0 }
 0x1ae   : > { %v4347_v46 = vpop.f32.mrf.mxu1 }
 0x1af   : > { %v4326_v47 = vpop.f32.mrf.mxu0 }
 0x1b0   : > { %v4348_v48 = vpop.f32.mrf.mxu1  ;;  %v4327_v54 = vadd.f32 %v4326_v47, %v4325_v45 }
 0x1b1   : > { %v4328_v49 = vpop.f32.mrf.mxu0  ;;  %v4349_v55 = vadd.f32 %v4348_v48, %v4347_v46 }
 0x1b2   : > { %v4350_v50 = vpop.f32.mrf.mxu1 }
 0x1b3   : > { %v4329_v51 = vpop.f32.mrf.mxu0  ;;  %v2868_v60 = vadd.f32 %v4349_v55, %v4327_v54 }
 0x1b4   : > { %v4351_v52 = vpop.f32.mrf.mxu1 }
 0x1b5   : > { %v2873_v6 = vadd.f32 %v2868_v60, %v2508_v44 }
 0x1cd   : > { %v4369_v57 = vpop.f32.mrf.mxu0 }
 0x1ce   : > { %v4391_v58 = vpop.f32.mrf.mxu1 }
 0x1cf   : > { %v4370_v62 = vpop.f32.mrf.mxu0 }
 0x1d0   : > { %v4392_v63 = vpop.f32.mrf.mxu1  ;;  %v4371_v0 = vadd.f32 %v4370_v62, %v4369_v57 }
 0x1d1   : > { %v4393_v1 = vadd.f32 %v4392_v63, %v4391_v58  ;;  %v4372_v4 = vpop.f32.mrf.mxu0 }
 0x1d2   : > { %v4394_v5 = vpop.f32.mrf.mxu1 }
 0x1d3   : > { %v3256_v7 = vadd.f32 %v4393_v1, %v4371_v0  ;;  %v4373_v9 = vpop.f32.mrf.mxu0 }
 0x1d4   : > { %v4395_v2 = vpop.f32.mrf.mxu1 }
 0x1d5   : > { %v3261_v10 = vadd.f32 %v3256_v7, %v2873_v6 }
 0x1d7   : > { %v3262_v12 = vadd.f32 %v5534_v16, %v3261_v10 }
 0x1d9   : > { %v3263_v14 = vsel %vm1747_vm0, %v3262_v12, 0.0  ;;  %v3271_v15 = vmul.f32 %v3262_v12, %v3262_v12  ;;  %v3280_v17 = vpack.c.bf16 %v3262_v12, %v3262_v12 }
 0x1da   : > { %v3264_v19 = vrot.slane %v3263_v14, 4 }
 0x1db   : > { %v3272_v20 = vsel %vm1747_vm0, %v3271_v15, 0.0  ;;  %4042 = vst [vmem:[%s5541_s6 + $0x1] sm:$0x1] %v3280_v17 }
 0x1dc   : > { %v3265_v22 = vadd.f32 %v3264_v19, %v3263_v14  ;;  %v3273_v23 = vrot.slane %v3272_v20, 4 }
 0x1de   : > { %v3266_v25 = vrot.slane %v3265_v22, 2  ;;  %v3274_v26 = vadd.f32 %v3273_v23, %v3272_v20 }
 0x1e0   : > { %v3267_v16 = vadd.f32 %v3266_v25, %v3265_v22  ;;  %v3275_v28 = vrot.slane %v3274_v26, 2 }
 0x1e2   : > { %v3268_v30 = vrot.slane %v3267_v16, 1  ;;  %v3276_v31 = vadd.f32 %v3275_v28, %v3274_v26 }
 0x1e4   : > { %v3269_v33 = vadd.f32 %v3268_v30, %v3267_v16  ;;  %v3277_v34 = vrot.slane %v3276_v31, 1 }
 0x1e6   : > { %v3270_v41 = vadd.f32 %v3269_v33, %v1754_v32  ;;  %v3278_v36 = vadd.f32 %v3277_v34, %v3276_v31 }
 0x1e8   : > { %v3279_v37 = vadd.f32 %v3278_v36, %v1763_v35  ;;  %3283 = vst [vmem:[%s236_s9] sm:$0x1] %v3270_v41 }
 0x1ea   : > { %3284 = vst [vmem:[%s239_s13] sm:$0x1] %v3279_v37 }
 0x1eb PF: > { %s16_s18 = sadd.s32 1, %s4676_s18  }
 0x1ec   : > { %p13_p4 = scmp.ge.s32.totalorder %s16_s18, 4  }
 0x1ee   :  { %15 = sbr.rel (!%p13_p4) target bundleno = 1 (0x1), region = 92 }

// kernel: encoder_forward.12
= control target key start
LH: loop header
LB: loop body
LE: loop exit
PB: predicated region body
PF: predicated region fallthrough
CT: control target
= control target key end

     0   :  { %s2358_s12 = smov 0   ;;  %s2800_s0 = inlined_call_operand.vmem [shape: bf16[2,2,2,512], index: 0, kind: input, shape index: {}]   ;;  %s2801_s1 = inlined_call_operand.vmem [shape: bf16[4,512,128], index: 1, kind: input, shape index: {}]   ;;  %s2802_s2 = inlined_call_operand.vmem [shape: f32[1,128], index: 2, kind: input, shape index: {}]   ;;  %s2803_s3 = inlined_call_operand.vmem [shape: f32[2,1,1,128], index: 3, kind: output, shape index: {}]  }
   0x1 LB: > { %s1683_s13 = sadd.s32 4294967295, %s2335_s12   ;;  %p1687_p0 = scmp.ge.s32.totalorder %s2335_s12, 1  ;;  %s2335_s12 = sphi %s2358_s12, %s13_s12  }
   0x2   : > { %p136_p1 = scmp.lt.s32.totalorder %s2335_s12, 3 }
   0x4   : > { %p137_p2 = pnand %p1687_p0, %p136_p1 }
   0x5   : > { %p157_p3 = scmp.lt.s32.totalorder (!%p137_p2), %s1683_s13, 1 }
   0x6   : > { %140 = sbr.rel (%p137_p2) target bundleno = 347 (0x15b), region = 32 }
   0xb   : > { %v2201_v0 = vld [vmem:[%s2801_s1 + $0x178] sm:$0xff]   ;;  %v2205_v4 = vld [vmem:[%s2801_s1 + $0x170] sm:$0xff]   ;;  %v2209_v8 = vld [vmem:[%s2801_s1 + $0x168] sm:$0xff]   ;;  %s2805_s13 = smov (!%p157_p3, %s1683_s13), 1  ;;  %v308_v30 = vlaneseq  ;;  %v2337_v34 = vmov 1966171168  }
   0xc   : > { %v2202_v1 = vld [vmem:[%s2801_s1 + $0x1f8] sm:$0xff]   ;;  %2016 = vmatprep.subr.bf16.mxu0 %v2201_v0  ;;  %v2206_v5 = vld [vmem:[%s2801_s1 + $0x1f0] sm:$0xff]   ;;  %v2210_v9 = vld [vmem:[%s2801_s1 + $0x1e8] sm:$0xff]   ;;  %s1688_s18 = sshll.u32 %s2805_s13, 3  ;;  %v306_v35 = vunpack.c.l.s4 %v2337_v34  ;;  %s163_s6 = scalar_lea.vmem %s2803_s3, %s2805_s13 }
   0xd   : > { %v2203_v2 = vld [vmem:[%s2801_s1 + $0x138] sm:$0xff]   ;;  %2038 = vmatprep.subr.bf16.mxu1 %v2202_v1  ;;  %v2207_v6 = vld [vmem:[%s2801_s1 + $0x130] sm:$0xff]   ;;  %v2211_v10 = vld [vmem:[%s2801_s1 + $0x128] sm:$0xff]   ;;  %s2466_s27 = scalar_lea.vmem %s2800_s0, %s1688_s18  ;;  %v309_v36 = vshrl.u32 %v308_v30, 7 }
   0xe   : > { %v2204_v3 = vld [vmem:[%s2801_s1 + $0x1b8] sm:$0xff]   ;;  %2017 = vmatpush3.bf16.msra.mxu0 %v2203_v2  ;;  %v2208_v7 = vld [vmem:[%s2801_s1 + $0x1b0] sm:$0xff]   ;;  %v2212_v11 = vld [vmem:[%s2801_s1 + $0x1a8] sm:$0xff]   ;;  %v307_v40 = vunpack.c.0.s8 %v306_v35 }
   0xf   : > { %2039 = vmatpush3.bf16.msra.mxu1 %v2204_v3  ;;  %2018 = vmatprep.subr.bf16.mxu0 %v2205_v4  ;;  %v2213_v12 = vld [vmem:[%s2801_s1 + $0x160] sm:$0xff]   ;;  %v2217_v16 = vld [vmem:[%s2801_s1 + $0x158] sm:$0xff]   ;;  %v2221_v20 = vld [vmem:[%s2801_s1 + $0x150] sm:$0xff]  }
  0x10   : > { %2040 = vmatprep.subr.bf16.mxu1 %v2206_v5  ;;  %v2214_v13 = vld [vmem:[%s2801_s1 + $0x1e0] sm:$0xff]   ;;  %v2218_v17 = vld [vmem:[%s2801_s1 + $0x1d8] sm:$0xff]   ;;  %v2222_v21 = vld [vmem:[%s2801_s1 + $0x1d0] sm:$0xff]   ;;  %v2481_v41 = vsub.s32 %v307_v40, %v309_v36 }
  0x11   : > { %v2215_v14 = vld [vmem:[%s2801_s1 + $0x120] sm:$0xff]   ;;  %v2219_v18 = vld [vmem:[%s2801_s1 + $0x118] sm:$0xff]   ;;  %v2223_v22 = vld [vmem:[%s2801_s1 + $0x110] sm:$0xff]  }
  0x12   : > { %2019 = vmatpush3.bf16.msra.mxu0 %v2207_v6  ;;  %v2216_v15 = vld [vmem:[%s2801_s1 + $0x1a0] sm:$0xff]   ;;  %v2220_v19 = vld [vmem:[%s2801_s1 + $0x198] sm:$0xff]   ;;  %v2224_v23 = vld [vmem:[%s2801_s1 + $0x190] sm:$0xff]  }
  0x13   : > { %2041 = vmatpush3.bf16.msra.mxu1 %v2208_v7  ;;  %2020 = vmatprep.subr.bf16.mxu0 %v2209_v8  ;;  %v2225_v24 = vld [vmem:[%s2801_s1 + $0x148] sm:$0xff]   ;;  %v2229_v28 = vld [vmem:[%s2801_s1 + $0x140] sm:$0xff]   ;;  %v2233_v37 = vld [vmem:[%s2801_s1 + $0x78] sm:$0xff]  }
  0x14   : > { %2042 = vmatprep.subr.bf16.mxu1 %v2210_v9  ;;  %v2226_v25 = vld [vmem:[%s2801_s1 + $0x1c8] sm:$0xff]   ;;  %v2230_v29 = vld [vmem:[%s2801_s1 + $0x1c0] sm:$0xff]   ;;  %v2234_v38 = vld [vmem:[%s2801_s1 + $0xf8] sm:$0xff]  }
  0x15   : > { %v2227_v26 = vld [vmem:[%s2801_s1 + $0x108] sm:$0xff]   ;;  %v2231_v31 = vld [vmem:[%s2801_s1 + $0x100] sm:$0xff]   ;;  %v2235_v44 = vld [vmem:[%s2801_s1 + $0x38] sm:$0xff]  }
  0x16   : > { %2021 = vmatpush3.bf16.msra.mxu0 %v2211_v10  ;;  %v2228_v27 = vld [vmem:[%s2801_s1 + $0x188] sm:$0xff]   ;;  %v2232_v32 = vld [vmem:[%s2801_s1 + $0x180] sm:$0xff]   ;;  %v2237_v49 = vld [vmem:[%s2801_s1 + $0x70] sm:$0xff]  }
  0x17   : > { %2043 = vmatpush3.bf16.msra.mxu1 %v2212_v11  ;;  %2022 = vmatprep.subr.bf16.mxu0 %v2213_v12  ;;  %v1753_v33 = vld.sshfl [vmem:[%s2466_s27] sm:$0x33 pattern:$0x75316420]  ;;  %v2236_v52 = vld [vmem:[%s2801_s1 + $0xb8] sm:$0xff]   ;;  %v2238_v53 = vld [vmem:[%s2801_s1 + $0xf0] sm:$0xff]  }
  0x18   : > { %2044 = vmatprep.subr.bf16.mxu1 %v2214_v13  ;;  %v304_v39 = vcombine.high %v1753_v33, %v1753_v33  ;;  %v2485_v43 = vrot.slane %v1753_v33, %v2481_v41  ;;  %v2239_v54 = vld [vmem:[%s2801_s1 + $0x30] sm:$0xff]   ;;  %v2241_v55 = vld [vmem:[%s2801_s1 + $0x68] sm:$0xff]   ;;  %v2245_v59 = vld [vmem:[%s2801_s1 + $0x60] sm:$0xff]  }
  0x19   : > { %v2240_v56 = vld [vmem:[%s2801_s1 + $0xb0] sm:$0xff]   ;;  %v2242_v57 = vld [vmem:[%s2801_s1 + $0xe8] sm:$0xff]   ;;  %v2246_v61 = vld [vmem:[%s2801_s1 + $0xe0] sm:$0xff]  }
  0x1a   : > { %2023 = vmatpush3.bf16.msra.mxu0 %v2215_v14  ;;  %v318_v42 = vrot.slane %v304_v39, %v2481_v41  ;;  %v322_v47 = vshrl.u32 %v2485_v43, 16  ;;  %v2493_v48 = vcombine.high %v2485_v43, %v2485_v43  ;;  %v2243_v58 = vld [vmem:[%s2801_s1 + $0x28] sm:$0xff]   ;;  %v2247_v62 = vld [vmem:[%s2801_s1 + $0x20] sm:$0xff]   ;;  %v2249_v63 = vld [vmem:[%s2801_s1 + $0x58] sm:$0xff]  }
  0x1b   : > { %2045 = vmatpush3.bf16.msra.mxu1 %v2216_v15  ;;  %2024 = vmatprep.subr.bf16.mxu0 %v2217_v16  ;;  %v2244_v60 = vld [vmem:[%s2801_s1 + $0xa8] sm:$0xff]   ;;  %v2248_v0 = vld [vmem:[%s2801_s1 + $0xa0] sm:$0xff]   ;;  %v2250_v1 = vld [vmem:[%s2801_s1 + $0xd8] sm:$0xff]  }
  0x1c   : > { %2046 = vmatprep.subr.bf16.mxu1 %v2218_v17  ;;  %v325_v45 = vshrl.u32 %v318_v42, 16  ;;  %v320_v46 = vcombine.high %v318_v42, %v318_v42  ;;  %v328_v51 = vshrl.u32 %v2493_v48, 16  ;;  %v2251_v2 = vld [vmem:[%s2801_s1 + $0x18] sm:$0xff]   ;;  %v2253_v3 = vld [vmem:[%s2801_s1 + $0x50] sm:$0xff]   ;;  %v2257_v7 = vld [vmem:[%s2801_s1 + $0x48] sm:$0xff]  }
  0x1d   : > { %v2252_v4 = vld [vmem:[%s2801_s1 + $0x98] sm:$0xff]   ;;  %v2254_v5 = vld [vmem:[%s2801_s1 + $0xd0] sm:$0xff]   ;;  %v2258_v9 = vld [vmem:[%s2801_s1 + $0xc8] sm:$0xff]  }
  0x1e   : > { %2025 = vmatpush3.bf16.msra.mxu0 %v2219_v18  ;;  %561 = vmatprep.mubr.bf16.mxu0 %v325_v45  ;;  %v331_v50 = vshrl.u32 %v320_v46, 16  ;;  %v2255_v6 = vld [vmem:[%s2801_s1 + $0x10] sm:$0xff]   ;;  %v2259_v10 = vld [vmem:[%s2801_s1 + $0x8] sm:$0xff]   ;;  %v2261_v11 = vld [vmem:[%s2801_s1 + $0x40] sm:$0xff]  }
  0x1f   : > { %2047 = vmatpush3.bf16.msra.mxu1 %v2220_v19  ;;  %2026 = vmatprep.subr.bf16.mxu0 %v2221_v20  ;;  %v2256_v8 = vld [vmem:[%s2801_s1 + $0x90] sm:$0xff]   ;;  %v2260_v12 = vld [vmem:[%s2801_s1 + $0x88] sm:$0xff]   ;;  %v2262_v13 = vld [vmem:[%s2801_s1 + $0xc0] sm:$0xff]  }
  0x20   : > { %2048 = vmatprep.subr.bf16.mxu1 %v2222_v21  ;;  %601 = vmatprep.mubr.bf16.mxu1 %v331_v50  ;;  %v2263_v14 = vld [vmem:[%s2801_s1] sm:$0xff]   ;;  %v2265_v15 = vld [vmem:[%s2801_s1 + $0x278] sm:$0xff]   ;;  %v2269_v19 = vld [vmem:[%s2801_s1 + $0x270] sm:$0xff]  }
  0x21   : > { %v2264_v16 = vld [vmem:[%s2801_s1 + $0x80] sm:$0xff]   ;;  %v2266_v17 = vld [vmem:[%s2801_s1 + $0x2f8] sm:$0xff]   ;;  %v2270_v21 = vld [vmem:[%s2801_s1 + $0x2f0] sm:$0xff]  }
  0x22   : > { %2027 = vmatpush3.bf16.msra.mxu0 %v2223_v22  ;;  %v2267_v18 = vld [vmem:[%s2801_s1 + $0x238] sm:$0xff]   ;;  %v2271_v22 = vld [vmem:[%s2801_s1 + $0x230] sm:$0xff]   ;;  %v2279_v30 = vld [vmem:[%s2801_s1 + $0x220] sm:$0xff]  }
  0x23   : > { %2049 = vmatpush3.bf16.msra.mxu1 %v2224_v23  ;;  %2028 = vmatprep.subr.bf16.mxu0 %v2225_v24  ;;  %v2268_v20 = vld [vmem:[%s2801_s1 + $0x2b8] sm:$0xff]   ;;  %v2273_v23 = vld [vmem:[%s2801_s1 + $0x268] sm:$0xff]   ;;  %v2272_v24 = vld [vmem:[%s2801_s1 + $0x2b0] sm:$0xff]  }
  0x24   : > { %2050 = vmatprep.subr.bf16.mxu1 %v2226_v25  ;;  %v2274_v25 = vld [vmem:[%s2801_s1 + $0x2e8] sm:$0xff]   ;;  %v2282_v33 = vld [vmem:[%s2801_s1 + $0x2d8] sm:$0xff]   ;;  %v2285_v35 = vld [vmem:[%s2801_s1 + $0x250] sm:$0xff]  }
  0x25   : > { %v2283_v34 = vld [vmem:[%s2801_s1 + $0x218] sm:$0xff]   ;;  %v2289_v39 = vld [vmem:[%s2801_s1 + $0x248] sm:$0xff]   ;;  %v2288_v40 = vld [vmem:[%s2801_s1 + $0x290] sm:$0xff]  }
  0x26   : > { %2029 = vmatpush3.bf16.msra.mxu0 %v2227_v26  ;;  %v2275_v26 = vld [vmem:[%s2801_s1 + $0x228] sm:$0xff]   ;;  %v2284_v36 = vld [vmem:[%s2801_s1 + $0x298] sm:$0xff]   ;;  %v1883_v45 = vld.sshfl [vmem:[%s2466_s27 + $0x4] sm:$0x33 pattern:$0x75316420] }
  0x27   : > { %2051 = vmatpush3.bf16.msra.mxu1 %v2228_v27  ;;  %2030 = vmatprep.subr.bf16.mxu0 %v2229_v28  ;;  %v2277_v27 = vld [vmem:[%s2801_s1 + $0x260] sm:$0xff]   ;;  %v2276_v28 = vld [vmem:[%s2801_s1 + $0x2a8] sm:$0xff]  }
  0x28   : > { %2052 = vmatprep.subr.bf16.mxu1 %v2230_v29  ;;  %v2278_v29 = vld [vmem:[%s2801_s1 + $0x2e0] sm:$0xff]  }
  0x29   : > { %v2295_v50 = vld [vmem:[%s2801_s1 + $0x200] sm:$0xff]  }
  0x2a   : > { %2031 = vmatpush3.bf16.msra.mxu0 %v2231_v31  ;;  %v2281_v31 = vld [vmem:[%s2801_s1 + $0x258] sm:$0xff]  }
  0x2b   : > { %2053 = vmatpush3.bf16.msra.mxu1 %v2232_v32  ;;  %2060 = vmatprep.subr.bf16.mxu0 %v2233_v37  ;;  %v2280_v32 = vld [vmem:[%s2801_s1 + $0x2a0] sm:$0xff]   ;;  %v2286_v37 = vld [vmem:[%s2801_s1 + $0x2d0] sm:$0xff]  }
  0x2c   : > { %2082 = vmatprep.subr.bf16.mxu1 %v2234_v38  ;;  %v2287_v38 = vld [vmem:[%s2801_s1 + $0x210] sm:$0xff]  }
  0x2d   : > { %562 = vmatmul.mubr.bf16.vlgmr.msra.gmra.mxu0 %v322_v47  ;;  %v2292_v47 = vld [vmem:[%s2801_s1 + $0x288] sm:$0xff]  }
  0x2e   : > { %2061 = vmatpush3.bf16.msra.mxu0 %v2235_v44  ;;  %602 = vmatmul.mubr.bf16.vlgmr.msra.gmra.mxu1 %v328_v51  ;;  %v2293_v44 = vld [vmem:[%s2801_s1 + $0x240] sm:$0xff]  }
  0x2f   : > { %2062 = vmatprep.subr.bf16.mxu0 %v2237_v49  ;;  %2083 = vmatpush3.bf16.msra.mxu1 %v2236_v52  ;;  %v2681_v52 = vrot.slane %v1883_v45, %v2481_v41 }
  0x30   : > { %837 = vmatprep.mubr.bf16.mxu0 %v318_v42  ;;  %2084 = vmatprep.subr.bf16.mxu1 %v2238_v53  ;;  %v2290_v42 = vld [vmem:[%s2801_s1 + $0x2c8] sm:$0xff]   ;;  %v2297_v53 = vld [vmem:[%s2801_s1 + $0x378] sm:$0xff]  }
  0x31   : > { %877 = vmatprep.mubr.bf16.mxu1 %v320_v46  ;;  %v960_v46 = vcombine.high %v1883_v45, %v1883_v45 }
  0x32   : > { %2063 = vmatpush3.bf16.msra.mxu0 %v2239_v54  ;;  %v2296_v54 = vld [vmem:[%s2801_s1 + $0x280] sm:$0xff]  }
  0x33   : > { %2064 = vmatprep.subr.bf16.mxu0 %v2241_v55  ;;  %2085 = vmatpush3.bf16.msra.mxu1 %v2240_v56  ;;  %v974_v49 = vrot.slane %v960_v46, %v2481_v41  ;;  %v2298_v55 = vld [vmem:[%s2801_s1 + $0x3f8] sm:$0xff]  }
  0x34   : > { %2086 = vmatprep.subr.bf16.mxu1 %v2242_v57  ;;  %v2299_v41 = vld [vmem:[%s2801_s1 + $0x338] sm:$0xff]   ;;  %v2697_v57 = vcombine.high %v2681_v52, %v2681_v52 }
  0x35   : > { %v976_v51 = vcombine.high %v974_v49, %v974_v49  ;;  %v1349_v56 = vshrl.u32 %v974_v49, 16 }
  0x36   : > { %2065 = vmatpush3.bf16.msra.mxu0 %v2243_v58  ;;  %v2301_v58 = vld [vmem:[%s2801_s1 + $0x370] sm:$0xff]  }
  0x37   : > { %2066 = vmatprep.subr.bf16.mxu0 %v2245_v59  ;;  %2087 = vmatpush3.bf16.msra.mxu1 %v2244_v60  ;;  %v2300_v59 = vld [vmem:[%s2801_s1 + $0x3b8] sm:$0xff]   ;;  %v1355_v60 = vshrl.u32 %v976_v51, 16 }
  0x38   : > { %2088 = vmatprep.subr.bf16.mxu1 %v2246_v61  ;;  %v2302_v61 = vld [vmem:[%s2801_s1 + $0x3f0] sm:$0xff]  }
  0x3a   : > { %2067 = vmatpush3.bf16.msra.mxu0 %v2247_v62  ;;  %v2303_v62 = vld [vmem:[%s2801_s1 + $0x330] sm:$0xff]  }
  0x3b   : > { %2068 = vmatprep.subr.bf16.mxu0 %v2249_v63  ;;  %2089 = vmatpush3.bf16.msra.mxu1 %v2248_v0  ;;  %v2305_v63 = vld [vmem:[%s2801_s1 + $0x368] sm:$0xff]   ;;  %v2304_v0 = vld [vmem:[%s2801_s1 + $0x3b0] sm:$0xff]  }
  0x3c   : > { %2090 = vmatprep.subr.bf16.mxu1 %v2250_v1  ;;  %v2306_v1 = vld [vmem:[%s2801_s1 + $0x3e8] sm:$0xff]  }
  0x3e   : > { %2069 = vmatpush3.bf16.msra.mxu0 %v2251_v2  ;;  %v2307_v2 = vld [vmem:[%s2801_s1 + $0x328] sm:$0xff]  }
  0x3f   : > { %2070 = vmatprep.subr.bf16.mxu0 %v2253_v3  ;;  %2091 = vmatpush3.bf16.msra.mxu1 %v2252_v4  ;;  %v2309_v3 = vld [vmem:[%s2801_s1 + $0x360] sm:$0xff]   ;;  %v2308_v4 = vld [vmem:[%s2801_s1 + $0x3a8] sm:$0xff]  }
  0x40   : > { %2092 = vmatprep.subr.bf16.mxu1 %v2254_v5  ;;  %v2310_v5 = vld [vmem:[%s2801_s1 + $0x3e0] sm:$0xff]  }
  0x42   : > { %2071 = vmatpush3.bf16.msra.mxu0 %v2255_v6  ;;  %v2311_v6 = vld [vmem:[%s2801_s1 + $0x320] sm:$0xff]  }
  0x43   : > { %2072 = vmatprep.subr.bf16.mxu0 %v2257_v7  ;;  %2093 = vmatpush3.bf16.msra.mxu1 %v2256_v8  ;;  %v2313_v7 = vld [vmem:[%s2801_s1 + $0x358] sm:$0xff]   ;;  %v2312_v8 = vld [vmem:[%s2801_s1 + $0x3a0] sm:$0xff]  }
  0x44   : > { %2094 = vmatprep.subr.bf16.mxu1 %v2258_v9  ;;  %v2314_v9 = vld [vmem:[%s2801_s1 + $0x3d8] sm:$0xff]  }
  0x46   : > { %2073 = vmatpush3.bf16.msra.mxu0 %v2259_v10  ;;  %v2315_v10 = vld [vmem:[%s2801_s1 + $0x318] sm:$0xff]  }
  0x47   : > { %2074 = vmatprep.subr.bf16.mxu0 %v2261_v11  ;;  %2095 = vmatpush3.bf16.msra.mxu1 %v2260_v12  ;;  %v2317_v11 = vld [vmem:[%s2801_s1 + $0x350] sm:$0xff]   ;;  %v2316_v12 = vld [vmem:[%s2801_s1 + $0x398] sm:$0xff]  }
  0x48   : > { %2096 = vmatprep.subr.bf16.mxu1 %v2262_v13  ;;  %v2318_v13 = vld [vmem:[%s2801_s1 + $0x3d0] sm:$0xff]  }
  0x4a   : > { %2075 = vmatpush3.bf16.msra.mxu0 %v2263_v14  ;;  %v2319_v14 = vld [vmem:[%s2801_s1 + $0x310] sm:$0xff]  }
  0x4b   : > { %2104 = vmatprep.subr.bf16.mxu0 %v2265_v15  ;;  %2097 = vmatpush3.bf16.msra.mxu1 %v2264_v16  ;;  %v2321_v15 = vld [vmem:[%s2801_s1 + $0x348] sm:$0xff]   ;;  %v2320_v16 = vld [vmem:[%s2801_s1 + $0x390] sm:$0xff]  }
  0x4c   : > { %2126 = vmatprep.subr.bf16.mxu1 %v2266_v17  ;;  %v2322_v17 = vld [vmem:[%s2801_s1 + $0x3c8] sm:$0xff]  }
  0x4d   : > { %838 = vmatmul.mubr.bf16.vlgmr.msra.gmra.mxu0 %v2485_v43  ;;  %v2291_v43 = vld [vmem:[%s2801_s1 + $0x208] sm:$0xff]  }
  0x4e   : > { %2105 = vmatpush3.bf16.msra.mxu0 %v2267_v18  ;;  %878 = vmatmul.mubr.bf16.vlgmr.msra.gmra.mxu1 %v2493_v48  ;;  %v2294_v48 = vld [vmem:[%s2801_s1 + $0x2c0] sm:$0xff]   ;;  %v2323_v18 = vld [vmem:[%s2801_s1 + $0x308] sm:$0xff]  }
  0x4f   : > { %2106 = vmatprep.subr.bf16.mxu0 %v2269_v19  ;;  %2127 = vmatpush3.bf16.msra.mxu1 %v2268_v20  ;;  %v2325_v19 = vld [vmem:[%s2801_s1 + $0x340] sm:$0xff]   ;;  %v2324_v20 = vld [vmem:[%s2801_s1 + $0x388] sm:$0xff]  }
  0x50   : > { %2128 = vmatprep.subr.bf16.mxu1 %v2270_v21  ;;  %1205 = vmatprep.mubr.bf16.mxu0 %v974_v49  ;;  %v2326_v21 = vld [vmem:[%s2801_s1 + $0x3c0] sm:$0xff]  }
  0x51   : > { %1245 = vmatprep.mubr.bf16.mxu1 %v976_v51 }
  0x52   : > { %2107 = vmatpush3.bf16.msra.mxu0 %v2271_v22  ;;  %v2327_v22 = vld [vmem:[%s2801_s1 + $0x300] sm:$0xff]  }
  0x53   : > { %2108 = vmatprep.subr.bf16.mxu0 %v2273_v23  ;;  %2129 = vmatpush3.bf16.msra.mxu1 %v2272_v24  ;;  %v2328_v23 = vld [vmem:[%s2801_s1 + $0x380] sm:$0xff]   ;;  %v1346_v24 = vshrl.u32 %v2681_v52, 16 }
  0x54   : > { %2130 = vmatprep.subr.bf16.mxu1 %v2274_v25  ;;  %v1352_v25 = vshrl.u32 %v2697_v57, 16 }
  0x56   : > { %2109 = vmatpush3.bf16.msra.mxu0 %v2275_v26 }
  0x57   : > { %2110 = vmatprep.subr.bf16.mxu0 %v2277_v27  ;;  %2131 = vmatpush3.bf16.msra.mxu1 %v2276_v28 }
  0x58   : > { %2132 = vmatprep.subr.bf16.mxu1 %v2278_v29 }
  0x5a   : > { %2111 = vmatpush3.bf16.msra.mxu0 %v2279_v30 }
  0x5b   : > { %2112 = vmatprep.subr.bf16.mxu0 %v2281_v31  ;;  %2133 = vmatpush3.bf16.msra.mxu1 %v2280_v32 }
  0x5c   : > { %2134 = vmatprep.subr.bf16.mxu1 %v2282_v33 }
  0x5e   : > { %2113 = vmatpush3.bf16.msra.mxu0 %v2283_v34 }
  0x5f   : > { %2114 = vmatprep.subr.bf16.mxu0 %v2285_v35  ;;  %2135 = vmatpush3.bf16.msra.mxu1 %v2284_v36 }
  0x60   : > { %2136 = vmatprep.subr.bf16.mxu1 %v2286_v37 }
  0x62   : > { %2115 = vmatpush3.bf16.msra.mxu0 %v2287_v38 }
  0x63   : > { %2116 = vmatprep.subr.bf16.mxu0 %v2289_v39  ;;  %2137 = vmatpush3.bf16.msra.mxu1 %v2288_v40 }
  0x64   : > { %2138 = vmatprep.subr.bf16.mxu1 %v2290_v42 }
  0x66   : > { %2117 = vmatpush3.bf16.msra.mxu0 %v2291_v43 }
  0x67   : > { %2118 = vmatprep.subr.bf16.mxu0 %v2293_v44  ;;  %2139 = vmatpush3.bf16.msra.mxu1 %v2292_v47 }
  0x68   : > { %2140 = vmatprep.subr.bf16.mxu1 %v2294_v48 }
  0x6a   : > { %2119 = vmatpush3.bf16.msra.mxu0 %v2295_v50 }
  0x6b   : > { %2148 = vmatprep.subr.bf16.mxu0 %v2297_v53  ;;  %2141 = vmatpush3.bf16.msra.mxu1 %v2296_v54 }
  0x6c   : > { %2170 = vmatprep.subr.bf16.mxu1 %v2298_v55 }
  0x6d   : > { %1206 = vmatmul.mubr.bf16.vlgmr.msra.gmra.mxu0 %v2681_v52 }
  0x6e   : > { %2149 = vmatpush3.bf16.msra.mxu0 %v2299_v41  ;;  %1585 = vmatprep.mubr.bf16.mxu0 %v1349_v56 }
  0x6f   : > { %1246 = vmatmul.mubr.bf16.vlgmr.msra.gmra.mxu1 %v2697_v57  ;;  %2150 = vmatprep.subr.bf16.mxu0 %v2301_v58 }
  0x70   : > { %2171 = vmatpush3.bf16.msra.mxu1 %v2300_v59  ;;  %1625 = vmatprep.mubr.bf16.mxu1 %v1355_v60 }
  0x71   : > { %2172 = vmatprep.subr.bf16.mxu1 %v2302_v61 }
  0x72   : > { %2151 = vmatpush3.bf16.msra.mxu0 %v2303_v62 }
  0x73   : > { %2152 = vmatprep.subr.bf16.mxu0 %v2305_v63 }
  0x74   : > { %2173 = vmatpush3.bf16.msra.mxu1 %v2304_v0 }
  0x75   : > { %2174 = vmatprep.subr.bf16.mxu1 %v2306_v1 }
  0x76   : > { %2153 = vmatpush3.bf16.msra.mxu0 %v2307_v2 }
  0x77   : > { %2154 = vmatprep.subr.bf16.mxu0 %v2309_v3 }
  0x78   : > { %2175 = vmatpush3.bf16.msra.mxu1 %v2308_v4 }
  0x79   : > { %2176 = vmatprep.subr.bf16.mxu1 %v2310_v5 }
  0x7a   : > { %2155 = vmatpush3.bf16.msra.mxu0 %v2311_v6 }
  0x7b   : > { %2156 = vmatprep.subr.bf16.mxu0 %v2313_v7  ;;  %v165_v7 = vld [vmem:[%s2802_s2] sm:$0x1] }
  0x7c   : > { %2177 = vmatpush3.bf16.msra.mxu1 %v2312_v8 }
  0x7d   : > { %2178 = vmatprep.subr.bf16.mxu1 %v2314_v9 }
  0x7e   : > { %2157 = vmatpush3.bf16.msra.mxu0 %v2315_v10 }
  0x7f   : > { %2158 = vmatprep.subr.bf16.mxu0 %v2317_v11 }
  0x80   : > { %2179 = vmatpush3.bf16.msra.mxu1 %v2316_v12 }
  0x81   : > { %2180 = vmatprep.subr.bf16.mxu1 %v2318_v13 }
  0x82   : > { %2159 = vmatpush3.bf16.msra.mxu0 %v2319_v14 }
  0x83   : > { %2160 = vmatprep.subr.bf16.mxu0 %v2321_v15 }
  0x84   : > { %2181 = vmatpush3.bf16.msra.mxu1 %v2320_v16 }
  0x85   : > { %2182 = vmatprep.subr.bf16.mxu1 %v2322_v17 }
  0x86   : > { %2161 = vmatpush3.bf16.msra.mxu0 %v2323_v18 }
  0x87   : > { %2162 = vmatprep.subr.bf16.mxu0 %v2325_v19 }
  0x88   : > { %2183 = vmatpush3.bf16.msra.mxu1 %v2324_v20 }
  0x89   : > { %2184 = vmatprep.subr.bf16.mxu1 %v2326_v21 }
  0x8a   : > { %2163 = vmatpush3.bf16.msra.mxu0 %v2327_v22 }
  0x8c   : > { %2185 = vmatpush3.bf16.msra.mxu1 %v2328_v23 }
  0x8d   : > { %1586 = vmatmul.mubr.bf16.vlgmr.msra.gmra.mxu0 %v1346_v24 }
  0x8f   : > { %1626 = vmatmul.mubr.bf16.vlgmr.msra.gmra.mxu1 %v1352_v25 }
  0xed   : > { %v2032_v26 = vpop.f32.mrf.mxu0 }
  0xee   : > { %v2054_v27 = vpop.f32.mrf.mxu1 }
  0xef   : > { %v2033_v28 = vpop.f32.mrf.mxu0 }
  0xf0   : > { %v2034_v29 = vadd.f32 %v2033_v28, %v2032_v26  ;;  %v2055_v30 = vpop.f32.mrf.mxu1 }
  0xf1   : > { %v2035_v31 = vpop.f32.mrf.mxu0  ;;  %v2056_v32 = vadd.f32 %v2055_v30, %v2054_v27 }
  0xf2   : > { %v2057_v33 = vpop.f32.mrf.mxu1 }
  0xf3   : > { %v2036_v34 = vpop.f32.mrf.mxu0  ;;  %v604_v35 = vadd.f32 %v2056_v32, %v2034_v29 }
  0xf4   : > { %v2058_v36 = vpop.f32.mrf.mxu1 }
 0x10d   : > { %v2076_v37 = vpop.f32.mrf.mxu0 }
 0x10e   : > { %v2098_v38 = vpop.f32.mrf.mxu1 }
 0x10f   : > { %v2077_v39 = vpop.f32.mrf.mxu0 }
 0x110   : > { %v2078_v40 = vadd.f32 %v2077_v39, %v2076_v37  ;;  %v2099_v42 = vpop.f32.mrf.mxu1 }
 0x111   : > { %v2079_v43 = vpop.f32.mrf.mxu0  ;;  %v2100_v45 = vadd.f32 %v2099_v42, %v2098_v38 }
 0x112   : > { %v840_v44 = vadd.f32 %v2078_v40, %v604_v35  ;;  %v2101_v46 = vpop.f32.mrf.mxu1 }
 0x113   : > { %v2080_v47 = vpop.f32.mrf.mxu0 }
 0x114   : > { %v880_v48 = vadd.f32 %v2100_v45, %v840_v44  ;;  %v2102_v49 = vpop.f32.mrf.mxu1 }
 0x12d   : > { %v2120_v50 = vpop.f32.mrf.mxu0 }
 0x12f   : > { %v2142_v51 = vpop.f32.mrf.mxu1  ;;  %v2121_v52 = vpop.f32.mrf.mxu0 }
 0x130   : > { %v2122_v57 = vadd.f32 %v2121_v52, %v2120_v50 }
 0x131   : > { %v2143_v53 = vpop.f32.mrf.mxu1  ;;  %v2123_v54 = vpop.f32.mrf.mxu0 }
 0x132   : > { %v2144_v58 = vadd.f32 %v2143_v53, %v2142_v51 }
 0x133   : > { %v2145_v55 = vpop.f32.mrf.mxu1  ;;  %v2124_v41 = vpop.f32.mrf.mxu0 }
 0x134   : > { %v1248_v62 = vadd.f32 %v2144_v58, %v2122_v57 }
 0x135   : > { %v2146_v56 = vpop.f32.mrf.mxu1 }
 0x136   : > { %v1253_v5 = vadd.f32 %v1248_v62, %v880_v48 }
 0x14d   : > { %v2164_v59 = vpop.f32.mrf.mxu0 }
 0x14f   : > { %v2186_v60 = vpop.f32.mrf.mxu1  ;;  %v2165_v61 = vpop.f32.mrf.mxu0 }
 0x150   : > { %v2166_v63 = vadd.f32 %v2165_v61, %v2164_v59 }
 0x151   : > { %v2187_v0 = vpop.f32.mrf.mxu1  ;;  %v2167_v1 = vpop.f32.mrf.mxu0 }
 0x152   : > { %v2188_v2 = vadd.f32 %v2187_v0, %v2186_v60 }
 0x153   : > { %v2189_v3 = vpop.f32.mrf.mxu1  ;;  %v2168_v4 = vpop.f32.mrf.mxu0 }
 0x154   : > { %v1628_v6 = vadd.f32 %v2188_v2, %v2166_v63 }
 0x155   : > { %v2190_v8 = vpop.f32.mrf.mxu1 }
 0x156   : > { %v1633_v9 = vadd.f32 %v1628_v6, %v1253_v5 }
 0x158   : > { %v1634_v10 = vadd.f32 %v1633_v9, %v165_v7 }
 0x15a   : > { %1635 = vst [vmem:[%s163_s6] sm:$0x1] %v1634_v10 }
 0x15b PF: > { %s13_s12 = sadd.s32 1, %s2335_s12  }
 0x15c   : > { %p10_p4 = scmp.ge.s32.totalorder %s13_s12, 4  }
 0x15e   :  { %12 = sbr.rel (!%p10_p4) target bundleno = 1 (0x1), region = 66 }

// kernel: encoder_forward.13
= control target key start
LH: loop header
LB: loop body
LE: loop exit
PB: predicated region body
PF: predicated region fallthrough
CT: control target
= control target key end

     0   :  { %v394_v1 = vmov 0.0   ;;  %vm395_vm0 = vmmov 0   ;;  %s487_s0 = inlined_call_operand.vmem [shape: bf16[2,128], index: 0, kind: input, shape index: {}]   ;;  %s488_s1 = inlined_call_operand.vmem [shape: bf16[128,128], index: 1, kind: input, shape index: {}]   ;;  %s489_s2 = inlined_call_operand.vmem [shape: f32[1,128], index: 2, kind: input, shape index: {}]   ;;  %s490_s3 = inlined_call_operand.vmem [shape: bf16[128,128], index: 3, kind: input, shape index: {}]   ;;  %s491_s4 = inlined_call_operand.vmem [shape: f32[1,128], index: 4, kind: input, shape index: {}]   ;;  %s492_s5 = inlined_call_operand.hbm [shape: f32[2,128], index: 5, kind: output, shape index: {}]  }
   0x1   :  { %v356_v0 = vld [vmem:[%s488_s1 + $0x38] sm:$0xff]   ;;  %313 = vmatprep.subr.bf16.mxu0 %v394_v1  ;;  %26 = vst [vmem:[#allocation2] sm:$0x3] %v394_v1  ;;  %333 = vmatprep.subr.bf16.mxu1 %v394_v1  ;;  %v357_v2 = vld [vmem:[%s488_s1 + $0x30] sm:$0xff]   ;;  %v358_v3 = vld [vmem:[%s488_s1 + $0x28] sm:$0xff]  }
   0x2   :  { %314 = vmatpush3.bf16.msra.mxu0 %v356_v0  ;;  %329 = vmatprep.mubr.msk.bf16.mxu0 %vm395_vm0, %v394_v1  ;;  %v364_v4 = vld [vmem:[%s490_s3 + $0x38] sm:$0xff]   ;;  %v359_v5 = vld [vmem:[%s488_s1 + $0x20] sm:$0xff]   ;;  %v365_v6 = vld [vmem:[%s490_s3 + $0x30] sm:$0xff]  }
   0x3   :  { %315 = vmatprep.subr.bf16.mxu0 %v394_v1  ;;  %349 = vmatprep.mubr.msk.bf16.mxu1 %vm395_vm0, %v394_v1  ;;  %v360_v7 = vld [vmem:[%s488_s1 + $0x18] sm:$0xff]   ;;  %v366_v8 = vld [vmem:[%s490_s3 + $0x28] sm:$0xff]  }
   0x4   :  { %334 = vmatpush3.bf16.msra.mxu1 %v364_v4 }
   0x5   :  { %335 = vmatprep.subr.bf16.mxu1 %v394_v1 }
   0x6   :  { %316 = vmatpush3.bf16.msra.mxu0 %v357_v2 }
   0x7   :  { %317 = vmatprep.subr.bf16.mxu0 %v394_v1 }
   0x8   :  { %336 = vmatpush3.bf16.msra.mxu1 %v365_v6 }
   0xa   :  { %318 = vmatpush3.bf16.msra.mxu0 %v358_v3 }
   0xb   :  { %319 = vmatprep.subr.bf16.mxu0 %v394_v1 }
   0xe   :  { %320 = vmatpush3.bf16.msra.mxu0 %v359_v5 }
   0xf   :  { %321 = vmatprep.subr.bf16.mxu0 %v394_v1 }
  0x10   :  { %10 = vsyncpa [#allocation4], 0  ;;  %337 = vmatprep.subr.bf16.mxu1 %v394_v1  ;;  %v361_v9 = vld [vmem:[%s488_s1 + $0x10] sm:$0xff]   ;;  %v367_v10 = vld [vmem:[%s490_s3 + $0x20] sm:$0xff]   ;;  %s396_s28 = smov [#allocation3]  }
  0x11   :  { %338 = vmatpush3.bf16.msra.mxu1 %v366_v8  ;;  %v362_v11 = vld [vmem:[%s488_s1 + $0x8] sm:$0xff]   ;;  %v363_v12 = vld [vmem:[%s488_s1] sm:$0xff]   ;;  %v368_v14 = vld [vmem:[%s490_s3 + $0x18] sm:$0xff]   ;;  %s269_s29 = sshll.u32 %s396_s28, 4  ;;  %s270_s29 = int_to_ptr.vmem [resolvable:$true] %s269_s29 }
  0x12   :  { %322 = vmatpush3.bf16.msra.mxu0 %v360_v7  ;;  %339 = vmatprep.subr.bf16.mxu1 %v394_v1  ;;  %v28_v13 = vld [vmem:[%s487_s0] sm:$0x1]  ;;  %v369_v15 = vld [vmem:[%s490_s3 + $0x10] sm:$0xff]   ;;  %v370_v16 = vld [vmem:[%s490_s3 + $0x8] sm:$0xff]   ;;  %p377_p1 = scmp.lt.s32.totalorder %s270_s29, %s270_s29 }
  0x13   :  { %323 = vmatprep.subr.bf16.mxu0 %v394_v1  ;;  %v371_v17 = vld [vmem:[%s490_s3] sm:$0xff]  }
  0x14   :  { %v27_v18 = vld [vmem:[#allocation2] sm:$0x3] }
  0x15   :  { %340 = vmatpush3.bf16.msra.mxu1 %v367_v10  ;;  %v285_v24 = vld [vmem:[%s489_s2] ss:$0 sm:$0xff]  ;;  %s372_s2 = scalar_lea.vmem %s270_s29, 32 }
  0x16   :  { %324 = vmatpush3.bf16.msra.mxu0 %v361_v9  ;;  %341 = vmatprep.subr.bf16.mxu1 %v394_v1  ;;  %v286_v30 = vld [vmem:[%s491_s4] ss:$0 sm:$0xff]  ;;  %p373_p0 = scmp.ne.s32.totalorder %s270_s29, %s372_s2  ;;  %p378_p2 = scmp.lt.s32.totalorder %s372_s2, %s372_s2 }
  0x17   :  { %325 = vmatprep.subr.bf16.mxu0 %v394_v1 }
  0x18   :  { %p379_p3 = por %p378_p2, %p377_p1 }
  0x19   :  { %342 = vmatpush3.bf16.msra.mxu1 %v368_v14 }
  0x1a   :  { %326 = vmatpush3.bf16.msra.mxu0 %v362_v11  ;;  %343 = vmatprep.subr.bf16.mxu1 %v394_v1  ;;  %p380_p4 = pnand %p379_p3, %p373_p0 }
  0x1b   :  { %327 = vmatprep.subr.bf16.mxu0 %v394_v1 }
  0x1d   :  { %344 = vmatpush3.bf16.msra.mxu1 %v369_v15 }
  0x1e   :  { %328 = vmatpush3.bf16.msra.mxu0 %v363_v12  ;;  %345 = vmatprep.subr.bf16.mxu1 %v394_v1 }
  0x21   :  { %330 = vmatmul.mubr.bf16.vlgmr.msra.gmra.mxu0 %v28_v13  ;;  %346 = vmatpush3.bf16.msra.mxu1 %v370_v16 }
  0x22   :  { %347 = vmatprep.subr.bf16.mxu1 %v394_v1 }
  0x25   :  { %348 = vmatpush3.bf16.msra.mxu1 %v371_v17 }
  0xe1   :  { %v127_v19 = vpop.f32.mrf.mxu0 }
  0xe2   :  { %v133_v20 = vadd.f32 %v127_v19, %v27_v18 }
  0xe3   :  { %v331_v21 = vpop.f32.mrf.mxu0 }
  0xe4   :  { %134 = vst [vmem:[#allocation2] sm:$0x3] %v133_v20 }
  0xe5   :  { %v130_v22 = vpop.f32.mrf.mxu0 }
  0xe7   :  { %v332_v23 = vpop.f32.mrf.mxu0 }
  0xeb   :  { %v138_v25 = vld [vmem:[#allocation2] sm:$0x3] }
  0xec   :  { %v146_v26 = vadd.f32 %v285_v24, %v138_v25 }
  0xee   :  { %vm147_vm1 = vcmp.ge.f32.partialorder %v146_v26, 0.0  ;;  %v148_v27 = vmul.f32 0.2, %v146_v26 }
  0xf0   :  { %v149_v28 = vsel %vm147_vm1, %v146_v26, %v148_v27 }
  0xf1   :  { %v150_v29 = vpack.c.bf16 %v149_v28, %v149_v28 }
  0xf3   :  { %350 = vmatmul.mubr.bf16.vlgmr.msra.gmra.mxu1 %v150_v29 }
 0x1b3   :  { %v256_v31 = vpop.f32.mrf.mxu1 }
 0x1b4   :  { %v257_v32 = vadd.f32 %v286_v30, %v256_v31 }
 0x1b5   :  { %v351_v33 = vpop.f32.mrf.mxu1 }
 0x1b6   :  { %262 = vst [vmem:[#allocation3] sm:$0x3] %v257_v32 }
 0x1b7   :  { %v259_v34 = vpop.f32.mrf.mxu1 }
 0x1b8   :  { %383 = shalt.err (!%p380_p4)
}
 0x1b9   :  { %272 = dma.vmem_to_hbm [thread:$0]  %s270_s29, 32, %s492_s5, [#allocation4]   ;;  %v352_v35 = vpop.f32.mrf.mxu1 }
 0x1ba   :  { %392 = dma.done.wait [#allocation4], 32  }
 0x1bb   :  { %393 = vsyncadd [#allocation4], 4294967264 }
 0x1bc   :  { %276 = vsyncpa [#allocation4], 1 }

// kernel: encoder_forward.8
= control target key start
LH: loop header
LB: loop body
LE: loop exit
PB: predicated region body
PF: predicated region fallthrough
CT: control target
= control target key end

     0   :  { %s9027_s18 = smov 0   ;;  %s10713_s0 = inlined_call_operand.vmem [shape: bf16[2,5,5,512], index: 0, kind: input, shape index: {}]   ;;  %s10714_s1 = inlined_call_operand.vmem [shape: bf16[4,512,128], index: 1, kind: input, shape index: {}]   ;;  %s10715_s2 = inlined_call_operand.vmem [shape: f32[1,128], index: 2, kind: input, shape index: {}]   ;;  %s10716_s3 = inlined_call_operand.vmem [shape: bf16[2,4,4,128], index: 3, kind: output, shape index: {0}]   ;;  %s10717_s4 = inlined_call_operand.vmem [shape: f32[2,1,128], index: 4, kind: output, shape index: {1}]   ;;  %s10718_s5 = inlined_call_operand.vmem [shape: f32[2,1,128], index: 5, kind: output, shape index: {2}]  }
   0x1 LB: > { %s6312_s19 = sadd.s32 4294967295, %s8995_s18   ;;  %p6316_p0 = scmp.ge.s32.totalorder %s8995_s18, 1  ;;  %s8995_s18 = sphi %s9027_s18, %s16_s18  }
   0x2   : > { %p192_p1 = scmp.lt.s32.totalorder %s8995_s18, 3 }
   0x4   : > { %p193_p2 = pnand %p6316_p0, %p192_p1 }
   0x5   : > { %p226_p3 = scmp.lt.s32.totalorder (!%p193_p2), %s6312_s19, 1 }
   0x6   : > { %196 = sbr.rel (%p193_p2) target bundleno = 747 (0x2eb), region = 32 }
   0xb   : > { %v8412_v0 = vld [vmem:[%s10714_s1 + $0x178] sm:$0xff]   ;;  %v8416_v4 = vld [vmem:[%s10714_s1 + $0x170] sm:$0xff]   ;;  %v8420_v8 = vld [vmem:[%s10714_s1 + $0x168] sm:$0xff]   ;;  %s10720_s19 = smov (!%p226_p3, %s6312_s19), 1  ;;  %vm1721_vm0 = vcmask 1043456  }
   0xc   : > { %v8413_v1 = vld [vmem:[%s10714_s1 + $0x1f8] sm:$0xff]   ;;  %7699 = vmatprep.subr.bf16.mxu0 %v8412_v0  ;;  %v8417_v5 = vld [vmem:[%s10714_s1 + $0x1f0] sm:$0xff]   ;;  %v8421_v9 = vld [vmem:[%s10714_s1 + $0x1e8] sm:$0xff]   ;;  %s8403_s26 = smul.u32 80, %s10720_s19  ;;  %s7698_s13 = sshll.u32 %s10720_s19, 3 }
   0xd   : > { %v8414_v2 = vld [vmem:[%s10714_s1 + $0x138] sm:$0xff]   ;;  %7721 = vmatprep.subr.bf16.mxu1 %v8413_v1  ;;  %v8418_v6 = vld [vmem:[%s10714_s1 + $0x130] sm:$0xff]   ;;  %v8422_v10 = vld [vmem:[%s10714_s1 + $0x128] sm:$0xff]   ;;  %s10081_s24 = scalar_lea.vmem %s10716_s3, %s7698_s13  ;;  %s238_s13 = scalar_lea.vmem %s10717_s4, %s10720_s19 }
   0xe   : > { %v8415_v3 = vld [vmem:[%s10714_s1 + $0x1b8] sm:$0xff]   ;;  %7700 = vmatpush3.bf16.msra.mxu0 %v8414_v2  ;;  %v8419_v7 = vld [vmem:[%s10714_s1 + $0x1b0] sm:$0xff]   ;;  %v8423_v11 = vld [vmem:[%s10714_s1 + $0x1a8] sm:$0xff]   ;;  %s9135_s12 = scalar_lea.vmem %s10713_s0, %s8403_s26 }
   0xf   : > { %7722 = vmatpush3.bf16.msra.mxu1 %v8415_v3  ;;  %7701 = vmatprep.subr.bf16.mxu0 %v8416_v4  ;;  %v8424_v12 = vld [vmem:[%s10714_s1 + $0x160] sm:$0xff]   ;;  %v8428_v16 = vld [vmem:[%s10714_s1 + $0x158] sm:$0xff]   ;;  %v8432_v20 = vld [vmem:[%s10714_s1 + $0x150] sm:$0xff]  }
  0x10   : > { %7723 = vmatprep.subr.bf16.mxu1 %v8417_v5  ;;  %v8425_v13 = vld [vmem:[%s10714_s1 + $0x1e0] sm:$0xff]   ;;  %v8429_v17 = vld [vmem:[%s10714_s1 + $0x1d8] sm:$0xff]   ;;  %v8433_v21 = vld [vmem:[%s10714_s1 + $0x1d0] sm:$0xff]  }
  0x11   : > { %v8426_v14 = vld [vmem:[%s10714_s1 + $0x120] sm:$0xff]   ;;  %v8430_v18 = vld [vmem:[%s10714_s1 + $0x118] sm:$0xff]   ;;  %v8434_v22 = vld [vmem:[%s10714_s1 + $0x110] sm:$0xff]  }
  0x12   : > { %7702 = vmatpush3.bf16.msra.mxu0 %v8418_v6  ;;  %v8427_v15 = vld [vmem:[%s10714_s1 + $0x1a0] sm:$0xff]   ;;  %v8431_v19 = vld [vmem:[%s10714_s1 + $0x198] sm:$0xff]   ;;  %v8435_v23 = vld [vmem:[%s10714_s1 + $0x190] sm:$0xff]  }
  0x13   : > { %7724 = vmatpush3.bf16.msra.mxu1 %v8419_v7  ;;  %7703 = vmatprep.subr.bf16.mxu0 %v8420_v8  ;;  %v8436_v24 = vld [vmem:[%s10714_s1 + $0x148] sm:$0xff]   ;;  %v8440_v28 = vld [vmem:[%s10714_s1 + $0x140] sm:$0xff]   ;;  %v8448_v38 = vld [vmem:[%s10714_s1 + $0x78] sm:$0xff]  }
  0x14   : > { %7725 = vmatprep.subr.bf16.mxu1 %v8421_v9  ;;  %v8437_v25 = vld [vmem:[%s10714_s1 + $0x1c8] sm:$0xff]   ;;  %v8441_v29 = vld [vmem:[%s10714_s1 + $0x1c0] sm:$0xff]   ;;  %v8449_v39 = vld [vmem:[%s10714_s1 + $0xf8] sm:$0xff]  }
  0x15   : > { %v8438_v26 = vld [vmem:[%s10714_s1 + $0x108] sm:$0xff]   ;;  %v8442_v30 = vld [vmem:[%s10714_s1 + $0x100] sm:$0xff]   ;;  %v8450_v50 = vld [vmem:[%s10714_s1 + $0x38] sm:$0xff]  }
  0x16   : > { %7704 = vmatpush3.bf16.msra.mxu0 %v8422_v10  ;;  %v8439_v27 = vld [vmem:[%s10714_s1 + $0x188] sm:$0xff]   ;;  %v8443_v31 = vld [vmem:[%s10714_s1 + $0x180] sm:$0xff]   ;;  %v8451_v51 = vld [vmem:[%s10714_s1 + $0xb8] sm:$0xff]  }
  0x17   : > { %7726 = vmatpush3.bf16.msra.mxu1 %v8423_v11  ;;  %7705 = vmatprep.subr.bf16.mxu0 %v8424_v12  ;;  %v310_v32 = vld [vmem:[%s9135_s12] sm:$0x77]  ;;  %v311_v33 = vld [vmem:[%s9135_s12 + $0x8] sm:$0x77]  ;;  %v8452_v56 = vld [vmem:[%s10714_s1 + $0x70] sm:$0xff]  }
  0x18   : > { %7727 = vmatprep.subr.bf16.mxu1 %v8425_v13  ;;  %v6384_v34 = vcombine.low %v310_v32, %v310_v32  ;;  %v6385_v35 = vcombine.high %v310_v32, %v310_v32  ;;  %v6386_v36 = vcombine.low %v311_v33, %v311_v33  ;;  %v6387_v37 = vcombine.high %v311_v33, %v311_v33  ;;  %v8453_v59 = vld [vmem:[%s10714_s1 + $0xf0] sm:$0xff]   ;;  %v8456_v62 = vld [vmem:[%s10714_s1 + $0x68] sm:$0xff]   ;;  %v8460_v2 = vld [vmem:[%s10714_s1 + $0x60] sm:$0xff]  }
  0x19   : > { %v8454_v60 = vld [vmem:[%s10714_s1 + $0x30] sm:$0xff]   ;;  %v8457_v63 = vld [vmem:[%s10714_s1 + $0xe8] sm:$0xff]   ;;  %v8461_v3 = vld [vmem:[%s10714_s1 + $0xe0] sm:$0xff]  }
  0x1a   : > { %7706 = vmatpush3.bf16.msra.mxu0 %v8426_v14  ;;  %v395_v40 = vshrl.u32 %v6385_v35, 16  ;;  %v397_v41 = vshll.u32 %v6385_v35, 16  ;;  %v409_v42 = vshrl.u32 %v6387_v37, 16  ;;  %v411_v43 = vshll.u32 %v6387_v37, 16  ;;  %v8455_v61 = vld [vmem:[%s10714_s1 + $0xb0] sm:$0xff]   ;;  %v8458_v0 = vld [vmem:[%s10714_s1 + $0x28] sm:$0xff]  }
  0x1b   : > { %7728 = vmatpush3.bf16.msra.mxu1 %v8427_v15  ;;  %7707 = vmatprep.subr.bf16.mxu0 %v8428_v16  ;;  %v388_v44 = vshrl.u32 %v6384_v34, 16  ;;  %v390_v45 = vshll.u32 %v6384_v34, 16  ;;  %v402_v46 = vshrl.u32 %v6386_v36, 16  ;;  %v404_v47 = vshll.u32 %v6386_v36, 16  ;;  %v8459_v1 = vld [vmem:[%s10714_s1 + $0xa8] sm:$0xff]   ;;  %v8462_v4 = vld [vmem:[%s10714_s1 + $0x20] sm:$0xff]  }
  0x1c   : > { %7729 = vmatprep.subr.bf16.mxu1 %v8429_v17  ;;  %v399_v48 = vrot.slane %v397_v41, 1  ;;  %v413_v49 = vrot.slane %v411_v43, 1  ;;  %v8463_v5 = vld [vmem:[%s10714_s1 + $0xa0] sm:$0xff]   ;;  %v8464_v6 = vld [vmem:[%s10714_s1 + $0x58] sm:$0xff]   ;;  %v8468_v10 = vld [vmem:[%s10714_s1 + $0x50] sm:$0xff]  }
  0x1d   : > { %v392_v52 = vrot.slane %v390_v45, 1  ;;  %v406_v53 = vrot.slane %v404_v47, 1  ;;  %v8465_v7 = vld [vmem:[%s10714_s1 + $0xd8] sm:$0xff]   ;;  %v8469_v11 = vld [vmem:[%s10714_s1 + $0xd0] sm:$0xff]   ;;  %v8472_v14 = vld [vmem:[%s10714_s1 + $0x48] sm:$0xff]  }
  0x1e   : > { %7708 = vmatpush3.bf16.msra.mxu0 %v8430_v18  ;;  %v400_v54 = vor.u32 %v399_v48, %v395_v40  ;;  %v414_v55 = vor.u32 %v413_v49, %v409_v42  ;;  %v8466_v8 = vld [vmem:[%s10714_s1 + $0x18] sm:$0xff]   ;;  %v8470_v12 = vld [vmem:[%s10714_s1 + $0x10] sm:$0xff]   ;;  %v8473_v15 = vld [vmem:[%s10714_s1 + $0xc8] sm:$0xff]  }
  0x1f   : > { %7730 = vmatpush3.bf16.msra.mxu1 %v8431_v19  ;;  %7709 = vmatprep.subr.bf16.mxu0 %v8432_v20  ;;  %v393_v57 = vor.u32 %v392_v52, %v388_v44  ;;  %v407_v58 = vor.u32 %v406_v53, %v402_v46  ;;  %v8467_v9 = vld [vmem:[%s10714_s1 + $0x98] sm:$0xff]   ;;  %v8471_v13 = vld [vmem:[%s10714_s1 + $0x90] sm:$0xff]   ;;  %v8474_v16 = vld [vmem:[%s10714_s1 + $0x8] sm:$0xff]  }
  0x20   : > { %7731 = vmatprep.subr.bf16.mxu1 %v8433_v21  ;;  %643 = vmatprep.mubr.bf16.mxu0 %v400_v54  ;;  %v8475_v17 = vld [vmem:[%s10714_s1 + $0x88] sm:$0xff]   ;;  %v8476_v18 = vld [vmem:[%s10714_s1 + $0x40] sm:$0xff]   ;;  %v8488_v32 = vld [vmem:[%s10714_s1 + $0x270] sm:$0xff]  }
  0x21   : > { %683 = vmatprep.mubr.bf16.mxu1 %v414_v55  ;;  %v8477_v19 = vld [vmem:[%s10714_s1 + $0xc0] sm:$0xff]   ;;  %v8489_v33 = vld [vmem:[%s10714_s1 + $0x2f0] sm:$0xff]   ;;  %v8492_v36 = vld [vmem:[%s10714_s1 + $0x268] sm:$0xff]  }
  0x22   : > { %7710 = vmatpush3.bf16.msra.mxu0 %v8434_v22  ;;  %v8478_v20 = vld [vmem:[%s10714_s1] sm:$0xff]   ;;  %v8490_v34 = vld [vmem:[%s10714_s1 + $0x230] sm:$0xff]   ;;  %v8493_v37 = vld [vmem:[%s10714_s1 + $0x2e8] sm:$0xff]  }
  0x23   : > { %7732 = vmatpush3.bf16.msra.mxu1 %v8435_v23  ;;  %7711 = vmatprep.subr.bf16.mxu0 %v8436_v24  ;;  %v8479_v21 = vld [vmem:[%s10714_s1 + $0x80] sm:$0xff]   ;;  %v245_v23 = vld [vmem:[%s9135_s12 + $0x8] sm:$0x33]  ;;  %v8491_v35 = vld [vmem:[%s10714_s1 + $0x2b0] sm:$0xff]  }
  0x24   : > { %7733 = vmatprep.subr.bf16.mxu1 %v8437_v25  ;;  %v244_v22 = vld [vmem:[%s9135_s12] sm:$0x33]  ;;  %v8484_v25 = vld [vmem:[%s10714_s1 + $0x278] sm:$0xff]   ;;  %v8504_v48 = vld [vmem:[%s10714_s1 + $0x250] sm:$0xff]  }
  0x25   : > { %v6421_v24 = vcombine.high %v244_v22, %v244_v22  ;;  %v8496_v40 = vld [vmem:[%s10714_s1 + $0x260] sm:$0xff]   ;;  %v8500_v44 = vld [vmem:[%s10714_s1 + $0x258] sm:$0xff]   ;;  %v8505_v49 = vld [vmem:[%s10714_s1 + $0x2d0] sm:$0xff]  }
  0x26   : > { %7712 = vmatpush3.bf16.msra.mxu0 %v8438_v26  ;;  %v6423_v26 = vcombine.high %v245_v23, %v245_v23  ;;  %v8497_v41 = vld [vmem:[%s10714_s1 + $0x2e0] sm:$0xff]   ;;  %v8501_v45 = vld [vmem:[%s10714_s1 + $0x2d8] sm:$0xff]   ;;  %v8508_v52 = vld [vmem:[%s10714_s1 + $0x248] sm:$0xff]  }
  0x27   : > { %7734 = vmatpush3.bf16.msra.mxu1 %v8439_v27  ;;  %7713 = vmatprep.subr.bf16.mxu0 %v8440_v28  ;;  %v8485_v27 = vld [vmem:[%s10714_s1 + $0x2f8] sm:$0xff]   ;;  %v8498_v42 = vld [vmem:[%s10714_s1 + $0x220] sm:$0xff]   ;;  %v8509_v53 = vld [vmem:[%s10714_s1 + $0x2c8] sm:$0xff]  }
  0x28   : > { %7735 = vmatprep.subr.bf16.mxu1 %v8441_v29  ;;  %v8486_v28 = vld [vmem:[%s10714_s1 + $0x238] sm:$0xff]   ;;  %v6420_v29 = vcombine.low %v244_v22, %v244_v22  ;;  %v8499_v43 = vld [vmem:[%s10714_s1 + $0x2a0] sm:$0xff]   ;;  %v8510_v54 = vld [vmem:[%s10714_s1 + $0x208] sm:$0xff]  }
  0x29   : > { %v8502_v46 = vld [vmem:[%s10714_s1 + $0x218] sm:$0xff]   ;;  %v8511_v55 = vld [vmem:[%s10714_s1 + $0x288] sm:$0xff]   ;;  %v8540_v22 = vld [vmem:[%s10714_s1 + $0x350] sm:$0xff]  }
  0x2a   : > { %7714 = vmatpush3.bf16.msra.mxu0 %v8442_v30  ;;  %v6422_v30 = vcombine.low %v245_v23, %v245_v23  ;;  %v8503_v47 = vld [vmem:[%s10714_s1 + $0x298] sm:$0xff]   ;;  %v8541_v23 = vld [vmem:[%s10714_s1 + $0x3d0] sm:$0xff]  }
  0x2b   : > { %7736 = vmatpush3.bf16.msra.mxu1 %v8443_v31  ;;  %7743 = vmatprep.subr.bf16.mxu0 %v8448_v38  ;;  %v8487_v31 = vld [vmem:[%s10714_s1 + $0x2b8] sm:$0xff]   ;;  %v8494_v38 = vld [vmem:[%s10714_s1 + $0x228] sm:$0xff]  }
  0x2c   : > { %7765 = vmatprep.subr.bf16.mxu1 %v8449_v39  ;;  %v8495_v39 = vld [vmem:[%s10714_s1 + $0x2a8] sm:$0xff]  }
  0x2d   : > { %644 = vmatmul.mubr.bf16.vlgmr.msra.gmra.mxu0 %v393_v57  ;;  %v8513_v57 = vld [vmem:[%s10714_s1 + $0x2c0] sm:$0xff]  }
  0x2e   : > { %684 = vmatmul.mubr.bf16.vlgmr.msra.gmra.mxu1 %v407_v58  ;;  %7744 = vmatpush3.bf16.msra.mxu0 %v8450_v50  ;;  %v8506_v50 = vld [vmem:[%s10714_s1 + $0x210] sm:$0xff]   ;;  %v8514_v58 = vld [vmem:[%s10714_s1 + $0x200] sm:$0xff]  }
  0x2f   : > { %7766 = vmatpush3.bf16.msra.mxu1 %v8451_v51  ;;  %7745 = vmatprep.subr.bf16.mxu0 %v8452_v56  ;;  %v8507_v51 = vld [vmem:[%s10714_s1 + $0x290] sm:$0xff]   ;;  %v8512_v56 = vld [vmem:[%s10714_s1 + $0x240] sm:$0xff]  }
  0x30   : > { %7767 = vmatprep.subr.bf16.mxu1 %v8453_v59  ;;  %929 = vmatprep.mubr.bf16.mxu0 %v6421_v24  ;;  %v8515_v59 = vld [vmem:[%s10714_s1 + $0x280] sm:$0xff]   ;;  %v8542_v24 = vld [vmem:[%s10714_s1 + $0x310] sm:$0xff]  }
  0x31   : > { %969 = vmatprep.mubr.bf16.mxu1 %v6423_v26  ;;  %v8544_v26 = vld [vmem:[%s10714_s1 + $0x348] sm:$0xff]  }
  0x32   : > { %7746 = vmatpush3.bf16.msra.mxu0 %v8454_v60  ;;  %v6456_v60 = vld [vmem:[%s9135_s12 + $0x10] sm:$0x33] }
  0x33   : > { %7768 = vmatpush3.bf16.msra.mxu1 %v8455_v61  ;;  %7747 = vmatprep.subr.bf16.mxu0 %v8456_v62  ;;  %v6457_v61 = vld [vmem:[%s9135_s12 + $0x18] sm:$0x33]  ;;  %v6523_v62 = vcombine.high %v6456_v60, %v6456_v60 }
  0x34   : > { %7769 = vmatprep.subr.bf16.mxu1 %v8457_v63  ;;  %v8520_v63 = vld [vmem:[%s10714_s1 + $0x378] sm:$0xff]  }
  0x36   : > { %7748 = vmatpush3.bf16.msra.mxu0 %v8458_v0  ;;  %v6525_v0 = vcombine.high %v6457_v61, %v6457_v61 }
  0x37   : > { %7770 = vmatpush3.bf16.msra.mxu1 %v8459_v1  ;;  %7749 = vmatprep.subr.bf16.mxu0 %v8460_v2  ;;  %v8521_v1 = vld [vmem:[%s10714_s1 + $0x3f8] sm:$0xff]   ;;  %v6522_v2 = vcombine.low %v6456_v60, %v6456_v60 }
  0x38   : > { %7771 = vmatprep.subr.bf16.mxu1 %v8461_v3  ;;  %v6524_v3 = vcombine.low %v6457_v61, %v6457_v61  ;;  %v8561_v61 = vld [vmem:[%s10714_s1 + $0x1f0] sm:$0xff]  }
  0x3a   : > { %7750 = vmatpush3.bf16.msra.mxu0 %v8462_v4  ;;  %v8522_v4 = vld [vmem:[%s10714_s1 + $0x338] sm:$0xff]  }
  0x3b   : > { %7772 = vmatpush3.bf16.msra.mxu1 %v8463_v5  ;;  %7751 = vmatprep.subr.bf16.mxu0 %v8464_v6  ;;  %v8523_v5 = vld [vmem:[%s10714_s1 + $0x3b8] sm:$0xff]   ;;  %v8524_v6 = vld [vmem:[%s10714_s1 + $0x370] sm:$0xff]  }
  0x3c   : > { %7773 = vmatprep.subr.bf16.mxu1 %v8465_v7  ;;  %v8525_v7 = vld [vmem:[%s10714_s1 + $0x3f0] sm:$0xff]  }
  0x3e   : > { %7752 = vmatpush3.bf16.msra.mxu0 %v8466_v8  ;;  %v8526_v8 = vld [vmem:[%s10714_s1 + $0x330] sm:$0xff]  }
  0x3f   : > { %7774 = vmatpush3.bf16.msra.mxu1 %v8467_v9  ;;  %7753 = vmatprep.subr.bf16.mxu0 %v8468_v10  ;;  %v8527_v9 = vld [vmem:[%s10714_s1 + $0x3b0] sm:$0xff]   ;;  %v8528_v10 = vld [vmem:[%s10714_s1 + $0x368] sm:$0xff]  }
  0x40   : > { %7775 = vmatprep.subr.bf16.mxu1 %v8469_v11  ;;  %v8529_v11 = vld [vmem:[%s10714_s1 + $0x3e8] sm:$0xff]  }
  0x42   : > { %7754 = vmatpush3.bf16.msra.mxu0 %v8470_v12  ;;  %v8530_v12 = vld [vmem:[%s10714_s1 + $0x328] sm:$0xff]  }
  0x43   : > { %7776 = vmatpush3.bf16.msra.mxu1 %v8471_v13  ;;  %7755 = vmatprep.subr.bf16.mxu0 %v8472_v14  ;;  %v8531_v13 = vld [vmem:[%s10714_s1 + $0x3a8] sm:$0xff]   ;;  %v8532_v14 = vld [vmem:[%s10714_s1 + $0x360] sm:$0xff]  }
  0x44   : > { %7777 = vmatprep.subr.bf16.mxu1 %v8473_v15  ;;  %v8533_v15 = vld [vmem:[%s10714_s1 + $0x3e0] sm:$0xff]  }
  0x46   : > { %7756 = vmatpush3.bf16.msra.mxu0 %v8474_v16  ;;  %v8534_v16 = vld [vmem:[%s10714_s1 + $0x320] sm:$0xff]  }
  0x47   : > { %7778 = vmatpush3.bf16.msra.mxu1 %v8475_v17  ;;  %7757 = vmatprep.subr.bf16.mxu0 %v8476_v18  ;;  %v8535_v17 = vld [vmem:[%s10714_s1 + $0x3a0] sm:$0xff]   ;;  %v8536_v18 = vld [vmem:[%s10714_s1 + $0x358] sm:$0xff]  }
  0x48   : > { %7779 = vmatprep.subr.bf16.mxu1 %v8477_v19  ;;  %v8537_v19 = vld [vmem:[%s10714_s1 + $0x3d8] sm:$0xff]  }
  0x4a   : > { %7758 = vmatpush3.bf16.msra.mxu0 %v8478_v20  ;;  %v8538_v20 = vld [vmem:[%s10714_s1 + $0x318] sm:$0xff]  }
  0x4b   : > { %7780 = vmatpush3.bf16.msra.mxu1 %v8479_v21  ;;  %7787 = vmatprep.subr.bf16.mxu0 %v8484_v25  ;;  %v8539_v21 = vld [vmem:[%s10714_s1 + $0x398] sm:$0xff]   ;;  %v8543_v25 = vld [vmem:[%s10714_s1 + $0x390] sm:$0xff]  }
  0x4c   : > { %7809 = vmatprep.subr.bf16.mxu1 %v8485_v27  ;;  %v8545_v27 = vld [vmem:[%s10714_s1 + $0x3c8] sm:$0xff]  }
  0x4d   : > { %930 = vmatmul.mubr.bf16.vlgmr.msra.gmra.mxu0 %v6420_v29  ;;  %v8547_v29 = vld [vmem:[%s10714_s1 + $0x388] sm:$0xff]  }
  0x4e   : > { %970 = vmatmul.mubr.bf16.vlgmr.msra.gmra.mxu1 %v6422_v30  ;;  %7788 = vmatpush3.bf16.msra.mxu0 %v8486_v28  ;;  %v8546_v28 = vld [vmem:[%s10714_s1 + $0x308] sm:$0xff]   ;;  %v8548_v30 = vld [vmem:[%s10714_s1 + $0x340] sm:$0xff]  }
  0x4f   : > { %7810 = vmatpush3.bf16.msra.mxu1 %v8487_v31  ;;  %7789 = vmatprep.subr.bf16.mxu0 %v8488_v32  ;;  %v8549_v31 = vld [vmem:[%s10714_s1 + $0x3c0] sm:$0xff]  }
  0x50   : > { %7811 = vmatprep.subr.bf16.mxu1 %v8489_v33  ;;  %1283 = vmatprep.mubr.bf16.mxu0 %v6523_v62  ;;  %v8550_v32 = vld [vmem:[%s10714_s1 + $0x300] sm:$0xff]   ;;  %v8562_v62 = vld [vmem:[%s10714_s1 + $0x130] sm:$0xff]  }
  0x51   : > { %1323 = vmatprep.mubr.bf16.mxu1 %v6525_v0  ;;  %v8551_v33 = vld [vmem:[%s10714_s1 + $0x380] sm:$0xff]   ;;  %v8564_v0 = vld [vmem:[%s10714_s1 + $0x168] sm:$0xff]  }
  0x52   : > { %7790 = vmatpush3.bf16.msra.mxu0 %v8490_v34  ;;  %v6558_v34 = vld [vmem:[%s9135_s12 + $0x10] sm:$0x77] }
  0x53   : > { %7812 = vmatpush3.bf16.msra.mxu1 %v8491_v35  ;;  %7791 = vmatprep.subr.bf16.mxu0 %v8492_v36  ;;  %v6624_v35 = vcombine.low %v6558_v34, %v6558_v34  ;;  %v6625_v36 = vcombine.high %v6558_v34, %v6558_v34 }
  0x54   : > { %7813 = vmatprep.subr.bf16.mxu1 %v8493_v37  ;;  %v6559_v37 = vld [vmem:[%s9135_s12 + $0x18] sm:$0x77] }
  0x56   : > { %7792 = vmatpush3.bf16.msra.mxu0 %v8494_v38  ;;  %v6626_v38 = vcombine.low %v6559_v37, %v6559_v37 }
  0x57   : > { %7814 = vmatpush3.bf16.msra.mxu1 %v8495_v39  ;;  %7793 = vmatprep.subr.bf16.mxu0 %v8496_v40  ;;  %v6627_v39 = vcombine.high %v6559_v37, %v6559_v37  ;;  %v8556_v40 = vld [vmem:[%s10714_s1 + $0x178] sm:$0xff]  }
  0x58   : > { %7815 = vmatprep.subr.bf16.mxu1 %v8497_v41  ;;  %v1417_v41 = vshrl.u32 %v6625_v36, 16 }
  0x5a   : > { %7794 = vmatpush3.bf16.msra.mxu0 %v8498_v42  ;;  %v1419_v42 = vshll.u32 %v6625_v36, 16 }
  0x5b   : > { %7816 = vmatpush3.bf16.msra.mxu1 %v8499_v43  ;;  %7795 = vmatprep.subr.bf16.mxu0 %v8500_v44  ;;  %v1410_v43 = vshrl.u32 %v6624_v35, 16  ;;  %v1412_v44 = vshll.u32 %v6624_v35, 16  ;;  %v8593_v35 = vld [vmem:[%s10714_s1 + $0xf8] sm:$0xff]  }
  0x5c   : > { %7817 = vmatprep.subr.bf16.mxu1 %v8501_v45  ;;  %v8557_v45 = vld [vmem:[%s10714_s1 + $0x1f8] sm:$0xff]  }
  0x5e   : > { %7796 = vmatpush3.bf16.msra.mxu0 %v8502_v46  ;;  %v1431_v46 = vshrl.u32 %v6627_v39, 16 }
  0x5f   : > { %7818 = vmatpush3.bf16.msra.mxu1 %v8503_v47  ;;  %7797 = vmatprep.subr.bf16.mxu0 %v8504_v48  ;;  %v1433_v47 = vshll.u32 %v6627_v39, 16  ;;  %v1424_v48 = vshrl.u32 %v6626_v38, 16 }
  0x60   : > { %7819 = vmatprep.subr.bf16.mxu1 %v8505_v49  ;;  %v1426_v49 = vshll.u32 %v6626_v38, 16 }
  0x62   : > { %7798 = vmatpush3.bf16.msra.mxu0 %v8506_v50  ;;  %v1421_v50 = vrot.slane %v1419_v42, 1  ;;  %v8594_v42 = vld [vmem:[%s10714_s1 + $0x38] sm:$0xff]  }
  0x63   : > { %7820 = vmatpush3.bf16.msra.mxu1 %v8507_v51  ;;  %7799 = vmatprep.subr.bf16.mxu0 %v8508_v52  ;;  %v1414_v51 = vrot.slane %v1412_v44, 1  ;;  %v8558_v52 = vld [vmem:[%s10714_s1 + $0x138] sm:$0xff]  }
  0x64   : > { %7821 = vmatprep.subr.bf16.mxu1 %v8509_v53  ;;  %v1435_v53 = vrot.slane %v1433_v47, 1 }
  0x66   : > { %7800 = vmatpush3.bf16.msra.mxu0 %v8510_v54  ;;  %v1428_v54 = vrot.slane %v1426_v49, 1 }
  0x67   : > { %7822 = vmatpush3.bf16.msra.mxu1 %v8511_v55  ;;  %7801 = vmatprep.subr.bf16.mxu0 %v8512_v56  ;;  %v8559_v55 = vld [vmem:[%s10714_s1 + $0x1b8] sm:$0xff]   ;;  %v8560_v56 = vld [vmem:[%s10714_s1 + $0x170] sm:$0xff]  }
  0x68   : > { %7823 = vmatprep.subr.bf16.mxu1 %v8513_v57  ;;  %v1422_v57 = vor.u32 %v1421_v50, %v1417_v41  ;;  %v1429_v60 = vor.u32 %v1428_v54, %v1424_v48  ;;  %v8600_v54 = vld [vmem:[%s10714_s1 + $0x68] sm:$0xff]  }
  0x6a   : > { %7802 = vmatpush3.bf16.msra.mxu0 %v8514_v58  ;;  %v1415_v58 = vor.u32 %v1414_v51, %v1410_v43  ;;  %v8597_v51 = vld [vmem:[%s10714_s1 + $0xf0] sm:$0xff]  }
  0x6b   : > { %7824 = vmatpush3.bf16.msra.mxu1 %v8515_v59  ;;  %7831 = vmatprep.subr.bf16.mxu0 %v8520_v63  ;;  %v1436_v59 = vor.u32 %v1435_v53, %v1431_v46  ;;  %v8563_v63 = vld [vmem:[%s10714_s1 + $0x1b0] sm:$0xff]  }
  0x6c   : > { %7853 = vmatprep.subr.bf16.mxu1 %v8521_v1  ;;  %v8565_v1 = vld [vmem:[%s10714_s1 + $0x1e8] sm:$0xff]   ;;  %v8596_v46 = vld [vmem:[%s10714_s1 + $0x70] sm:$0xff]  }
  0x6d   : > { %1284 = vmatmul.mubr.bf16.vlgmr.msra.gmra.mxu0 %v6522_v2  ;;  %v8566_v2 = vld [vmem:[%s10714_s1 + $0x128] sm:$0xff]   ;;  %v8599_v53 = vld [vmem:[%s10714_s1 + $0xb0] sm:$0xff]  }
  0x6e   : > { %1324 = vmatmul.mubr.bf16.vlgmr.msra.gmra.mxu1 %v6524_v3  ;;  %7832 = vmatpush3.bf16.msra.mxu0 %v8522_v4  ;;  %v8567_v3 = vld [vmem:[%s10714_s1 + $0x1a8] sm:$0xff]   ;;  %v8568_v4 = vld [vmem:[%s10714_s1 + $0x160] sm:$0xff]  }
  0x6f   : > { %7854 = vmatpush3.bf16.msra.mxu1 %v8523_v5  ;;  %7833 = vmatprep.subr.bf16.mxu0 %v8524_v6  ;;  %v8569_v5 = vld [vmem:[%s10714_s1 + $0x1e0] sm:$0xff]  }
  0x70   : > { %7855 = vmatprep.subr.bf16.mxu1 %v8525_v7  ;;  %1665 = vmatprep.mubr.bf16.mxu0 %v1422_v57  ;;  %v8570_v6 = vld [vmem:[%s10714_s1 + $0x120] sm:$0xff]   ;;  %v8603_v57 = vld [vmem:[%s10714_s1 + $0xa8] sm:$0xff]  }
  0x71   : > { %1705 = vmatprep.mubr.bf16.mxu1 %v1436_v59  ;;  %v8571_v7 = vld [vmem:[%s10714_s1 + $0x1a0] sm:$0xff]  }
  0x72   : > { %7834 = vmatpush3.bf16.msra.mxu0 %v8526_v8  ;;  %v8572_v8 = vld [vmem:[%s10714_s1 + $0x158] sm:$0xff]   ;;  %v8605_v59 = vld [vmem:[%s10714_s1 + $0xe0] sm:$0xff]  }
  0x73   : > { %7856 = vmatpush3.bf16.msra.mxu1 %v8527_v9  ;;  %7835 = vmatprep.subr.bf16.mxu0 %v8528_v10  ;;  %v8573_v9 = vld [vmem:[%s10714_s1 + $0x1d8] sm:$0xff]  }
  0x74   : > { %7857 = vmatprep.subr.bf16.mxu1 %v8529_v11  ;;  %v8574_v10 = vld [vmem:[%s10714_s1 + $0x118] sm:$0xff]  }
  0x75   : > { %v8575_v11 = vld [vmem:[%s10714_s1 + $0x198] sm:$0xff]  }
  0x76   : > { %7836 = vmatpush3.bf16.msra.mxu0 %v8530_v12  ;;  %v8576_v12 = vld [vmem:[%s10714_s1 + $0x150] sm:$0xff]  }
  0x77   : > { %7858 = vmatpush3.bf16.msra.mxu1 %v8531_v13  ;;  %7837 = vmatprep.subr.bf16.mxu0 %v8532_v14  ;;  %v8577_v13 = vld [vmem:[%s10714_s1 + $0x1d0] sm:$0xff]  }
  0x78   : > { %7859 = vmatprep.subr.bf16.mxu1 %v8533_v15  ;;  %v8578_v14 = vld [vmem:[%s10714_s1 + $0x110] sm:$0xff]  }
  0x79   : > { %v8579_v15 = vld [vmem:[%s10714_s1 + $0x190] sm:$0xff]  }
  0x7a   : > { %7838 = vmatpush3.bf16.msra.mxu0 %v8534_v16  ;;  %v8580_v16 = vld [vmem:[%s10714_s1 + $0x148] sm:$0xff]  }
  0x7b   : > { %7860 = vmatpush3.bf16.msra.mxu1 %v8535_v17  ;;  %7839 = vmatprep.subr.bf16.mxu0 %v8536_v18  ;;  %v8581_v17 = vld [vmem:[%s10714_s1 + $0x1c8] sm:$0xff]  }
  0x7c   : > { %7861 = vmatprep.subr.bf16.mxu1 %v8537_v19  ;;  %v8582_v18 = vld [vmem:[%s10714_s1 + $0x108] sm:$0xff]  }
  0x7d   : > { %v8583_v19 = vld [vmem:[%s10714_s1 + $0x188] sm:$0xff]  }
  0x7e   : > { %7840 = vmatpush3.bf16.msra.mxu0 %v8538_v20  ;;  %v8584_v20 = vld [vmem:[%s10714_s1 + $0x140] sm:$0xff]  }
  0x7f   : > { %7862 = vmatpush3.bf16.msra.mxu1 %v8539_v21  ;;  %7841 = vmatprep.subr.bf16.mxu0 %v8540_v22  ;;  %v8585_v21 = vld [vmem:[%s10714_s1 + $0x1c0] sm:$0xff]  }
  0x80   : > { %7863 = vmatprep.subr.bf16.mxu1 %v8541_v23  ;;  %v8586_v22 = vld [vmem:[%s10714_s1 + $0x100] sm:$0xff]  }
  0x81   : > { %v8587_v23 = vld [vmem:[%s10714_s1 + $0x180] sm:$0xff]  }
  0x82   : > { %7842 = vmatpush3.bf16.msra.mxu0 %v8542_v24  ;;  %v6663_v24 = vld [vmem:[%s9135_s12 + $0x10] sm:$0x77] }
  0x83   : > { %7864 = vmatpush3.bf16.msra.mxu1 %v8543_v25  ;;  %7843 = vmatprep.subr.bf16.mxu0 %v8544_v26  ;;  %v6729_v25 = vcombine.low %v6663_v24, %v6663_v24  ;;  %v6730_v26 = vcombine.high %v6663_v24, %v6663_v24  ;;  %v8632_v24 = vld [vmem:[%s10714_s1 + $0x270] sm:$0xff]  }
  0x84   : > { %7865 = vmatprep.subr.bf16.mxu1 %v8545_v27  ;;  %v6664_v27 = vld [vmem:[%s9135_s12 + $0x18] sm:$0x77] }
  0x85   : > { %v1886_v34 = vshll.u32 %v6729_v25, 16 }
  0x86   : > { %7844 = vmatpush3.bf16.msra.mxu0 %v8546_v28  ;;  %v6731_v28 = vcombine.low %v6664_v27, %v6664_v27 }
  0x87   : > { %7866 = vmatpush3.bf16.msra.mxu1 %v8547_v29  ;;  %7845 = vmatprep.subr.bf16.mxu0 %v8548_v30  ;;  %v6732_v29 = vcombine.high %v6664_v27, %v6664_v27  ;;  %v8592_v30 = vld [vmem:[%s10714_s1 + $0x78] sm:$0xff]   ;;  %v1888_v41 = vrot.slane %v1886_v34, 1  ;;  %v8635_v27 = vld [vmem:[%s10714_s1 + $0x2b0] sm:$0xff]   ;;  %v8642_v34 = vld [vmem:[%s10714_s1 + $0x220] sm:$0xff]  }
  0x88   : > { %7867 = vmatprep.subr.bf16.mxu1 %v8549_v31  ;;  %v1891_v31 = vshrl.u32 %v6730_v26, 16  ;;  %v1898_v38 = vshrl.u32 %v6731_v28, 16  ;;  %v1900_v39 = vshll.u32 %v6731_v28, 16  ;;  %v8636_v28 = vld [vmem:[%s10714_s1 + $0x268] sm:$0xff]  }
  0x89   : > { %v1905_v36 = vshrl.u32 %v6732_v29, 16  ;;  %v1907_v37 = vshll.u32 %v6732_v29, 16  ;;  %v8637_v29 = vld [vmem:[%s10714_s1 + $0x2e8] sm:$0xff]  }
  0x8a   : > { %7846 = vmatpush3.bf16.msra.mxu0 %v8550_v32  ;;  %v1893_v32 = vshll.u32 %v6730_v26, 16  ;;  %v1902_v44 = vrot.slane %v1900_v39, 1  ;;  %v8634_v26 = vld [vmem:[%s10714_s1 + $0x230] sm:$0xff]   ;;  %v8647_v39 = vld [vmem:[%s10714_s1 + $0x298] sm:$0xff]  }
  0x8b   : > { %7868 = vmatpush3.bf16.msra.mxu1 %v8551_v33  ;;  %7875 = vmatprep.subr.bf16.mxu0 %v8556_v40  ;;  %v1884_v33 = vshrl.u32 %v6729_v25, 16  ;;  %v1909_v43 = vrot.slane %v1907_v37, 1  ;;  %v8633_v25 = vld [vmem:[%s10714_s1 + $0x2f0] sm:$0xff]   ;;  %v8645_v37 = vld [vmem:[%s10714_s1 + $0x2d8] sm:$0xff]  }
  0x8c   : > { %7897 = vmatprep.subr.bf16.mxu1 %v8557_v45  ;;  %v1895_v40 = vrot.slane %v1893_v32, 1  ;;  %v8595_v45 = vld [vmem:[%s10714_s1 + $0xb8] sm:$0xff]   ;;  %v1903_v50 = vor.u32 %v1902_v44, %v1898_v38  ;;  %v8640_v32 = vld [vmem:[%s10714_s1 + $0x260] sm:$0xff]   ;;  %v8652_v44 = vld [vmem:[%s10714_s1 + $0x248] sm:$0xff]  }
  0x8d   : > { %1666 = vmatmul.mubr.bf16.vlgmr.msra.gmra.mxu0 %v1415_v58  ;;  %v1889_v48 = vor.u32 %v1888_v41, %v1884_v33  ;;  %v1910_v49 = vor.u32 %v1909_v43, %v1905_v36  ;;  %v8604_v58 = vld [vmem:[%s10714_s1 + $0x60] sm:$0xff]   ;;  %v8644_v36 = vld [vmem:[%s10714_s1 + $0x258] sm:$0xff]   ;;  %v8649_v41 = vld [vmem:[%s10714_s1 + $0x2d0] sm:$0xff]  }
  0x8e   : > { %1706 = vmatmul.mubr.bf16.vlgmr.msra.gmra.mxu1 %v1429_v60  ;;  %7876 = vmatpush3.bf16.msra.mxu0 %v8558_v52  ;;  %v1896_v47 = vor.u32 %v1895_v40, %v1891_v31  ;;  %v8598_v52 = vld [vmem:[%s10714_s1 + $0x30] sm:$0xff]   ;;  %v8606_v60 = vld [vmem:[%s10714_s1 + $0x20] sm:$0xff]   ;;  %v8639_v31 = vld [vmem:[%s10714_s1 + $0x2a8] sm:$0xff]  }
  0x8f   : > { %7898 = vmatpush3.bf16.msra.mxu1 %v8559_v55  ;;  %7877 = vmatprep.subr.bf16.mxu0 %v8560_v56  ;;  %v8601_v55 = vld [vmem:[%s10714_s1 + $0xe8] sm:$0xff]   ;;  %v8641_v33 = vld [vmem:[%s10714_s1 + $0x2e0] sm:$0xff]   ;;  %v8646_v38 = vld [vmem:[%s10714_s1 + $0x218] sm:$0xff]  }
  0x90   : > { %7899 = vmatprep.subr.bf16.mxu1 %v8561_v61  ;;  %2139 = vmatprep.mubr.bf16.mxu0 %v1896_v47  ;;  %v8602_v56 = vld [vmem:[%s10714_s1 + $0x28] sm:$0xff]   ;;  %v8607_v61 = vld [vmem:[%s10714_s1 + $0xa0] sm:$0xff]   ;;  %v8648_v40 = vld [vmem:[%s10714_s1 + $0x250] sm:$0xff]  }
  0x91   : > { %2179 = vmatprep.mubr.bf16.mxu1 %v1910_v49  ;;  %v8651_v43 = vld [vmem:[%s10714_s1 + $0x290] sm:$0xff]   ;;  %v8655_v47 = vld [vmem:[%s10714_s1 + $0x288] sm:$0xff]   ;;  %v8657_v49 = vld [vmem:[%s10714_s1 + $0x2c0] sm:$0xff]  }
  0x92   : > { %7878 = vmatpush3.bf16.msra.mxu0 %v8562_v62  ;;  %v8608_v62 = vld [vmem:[%s10714_s1 + $0x58] sm:$0xff]  }
  0x93   : > { %7900 = vmatpush3.bf16.msra.mxu1 %v8563_v63  ;;  %7879 = vmatprep.subr.bf16.mxu0 %v8564_v0  ;;  %v8609_v63 = vld [vmem:[%s10714_s1 + $0xd8] sm:$0xff]  }
  0x94   : > { %7901 = vmatprep.subr.bf16.mxu1 %v8565_v1  ;;  %v8610_v0 = vld [vmem:[%s10714_s1 + $0x18] sm:$0xff]  }
  0x95   : > { %v8611_v1 = vld [vmem:[%s10714_s1 + $0x98] sm:$0xff]  }
  0x96   : > { %7880 = vmatpush3.bf16.msra.mxu0 %v8566_v2  ;;  %v8612_v2 = vld [vmem:[%s10714_s1 + $0x50] sm:$0xff]  }
  0x97   : > { %7902 = vmatpush3.bf16.msra.mxu1 %v8567_v3  ;;  %7881 = vmatprep.subr.bf16.mxu0 %v8568_v4  ;;  %v8613_v3 = vld [vmem:[%s10714_s1 + $0xd0] sm:$0xff]  }
  0x98   : > { %7903 = vmatprep.subr.bf16.mxu1 %v8569_v5  ;;  %v8614_v4 = vld [vmem:[%s10714_s1 + $0x10] sm:$0xff]  }
  0x99   : > { %v8615_v5 = vld [vmem:[%s10714_s1 + $0x90] sm:$0xff]  }
  0x9a   : > { %7882 = vmatpush3.bf16.msra.mxu0 %v8570_v6  ;;  %v8616_v6 = vld [vmem:[%s10714_s1 + $0x48] sm:$0xff]  }
  0x9b   : > { %7904 = vmatpush3.bf16.msra.mxu1 %v8571_v7  ;;  %7883 = vmatprep.subr.bf16.mxu0 %v8572_v8  ;;  %v8617_v7 = vld [vmem:[%s10714_s1 + $0xc8] sm:$0xff]  }
  0x9c   : > { %7905 = vmatprep.subr.bf16.mxu1 %v8573_v9  ;;  %v8618_v8 = vld [vmem:[%s10714_s1 + $0x8] sm:$0xff]  }
  0x9d   : > { %v8619_v9 = vld [vmem:[%s10714_s1 + $0x88] sm:$0xff]  }
  0x9e   : > { %7884 = vmatpush3.bf16.msra.mxu0 %v8574_v10  ;;  %v8620_v10 = vld [vmem:[%s10714_s1 + $0x40] sm:$0xff]  }
  0x9f   : > { %7906 = vmatpush3.bf16.msra.mxu1 %v8575_v11  ;;  %7885 = vmatprep.subr.bf16.mxu0 %v8576_v12  ;;  %v8621_v11 = vld [vmem:[%s10714_s1 + $0xc0] sm:$0xff]  }
  0xa0   : > { %7907 = vmatprep.subr.bf16.mxu1 %v8577_v13  ;;  %v8622_v12 = vld [vmem:[%s10714_s1] sm:$0xff]  }
  0xa1   : > { %v8623_v13 = vld [vmem:[%s10714_s1 + $0x80] sm:$0xff]  }
  0xa2   : > { %7886 = vmatpush3.bf16.msra.mxu0 %v8578_v14  ;;  %v6661_v14 = vld [vmem:[%s9135_s12 + $0x10] sm:$0x33] }
  0xa3   : > { %7908 = vmatpush3.bf16.msra.mxu1 %v8579_v15  ;;  %7887 = vmatprep.subr.bf16.mxu0 %v8580_v16  ;;  %v6766_v15 = vcombine.high %v6661_v14, %v6661_v14  ;;  %v6662_v16 = vld [vmem:[%s9135_s12 + $0x18] sm:$0x33] }
  0xa4   : > { %7909 = vmatprep.subr.bf16.mxu1 %v8581_v17  ;;  %v6768_v17 = vcombine.high %v6662_v16, %v6662_v16 }
  0xa6   : > { %7888 = vmatpush3.bf16.msra.mxu0 %v8582_v18  ;;  %v8628_v18 = vld [vmem:[%s10714_s1 + $0x278] sm:$0xff]  }
  0xa7   : > { %7910 = vmatpush3.bf16.msra.mxu1 %v8583_v19  ;;  %7889 = vmatprep.subr.bf16.mxu0 %v8584_v20  ;;  %v8629_v19 = vld [vmem:[%s10714_s1 + $0x2f8] sm:$0xff]   ;;  %v6765_v20 = vcombine.low %v6661_v14, %v6661_v14  ;;  %v8673_v14 = vld [vmem:[%s10714_s1 + $0x3e8] sm:$0xff]  }
  0xa8   : > { %7911 = vmatprep.subr.bf16.mxu1 %v8585_v21  ;;  %v8630_v21 = vld [vmem:[%s10714_s1 + $0x238] sm:$0xff]  }
  0xaa   : > { %7890 = vmatpush3.bf16.msra.mxu0 %v8586_v22  ;;  %v6767_v22 = vcombine.low %v6662_v16, %v6662_v16  ;;  %v8675_v16 = vld [vmem:[%s10714_s1 + $0x3a8] sm:$0xff]  }
  0xab   : > { %7912 = vmatpush3.bf16.msra.mxu1 %v8587_v23  ;;  %7919 = vmatprep.subr.bf16.mxu0 %v8592_v30  ;;  %v8631_v23 = vld [vmem:[%s10714_s1 + $0x2b8] sm:$0xff]   ;;  %v8638_v30 = vld [vmem:[%s10714_s1 + $0x228] sm:$0xff]  }
  0xac   : > { %7941 = vmatprep.subr.bf16.mxu1 %v8593_v35  ;;  %v8643_v35 = vld [vmem:[%s10714_s1 + $0x2a0] sm:$0xff]  }
  0xad   : > { %2140 = vmatmul.mubr.bf16.vlgmr.msra.gmra.mxu0 %v1889_v48  ;;  %v8656_v48 = vld [vmem:[%s10714_s1 + $0x240] sm:$0xff]  }
  0xae   : > { %2180 = vmatmul.mubr.bf16.vlgmr.msra.gmra.mxu1 %v1903_v50  ;;  %7920 = vmatpush3.bf16.msra.mxu0 %v8594_v42  ;;  %v8650_v42 = vld [vmem:[%s10714_s1 + $0x210] sm:$0xff]   ;;  %v8658_v50 = vld [vmem:[%s10714_s1 + $0x200] sm:$0xff]  }
  0xaf   : > { %7942 = vmatpush3.bf16.msra.mxu1 %v8595_v45  ;;  %7921 = vmatprep.subr.bf16.mxu0 %v8596_v46  ;;  %v8653_v45 = vld [vmem:[%s10714_s1 + $0x2c8] sm:$0xff]  }
  0xb0   : > { %7943 = vmatprep.subr.bf16.mxu1 %v8597_v51  ;;  %2425 = vmatprep.mubr.bf16.mxu0 %v6766_v15  ;;  %v8654_v46 = vld [vmem:[%s10714_s1 + $0x208] sm:$0xff]   ;;  %v8659_v51 = vld [vmem:[%s10714_s1 + $0x280] sm:$0xff]  }
  0xb1   : > { %2465 = vmatprep.mubr.bf16.mxu1 %v6768_v17  ;;  %v8674_v15 = vld [vmem:[%s10714_s1 + $0x328] sm:$0xff]   ;;  %v8676_v17 = vld [vmem:[%s10714_s1 + $0x360] sm:$0xff]  }
  0xb2   : > { %7922 = vmatpush3.bf16.msra.mxu0 %v8598_v52  ;;  %v6801_v52 = vld [vmem:[%s9135_s12 + $0x20] sm:$0x33] }
  0xb3   : > { %7944 = vmatpush3.bf16.msra.mxu1 %v8599_v53  ;;  %7923 = vmatprep.subr.bf16.mxu0 %v8600_v54  ;;  %v6802_v53 = vld [vmem:[%s9135_s12 + $0x28] sm:$0x33]  ;;  %v6868_v54 = vcombine.high %v6801_v52, %v6801_v52 }
  0xb4   : > { %7945 = vmatprep.subr.bf16.mxu1 %v8601_v55  ;;  %v8664_v55 = vld [vmem:[%s10714_s1 + $0x378] sm:$0xff]  }
  0xb6   : > { %7924 = vmatpush3.bf16.msra.mxu0 %v8602_v56  ;;  %v6870_v56 = vcombine.high %v6802_v53, %v6802_v53 }
  0xb7   : > { %7946 = vmatpush3.bf16.msra.mxu1 %v8603_v57  ;;  %7925 = vmatprep.subr.bf16.mxu0 %v8604_v58 }
  0xb8   : > { %7947 = vmatprep.subr.bf16.mxu1 %v8605_v59  ;;  %v8665_v59 = vld [vmem:[%s10714_s1 + $0x3f8] sm:$0xff]  }
  0xba   : > { %7926 = vmatpush3.bf16.msra.mxu0 %v8606_v60  ;;  %v6867_v60 = vcombine.low %v6801_v52, %v6801_v52 }
  0xbb   : > { %7948 = vmatpush3.bf16.msra.mxu1 %v8607_v61  ;;  %7927 = vmatprep.subr.bf16.mxu0 %v8608_v62  ;;  %v8666_v61 = vld [vmem:[%s10714_s1 + $0x338] sm:$0xff]   ;;  %v6869_v62 = vcombine.low %v6802_v53, %v6802_v53 }
  0xbc   : > { %7949 = vmatprep.subr.bf16.mxu1 %v8609_v63  ;;  %v8667_v63 = vld [vmem:[%s10714_s1 + $0x3b8] sm:$0xff]  }
  0xbe   : > { %7928 = vmatpush3.bf16.msra.mxu0 %v8610_v0 }
  0xbf   : > { %7950 = vmatpush3.bf16.msra.mxu1 %v8611_v1  ;;  %7929 = vmatprep.subr.bf16.mxu0 %v8612_v2 }
  0xc0   : > { %7951 = vmatprep.subr.bf16.mxu1 %v8613_v3 }
  0xc2   : > { %7930 = vmatpush3.bf16.msra.mxu0 %v8614_v4  ;;  %v8668_v4 = vld [vmem:[%s10714_s1 + $0x370] sm:$0xff]  }
  0xc3   : > { %7952 = vmatpush3.bf16.msra.mxu1 %v8615_v5  ;;  %7931 = vmatprep.subr.bf16.mxu0 %v8616_v6 }
  0xc4   : > { %7953 = vmatprep.subr.bf16.mxu1 %v8617_v7  ;;  %v8669_v7 = vld [vmem:[%s10714_s1 + $0x3f0] sm:$0xff]  }
  0xc6   : > { %7932 = vmatpush3.bf16.msra.mxu0 %v8618_v8 }
  0xc7   : > { %7954 = vmatpush3.bf16.msra.mxu1 %v8619_v9  ;;  %7933 = vmatprep.subr.bf16.mxu0 %v8620_v10  ;;  %v8670_v9 = vld [vmem:[%s10714_s1 + $0x330] sm:$0xff]  }
  0xc8   : > { %7955 = vmatprep.subr.bf16.mxu1 %v8621_v11  ;;  %v8671_v10 = vld [vmem:[%s10714_s1 + $0x3b0] sm:$0xff]  }
  0xca   : > { %7934 = vmatpush3.bf16.msra.mxu0 %v8622_v12 }
  0xcb   : > { %7956 = vmatpush3.bf16.msra.mxu1 %v8623_v13  ;;  %7963 = vmatprep.subr.bf16.mxu0 %v8628_v18  ;;  %v8672_v13 = vld [vmem:[%s10714_s1 + $0x368] sm:$0xff]   ;;  %v8677_v18 = vld [vmem:[%s10714_s1 + $0x3e0] sm:$0xff]  }
  0xcc   : > { %7985 = vmatprep.subr.bf16.mxu1 %v8629_v19  ;;  %v8678_v19 = vld [vmem:[%s10714_s1 + $0x320] sm:$0xff]  }
  0xcd   : > { %2426 = vmatmul.mubr.bf16.vlgmr.msra.gmra.mxu0 %v6765_v20  ;;  %v8679_v20 = vld [vmem:[%s10714_s1 + $0x3a0] sm:$0xff]  }
  0xce   : > { %2466 = vmatmul.mubr.bf16.vlgmr.msra.gmra.mxu1 %v6767_v22  ;;  %7964 = vmatpush3.bf16.msra.mxu0 %v8630_v21  ;;  %v8680_v21 = vld [vmem:[%s10714_s1 + $0x358] sm:$0xff]  }
  0xcf   : > { %7986 = vmatpush3.bf16.msra.mxu1 %v8631_v23  ;;  %7965 = vmatprep.subr.bf16.mxu0 %v8632_v24  ;;  %v8681_v22 = vld [vmem:[%s10714_s1 + $0x3d8] sm:$0xff]  }
  0xd0   : > { %7987 = vmatprep.subr.bf16.mxu1 %v8633_v25  ;;  %2778 = vmatprep.mubr.bf16.mxu0 %v6868_v54  ;;  %v8682_v23 = vld [vmem:[%s10714_s1 + $0x318] sm:$0xff]   ;;  %v8684_v25 = vld [vmem:[%s10714_s1 + $0x350] sm:$0xff]  }
  0xd1   : > { %2818 = vmatprep.mubr.bf16.mxu1 %v6870_v56  ;;  %v8683_v24 = vld [vmem:[%s10714_s1 + $0x398] sm:$0xff]  }
  0xd2   : > { %7966 = vmatpush3.bf16.msra.mxu0 %v8634_v26  ;;  %v8685_v26 = vld [vmem:[%s10714_s1 + $0x3d0] sm:$0xff]  }
  0xd3   : > { %7988 = vmatpush3.bf16.msra.mxu1 %v8635_v27  ;;  %7967 = vmatprep.subr.bf16.mxu0 %v8636_v28  ;;  %v8686_v27 = vld [vmem:[%s10714_s1 + $0x310] sm:$0xff]  }
  0xd4   : > { %7989 = vmatprep.subr.bf16.mxu1 %v8637_v29  ;;  %v8687_v28 = vld [vmem:[%s10714_s1 + $0x390] sm:$0xff]   ;;  %v8688_v29 = vld [vmem:[%s10714_s1 + $0x348] sm:$0xff]  }
  0xd6   : > { %7968 = vmatpush3.bf16.msra.mxu0 %v8638_v30  ;;  %v8689_v30 = vld [vmem:[%s10714_s1 + $0x3c8] sm:$0xff]  }
  0xd7   : > { %7990 = vmatpush3.bf16.msra.mxu1 %v8639_v31  ;;  %7969 = vmatprep.subr.bf16.mxu0 %v8640_v32  ;;  %v8690_v31 = vld [vmem:[%s10714_s1 + $0x308] sm:$0xff]  }
  0xd8   : > { %7991 = vmatprep.subr.bf16.mxu1 %v8641_v33  ;;  %v8691_v32 = vld [vmem:[%s10714_s1 + $0x388] sm:$0xff]   ;;  %v8692_v33 = vld [vmem:[%s10714_s1 + $0x340] sm:$0xff]  }
  0xda   : > { %7970 = vmatpush3.bf16.msra.mxu0 %v8642_v34  ;;  %v8693_v34 = vld [vmem:[%s10714_s1 + $0x3c0] sm:$0xff]  }
  0xdb   : > { %7992 = vmatpush3.bf16.msra.mxu1 %v8643_v35  ;;  %7971 = vmatprep.subr.bf16.mxu0 %v8644_v36  ;;  %v8694_v35 = vld [vmem:[%s10714_s1 + $0x300] sm:$0xff]  }
  0xdc   : > { %7993 = vmatprep.subr.bf16.mxu1 %v8645_v37  ;;  %v8695_v36 = vld [vmem:[%s10714_s1 + $0x380] sm:$0xff]  }
  0xdd   : > { %v6903_v37 = vld [vmem:[%s9135_s12 + $0x20] sm:$0x77] }
  0xde   : > { %7972 = vmatpush3.bf16.msra.mxu0 %v8646_v38  ;;  %v6904_v38 = vld [vmem:[%s9135_s12 + $0x28] sm:$0x77] }
  0xdf   : > { %7994 = vmatpush3.bf16.msra.mxu1 %v8647_v39  ;;  %7973 = vmatprep.subr.bf16.mxu0 %v8648_v40  ;;  %v6969_v39 = vcombine.low %v6903_v37, %v6903_v37  ;;  %v6970_v40 = vcombine.high %v6903_v37, %v6903_v37  ;;  %v8730_v37 = vld [vmem:[%s10714_s1 + $0x100] sm:$0xff]  }
  0xe0   : > { %7995 = vmatprep.subr.bf16.mxu1 %v8649_v41  ;;  %v6971_v41 = vcombine.low %v6904_v38, %v6904_v38 }
  0xe1   : > { %v2904_v53 = vshrl.u32 %v6969_v39, 16  ;;  %v2906_v54 = vshll.u32 %v6969_v39, 16 }
  0xe2   : > { %7974 = vmatpush3.bf16.msra.mxu0 %v8650_v42  ;;  %v6972_v42 = vcombine.high %v6904_v38, %v6904_v38  ;;  %v2920_v56 = vshll.u32 %v6971_v41, 16 }
  0xe3   : > { %7996 = vmatpush3.bf16.msra.mxu1 %v8651_v43  ;;  %7975 = vmatprep.subr.bf16.mxu0 %v8652_v44 }
  0xe4   : > { %7997 = vmatprep.subr.bf16.mxu1 %v8653_v45  ;;  %v8700_v45 = vld [vmem:[%s10714_s1 + $0x178] sm:$0xff]  }
  0xe6   : > { %7976 = vmatpush3.bf16.msra.mxu0 %v8654_v46  ;;  %v8701_v46 = vld [vmem:[%s10714_s1 + $0x1f8] sm:$0xff]  }
  0xe7   : > { %7998 = vmatpush3.bf16.msra.mxu1 %v8655_v47  ;;  %7977 = vmatprep.subr.bf16.mxu0 %v8656_v48  ;;  %v2911_v47 = vshrl.u32 %v6970_v40, 16  ;;  %v2913_v48 = vshll.u32 %v6970_v40, 16  ;;  %v8731_v40 = vld [vmem:[%s10714_s1 + $0x180] sm:$0xff]  }
  0xe8   : > { %7999 = vmatprep.subr.bf16.mxu1 %v8657_v49  ;;  %v2925_v49 = vshrl.u32 %v6972_v42, 16 }
  0xea   : > { %7978 = vmatpush3.bf16.msra.mxu0 %v8658_v50  ;;  %v2927_v50 = vshll.u32 %v6972_v42, 16  ;;  %v7009_v42 = vld [vmem:[%s9135_s12 + $0x28] sm:$0x77] }
  0xeb   : > { %8000 = vmatpush3.bf16.msra.mxu1 %v8659_v51  ;;  %8007 = vmatprep.subr.bf16.mxu0 %v8664_v55  ;;  %v2918_v55 = vshrl.u32 %v6971_v41, 16  ;;  %v7008_v41 = vld [vmem:[%s9135_s12 + $0x20] sm:$0x77] }
  0xec   : > { %8029 = vmatprep.subr.bf16.mxu1 %v8665_v59  ;;  %v8702_v59 = vld [vmem:[%s10714_s1 + $0x138] sm:$0xff]  }
  0xed   : > { %v7715_v57 = vpop.f32.mrf.mxu0  ;;  %2779 = vmatmul.mubr.bf16.vlgmr.msra.gmra.mxu0 %v6867_v60  ;;  %v8703_v60 = vld [vmem:[%s10714_s1 + $0x1b8] sm:$0xff]  }
  0xee   : > { %v7737_v58 = vpop.f32.mrf.mxu1  ;;  %2819 = vmatmul.mubr.bf16.vlgmr.msra.gmra.mxu1 %v6869_v62  ;;  %8008 = vmatpush3.bf16.msra.mxu0 %v8666_v61 }
  0xef   : > { %v7716_v0 = vpop.f32.mrf.mxu0  ;;  %8030 = vmatpush3.bf16.msra.mxu1 %v8667_v63  ;;  %8009 = vmatprep.subr.bf16.mxu0 %v8668_v4 }
  0xf0   : > { %v7738_v1 = vpop.f32.mrf.mxu1  ;;  %v7717_v2 = vadd.f32 %v7716_v0, %v7715_v57  ;;  %8031 = vmatprep.subr.bf16.mxu1 %v8669_v7  ;;  %v2915_v57 = vrot.slane %v2913_v48, 1 }
  0xf1   : > { %v7739_v3 = vadd.f32 %v7738_v1, %v7737_v58  ;;  %v7718_v5 = vpop.f32.mrf.mxu0  ;;  %v2929_v58 = vrot.slane %v2927_v50, 1  ;;  %v2908_v1 = vrot.slane %v2906_v54, 1  ;;  %v8737_v50 = vld [vmem:[%s10714_s1 + $0xf8] sm:$0xff]  }
  0xf2   : > { %v7740_v6 = vpop.f32.mrf.mxu1  ;;  %8010 = vmatpush3.bf16.msra.mxu0 %v8670_v9 }
  0xf3   : > { %v9751_v8 = vadd.f32 %v7739_v3, %v7717_v2  ;;  %v7719_v11 = vpop.f32.mrf.mxu0  ;;  %8032 = vmatpush3.bf16.msra.mxu1 %v8671_v10  ;;  %8011 = vmatprep.subr.bf16.mxu0 %v8672_v13  ;;  %v2922_v2 = vrot.slane %v2920_v56, 1  ;;  %v2916_v3 = vor.u32 %v2915_v57, %v2911_v47  ;;  %v2930_v4 = vor.u32 %v2929_v58, %v2925_v49  ;;  %v8704_v6 = vld [vmem:[%s10714_s1 + $0x170] sm:$0xff]  }
  0xf4   : > { %v7741_v12 = vpop.f32.mrf.mxu1  ;;  %8033 = vmatprep.subr.bf16.mxu1 %v8673_v14  ;;  %v2909_v10 = vor.u32 %v2908_v1, %v2904_v53  ;;  %v8707_v14 = vld [vmem:[%s10714_s1 + $0x1b0] sm:$0xff]   ;;  %v7077_v49 = vcombine.high %v7009_v42, %v7009_v42 }
  0xf5   : > { %v2923_v11 = vor.u32 %v2922_v2, %v2918_v55  ;;  %v8705_v12 = vld [vmem:[%s10714_s1 + $0x1f0] sm:$0xff]   ;;  %3159 = vmatprep.mubr.bf16.mxu0 %v2916_v3  ;;  %3199 = vmatprep.mubr.bf16.mxu1 %v2930_v4  ;;  %v8739_v4 = vld [vmem:[%s10714_s1 + $0xb8] sm:$0xff]  }
  0xf6   : > { %8012 = vmatpush3.bf16.msra.mxu0 %v8674_v15  ;;  %v8708_v15 = vld [vmem:[%s10714_s1 + $0x168] sm:$0xff]   ;;  %v3393_v57 = vshrl.u32 %v7077_v49, 16  ;;  %v3395_v58 = vshll.u32 %v7077_v49, 16  ;;  %v8773_v49 = vld [vmem:[%s10714_s1 + $0x2f8] sm:$0xff]  }
  0xf7   : > { %8034 = vmatpush3.bf16.msra.mxu1 %v8675_v16  ;;  %8013 = vmatprep.subr.bf16.mxu0 %v8676_v17  ;;  %v8709_v16 = vld [vmem:[%s10714_s1 + $0x1e8] sm:$0xff]  }
  0xf8   : > { %8035 = vmatprep.subr.bf16.mxu1 %v8677_v18  ;;  %v8710_v17 = vld [vmem:[%s10714_s1 + $0x128] sm:$0xff]   ;;  %v3397_v2 = vrot.slane %v3395_v58, 1  ;;  %v6660_v58 = vld [vmem:[%s10715_s2] ss:$0 sm:$0xff] }
  0xf9   : > { %v8711_v18 = vld [vmem:[%s10714_s1 + $0x1a8] sm:$0xff]  }
  0xfa   : > { %8014 = vmatpush3.bf16.msra.mxu0 %v8678_v19  ;;  %v8712_v19 = vld [vmem:[%s10714_s1 + $0x160] sm:$0xff]  }
  0xfb   : > { %8036 = vmatpush3.bf16.msra.mxu1 %v8679_v20  ;;  %8015 = vmatprep.subr.bf16.mxu0 %v8680_v21  ;;  %v8713_v20 = vld [vmem:[%s10714_s1 + $0x1e0] sm:$0xff]  }
  0xfc   : > { %8037 = vmatprep.subr.bf16.mxu1 %v8681_v22  ;;  %v8714_v21 = vld [vmem:[%s10714_s1 + $0x120] sm:$0xff]  }
  0xfd   : > { %v8715_v22 = vld [vmem:[%s10714_s1 + $0x1a0] sm:$0xff]  }
  0xfe   : > { %8016 = vmatpush3.bf16.msra.mxu0 %v8682_v23  ;;  %v8716_v23 = vld [vmem:[%s10714_s1 + $0x158] sm:$0xff]  }
  0xff   : > { %8038 = vmatpush3.bf16.msra.mxu1 %v8683_v24  ;;  %8017 = vmatprep.subr.bf16.mxu0 %v8684_v25  ;;  %v8717_v24 = vld [vmem:[%s10714_s1 + $0x1d8] sm:$0xff]  }
 0x100   : > { %8039 = vmatprep.subr.bf16.mxu1 %v8685_v26  ;;  %v8718_v25 = vld [vmem:[%s10714_s1 + $0x118] sm:$0xff]  }
 0x101   : > { %v8719_v26 = vld [vmem:[%s10714_s1 + $0x198] sm:$0xff]  }
 0x102   : > { %8018 = vmatpush3.bf16.msra.mxu0 %v8686_v27  ;;  %v8720_v27 = vld [vmem:[%s10714_s1 + $0x150] sm:$0xff]  }
 0x103   : > { %8040 = vmatpush3.bf16.msra.mxu1 %v8687_v28  ;;  %8019 = vmatprep.subr.bf16.mxu0 %v8688_v29  ;;  %v8721_v28 = vld [vmem:[%s10714_s1 + $0x1d0] sm:$0xff]  }
 0x104   : > { %8041 = vmatprep.subr.bf16.mxu1 %v8689_v30  ;;  %v8722_v29 = vld [vmem:[%s10714_s1 + $0x110] sm:$0xff]  }
 0x105   : > { %v8723_v30 = vld [vmem:[%s10714_s1 + $0x190] sm:$0xff]  }
 0x106   : > { %8020 = vmatpush3.bf16.msra.mxu0 %v8690_v31  ;;  %v8724_v31 = vld [vmem:[%s10714_s1 + $0x148] sm:$0xff]  }
 0x107   : > { %8042 = vmatpush3.bf16.msra.mxu1 %v8691_v32  ;;  %8021 = vmatprep.subr.bf16.mxu0 %v8692_v33  ;;  %v8725_v32 = vld [vmem:[%s10714_s1 + $0x1c8] sm:$0xff]  }
 0x108   : > { %8043 = vmatprep.subr.bf16.mxu1 %v8693_v34  ;;  %v8726_v33 = vld [vmem:[%s10714_s1 + $0x108] sm:$0xff]  }
 0x109   : > { %v8727_v34 = vld [vmem:[%s10714_s1 + $0x188] sm:$0xff]  }
 0x10a   : > { %8022 = vmatpush3.bf16.msra.mxu0 %v8694_v35  ;;  %v8728_v35 = vld [vmem:[%s10714_s1 + $0x140] sm:$0xff]  }
 0x10b   : > { %8044 = vmatpush3.bf16.msra.mxu1 %v8695_v36  ;;  %8051 = vmatprep.subr.bf16.mxu0 %v8700_v45  ;;  %v8729_v36 = vld [vmem:[%s10714_s1 + $0x1c0] sm:$0xff]   ;;  %v7076_v45 = vcombine.low %v7009_v42, %v7009_v42 }
 0x10c   : > { %8073 = vmatprep.subr.bf16.mxu1 %v8701_v46  ;;  %v8736_v46 = vld [vmem:[%s10714_s1 + $0x78] sm:$0xff]   ;;  %v7006_v42 = vld [vmem:[%s9135_s12 + $0x20] sm:$0x33] }
 0x10d   : > { %v7759_v43 = vpop.f32.mrf.mxu0  ;;  %3160 = vmatmul.mubr.bf16.vlgmr.msra.gmra.mxu0 %v2909_v10 }
 0x10e   : > { %v7781_v44 = vpop.f32.mrf.mxu1  ;;  %3200 = vmatmul.mubr.bf16.vlgmr.msra.gmra.mxu1 %v2923_v11  ;;  %8052 = vmatpush3.bf16.msra.mxu0 %v8702_v59  ;;  %v3386_v59 = vshrl.u32 %v7076_v45, 16  ;;  %v8741_v11 = vld [vmem:[%s10714_s1 + $0xf0] sm:$0xff]  }
 0x10f   : > { %v7760_v51 = vpop.f32.mrf.mxu0  ;;  %8074 = vmatpush3.bf16.msra.mxu1 %v8703_v60  ;;  %8053 = vmatprep.subr.bf16.mxu0 %v8704_v6  ;;  %v3388_v60 = vshll.u32 %v7076_v45, 16 }
 0x110   : > { %v7782_v52 = vpop.f32.mrf.mxu1  ;;  %v7761_v61 = vadd.f32 %v7760_v51, %v7759_v43  ;;  %8075 = vmatprep.subr.bf16.mxu1 %v8705_v12  ;;  %v7074_v43 = vcombine.low %v7008_v41, %v7008_v41  ;;  %v8742_v12 = vld [vmem:[%s10714_s1 + $0x30] sm:$0xff]  }
 0x111   : > { %v7783_v62 = vadd.f32 %v7782_v52, %v7781_v44  ;;  %v7762_v63 = vpop.f32.mrf.mxu0  ;;  %v7075_v44 = vcombine.high %v7008_v41, %v7008_v41  ;;  %v3390_v3 = vrot.slane %v3388_v60, 1  ;;  %v8767_v41 = vld [vmem:[%s10714_s1 + $0x80] sm:$0xff]  }
 0x112   : > { %v7784_v0 = vpop.f32.mrf.mxu1  ;;  %v932_v5 = vadd.f32 %v7761_v61, %v9751_v8  ;;  %v8706_v8 = vld [vmem:[%s10714_s1 + $0x130] sm:$0xff]   ;;  %v3372_v53 = vshrl.u32 %v7074_v43, 16  ;;  %v3374_v54 = vshll.u32 %v7074_v43, 16  ;;  %v8738_v63 = vld [vmem:[%s10714_s1 + $0x38] sm:$0xff]   ;;  %v7111_v43 = vcombine.high %v7006_v42, %v7006_v42 }
 0x113   : > { %v7763_v7 = vpop.f32.mrf.mxu0  ;;  %8054 = vmatpush3.bf16.msra.mxu0 %v8706_v8  ;;  %8076 = vmatpush3.bf16.msra.mxu1 %v8707_v14  ;;  %v3379_v51 = vshrl.u32 %v7075_v44, 16  ;;  %v3381_v52 = vshll.u32 %v7075_v44, 16  ;;  %v3391_v10 = vor.u32 %v3390_v3, %v3386_v59  ;;  %v8743_v8 = vld [vmem:[%s10714_s1 + $0xb0] sm:$0xff]   ;;  %v8744_v14 = vld [vmem:[%s10714_s1 + $0x68] sm:$0xff]  }
 0x114   : > { %v7785_v9 = vpop.f32.mrf.mxu1  ;;  %v9852_v13 = vadd.f32 %v7783_v62, %v932_v5  ;;  %8055 = vmatprep.subr.bf16.mxu0 %v8708_v15  ;;  %8077 = vmatprep.subr.bf16.mxu1 %v8709_v16  ;;  %v3376_v62 = vrot.slane %v3374_v54, 1  ;;  %v8740_v7 = vld [vmem:[%s10714_s1 + $0x70] sm:$0xff]   ;;  %v8745_v15 = vld [vmem:[%s10714_s1 + $0xe8] sm:$0xff]  }
 0x115   : > { %v3383_v61 = vrot.slane %v3381_v52, 1  ;;  %v3398_v9 = vor.u32 %v3397_v2, %v3393_v57  ;;  %v8746_v16 = vld [vmem:[%s10714_s1 + $0x28] sm:$0xff]   ;;  %v7110_v52 = vcombine.low %v7006_v42, %v7006_v42  ;;  %v8775_v57 = vld [vmem:[%s10714_s1 + $0x2b8] sm:$0xff]   ;;  %v8779_v3 = vld [vmem:[%s10714_s1 + $0x2b0] sm:$0xff]  }
 0x116   : > { %v3377_v6 = vor.u32 %v3376_v62, %v3372_v53  ;;  %v8774_v53 = vld [vmem:[%s10714_s1 + $0x238] sm:$0xff]   ;;  %v8776_v62 = vld [vmem:[%s10714_s1 + $0x270] sm:$0xff]  }
 0x117   : > { %8056 = vmatpush3.bf16.msra.mxu0 %v8710_v17  ;;  %8078 = vmatpush3.bf16.msra.mxu1 %v8711_v18  ;;  %v3384_v5 = vor.u32 %v3383_v61, %v3379_v51  ;;  %v8747_v17 = vld [vmem:[%s10714_s1 + $0xa8] sm:$0xff]   ;;  %v8748_v18 = vld [vmem:[%s10714_s1 + $0x60] sm:$0xff]  }
 0x118   : > { %8057 = vmatprep.subr.bf16.mxu0 %v8712_v19  ;;  %8079 = vmatprep.subr.bf16.mxu1 %v8713_v20  ;;  %v8749_v19 = vld [vmem:[%s10714_s1 + $0xe0] sm:$0xff]  }
 0x119   : > { %3627 = vmatprep.mubr.bf16.mxu0 %v3384_v5  ;;  %3667 = vmatprep.mubr.bf16.mxu1 %v3398_v9  ;;  %v8750_v20 = vld [vmem:[%s10714_s1 + $0x20] sm:$0xff]   ;;  %v8780_v5 = vld [vmem:[%s10714_s1 + $0x268] sm:$0xff]  }
 0x11a   : > { %v8782_v9 = vld [vmem:[%s10714_s1 + $0x228] sm:$0xff]  }
 0x11b   : > { %8058 = vmatpush3.bf16.msra.mxu0 %v8714_v21  ;;  %8080 = vmatpush3.bf16.msra.mxu1 %v8715_v22  ;;  %v8751_v21 = vld [vmem:[%s10714_s1 + $0xa0] sm:$0xff]   ;;  %v8752_v22 = vld [vmem:[%s10714_s1 + $0x58] sm:$0xff]  }
 0x11c   : > { %8059 = vmatprep.subr.bf16.mxu0 %v8716_v23  ;;  %8081 = vmatprep.subr.bf16.mxu1 %v8717_v24  ;;  %v8753_v23 = vld [vmem:[%s10714_s1 + $0xd8] sm:$0xff]  }
 0x11d   : > { %v8754_v24 = vld [vmem:[%s10714_s1 + $0x18] sm:$0xff]  }
 0x11f   : > { %8060 = vmatpush3.bf16.msra.mxu0 %v8718_v25  ;;  %8082 = vmatpush3.bf16.msra.mxu1 %v8719_v26  ;;  %v8755_v25 = vld [vmem:[%s10714_s1 + $0x98] sm:$0xff]   ;;  %v8756_v26 = vld [vmem:[%s10714_s1 + $0x50] sm:$0xff]  }
 0x120   : > { %8061 = vmatprep.subr.bf16.mxu0 %v8720_v27  ;;  %8083 = vmatprep.subr.bf16.mxu1 %v8721_v28  ;;  %v8757_v27 = vld [vmem:[%s10714_s1 + $0xd0] sm:$0xff]  }
 0x121   : > { %v8758_v28 = vld [vmem:[%s10714_s1 + $0x10] sm:$0xff]  }
 0x123   : > { %8062 = vmatpush3.bf16.msra.mxu0 %v8722_v29  ;;  %8084 = vmatpush3.bf16.msra.mxu1 %v8723_v30  ;;  %v8759_v29 = vld [vmem:[%s10714_s1 + $0x90] sm:$0xff]   ;;  %v8760_v30 = vld [vmem:[%s10714_s1 + $0x48] sm:$0xff]  }
 0x124   : > { %8063 = vmatprep.subr.bf16.mxu0 %v8724_v31  ;;  %8085 = vmatprep.subr.bf16.mxu1 %v8725_v32  ;;  %v8761_v31 = vld [vmem:[%s10714_s1 + $0xc8] sm:$0xff]  }
 0x125   : > { %v8762_v32 = vld [vmem:[%s10714_s1 + $0x8] sm:$0xff]  }
 0x127   : > { %8064 = vmatpush3.bf16.msra.mxu0 %v8726_v33  ;;  %8086 = vmatpush3.bf16.msra.mxu1 %v8727_v34  ;;  %v8763_v33 = vld [vmem:[%s10714_s1 + $0x88] sm:$0xff]   ;;  %v8764_v34 = vld [vmem:[%s10714_s1 + $0x40] sm:$0xff]  }
 0x128   : > { %8065 = vmatprep.subr.bf16.mxu0 %v8728_v35  ;;  %8087 = vmatprep.subr.bf16.mxu1 %v8729_v36 }
 0x12b   : > { %8066 = vmatpush3.bf16.msra.mxu0 %v8730_v37  ;;  %8088 = vmatpush3.bf16.msra.mxu1 %v8731_v40  ;;  %v8765_v37 = vld [vmem:[%s10714_s1 + $0xc0] sm:$0xff]  }
 0x12c   : > { %8095 = vmatprep.subr.bf16.mxu0 %v8736_v46  ;;  %8117 = vmatprep.subr.bf16.mxu1 %v8737_v50  ;;  %v8766_v40 = vld [vmem:[%s10714_s1] sm:$0xff]  }
 0x12d   : > { %v9929_v38 = vpop.f32.mrf.mxu0 }
 0x12e   : > { %v9931_v39 = vpop.f32.mrf.mxu1  ;;  %3628 = vmatmul.mubr.bf16.vlgmr.msra.gmra.mxu0 %v3377_v6  ;;  %3668 = vmatmul.mubr.bf16.vlgmr.msra.gmra.mxu1 %v3391_v10  ;;  %v8781_v6 = vld [vmem:[%s10714_s1 + $0x2e8] sm:$0xff]  }
 0x12f   : > { %v9941_v47 = vpop.f32.mrf.mxu0  ;;  %8096 = vmatpush3.bf16.msra.mxu0 %v8738_v63  ;;  %8118 = vmatpush3.bf16.msra.mxu1 %v8739_v4  ;;  %v8783_v10 = vld [vmem:[%s10714_s1 + $0x2a8] sm:$0xff]  }
 0x130   : > { %v9943_v48 = vpop.f32.mrf.mxu1  ;;  %8097 = vmatprep.subr.bf16.mxu0 %v8740_v7  ;;  %8119 = vmatprep.subr.bf16.mxu1 %v8741_v11  ;;  %v7805_v35 = vadd.f32 %v9941_v47, %v9929_v38  ;;  %v8772_v47 = vld [vmem:[%s10714_s1 + $0x278] sm:$0xff]   ;;  %v8784_v11 = vld [vmem:[%s10714_s1 + $0x260] sm:$0xff]  }
 0x131   : > { %v7806_v55 = vpop.f32.mrf.mxu0  ;;  %v7827_v36 = vadd.f32 %v9943_v48, %v9931_v39  ;;  %v7007_v39 = vld [vmem:[%s9135_s12 + $0x28] sm:$0x33]  ;;  %3913 = vmatprep.mubr.bf16.mxu0 %v7111_v43  ;;  %v8810_v43 = vld [vmem:[%s10714_s1 + $0x338] sm:$0xff]  }
 0x132   : > { %v7828_v56 = vpop.f32.mrf.mxu1  ;;  %v7113_v46 = vcombine.high %v7007_v39, %v7007_v39 }
 0x133   : > { %v7807_v0 = vpop.f32.mrf.mxu0  ;;  %8098 = vmatpush3.bf16.msra.mxu0 %v8742_v12  ;;  %8120 = vmatpush3.bf16.msra.mxu1 %v8743_v8  ;;  %v1326_v45 = vadd.f32 %v7827_v36, %v7805_v35  ;;  %v7112_v56 = vcombine.low %v7007_v39, %v7007_v39  ;;  %v8785_v12 = vld [vmem:[%s10714_s1 + $0x2e0] sm:$0xff]  }
 0x134   : > { %v7829_v1 = vpop.f32.mrf.mxu1  ;;  %8099 = vmatprep.subr.bf16.mxu0 %v8744_v14  ;;  %8121 = vmatprep.subr.bf16.mxu1 %v8745_v15  ;;  %v8777_v0 = vld [vmem:[%s10714_s1 + $0x2f0] sm:$0xff]   ;;  %v8786_v8 = vld [vmem:[%s10714_s1 + $0x220] sm:$0xff]   ;;  %v8788_v15 = vld [vmem:[%s10714_s1 + $0x258] sm:$0xff]  }
 0x135   : > { %3953 = vmatprep.mubr.bf16.mxu1 %v7113_v46  ;;  %v1331_v60 = vadd.f32 %v1326_v45, %v9852_v13  ;;  %v8778_v13 = vld [vmem:[%s10714_s1 + $0x230] sm:$0xff]   ;;  %v8787_v14 = vld [vmem:[%s10714_s1 + $0x2a0] sm:$0xff]   ;;  %v8811_v45 = vld [vmem:[%s10714_s1 + $0x3b8] sm:$0xff]  }
 0x137   : > { %8100 = vmatpush3.bf16.msra.mxu0 %v8746_v16  ;;  %8122 = vmatpush3.bf16.msra.mxu1 %v8747_v17  ;;  %v8789_v16 = vld [vmem:[%s10714_s1 + $0x2d8] sm:$0xff]  }
 0x138   : > { %8101 = vmatprep.subr.bf16.mxu0 %v8748_v18  ;;  %8123 = vmatprep.subr.bf16.mxu1 %v8749_v19  ;;  %v8790_v17 = vld [vmem:[%s10714_s1 + $0x218] sm:$0xff]   ;;  %v8792_v19 = vld [vmem:[%s10714_s1 + $0x250] sm:$0xff]  }
 0x139   : > { %v8791_v18 = vld [vmem:[%s10714_s1 + $0x298] sm:$0xff]  }
 0x13b   : > { %8102 = vmatpush3.bf16.msra.mxu0 %v8750_v20  ;;  %8124 = vmatpush3.bf16.msra.mxu1 %v8751_v21  ;;  %v8793_v20 = vld [vmem:[%s10714_s1 + $0x2d0] sm:$0xff]  }
 0x13c   : > { %8103 = vmatprep.subr.bf16.mxu0 %v8752_v22  ;;  %8125 = vmatprep.subr.bf16.mxu1 %v8753_v23  ;;  %v8794_v21 = vld [vmem:[%s10714_s1 + $0x210] sm:$0xff]   ;;  %v8796_v23 = vld [vmem:[%s10714_s1 + $0x248] sm:$0xff]  }
 0x13d   : > { %v8795_v22 = vld [vmem:[%s10714_s1 + $0x290] sm:$0xff]  }
 0x13f   : > { %8104 = vmatpush3.bf16.msra.mxu0 %v8754_v24  ;;  %8126 = vmatpush3.bf16.msra.mxu1 %v8755_v25  ;;  %v8797_v24 = vld [vmem:[%s10714_s1 + $0x2c8] sm:$0xff]  }
 0x140   : > { %8105 = vmatprep.subr.bf16.mxu0 %v8756_v26  ;;  %8127 = vmatprep.subr.bf16.mxu1 %v8757_v27  ;;  %v8798_v25 = vld [vmem:[%s10714_s1 + $0x208] sm:$0xff]   ;;  %v8800_v27 = vld [vmem:[%s10714_s1 + $0x240] sm:$0xff]  }
 0x141   : > { %v8799_v26 = vld [vmem:[%s10714_s1 + $0x288] sm:$0xff]  }
 0x143   : > { %8106 = vmatpush3.bf16.msra.mxu0 %v8758_v28  ;;  %8128 = vmatpush3.bf16.msra.mxu1 %v8759_v29  ;;  %v8801_v28 = vld [vmem:[%s10714_s1 + $0x2c0] sm:$0xff]  }
 0x144   : > { %8107 = vmatprep.subr.bf16.mxu0 %v8760_v30  ;;  %8129 = vmatprep.subr.bf16.mxu1 %v8761_v31  ;;  %v8802_v29 = vld [vmem:[%s10714_s1 + $0x200] sm:$0xff]   ;;  %v7146_v31 = vld [vmem:[%s9135_s12 + $0x30] sm:$0x33] }
 0x145   : > { %v8803_v30 = vld [vmem:[%s10714_s1 + $0x280] sm:$0xff]  }
 0x147   : > { %8108 = vmatpush3.bf16.msra.mxu0 %v8762_v32  ;;  %8130 = vmatpush3.bf16.msra.mxu1 %v8763_v33  ;;  %v7213_v32 = vcombine.high %v7146_v31, %v7146_v31  ;;  %v7147_v33 = vld [vmem:[%s9135_s12 + $0x38] sm:$0x33] }
 0x148   : > { %8109 = vmatprep.subr.bf16.mxu0 %v8764_v34  ;;  %8131 = vmatprep.subr.bf16.mxu1 %v8765_v37  ;;  %v7215_v35 = vcombine.high %v7147_v33, %v7147_v33  ;;  %v8808_v37 = vld [vmem:[%s10714_s1 + $0x378] sm:$0xff]  }
 0x14b   : > { %8110 = vmatpush3.bf16.msra.mxu0 %v8766_v40  ;;  %8132 = vmatpush3.bf16.msra.mxu1 %v8767_v41  ;;  %v7212_v40 = vcombine.low %v7146_v31, %v7146_v31  ;;  %v8809_v41 = vld [vmem:[%s10714_s1 + $0x3f8] sm:$0xff]  }
 0x14c   : > { %8139 = vmatprep.subr.bf16.mxu0 %v8772_v47  ;;  %8161 = vmatprep.subr.bf16.mxu1 %v8773_v49  ;;  %v8812_v49 = vld [vmem:[%s10714_s1 + $0x370] sm:$0xff]  }
 0x14d   : > { %v7847_v38 = vpop.f32.mrf.mxu0 }
 0x14e   : > { %v7869_v44 = vpop.f32.mrf.mxu1  ;;  %3914 = vmatmul.mubr.bf16.vlgmr.msra.gmra.mxu0 %v7110_v52  ;;  %3954 = vmatmul.mubr.bf16.vlgmr.msra.gmra.mxu1 %v7112_v56  ;;  %v8816_v56 = vld [vmem:[%s10714_s1 + $0x368] sm:$0xff]  }
 0x14f   : > { %v7848_v48 = vpop.f32.mrf.mxu0  ;;  %8140 = vmatpush3.bf16.msra.mxu0 %v8774_v53  ;;  %8162 = vmatpush3.bf16.msra.mxu1 %v8775_v57  ;;  %v8814_v53 = vld [vmem:[%s10714_s1 + $0x330] sm:$0xff]   ;;  %v8817_v57 = vld [vmem:[%s10714_s1 + $0x3e8] sm:$0xff]  }
 0x150   : > { %v7849_v50 = vadd.f32 %v7848_v48, %v7847_v38  ;;  %v7870_v51 = vpop.f32.mrf.mxu1  ;;  %8141 = vmatprep.subr.bf16.mxu0 %v8776_v62  ;;  %8163 = vmatprep.subr.bf16.mxu1 %v8777_v0  ;;  %v7214_v38 = vcombine.low %v7147_v33, %v7147_v33  ;;  %v8822_v62 = vld [vmem:[%s10714_s1 + $0x320] sm:$0xff]   ;;  %v8824_v0 = vld [vmem:[%s10714_s1 + $0x358] sm:$0xff]  }
 0x151   : > { %v7871_v54 = vadd.f32 %v7870_v51, %v7869_v44  ;;  %v7850_v55 = vpop.f32.mrf.mxu0  ;;  %4266 = vmatprep.mubr.bf16.mxu0 %v7213_v32  ;;  %4306 = vmatprep.mubr.bf16.mxu1 %v7215_v35  ;;  %v8813_v51 = vld [vmem:[%s10714_s1 + $0x3f0] sm:$0xff]  }
 0x152   : > { %v7872_v59 = vpop.f32.mrf.mxu1  ;;  %v8815_v55 = vld [vmem:[%s10714_s1 + $0x3b0] sm:$0xff]  }
 0x153   : > { %v1708_v61 = vadd.f32 %v7871_v54, %v7849_v50  ;;  %v7851_v63 = vpop.f32.mrf.mxu0  ;;  %8142 = vmatpush3.bf16.msra.mxu0 %v8778_v13  ;;  %8164 = vmatpush3.bf16.msra.mxu1 %v8779_v3  ;;  %v8819_v59 = vld [vmem:[%s10714_s1 + $0x3a8] sm:$0xff]   ;;  %v8827_v13 = vld [vmem:[%s10714_s1 + $0x398] sm:$0xff]   ;;  %v8828_v3 = vld [vmem:[%s10714_s1 + $0x350] sm:$0xff]  }
 0x154   : > { %v7873_v1 = vpop.f32.mrf.mxu1  ;;  %8143 = vmatprep.subr.bf16.mxu0 %v8780_v5  ;;  %8165 = vmatprep.subr.bf16.mxu1 %v8781_v6  ;;  %v8823_v63 = vld [vmem:[%s10714_s1 + $0x3a0] sm:$0xff]   ;;  %v8829_v5 = vld [vmem:[%s10714_s1 + $0x3d0] sm:$0xff]  }
 0x155   : > { %v1713_v2 = vadd.f32 %v1708_v61, %v1331_v60  ;;  %v8820_v60 = vld [vmem:[%s10714_s1 + $0x360] sm:$0xff]   ;;  %v8825_v1 = vld [vmem:[%s10714_s1 + $0x3d8] sm:$0xff]   ;;  %v8830_v6 = vld [vmem:[%s10714_s1 + $0x310] sm:$0xff]  }
 0x156   : > { %v8821_v61 = vld [vmem:[%s10714_s1 + $0x3e0] sm:$0xff]  }
 0x157   : > { %v10073_v4 = vadd.f32 %v6660_v58, %v1713_v2  ;;  %8144 = vmatpush3.bf16.msra.mxu0 %v8782_v9  ;;  %8166 = vmatpush3.bf16.msra.mxu1 %v8783_v10  ;;  %v8818_v58 = vld [vmem:[%s10714_s1 + $0x328] sm:$0xff]   ;;  %v8826_v2 = vld [vmem:[%s10714_s1 + $0x318] sm:$0xff]  }
 0x158   : > { %8145 = vmatprep.subr.bf16.mxu0 %v8784_v11  ;;  %8167 = vmatprep.subr.bf16.mxu1 %v8785_v12  ;;  %v8832_v9 = vld [vmem:[%s10714_s1 + $0x348] sm:$0xff]  }
 0x159   : > { %v1739_v7 = vpack.c.bf16 %v10073_v4, %v10073_v4  ;;  %v8833_v10 = vld [vmem:[%s10714_s1 + $0x3c8] sm:$0xff]  }
 0x15a   : > { %v8834_v11 = vld [vmem:[%s10714_s1 + $0x308] sm:$0xff]  }
 0x15b   : > { %1740 = vst [vmem:[%s10081_s24] sm:$0x3] %v1739_v7  ;;  %8146 = vmatpush3.bf16.msra.mxu0 %v8786_v8  ;;  %8168 = vmatpush3.bf16.msra.mxu1 %v8787_v14  ;;  %v8831_v7 = vld [vmem:[%s10714_s1 + $0x390] sm:$0xff]   ;;  %v8835_v12 = vld [vmem:[%s10714_s1 + $0x388] sm:$0xff]   ;;  %v8836_v8 = vld [vmem:[%s10714_s1 + $0x340] sm:$0xff]  }
 0x15c   : > { %8147 = vmatprep.subr.bf16.mxu0 %v8788_v15  ;;  %8169 = vmatprep.subr.bf16.mxu1 %v8789_v16  ;;  %v8837_v14 = vld [vmem:[%s10714_s1 + $0x3c0] sm:$0xff]  }
 0x15d   : > { %v8838_v15 = vld [vmem:[%s10714_s1 + $0x300] sm:$0xff]  }
 0x15e   : > { %v8839_v16 = vld [vmem:[%s10714_s1 + $0x380] sm:$0xff]  }
 0x15f   : > { %8148 = vmatpush3.bf16.msra.mxu0 %v8790_v17  ;;  %8170 = vmatpush3.bf16.msra.mxu1 %v8791_v18  ;;  %v7248_v17 = vld [vmem:[%s9135_s12 + $0x30] sm:$0x77]  ;;  %v7249_v18 = vld [vmem:[%s9135_s12 + $0x38] sm:$0x77] }
 0x160   : > { %8149 = vmatprep.subr.bf16.mxu0 %v8792_v19  ;;  %8171 = vmatprep.subr.bf16.mxu1 %v8793_v20  ;;  %v7314_v20 = vcombine.low %v7248_v17, %v7248_v17 }
 0x162   : > { %v4392_v33 = vshrl.u32 %v7314_v20, 16 }
 0x163   : > { %8150 = vmatpush3.bf16.msra.mxu0 %v8794_v21  ;;  %8172 = vmatpush3.bf16.msra.mxu1 %v8795_v22  ;;  %v7315_v21 = vcombine.high %v7248_v17, %v7248_v17  ;;  %v7316_v22 = vcombine.low %v7249_v18, %v7249_v18  ;;  %v8873_v17 = vld [vmem:[%s10714_s1 + $0x1c0] sm:$0xff]  }
 0x164   : > { %8151 = vmatprep.subr.bf16.mxu0 %v8796_v23  ;;  %8173 = vmatprep.subr.bf16.mxu1 %v8797_v24  ;;  %v7317_v23 = vcombine.high %v7249_v18, %v7249_v18 }
 0x165   : > { %v4406_v35 = vshrl.u32 %v7316_v22, 16 }
 0x166   : > { %v4415_v31 = vshll.u32 %v7317_v23, 16 }
 0x167   : > { %8152 = vmatpush3.bf16.msra.mxu0 %v8798_v25  ;;  %8174 = vmatpush3.bf16.msra.mxu1 %v8799_v26  ;;  %v8844_v25 = vld [vmem:[%s10714_s1 + $0x178] sm:$0xff]  }
 0x168   : > { %8153 = vmatprep.subr.bf16.mxu0 %v8800_v27  ;;  %8175 = vmatprep.subr.bf16.mxu1 %v8801_v28  ;;  %v8845_v26 = vld [vmem:[%s10714_s1 + $0x1f8] sm:$0xff]   ;;  %v4399_v28 = vshrl.u32 %v7315_v21, 16 }
 0x16b   : > { %8154 = vmatpush3.bf16.msra.mxu0 %v8802_v29  ;;  %8176 = vmatpush3.bf16.msra.mxu1 %v8803_v30  ;;  %v4401_v29 = vshll.u32 %v7315_v21, 16  ;;  %v4413_v30 = vshrl.u32 %v7317_v23, 16  ;;  %v8875_v21 = vld [vmem:[%s10714_s1 + $0x180] sm:$0xff]  }
 0x16c   : > { %8183 = vmatprep.subr.bf16.mxu0 %v8808_v37  ;;  %8205 = vmatprep.subr.bf16.mxu1 %v8809_v41  ;;  %v4417_v41 = vrot.slane %v4415_v31, 1 }
 0x16d   : > { %v7891_v34 = vpop.f32.mrf.mxu0 }
 0x16e   : > { %v7913_v36 = vpop.f32.mrf.mxu1  ;;  %4267 = vmatmul.mubr.bf16.vlgmr.msra.gmra.mxu0 %v7212_v40  ;;  %4307 = vmatmul.mubr.bf16.vlgmr.msra.gmra.mxu1 %v7214_v38  ;;  %v4403_v40 = vrot.slane %v4401_v29, 1  ;;  %v8847_v38 = vld [vmem:[%s10714_s1 + $0x1b8] sm:$0xff]  }
 0x16f   : > { %v7892_v42 = vpop.f32.mrf.mxu0  ;;  %8184 = vmatpush3.bf16.msra.mxu0 %v8810_v43  ;;  %8206 = vmatpush3.bf16.msra.mxu1 %v8811_v45 }
 0x170   : > { %v7893_v39 = vadd.f32 %v7892_v42, %v7891_v34  ;;  %v7914_v44 = vpop.f32.mrf.mxu1  ;;  %8185 = vmatprep.subr.bf16.mxu0 %v8812_v49  ;;  %8207 = vmatprep.subr.bf16.mxu1 %v8813_v51  ;;  %v4394_v34 = vshll.u32 %v7314_v20, 16  ;;  %v8846_v42 = vld [vmem:[%s10714_s1 + $0x138] sm:$0xff]   ;;  %v4418_v49 = vor.u32 %v4417_v41, %v4413_v30 }
 0x171   : > { %v7915_v46 = vadd.f32 %v7914_v44, %v7913_v36  ;;  %v7894_v47 = vpop.f32.mrf.mxu0  ;;  %v4408_v36 = vshll.u32 %v7316_v22, 16  ;;  %v7353_v22 = vld [vmem:[%s9135_s12 + $0x30] sm:$0x77]  ;;  %v8880_v30 = vld [vmem:[%s10714_s1 + $0x78] sm:$0xff]  }
 0x172   : > { %v7916_v48 = vpop.f32.mrf.mxu1  ;;  %v4396_v45 = vrot.slane %v4394_v34, 1  ;;  %4687 = vmatprep.mubr.bf16.mxu1 %v4418_v49  ;;  %v8883_v49 = vld [vmem:[%s10714_s1 + $0xb8] sm:$0xff]  }
 0x173   : > { %v10172_v50 = vadd.f32 %v7915_v46, %v7893_v39  ;;  %v7895_v52 = vpop.f32.mrf.mxu0  ;;  %8186 = vmatpush3.bf16.msra.mxu0 %v8814_v53  ;;  %8208 = vmatpush3.bf16.msra.mxu1 %v8815_v55  ;;  %v4410_v46 = vrot.slane %v4408_v36, 1  ;;  %v4404_v48 = vor.u32 %v4403_v40, %v4399_v28  ;;  %v8881_v36 = vld [vmem:[%s10714_s1 + $0xf8] sm:$0xff]  }
 0x174   : > { %v7917_v54 = vpop.f32.mrf.mxu1  ;;  %8187 = vmatprep.subr.bf16.mxu0 %v8816_v56  ;;  %8209 = vmatprep.subr.bf16.mxu1 %v8817_v57  ;;  %v8848_v52 = vld [vmem:[%s10714_s1 + $0x170] sm:$0xff]  }
 0x175   : > { %v4397_v54 = vor.u32 %v4396_v45, %v4392_v33  ;;  %v4411_v55 = vor.u32 %v4410_v46, %v4406_v35  ;;  %v8849_v56 = vld [vmem:[%s10714_s1 + $0x1f0] sm:$0xff]   ;;  %4647 = vmatprep.mubr.bf16.mxu0 %v4404_v48  ;;  %v8882_v45 = vld [vmem:[%s10714_s1 + $0x38] sm:$0xff]  }
 0x177   : > { %8188 = vmatpush3.bf16.msra.mxu0 %v8818_v58  ;;  %8210 = vmatpush3.bf16.msra.mxu1 %v8819_v59  ;;  %v8850_v58 = vld [vmem:[%s10714_s1 + $0x130] sm:$0xff]   ;;  %v8852_v59 = vld [vmem:[%s10714_s1 + $0x168] sm:$0xff]  }
 0x178   : > { %8189 = vmatprep.subr.bf16.mxu0 %v8820_v60  ;;  %8211 = vmatprep.subr.bf16.mxu1 %v8821_v61  ;;  %v8853_v60 = vld [vmem:[%s10714_s1 + $0x1e8] sm:$0xff]  }
 0x179   : > { %v8854_v61 = vld [vmem:[%s10714_s1 + $0x128] sm:$0xff]  }
 0x17b   : > { %8190 = vmatpush3.bf16.msra.mxu0 %v8822_v62  ;;  %8212 = vmatpush3.bf16.msra.mxu1 %v8823_v63  ;;  %v8855_v62 = vld [vmem:[%s10714_s1 + $0x1a8] sm:$0xff]   ;;  %v8856_v63 = vld [vmem:[%s10714_s1 + $0x160] sm:$0xff]  }
 0x17c   : > { %8191 = vmatprep.subr.bf16.mxu0 %v8824_v0  ;;  %8213 = vmatprep.subr.bf16.mxu1 %v8825_v1  ;;  %v8857_v0 = vld [vmem:[%s10714_s1 + $0x1e0] sm:$0xff]  }
 0x17d   : > { %v8858_v1 = vld [vmem:[%s10714_s1 + $0x120] sm:$0xff]  }
 0x17f   : > { %8192 = vmatpush3.bf16.msra.mxu0 %v8826_v2  ;;  %8214 = vmatpush3.bf16.msra.mxu1 %v8827_v13  ;;  %v8859_v2 = vld [vmem:[%s10714_s1 + $0x1a0] sm:$0xff]   ;;  %v8860_v13 = vld [vmem:[%s10714_s1 + $0x158] sm:$0xff]  }
 0x180   : > { %8193 = vmatprep.subr.bf16.mxu0 %v8828_v3  ;;  %8215 = vmatprep.subr.bf16.mxu1 %v8829_v5  ;;  %v8861_v3 = vld [vmem:[%s10714_s1 + $0x1d8] sm:$0xff]  }
 0x181   : > { %v8862_v5 = vld [vmem:[%s10714_s1 + $0x118] sm:$0xff]  }
 0x183   : > { %8194 = vmatpush3.bf16.msra.mxu0 %v8830_v6  ;;  %8216 = vmatpush3.bf16.msra.mxu1 %v8831_v7  ;;  %v8863_v6 = vld [vmem:[%s10714_s1 + $0x198] sm:$0xff]   ;;  %v8864_v7 = vld [vmem:[%s10714_s1 + $0x150] sm:$0xff]  }
 0x184   : > { %8195 = vmatprep.subr.bf16.mxu0 %v8832_v9  ;;  %8217 = vmatprep.subr.bf16.mxu1 %v8833_v10  ;;  %v8865_v9 = vld [vmem:[%s10714_s1 + $0x1d0] sm:$0xff]  }
 0x185   : > { %v8866_v10 = vld [vmem:[%s10714_s1 + $0x110] sm:$0xff]  }
 0x187   : > { %8196 = vmatpush3.bf16.msra.mxu0 %v8834_v11  ;;  %8218 = vmatpush3.bf16.msra.mxu1 %v8835_v12  ;;  %v8867_v11 = vld [vmem:[%s10714_s1 + $0x190] sm:$0xff]   ;;  %v8868_v12 = vld [vmem:[%s10714_s1 + $0x148] sm:$0xff]  }
 0x188   : > { %8197 = vmatprep.subr.bf16.mxu0 %v8836_v8  ;;  %8219 = vmatprep.subr.bf16.mxu1 %v8837_v14  ;;  %v8869_v8 = vld [vmem:[%s10714_s1 + $0x1c8] sm:$0xff]  }
 0x189   : > { %v8870_v14 = vld [vmem:[%s10714_s1 + $0x108] sm:$0xff]  }
 0x18b   : > { %8198 = vmatpush3.bf16.msra.mxu0 %v8838_v15  ;;  %8220 = vmatpush3.bf16.msra.mxu1 %v8839_v16  ;;  %v8871_v15 = vld [vmem:[%s10714_s1 + $0x188] sm:$0xff]   ;;  %v8872_v16 = vld [vmem:[%s10714_s1 + $0x140] sm:$0xff]  }
 0x18c   : > { %8227 = vmatprep.subr.bf16.mxu0 %v8844_v25  ;;  %8249 = vmatprep.subr.bf16.mxu1 %v8845_v26  ;;  %v7420_v25 = vcombine.high %v7353_v22, %v7353_v22  ;;  %v7354_v26 = vld [vmem:[%s9135_s12 + $0x38] sm:$0x77] }
 0x18d   : > { %v7935_v19 = vpop.f32.mrf.mxu0  ;;  %v7421_v28 = vcombine.low %v7354_v26, %v7354_v26  ;;  %v7422_v29 = vcombine.high %v7354_v26, %v7354_v26 }
 0x18e   : > { %v7957_v24 = vpop.f32.mrf.mxu1  ;;  %4648 = vmatmul.mubr.bf16.vlgmr.msra.gmra.mxu0 %v4397_v54  ;;  %4688 = vmatmul.mubr.bf16.vlgmr.msra.gmra.mxu1 %v4411_v55  ;;  %v4869_v33 = vshll.u32 %v7420_v25, 16 }
 0x18f   : > { %v7936_v27 = vpop.f32.mrf.mxu0  ;;  %8228 = vmatpush3.bf16.msra.mxu0 %v8846_v42  ;;  %8250 = vmatpush3.bf16.msra.mxu1 %v8847_v38  ;;  %v4881_v40 = vshrl.u32 %v7422_v29, 16  ;;  %v4883_v41 = vshll.u32 %v7422_v29, 16  ;;  %v4874_v42 = vshrl.u32 %v7421_v28, 16  ;;  %v4876_v38 = vshll.u32 %v7421_v28, 16 }
 0x190   : > { %v7958_v32 = vpop.f32.mrf.mxu1  ;;  %v7937_v43 = vadd.f32 %v7936_v27, %v7935_v19  ;;  %8229 = vmatprep.subr.bf16.mxu0 %v8848_v52  ;;  %8251 = vmatprep.subr.bf16.mxu1 %v8849_v56  ;;  %v8874_v19 = vld [vmem:[%s10714_s1 + $0x100] sm:$0xff]   ;;  %v8885_v56 = vld [vmem:[%s10714_s1 + $0xf0] sm:$0xff]  }
 0x191   : > { %v7938_v37 = vpop.f32.mrf.mxu0  ;;  %v7959_v39 = vadd.f32 %v7958_v32, %v7957_v24  ;;  %v7419_v24 = vcombine.low %v7353_v22, %v7353_v22  ;;  %v4867_v32 = vshrl.u32 %v7420_v25, 16  ;;  %v4878_v48 = vrot.slane %v4876_v38, 1  ;;  %v8908_v22 = vld [vmem:[%s10714_s1 + $0x40] sm:$0xff]   ;;  %v7351_v25 = vld [vmem:[%s9135_s12 + $0x30] sm:$0x33] }
 0x192   : > { %v7960_v44 = vpop.f32.mrf.mxu1  ;;  %v2428_v51 = vadd.f32 %v7937_v43, %v10172_v50  ;;  %v8851_v50 = vld [vmem:[%s10714_s1 + $0x1b0] sm:$0xff]   ;;  %v7456_v29 = vcombine.high %v7351_v25, %v7351_v25 }
 0x193   : > { %v7939_v47 = vpop.f32.mrf.mxu0  ;;  %8230 = vmatpush3.bf16.msra.mxu0 %v8850_v58  ;;  %8252 = vmatpush3.bf16.msra.mxu1 %v8851_v50  ;;  %v4860_v34 = vshrl.u32 %v7419_v24, 16  ;;  %v4862_v35 = vshll.u32 %v7419_v24, 16  ;;  %v4879_v55 = vor.u32 %v4878_v48, %v4874_v42  ;;  %v8886_v58 = vld [vmem:[%s10714_s1 + $0x30] sm:$0xff]   ;;  %v8909_v24 = vld [vmem:[%s10714_s1 + $0xc0] sm:$0xff]   ;;  %v8918_v42 = vld [vmem:[%s10714_s1 + $0x238] sm:$0xff]  }
 0x194   : > { %v7961_v53 = vpop.f32.mrf.mxu1  ;;  %v10276_v57 = vadd.f32 %v7959_v39, %v2428_v51  ;;  %8231 = vmatprep.subr.bf16.mxu0 %v8852_v59  ;;  %8253 = vmatprep.subr.bf16.mxu1 %v8853_v60  ;;  %v4871_v39 = vrot.slane %v4869_v33, 1  ;;  %v4885_v47 = vrot.slane %v4883_v41, 1  ;;  %v8884_v51 = vld [vmem:[%s10714_s1 + $0x70] sm:$0xff]   ;;  %v8888_v59 = vld [vmem:[%s10714_s1 + $0x68] sm:$0xff]   ;;  %v8916_v33 = vld [vmem:[%s10714_s1 + $0x278] sm:$0xff]   ;;  %v7455_v41 = vcombine.low %v7351_v25, %v7351_v25 }
 0x195   : > { %v4864_v44 = vrot.slane %v4862_v35, 1  ;;  %v8887_v50 = vld [vmem:[%s10714_s1 + $0xb0] sm:$0xff]   ;;  %v8889_v60 = vld [vmem:[%s10714_s1 + $0xe8] sm:$0xff]  }
 0x196   : > { %v4872_v52 = vor.u32 %v4871_v39, %v4867_v32  ;;  %v4886_v54 = vor.u32 %v4885_v47, %v4881_v40 }
 0x197   : > { %8232 = vmatpush3.bf16.msra.mxu0 %v8854_v61  ;;  %8254 = vmatpush3.bf16.msra.mxu1 %v8855_v62  ;;  %v4865_v53 = vor.u32 %v4864_v44, %v4860_v34  ;;  %v8890_v61 = vld [vmem:[%s10714_s1 + $0x28] sm:$0xff]  }
 0x198   : > { %8233 = vmatprep.subr.bf16.mxu0 %v8856_v63  ;;  %8255 = vmatprep.subr.bf16.mxu1 %v8857_v0  ;;  %v8891_v62 = vld [vmem:[%s10714_s1 + $0xa8] sm:$0xff]   ;;  %v8892_v63 = vld [vmem:[%s10714_s1 + $0x60] sm:$0xff]  }
 0x199   : > { %5115 = vmatprep.mubr.bf16.mxu0 %v4872_v52  ;;  %5155 = vmatprep.mubr.bf16.mxu1 %v4886_v54  ;;  %v8893_v0 = vld [vmem:[%s10714_s1 + $0xe0] sm:$0xff]   ;;  %v8922_v54 = vld [vmem:[%s10714_s1 + $0x230] sm:$0xff]  }
 0x19b   : > { %8234 = vmatpush3.bf16.msra.mxu0 %v8858_v1  ;;  %8256 = vmatpush3.bf16.msra.mxu1 %v8859_v2  ;;  %v8894_v1 = vld [vmem:[%s10714_s1 + $0x20] sm:$0xff]  }
 0x19c   : > { %8235 = vmatprep.subr.bf16.mxu0 %v8860_v13  ;;  %8257 = vmatprep.subr.bf16.mxu1 %v8861_v3  ;;  %v8895_v2 = vld [vmem:[%s10714_s1 + $0xa0] sm:$0xff]   ;;  %v8896_v13 = vld [vmem:[%s10714_s1 + $0x58] sm:$0xff]  }
 0x19d   : > { %v8897_v3 = vld [vmem:[%s10714_s1 + $0xd8] sm:$0xff]  }
 0x19f   : > { %8236 = vmatpush3.bf16.msra.mxu0 %v8862_v5  ;;  %8258 = vmatpush3.bf16.msra.mxu1 %v8863_v6  ;;  %v8898_v5 = vld [vmem:[%s10714_s1 + $0x18] sm:$0xff]  }
 0x1a0   : > { %8237 = vmatprep.subr.bf16.mxu0 %v8864_v7  ;;  %8259 = vmatprep.subr.bf16.mxu1 %v8865_v9  ;;  %v8899_v6 = vld [vmem:[%s10714_s1 + $0x98] sm:$0xff]   ;;  %v8900_v7 = vld [vmem:[%s10714_s1 + $0x50] sm:$0xff]  }
 0x1a1   : > { %v8901_v9 = vld [vmem:[%s10714_s1 + $0xd0] sm:$0xff]  }
 0x1a3   : > { %8238 = vmatpush3.bf16.msra.mxu0 %v8866_v10  ;;  %8260 = vmatpush3.bf16.msra.mxu1 %v8867_v11  ;;  %v8902_v10 = vld [vmem:[%s10714_s1 + $0x10] sm:$0xff]  }
 0x1a4   : > { %8239 = vmatprep.subr.bf16.mxu0 %v8868_v12  ;;  %8261 = vmatprep.subr.bf16.mxu1 %v8869_v8  ;;  %v8903_v11 = vld [vmem:[%s10714_s1 + $0x90] sm:$0xff]   ;;  %v8904_v12 = vld [vmem:[%s10714_s1 + $0x48] sm:$0xff]  }
 0x1a5   : > { %v8905_v8 = vld [vmem:[%s10714_s1 + $0xc8] sm:$0xff]  }
 0x1a7   : > { %8240 = vmatpush3.bf16.msra.mxu0 %v8870_v14  ;;  %8262 = vmatpush3.bf16.msra.mxu1 %v8871_v15  ;;  %v1730_v14 = vmul.f32 %v10073_v4, %v10073_v4  ;;  %v8906_v15 = vld [vmem:[%s10714_s1 + $0x8] sm:$0xff]  }
 0x1a8   : > { %8241 = vmatprep.subr.bf16.mxu0 %v8872_v16  ;;  %8263 = vmatprep.subr.bf16.mxu1 %v8873_v17  ;;  %v8907_v16 = vld [vmem:[%s10714_s1 + $0x88] sm:$0xff]   ;;  %v1722_v17 = vsel %vm1721_vm0, %v10073_v4, 0.0 }
 0x1a9   : > { %v1731_v4 = vsel %vm1721_vm0, %v1730_v14, 0.0  ;;  %v8930_v14 = vld [vmem:[%s10714_s1 + $0x220] sm:$0xff]  }
 0x1ab   : > { %8242 = vmatpush3.bf16.msra.mxu0 %v8874_v19  ;;  %8264 = vmatpush3.bf16.msra.mxu1 %v8875_v21 }
 0x1ac   : > { %8271 = vmatprep.subr.bf16.mxu0 %v8880_v30  ;;  %8293 = vmatprep.subr.bf16.mxu1 %v8881_v36  ;;  %v7352_v30 = vld [vmem:[%s9135_s12 + $0x38] sm:$0x33] }
 0x1ad   : > { %v10350_v18 = vpop.f32.mrf.mxu0  ;;  %v7458_v32 = vcombine.high %v7352_v30, %v7352_v30  ;;  %v8917_v36 = vld [vmem:[%s10714_s1 + $0x2f8] sm:$0xff]  }
 0x1ae   : > { %v10355_v20 = vpop.f32.mrf.mxu1  ;;  %5116 = vmatmul.mubr.bf16.vlgmr.msra.gmra.mxu0 %v4865_v53  ;;  %5156 = vmatmul.mubr.bf16.vlgmr.msra.gmra.mxu1 %v4879_v55 }
 0x1af   : > { %v10361_v23 = vpop.f32.mrf.mxu0  ;;  %8272 = vmatpush3.bf16.msra.mxu0 %v8882_v45  ;;  %8294 = vmatpush3.bf16.msra.mxu1 %v8883_v49  ;;  %v7457_v45 = vcombine.low %v7352_v30, %v7352_v30  ;;  %v8920_v49 = vld [vmem:[%s10714_s1 + $0x270] sm:$0xff]  }
 0x1b0   : > { %v10364_v27 = vpop.f32.mrf.mxu1  ;;  %8273 = vmatprep.subr.bf16.mxu0 %v8884_v51  ;;  %8295 = vmatprep.subr.bf16.mxu1 %v8885_v56  ;;  %v7981_v19 = vadd.f32 %v10361_v23, %v10350_v18  ;;  %v8910_v18 = vld [vmem:[%s10714_s1] sm:$0xff]  }
 0x1b1   : > { %v7982_v31 = vpop.f32.mrf.mxu0  ;;  %v8003_v21 = vadd.f32 %v10364_v27, %v10355_v20  ;;  %v1723_v20 = vrot.slane %v1722_v17, 4  ;;  %v8911_v23 = vld [vmem:[%s10714_s1 + $0x80] sm:$0xff]   ;;  %5401 = vmatprep.mubr.bf16.mxu0 %v7456_v29  ;;  %5441 = vmatprep.mubr.bf16.mxu1 %v7458_v32  ;;  %v8937_v29 = vld [vmem:[%s10714_s1 + $0x2d0] sm:$0xff]  }
 0x1b2   : > { %v8004_v37 = vpop.f32.mrf.mxu1  ;;  %v1732_v31 = vrot.slane %v1731_v4, 4  ;;  %v10498_v56 = vld [vmem:[%s10715_s2] ss:$0 sm:$0xff] }
 0x1b3   : > { %v7983_v43 = vpop.f32.mrf.mxu0  ;;  %8274 = vmatpush3.bf16.msra.mxu0 %v8886_v58  ;;  %8296 = vmatpush3.bf16.msra.mxu1 %v8887_v50  ;;  %v2821_v28 = vadd.f32 %v8003_v21, %v7981_v19  ;;  %v1724_v39 = vadd.f32 %v1723_v20, %v1722_v17  ;;  %v8923_v50 = vld [vmem:[%s10714_s1 + $0x2b0] sm:$0xff]   ;;  %v8932_v21 = vld [vmem:[%s10714_s1 + $0x258] sm:$0xff]  }
 0x1b4   : > { %v8005_v46 = vpop.f32.mrf.mxu1  ;;  %8275 = vmatprep.subr.bf16.mxu0 %v8888_v59  ;;  %8297 = vmatprep.subr.bf16.mxu1 %v8889_v60  ;;  %v1733_v48 = vadd.f32 %v1732_v31, %v1731_v4  ;;  %v8924_v60 = vld [vmem:[%s10714_s1 + $0x268] sm:$0xff]   ;;  %v8934_v20 = vld [vmem:[%s10714_s1 + $0x218] sm:$0xff]  }
 0x1b5   : > { %v2826_v44 = vadd.f32 %v2821_v28, %v10276_v57  ;;  %v8919_v46 = vld [vmem:[%s10714_s1 + $0x2b8] sm:$0xff]   ;;  %v8921_v57 = vld [vmem:[%s10714_s1 + $0x2f0] sm:$0xff]   ;;  %v1725_v55 = vrot.slane %v1724_v39, 2 }
 0x1b6   : > { %v1734_v59 = vrot.slane %v1733_v48, 2  ;;  %v8936_v28 = vld [vmem:[%s10714_s1 + $0x250] sm:$0xff]  }
 0x1b7   : > { %8276 = vmatpush3.bf16.msra.mxu0 %v8890_v61  ;;  %8298 = vmatpush3.bf16.msra.mxu1 %v8891_v62 }
 0x1b8   : > { %8277 = vmatprep.subr.bf16.mxu0 %v8892_v63  ;;  %8299 = vmatprep.subr.bf16.mxu1 %v8893_v0  ;;  %v8925_v0 = vld [vmem:[%s10714_s1 + $0x2e8] sm:$0xff]  }
 0x1bb   : > { %8278 = vmatpush3.bf16.msra.mxu0 %v8894_v1  ;;  %8300 = vmatpush3.bf16.msra.mxu1 %v8895_v2  ;;  %v8926_v2 = vld [vmem:[%s10714_s1 + $0x228] sm:$0xff]  }
 0x1bc   : > { %8279 = vmatprep.subr.bf16.mxu0 %v8896_v13  ;;  %8301 = vmatprep.subr.bf16.mxu1 %v8897_v3  ;;  %v1726_v13 = vadd.f32 %v1725_v55, %v1724_v39  ;;  %v8947_v39 = vld [vmem:[%s10714_s1 + $0x280] sm:$0xff]  }
 0x1bf   : > { %8280 = vmatpush3.bf16.msra.mxu0 %v8898_v5  ;;  %8302 = vmatpush3.bf16.msra.mxu1 %v8899_v6  ;;  %v8927_v5 = vld [vmem:[%s10714_s1 + $0x2a8] sm:$0xff]  }
 0x1c0   : > { %8281 = vmatprep.subr.bf16.mxu0 %v8900_v7  ;;  %8303 = vmatprep.subr.bf16.mxu1 %v8901_v9  ;;  %v8928_v9 = vld [vmem:[%s10714_s1 + $0x260] sm:$0xff]  }
 0x1c3   : > { %8282 = vmatpush3.bf16.msra.mxu0 %v8902_v10  ;;  %8304 = vmatpush3.bf16.msra.mxu1 %v8903_v11  ;;  %v1735_v10 = vadd.f32 %v1734_v59, %v1733_v48  ;;  %v8929_v11 = vld [vmem:[%s10714_s1 + $0x2e0] sm:$0xff]   ;;  %v8952_v48 = vld [vmem:[%s10714_s1 + $0x378] sm:$0xff]  }
 0x1c4   : > { %8283 = vmatprep.subr.bf16.mxu0 %v8904_v12  ;;  %8305 = vmatprep.subr.bf16.mxu1 %v8905_v8 }
 0x1c7   : > { %8284 = vmatpush3.bf16.msra.mxu0 %v8906_v15  ;;  %8306 = vmatpush3.bf16.msra.mxu1 %v8907_v16  ;;  %v1727_v15 = vrot.slane %v1726_v13, 1  ;;  %v8931_v16 = vld [vmem:[%s10714_s1 + $0x2a0] sm:$0xff]  }
 0x1c8   : > { %8285 = vmatprep.subr.bf16.mxu0 %v8908_v22  ;;  %8307 = vmatprep.subr.bf16.mxu1 %v8909_v24  ;;  %v1736_v22 = vrot.slane %v1735_v10, 1  ;;  %v8933_v24 = vld [vmem:[%s10714_s1 + $0x2d8] sm:$0xff]  }
 0x1c9   : > { %v1728_v25 = vadd.f32 %v1727_v15, %v1726_v13  ;;  %v8968_v15 = vld [vmem:[%s10714_s1 + $0x358] sm:$0xff]  }
 0x1ca   : > { %v1737_v30 = vadd.f32 %v1736_v22, %v1735_v10  ;;  %v8963_v10 = vld [vmem:[%s10714_s1 + $0x3a8] sm:$0xff]   ;;  %v8973_v22 = vld [vmem:[%s10714_s1 + $0x3d0] sm:$0xff]  }
 0x1cb   : > { %8286 = vmatpush3.bf16.msra.mxu0 %v8910_v18  ;;  %8308 = vmatpush3.bf16.msra.mxu1 %v8911_v23  ;;  %v8935_v23 = vld [vmem:[%s10714_s1 + $0x298] sm:$0xff]  }
 0x1cc   : > { %8315 = vmatprep.subr.bf16.mxu0 %v8916_v33  ;;  %8337 = vmatprep.subr.bf16.mxu1 %v8917_v36  ;;  %v8938_v33 = vld [vmem:[%s10714_s1 + $0x210] sm:$0xff]   ;;  %v8940_v36 = vld [vmem:[%s10714_s1 + $0x248] sm:$0xff]  }
 0x1cd   : > { %v8023_v26 = vpop.f32.mrf.mxu0 }
 0x1ce   : > { %v8045_v27 = vpop.f32.mrf.mxu1  ;;  %5402 = vmatmul.mubr.bf16.vlgmr.msra.gmra.mxu0 %v7455_v41  ;;  %5442 = vmatmul.mubr.bf16.vlgmr.msra.gmra.mxu1 %v7457_v45  ;;  %v8943_v41 = vld [vmem:[%s10714_s1 + $0x288] sm:$0xff]  }
 0x1cf   : > { %v8024_v34 = vpop.f32.mrf.mxu0  ;;  %8316 = vmatpush3.bf16.msra.mxu0 %v8918_v42  ;;  %8338 = vmatpush3.bf16.msra.mxu1 %v8919_v46  ;;  %v8944_v42 = vld [vmem:[%s10714_s1 + $0x240] sm:$0xff]   ;;  %v7492_v45 = vld [vmem:[%s9135_s12 + $0x48] sm:$0x33] }
 0x1d0   : > { %v8046_v35 = vpop.f32.mrf.mxu1  ;;  %v8025_v37 = vadd.f32 %v8024_v34, %v8023_v26  ;;  %8317 = vmatprep.subr.bf16.mxu0 %v8920_v49  ;;  %8339 = vmatprep.subr.bf16.mxu1 %v8921_v57  ;;  %v8939_v34 = vld [vmem:[%s10714_s1 + $0x290] sm:$0xff]   ;;  %v7560_v49 = vcombine.high %v7492_v45, %v7492_v45  ;;  %v8954_v57 = vld [vmem:[%s10714_s1 + $0x338] sm:$0xff]   ;;  %v7559_v55 = vcombine.low %v7492_v45, %v7492_v45 }
 0x1d1   : > { %v8047_v40 = vadd.f32 %v8046_v35, %v8045_v27  ;;  %v8026_v38 = vpop.f32.mrf.mxu0 }
 0x1d2   : > { %v8048_v43 = vpop.f32.mrf.mxu1  ;;  %v8945_v38 = vld [vmem:[%s10714_s1 + $0x2c0] sm:$0xff]   ;;  %5794 = vmatprep.mubr.bf16.mxu1 %v7560_v49 }
 0x1d3   : > { %v3202_v47 = vadd.f32 %v8047_v40, %v8025_v37  ;;  %v8027_v51 = vpop.f32.mrf.mxu0  ;;  %8318 = vmatpush3.bf16.msra.mxu0 %v8922_v54  ;;  %8340 = vmatpush3.bf16.msra.mxu1 %v8923_v50  ;;  %v8941_v37 = vld [vmem:[%s10714_s1 + $0x2c8] sm:$0xff]   ;;  %v8946_v43 = vld [vmem:[%s10714_s1 + $0x200] sm:$0xff]  }
 0x1d4   : > { %v8049_v52 = vpop.f32.mrf.mxu1  ;;  %8319 = vmatprep.subr.bf16.mxu0 %v8924_v60  ;;  %8341 = vmatprep.subr.bf16.mxu1 %v8925_v0  ;;  %v8942_v40 = vld [vmem:[%s10714_s1 + $0x208] sm:$0xff]   ;;  %v8957_v0 = vld [vmem:[%s10714_s1 + $0x3f0] sm:$0xff]  }
 0x1d5   : > { %v3207_v53 = vadd.f32 %v3202_v47, %v2826_v44  ;;  %v7491_v44 = vld [vmem:[%s9135_s12 + $0x40] sm:$0x33]  ;;  %v8953_v52 = vld [vmem:[%s10714_s1 + $0x3f8] sm:$0xff]  }
 0x1d6   : > { %v7558_v46 = vcombine.high %v7491_v44, %v7491_v44 }
 0x1d7   : > { %v3208_v58 = vadd.f32 %v10498_v56, %v3207_v53  ;;  %8320 = vmatpush3.bf16.msra.mxu0 %v8926_v2  ;;  %8342 = vmatpush3.bf16.msra.mxu1 %v8927_v5  ;;  %v7557_v53 = vcombine.low %v7491_v44, %v7491_v44  ;;  %v8958_v2 = vld [vmem:[%s10714_s1 + $0x330] sm:$0xff]  }
 0x1d8   : > { %8321 = vmatprep.subr.bf16.mxu0 %v8928_v9  ;;  %8343 = vmatprep.subr.bf16.mxu1 %v8929_v11  ;;  %v8962_v9 = vld [vmem:[%s10714_s1 + $0x328] sm:$0xff]   ;;  %v8964_v11 = vld [vmem:[%s10714_s1 + $0x360] sm:$0xff]  }
 0x1d9   : > { %v3209_v61 = vsel %vm1721_vm0, %v3208_v58, 0.0  ;;  %v3217_v62 = vmul.f32 %v3208_v58, %v3208_v58  ;;  %v3226_v63 = vpack.c.bf16 %v3208_v58, %v3208_v58  ;;  %5754 = vmatprep.mubr.bf16.mxu0 %v7558_v46  ;;  %v8955_v58 = vld [vmem:[%s10714_s1 + $0x3b8] sm:$0xff]  }
 0x1da   : > { %v3210_v1 = vrot.slane %v3209_v61, 4 }
 0x1db   : > { %v3218_v3 = vsel %vm1721_vm0, %v3217_v62, 0.0  ;;  %7005 = vst [vmem:[%s10081_s24 + $0x2] sm:$0x3] %v3226_v63  ;;  %8322 = vmatpush3.bf16.msra.mxu0 %v8930_v14  ;;  %8344 = vmatpush3.bf16.msra.mxu1 %v8931_v16  ;;  %v8956_v62 = vld [vmem:[%s10714_s1 + $0x370] sm:$0xff]   ;;  %v8967_v14 = vld [vmem:[%s10714_s1 + $0x3a0] sm:$0xff]   ;;  %v8969_v16 = vld [vmem:[%s10714_s1 + $0x3d8] sm:$0xff]  }
 0x1dc   : > { %v3211_v6 = vadd.f32 %v3210_v1, %v3209_v61  ;;  %v3219_v7 = vrot.slane %v3218_v3, 4  ;;  %8323 = vmatprep.subr.bf16.mxu0 %v8932_v21  ;;  %8345 = vmatprep.subr.bf16.mxu1 %v8933_v24  ;;  %v8972_v21 = vld [vmem:[%s10714_s1 + $0x350] sm:$0xff]  }
 0x1dd   : > { %v8974_v24 = vld [vmem:[%s10714_s1 + $0x310] sm:$0xff]  }
 0x1de   : > { %v3212_v12 = vrot.slane %v3211_v6, 2  ;;  %v3220_v8 = vadd.f32 %v3219_v7, %v3218_v3  ;;  %v8959_v3 = vld [vmem:[%s10714_s1 + $0x3b0] sm:$0xff]   ;;  %v8961_v7 = vld [vmem:[%s10714_s1 + $0x3e8] sm:$0xff]  }
 0x1df   : > { %8324 = vmatpush3.bf16.msra.mxu0 %v8934_v20  ;;  %8346 = vmatpush3.bf16.msra.mxu1 %v8935_v23  ;;  %v8977_v20 = vld [vmem:[%s10714_s1 + $0x3c8] sm:$0xff]  }
 0x1e0   : > { %v3213_v17 = vadd.f32 %v3212_v12, %v3211_v6  ;;  %v3221_v19 = vrot.slane %v3220_v8, 2  ;;  %8325 = vmatprep.subr.bf16.mxu0 %v8936_v28  ;;  %8347 = vmatprep.subr.bf16.mxu1 %v8937_v29  ;;  %v8960_v6 = vld [vmem:[%s10714_s1 + $0x368] sm:$0xff]   ;;  %v8965_v12 = vld [vmem:[%s10714_s1 + $0x3e0] sm:$0xff]  }
 0x1e1   : > { %v8978_v23 = vld [vmem:[%s10714_s1 + $0x308] sm:$0xff]   ;;  %v8982_v28 = vld [vmem:[%s10714_s1 + $0x300] sm:$0xff]  }
 0x1e2   : > { %v3214_v4 = vrot.slane %v3213_v17, 1  ;;  %v3222_v18 = vadd.f32 %v3221_v19, %v3220_v8  ;;  %v8966_v8 = vld [vmem:[%s10714_s1 + $0x320] sm:$0xff]   ;;  %v8971_v19 = vld [vmem:[%s10714_s1 + $0x398] sm:$0xff]  }
 0x1e3   : > { %8326 = vmatpush3.bf16.msra.mxu0 %v8938_v33  ;;  %8348 = vmatpush3.bf16.msra.mxu1 %v8939_v34  ;;  %v8983_v29 = vld [vmem:[%s10714_s1 + $0x380] sm:$0xff]  }
 0x1e4   : > { %v3215_v26 = vadd.f32 %v3214_v4, %v3213_v17  ;;  %v3223_v27 = vrot.slane %v3222_v18, 1  ;;  %8327 = vmatprep.subr.bf16.mxu0 %v8940_v36  ;;  %8349 = vmatprep.subr.bf16.mxu1 %v8941_v37  ;;  %v8970_v17 = vld [vmem:[%s10714_s1 + $0x318] sm:$0xff]   ;;  %v8975_v4 = vld [vmem:[%s10714_s1 + $0x390] sm:$0xff]  }
 0x1e6   : > { %v10549_v31 = vadd.f32 %v3215_v26, %v1728_v25  ;;  %v3224_v32 = vadd.f32 %v3223_v27, %v3222_v18  ;;  %v8976_v18 = vld [vmem:[%s10714_s1 + $0x348] sm:$0xff]   ;;  %v8980_v26 = vld [vmem:[%s10714_s1 + $0x340] sm:$0xff]  }
 0x1e7   : > { %8328 = vmatpush3.bf16.msra.mxu0 %v8942_v40  ;;  %8350 = vmatpush3.bf16.msra.mxu1 %v8943_v41  ;;  %v8979_v25 = vld [vmem:[%s10714_s1 + $0x388] sm:$0xff]   ;;  %v8981_v27 = vld [vmem:[%s10714_s1 + $0x3c0] sm:$0xff]  }
 0x1e8   : > { %v10557_v35 = vadd.f32 %v3224_v32, %v1737_v30  ;;  %8329 = vmatprep.subr.bf16.mxu0 %v8944_v42  ;;  %8351 = vmatprep.subr.bf16.mxu1 %v8945_v38  ;;  %v7593_v30 = vld [vmem:[%s9135_s12 + $0x40] sm:$0x77]  ;;  %v7594_v32 = vld [vmem:[%s9135_s12 + $0x48] sm:$0x77] }
 0x1e9   : > { %v7659_v34 = vcombine.low %v7593_v30, %v7593_v30  ;;  %v7660_v36 = vcombine.high %v7593_v30, %v7593_v30  ;;  %v7661_v37 = vcombine.low %v7594_v32, %v7594_v32  ;;  %v7662_v40 = vcombine.high %v7594_v32, %v7594_v32 }
 0x1eb   : > { %8330 = vmatpush3.bf16.msra.mxu0 %v8946_v43  ;;  %8352 = vmatpush3.bf16.msra.mxu1 %v8947_v39  ;;  %v5887_v38 = vshrl.u32 %v7660_v36, 16  ;;  %v5889_v43 = vshll.u32 %v7660_v36, 16  ;;  %v5901_v39 = vshrl.u32 %v7662_v40, 16  ;;  %v5903_v44 = vshll.u32 %v7662_v40, 16 }
 0x1ec   : > { %8359 = vmatprep.subr.bf16.mxu0 %v8952_v48  ;;  %8381 = vmatprep.subr.bf16.mxu1 %v8953_v52  ;;  %v5880_v46 = vshrl.u32 %v7659_v34, 16  ;;  %v5894_v48 = vshrl.u32 %v7661_v37, 16  ;;  %v5896_v49 = vshll.u32 %v7661_v37, 16 }
 0x1ed   : > { %v5891_v52 = vrot.slane %v5889_v43, 1 }
 0x1ee   : > { %v8067_v47 = vpop.f32.mrf.mxu0  ;;  %v8089_v51 = vpop.f32.mrf.mxu1  ;;  %5755 = vmatmul.mubr.bf16.vlgmr.msra.gmra.mxu0 %v7557_v53  ;;  %5795 = vmatmul.mubr.bf16.vlgmr.msra.gmra.mxu1 %v7559_v55  ;;  %v5905_v53 = vrot.slane %v5903_v44, 1 }
 0x1ef   : > { %8360 = vmatpush3.bf16.msra.mxu0 %v8954_v57  ;;  %8382 = vmatpush3.bf16.msra.mxu1 %v8955_v58 }
 0x1f0   : > { %v8068_v54 = vpop.f32.mrf.mxu0  ;;  %v8090_v59 = vpop.f32.mrf.mxu1  ;;  %8361 = vmatprep.subr.bf16.mxu0 %v8956_v62  ;;  %8383 = vmatprep.subr.bf16.mxu1 %v8957_v0 }
 0x1f1   : > { %v8069_v50 = vadd.f32 %v8068_v54, %v8067_v47  ;;  %v8091_v60 = vadd.f32 %v8090_v59, %v8089_v51  ;;  %v5882_v47 = vshll.u32 %v7659_v34, 16 }
 0x1f2   : > { %v8070_v61 = vpop.f32.mrf.mxu0  ;;  %v8092_v63 = vpop.f32.mrf.mxu1 }
 0x1f3   : > { %v10603_v1 = vadd.f32 %v8091_v60, %v8069_v50  ;;  %8362 = vmatpush3.bf16.msra.mxu0 %v8958_v2  ;;  %8384 = vmatpush3.bf16.msra.mxu1 %v8959_v3  ;;  %v5884_v58 = vrot.slane %v5882_v47, 1  ;;  %v5898_v50 = vrot.slane %v5896_v49, 1  ;;  %v5892_v60 = vor.u32 %v5891_v52, %v5887_v38 }
 0x1f4   : > { %v8071_v13 = vpop.f32.mrf.mxu0  ;;  %v8093_v5 = vpop.f32.mrf.mxu1  ;;  %8363 = vmatprep.subr.bf16.mxu0 %v8960_v6  ;;  %8385 = vmatprep.subr.bf16.mxu1 %v8961_v7  ;;  %v5906_v61 = vor.u32 %v5905_v53, %v5901_v39 }
 0x1f5   : > { %v5885_v0 = vor.u32 %v5884_v58, %v5880_v46  ;;  %v5899_v2 = vor.u32 %v5898_v50, %v5894_v48  ;;  %6135 = vmatprep.mubr.bf16.mxu0 %v5892_v60 }
 0x1f6   : > { %6175 = vmatprep.mubr.bf16.mxu1 %v5906_v61 }
 0x1f7   : > { %8364 = vmatpush3.bf16.msra.mxu0 %v8962_v9  ;;  %8386 = vmatpush3.bf16.msra.mxu1 %v8963_v10 }
 0x1f8   : > { %8365 = vmatprep.subr.bf16.mxu0 %v8964_v11  ;;  %8387 = vmatprep.subr.bf16.mxu1 %v8965_v12 }
 0x1fb   : > { %8366 = vmatpush3.bf16.msra.mxu0 %v8966_v8  ;;  %8388 = vmatpush3.bf16.msra.mxu1 %v8967_v14 }
 0x1fc   : > { %8367 = vmatprep.subr.bf16.mxu0 %v8968_v15  ;;  %8389 = vmatprep.subr.bf16.mxu1 %v8969_v16 }
 0x1ff   : > { %8368 = vmatpush3.bf16.msra.mxu0 %v8970_v17  ;;  %8390 = vmatpush3.bf16.msra.mxu1 %v8971_v19 }
 0x200   : > { %8369 = vmatprep.subr.bf16.mxu0 %v8972_v21  ;;  %8391 = vmatprep.subr.bf16.mxu1 %v8973_v22 }
 0x203   : > { %8370 = vmatpush3.bf16.msra.mxu0 %v8974_v24  ;;  %8392 = vmatpush3.bf16.msra.mxu1 %v8975_v4 }
 0x204   : > { %8371 = vmatprep.subr.bf16.mxu0 %v8976_v18  ;;  %8393 = vmatprep.subr.bf16.mxu1 %v8977_v20 }
 0x207   : > { %8372 = vmatpush3.bf16.msra.mxu0 %v8978_v23  ;;  %8394 = vmatpush3.bf16.msra.mxu1 %v8979_v25 }
 0x208   : > { %8373 = vmatprep.subr.bf16.mxu0 %v8980_v26  ;;  %8395 = vmatprep.subr.bf16.mxu1 %v8981_v27 }
 0x20b   : > { %8374 = vmatpush3.bf16.msra.mxu0 %v8982_v28  ;;  %8396 = vmatpush3.bf16.msra.mxu1 %v8983_v29 }
 0x20e   : > { %v8111_v33 = vpop.f32.mrf.mxu0  ;;  %v8133_v41 = vpop.f32.mrf.mxu1  ;;  %6136 = vmatmul.mubr.bf16.vlgmr.msra.gmra.mxu0 %v5885_v0  ;;  %6176 = vmatmul.mubr.bf16.vlgmr.msra.gmra.mxu1 %v5899_v2 }
 0x210   : > { %v8112_v42 = vpop.f32.mrf.mxu0  ;;  %v8134_v45 = vpop.f32.mrf.mxu1 }
 0x211   : > { %v8113_v57 = vadd.f32 %v8112_v42, %v8111_v33  ;;  %v8135_v54 = vadd.f32 %v8134_v45, %v8133_v41 }
 0x212   : > { %v8114_v51 = vpop.f32.mrf.mxu0  ;;  %v8136_v55 = vpop.f32.mrf.mxu1 }
 0x213   : > { %v3916_v62 = vadd.f32 %v8113_v57, %v10603_v1 }
 0x214   : > { %v8115_v59 = vpop.f32.mrf.mxu0  ;;  %v8137_v63 = vpop.f32.mrf.mxu1 }
 0x215   : > { %v3956_v13 = vadd.f32 %v8135_v54, %v3916_v62 }
 0x22e   : > { %v8155_v3 = vpop.f32.mrf.mxu0  ;;  %v8177_v5 = vpop.f32.mrf.mxu1 }
 0x230   : > { %v8156_v6 = vpop.f32.mrf.mxu0  ;;  %v8178_v7 = vpop.f32.mrf.mxu1 }
 0x231   : > { %v8157_v8 = vadd.f32 %v8156_v6, %v8155_v3  ;;  %v8179_v14 = vadd.f32 %v8178_v7, %v8177_v5 }
 0x232   : > { %v8158_v9 = vpop.f32.mrf.mxu0  ;;  %v8180_v10 = vpop.f32.mrf.mxu1 }
 0x233   : > { %v4309_v16 = vadd.f32 %v8179_v14, %v8157_v8 }
 0x234   : > { %v8159_v11 = vpop.f32.mrf.mxu0  ;;  %v8181_v12 = vpop.f32.mrf.mxu1 }
 0x235   : > { %v4314_v18 = vadd.f32 %v4309_v16, %v3956_v13 }
 0x24e   : > { %v8199_v15 = vpop.f32.mrf.mxu0  ;;  %v8221_v1 = vpop.f32.mrf.mxu1 }
 0x250   : > { %v8200_v17 = vpop.f32.mrf.mxu0  ;;  %v8222_v19 = vpop.f32.mrf.mxu1 }
 0x251   : > { %v8201_v21 = vadd.f32 %v8200_v17, %v8199_v15  ;;  %v8223_v22 = vadd.f32 %v8222_v19, %v8221_v1 }
 0x252   : > { %v8202_v24 = vpop.f32.mrf.mxu0  ;;  %v8224_v4 = vpop.f32.mrf.mxu1 }
 0x253   : > { %v4690_v20 = vadd.f32 %v8223_v22, %v8201_v21 }
 0x254   : > { %v8203_v23 = vpop.f32.mrf.mxu0  ;;  %v8225_v25 = vpop.f32.mrf.mxu1 }
 0x255   : > { %v4695_v26 = vadd.f32 %v4690_v20, %v4314_v18 }
 0x257   : > { %v4696_v27 = vadd.f32 %v10498_v56, %v4695_v26 }
 0x259   : > { %v4697_v28 = vsel %vm1721_vm0, %v4696_v27, 0.0  ;;  %v4705_v29 = vmul.f32 %v4696_v27, %v4696_v27  ;;  %v4714_v30 = vpack.c.bf16 %v4696_v27, %v4696_v27 }
 0x25a   : > { %v4698_v32 = vrot.slane %v4697_v28, 4 }
 0x25b   : > { %v4706_v33 = vsel %vm1721_vm0, %v4705_v29, 0.0  ;;  %7350 = vst [vmem:[%s10081_s24 + $0x4] sm:$0x3] %v4714_v30 }
 0x25c   : > { %v4699_v34 = vadd.f32 %v4698_v32, %v4697_v28  ;;  %v4707_v36 = vrot.slane %v4706_v33, 4 }
 0x25e   : > { %v4700_v37 = vrot.slane %v4699_v34, 2  ;;  %v4708_v40 = vadd.f32 %v4707_v36, %v4706_v33 }
 0x260   : > { %v4701_v41 = vadd.f32 %v4700_v37, %v4699_v34  ;;  %v4709_v42 = vrot.slane %v4708_v40, 2 }
 0x262   : > { %v4702_v38 = vrot.slane %v4701_v41, 1  ;;  %v4710_v43 = vadd.f32 %v4709_v42, %v4708_v40 }
 0x264   : > { %v4703_v39 = vadd.f32 %v4702_v38, %v4701_v41  ;;  %v4711_v44 = vrot.slane %v4710_v43, 1 }
 0x266   : > { %v10691_v45 = vadd.f32 %v4703_v39, %v10549_v31  ;;  %v4712_v46 = vadd.f32 %v4711_v44, %v4710_v43 }
 0x268   : > { %v10694_v47 = vadd.f32 %v4712_v46, %v10557_v35 }
 0x26e   : > { %v8243_v48 = vpop.f32.mrf.mxu0  ;;  %v8265_v49 = vpop.f32.mrf.mxu1 }
 0x270   : > { %v8244_v51 = vpop.f32.mrf.mxu0  ;;  %v8266_v53 = vpop.f32.mrf.mxu1 }
 0x271   : > { %v8245_v52 = vadd.f32 %v8244_v51, %v8243_v48  ;;  %v8267_v57 = vadd.f32 %v8266_v53, %v8265_v49 }
 0x272   : > { %v8246_v54 = vpop.f32.mrf.mxu0  ;;  %v8268_v55 = vpop.f32.mrf.mxu1 }
 0x273   : > { %v5158_v58 = vadd.f32 %v8267_v57, %v8245_v52 }
 0x274   : > { %v8247_v50 = vpop.f32.mrf.mxu0  ;;  %v8269_v59 = vpop.f32.mrf.mxu1 }
 0x28e   : > { %v8287_v60 = vpop.f32.mrf.mxu0  ;;  %v8309_v61 = vpop.f32.mrf.mxu1 }
 0x290   : > { %v8288_v62 = vpop.f32.mrf.mxu0  ;;  %v8310_v63 = vpop.f32.mrf.mxu1 }
 0x291   : > { %v8289_v31 = vadd.f32 %v8288_v62, %v8287_v60  ;;  %v8311_v0 = vadd.f32 %v8310_v63, %v8309_v61 }
 0x292   : > { %v8290_v2 = vpop.f32.mrf.mxu0  ;;  %v8312_v13 = vpop.f32.mrf.mxu1 }
 0x293   : > { %v5404_v35 = vadd.f32 %v8289_v31, %v5158_v58 }
 0x294   : > { %v8291_v3 = vpop.f32.mrf.mxu0  ;;  %v8313_v6 = vpop.f32.mrf.mxu1 }
 0x295   : > { %v5444_v5 = vadd.f32 %v8311_v0, %v5404_v35 }
 0x2ae   : > { %v8331_v7 = vpop.f32.mrf.mxu0  ;;  %v8353_v9 = vpop.f32.mrf.mxu1 }
 0x2b0   : > { %v8332_v10 = vpop.f32.mrf.mxu0  ;;  %v8354_v11 = vpop.f32.mrf.mxu1 }
 0x2b1   : > { %v8333_v1 = vadd.f32 %v8332_v10, %v8331_v7  ;;  %v8355_v16 = vadd.f32 %v8354_v11, %v8353_v9 }
 0x2b2   : > { %v8334_v12 = vpop.f32.mrf.mxu0  ;;  %v8356_v8 = vpop.f32.mrf.mxu1 }
 0x2b3   : > { %v5797_v21 = vadd.f32 %v8355_v16, %v8333_v1 }
 0x2b4   : > { %v8335_v14 = vpop.f32.mrf.mxu0  ;;  %v8357_v15 = vpop.f32.mrf.mxu1 }
 0x2b5   : > { %v5802_v25 = vadd.f32 %v5797_v21, %v5444_v5 }
 0x2ce   : > { %v8375_v17 = vpop.f32.mrf.mxu0  ;;  %v8397_v19 = vpop.f32.mrf.mxu1 }
 0x2d0   : > { %v8376_v22 = vpop.f32.mrf.mxu0  ;;  %v8398_v24 = vpop.f32.mrf.mxu1 }
 0x2d1   : > { %v8377_v4 = vadd.f32 %v8376_v22, %v8375_v17  ;;  %v8399_v18 = vadd.f32 %v8398_v24, %v8397_v19 }
 0x2d2   : > { %v8378_v20 = vpop.f32.mrf.mxu0  ;;  %v8400_v23 = vpop.f32.mrf.mxu1 }
 0x2d3   : > { %v6178_v26 = vadd.f32 %v8399_v18, %v8377_v4 }
 0x2d4   : > { %v8379_v27 = vpop.f32.mrf.mxu0  ;;  %v8401_v28 = vpop.f32.mrf.mxu1 }
 0x2d5   : > { %v6183_v29 = vadd.f32 %v6178_v26, %v5802_v25 }
 0x2d7   : > { %v6184_v30 = vadd.f32 %v10498_v56, %v6183_v29 }
 0x2d9   : > { %v6185_v32 = vsel %vm1721_vm0, %v6184_v30, 0.0  ;;  %v6193_v33 = vmul.f32 %v6184_v30, %v6184_v30  ;;  %v6202_v34 = vpack.c.bf16 %v6184_v30, %v6184_v30 }
 0x2da   : > { %v6186_v36 = vrot.slane %v6185_v32, 4 }
 0x2db   : > { %v6194_v37 = vsel %vm1721_vm0, %v6193_v33, 0.0  ;;  %7695 = vst [vmem:[%s10081_s24 + $0x6] sm:$0x3] %v6202_v34  ;;  %s241_s24 = scalar_lea.vmem %s10718_s5, %s10720_s19 }
 0x2dc   : > { %v6187_v40 = vadd.f32 %v6186_v36, %v6185_v32  ;;  %v6195_v41 = vrot.slane %v6194_v37, 4 }
 0x2de   : > { %v6188_v42 = vrot.slane %v6187_v40, 2  ;;  %v6196_v38 = vadd.f32 %v6195_v41, %v6194_v37 }
 0x2e0   : > { %v6189_v43 = vadd.f32 %v6188_v42, %v6187_v40  ;;  %v6197_v39 = vrot.slane %v6196_v38, 2 }
 0x2e2   : > { %v6190_v44 = vrot.slane %v6189_v43, 1  ;;  %v6198_v46 = vadd.f32 %v6197_v39, %v6196_v38 }
 0x2e4   : > { %v6191_v48 = vadd.f32 %v6190_v44, %v6189_v43  ;;  %v6199_v56 = vrot.slane %v6198_v46, 1 }
 0x2e6   : > { %v6192_v49 = vadd.f32 %v6191_v48, %v10691_v45  ;;  %v6200_v51 = vadd.f32 %v6199_v56, %v6198_v46 }
 0x2e8   : > { %v6201_v52 = vadd.f32 %v6200_v51, %v10694_v47  ;;  %6205 = vst [vmem:[%s238_s13] sm:$0x1] %v6192_v49 }
 0x2ea   : > { %6206 = vst [vmem:[%s241_s24] sm:$0x1] %v6201_v52 }
 0x2eb PF: > { %s16_s18 = sadd.s32 1, %s8995_s18  }
 0x2ec   : > { %p13_p4 = scmp.ge.s32.totalorder %s16_s18, 4  }
 0x2ee   :  { %15 = sbr.rel (!%p13_p4) target bundleno = 1 (0x1), region = 96 }

</bundles_post_ra>
